<compile_context>
chip_gen: v5e
topology: v5e:2x2
jax: 0.10.0
libtpu: 0.0.40
codegen_flags: <defaults>
</compile_context>

<pallas_src>
import numpy as np
import jax
import jax.numpy as jnp
from jax.experimental import pallas as pl
from jax.experimental.pallas import tpu as pltpu

KSIZE = 11
STRIDE = 2
PAD = 5
OUT_PAD = 1

# (name, input phase count P, prev-path channels, skip channels, Cout, act)
LAYER_DEFS = [
    ("de4", 1, 128, 128, 64, "prelu"),
    ("de3", 2, 64, 64, 32, "prelu"),
    ("de2", 4, 32, 32, 16, "prelu"),
    ("de1", 8, 16, 16, 1, "tanh"),
]


def _d_set(P):
    """Folded-block shifts D = floor((r+m)/P), r in [0,P), m in [-2,3]."""
    return tuple(sorted({(r + m) // P for r in range(P) for m in range(-2, 4)}))


D4, D3, D2, D1 = _d_set(1), _d_set(2), _d_set(4), _d_set(8)
MAX_LEFT = 2            # max(-min(D)) over all layers  (D4: -2)
MAX_RIGHT = 3           # max(max(D))  over all layers  (D4: +3)


# ---------------------------------------------------------------------------
# One-time parameter preparation (hoisted out of the forward path)
# ---------------------------------------------------------------------------
def _fold_conv_weight(w, P, c_prev, c_skip):
    """Fold a ConvTranspose1d(k=11,s=2,p=5,op=1) weight for the phase-folded
    cascade.

    w: (Cin, Cout, 11) with Cin = c_prev + c_skip.
    Folded input channel layout (per shift block):
       [prev-output phase-major: rho*c_prev + c  |  skip phase-major:
        P*c_prev + rho*c_skip + c'].
    Folded output row layout: row = s*Cout + cout, s = 2r + e in [0, 2P).
    Returns (2*P*Cout, len(D)*P*Cin) float32."""
    cin, cout, ktaps = w.shape
    assert cin == c_prev + c_skip
    cf = P * cin
    ds = _d_set(P)
    wt = np.transpose(np.asarray(w, np.float32), (1, 0, 2))      # (Cout, Cin, 11)
    wf = np.zeros((2 * P * cout, len(ds) * cf), np.float32)
    for s in range(2 * P):
        r, e = s // 2, s % 2
        for m in range(-2, 4):
            tap = (5 + e) - 2 * m
            if not (0 <= tap < ktaps):
                continue
            rho, dd = (r + m) % P, (r + m) // P
            base = ds.index(dd) * cf
            rows = slice(s * cout, (s + 1) * cout)
            wf[rows, base + rho * c_prev: base + (rho + 1) * c_prev] = \
                wt[:, :c_prev, tap]
            off = base + P * c_prev + rho * c_skip
            wf[rows, off: off + c_skip] = wt[:, c_prev:, tap]
    return wf


def prepare_params(params):
    """Fold weights and pack all bias/alpha vectors into one (128, 8) array:
    cols: 0=b4 1=a4 2=b3 3=a3 4=b2 5=a2 6=b1(first 16 rows) 7=unused."""
    folded = {}
    ba = np.zeros((128, 8), np.float32)
    col = 0
    for name, P, c_prev, c_skip, cout, act in LAYER_DEFS:
        p = params[name]
        folded["W" + name[-1]] = jnp.asarray(
            _fold_conv_weight(np.asarray(p["w"]), P, c_prev, c_skip))
        bf = np.tile(np.asarray(p["b"], np.float32), 2 * P)       # (2P*Cout,)
        ba[: bf.size, col] = bf
        col += 1
        if act == "prelu":
            af = np.tile(np.asarray(p["alpha"], np.float32), 2 * P)
            ba[: af.size, col] = af
            col += 1
    folded["BA"] = jnp.asarray(ba)
    return folded


def _fold_skip(s, P):
    """(B, C, P*L) -> (B, P*C, L), row rho*C + c = s[:, c, P*q + rho].
    Pure layout; done in XLA outside the kernel."""
    B, C, PL = s.shape
    L = PL // P
    return s.reshape(B, C, L, P).transpose(0, 3, 1, 2).reshape(B, P * C, L)


# ---------------------------------------------------------------------------
# Fused Pallas kernel: whole 4-layer decoder per batch element
# ---------------------------------------------------------------------------
def decoder_kernel(x_ref, s4_ref, s3_ref, s2_ref, s1_ref,
                   w4_ref, w3_ref, w2_ref, w1_ref, ba_ref,
                   o_ref, pad_ref):
    ba = ba_ref[...]                                              # (128, 8)

    def shift_stack(h, ds):
        """h: (256, L) -> (len(ds)*256, L); block i holds h[:, q + ds[i]]
        with zero fill, built via a zero-initialized VMEM scratch."""
        _, l = h.shape
        left = max(0, -min(ds))
        pad_ref[...] = jnp.zeros(pad_ref.shape, pad_ref.dtype)
        pad_ref[:, left:left + l] = h
        return jnp.concatenate(
            [pad_ref[:, left + d: left + d + l] for d in ds], axis=0)

    def layer(h, w_ref, b, a, ds):
        xb = shift_stack(h, ds)                                   # (|D|*256, L)
        y = jnp.dot(w_ref[...], xb, preferred_element_type=jnp.float32) + b
        return jnp.where(y >= 0.0, y, a * y)                      # phase-tiled PReLU

    # skip concats are sublane-aligned, fully in VMEM/vregs
    h = jnp.concatenate([x_ref[0], s4_ref[0]], axis=0)            # (256, L)
    h = layer(h, w4_ref, ba[:, 0:1], ba[:, 1:2], D4)              # (128, L) 2ph x 64
    h = jnp.concatenate([h, s3_ref[0]], axis=0)                   # (256, L)
    h = layer(h, w3_ref, ba[:, 2:3], ba[:, 3:4], D3)              # (128, L) 4ph x 32
    h = jnp.concatenate([h, s2_ref[0]], axis=0)                   # (256, L)
    h = layer(h, w2_ref, ba[:, 4:5], ba[:, 5:6], D2)              # (128, L) 8ph x 16
    h = jnp.concatenate([h, s1_ref[0]], axis=0)                   # (256, L)
    xb = shift_stack(h, D1)                                       # (768, L)
    y = jnp.dot(w1_ref[...], xb, preferred_element_type=jnp.float32) + ba[0:16, 6:7]
    o_ref[0, :, :] = jnp.tanh(y)                                  # (16, L) 16ph x 1


def decoder_forward(prepped, x, x_list):
    B, _, L = x.shape
    s4, s3, s2, s1 = x_list[-1], x_list[-2], x_list[-3], x_list[-4]

    # Phase-fold the skip connections (layout only, exact) -> all (B, 128, L).
    s3f = _fold_skip(s3, 2)
    s2f = _fold_skip(s2, 4)
    s1f = _fold_skip(s1, 8)

    w4, w3, w2, w1 = prepped["W4"], prepped["W3"], prepped["W2"], prepped["W1"]
    ba = prepped["BA"]

    batched = (x, s4, s3f, s2f, s1f)
    shared = (w4, w3, w2, w1, ba)

    def bspec(arr):
        return pl.BlockSpec((1,) + arr.shape[1:], lambda b: (b, 0, 0))

    def fspec(arr):
        nd = arr.ndim
        return pl.BlockSpec(arr.shape, lambda b: (0,) * nd)

    flops = 2 * B * L * sum(int(w.shape[0]) * int(w.shape[1])
                            for w in (w4, w3, w2, w1))
    bytes_accessed = 4 * (sum(int(np.prod(a.shape)) for a in batched + shared)
                          + B * 16 * L)

    out_folded = pl.pallas_call(
        decoder_kernel,
        out_shape=jax.ShapeDtypeStruct((B, 16, L), jnp.float32),
        grid=(B,),
        in_specs=[bspec(a) for a in batched] + [fspec(a) for a in shared],
        out_specs=pl.BlockSpec((1, 16, L), lambda b: (b, 0, 0)),
        scratch_shapes=[pltpu.VMEM((256, L + MAX_LEFT + MAX_RIGHT), jnp.float32)],
        compiler_params=pltpu.CompilerParams(
            dimension_semantics=("parallel",),
            vmem_limit_bytes=64 * 1024 * 1024),
        cost_estimate=pl.CostEstimate(
            flops=flops,
            transcendentals=B * 16 * L,
            bytes_accessed=bytes_accessed),
    )(*batched, *shared)

    # Un-fold the 16 output phases (layout only, in XLA): y[0, 16q+s] = out[s, q].
    return out_folded.transpose(0, 2, 1).reshape(B, 1, 16 * L)


# ---------------------------------------------------------------------------
# Parameter construction (deterministic, synthetic)
# ---------------------------------------------------------------------------
def init_params(key):
    params = {}
    for name, _, c_prev, c_skip, cout, act in LAYER_DEFS:
        cin = c_prev + c_skip
        key, kw, kb = jax.random.split(key, 3)
        w = jax.random.normal(kw, (cin, cout, KSIZE), jnp.float32) * 0.05
        b = jax.random.normal(kb, (cout,), jnp.float32) * 0.05
        alpha = jnp.full((cout,), 0.25, jnp.float32)   # PReLU default init
        params[name] = {"w": w, "b": b, "alpha": alpha, "act": act}
    return params


# ---------------------------------------------------------------------------
# NumPy reference (PyTorch ConvTranspose1d semantics) for verification
# ---------------------------------------------------------------------------
def ref_conv_transpose1d(x, w, b):
    B, Cin, Li = x.shape
    Cout = w.shape[1]
    Lo = (Li - 1) * STRIDE - 2 * PAD + KSIZE + OUT_PAD
    y = np.zeros((B, Cout, Lo), np.float64)
    for bi in range(B):
        for i in range(Li):
            for k in range(KSIZE):
                t = i * STRIDE - PAD + k
                if 0 <= t < Lo:
                    y[bi, :, t] += w[:, :, k].T @ x[bi, :, i]
    return y + b.reshape(1, Cout, 1)


def ref_decoder(params, x, x_list):
    def layer(xx, p):
        y = ref_conv_transpose1d(xx, np.asarray(p["w"], np.float64),
                                 np.asarray(p["b"], np.float64))
        if p["act"] == "prelu":
            a = np.asarray(p["alpha"], np.float64).reshape(1, -1, 1)
            return np.where(y >= 0, y, a * y)
        return np.tanh(y)

    x = np.asarray(x, np.float64)
    xl = [np.asarray(t, np.float64) for t in x_list]
    x = layer(np.concatenate([x, xl[-1]], axis=1), params["de4"])
    x = layer(np.concatenate([x, xl[-2]], axis=1), params["de3"])
    x = layer(np.concatenate([x, xl[-3]], axis=1), params["de2"])
    x = layer(np.concatenate([x, xl[-4]], axis=1), params["de1"])
    return x


if __name__ == "__main__":
    key = jax.random.PRNGKey(0)
    key, k0, k1, k2, k3, k4 = jax.random.split(key, 6)

    B, L = 2, 8  # base sequence length of the deepest feature map
    x = jax.random.normal(k0, (B, 128, L), jnp.float32)
    x_list = [
        jax.random.normal(k1, (B, 16, 8 * L), jnp.float32),   # x_list[-4]
        jax.random.normal(k2, (B, 32, 4 * L), jnp.float32),   # x_list[-3]
        jax.random.normal(k3, (B, 64, 2 * L), jnp.float32),   # x_list[-2]
        jax.random.normal(k4, (B, 128, L), jnp.float32),      # x_list[-1]
    ]

    params = init_params(key)
    prepped = prepare_params(params)          # one-time weight folding

    out = decoder_forward(prepped, x, x_list)
    out = jax.block_until_ready(out)

    assert out.shape == (B, 1, 16 * L), out.shape

    ref = ref_decoder(params, np.asarray(x), [np.asarray(t) for t in x_list])
    np.testing.assert_allclose(np.asarray(out), ref, rtol=1e-4, atol=1e-4)

    print("KERNEL_OK")
</pallas_src>

<mosaic_0001>
module attributes {stable_mosaic.version = 11 : i64} {
  func.func @decoder_kernel(%arg0: i32, %arg1: memref<1x128x8xf32, #tpu.memory_space<vmem>>, %arg2: memref<1x128x8xf32, #tpu.memory_space<vmem>>, %arg3: memref<1x128x8xf32, #tpu.memory_space<vmem>>, %arg4: memref<1x128x8xf32, #tpu.memory_space<vmem>>, %arg5: memref<1x128x8xf32, #tpu.memory_space<vmem>>, %arg6: memref<128x1536xf32, #tpu.memory_space<vmem>>, %arg7: memref<128x1024xf32, #tpu.memory_space<vmem>>, %arg8: memref<128x768xf32, #tpu.memory_space<vmem>>, %arg9: memref<16x768xf32, #tpu.memory_space<vmem>>, %arg10: memref<128x8xf32, #tpu.memory_space<vmem>>, %arg11: memref<1x16x8xf32, #tpu.memory_space<vmem>>, %arg12: memref<256x13xf32, #tpu.memory_space<vmem>>) attributes {dimension_semantics = [#tpu.dimension_semantics<parallel>], iteration_bounds = array<i64: 2>, scalar_prefetch = 0 : i64, scratch_operands = 1 : i64, tpu.core_type = #tpu.core_type<tc>, window_params = [{transform_indices = @transform_0, window_bounds = array<i64: 1, 128, 8>}, {transform_indices = @transform_1, window_bounds = array<i64: 1, 128, 8>}, {transform_indices = @transform_2, window_bounds = array<i64: 1, 128, 8>}, {transform_indices = @transform_3, window_bounds = array<i64: 1, 128, 8>}, {transform_indices = @transform_4, window_bounds = array<i64: 1, 128, 8>}, {pipeline_mode = #tpu.pipeline_mode<synchronous>, transform_indices = @transform_5, window_bounds = array<i64: 128, 1536>}, {pipeline_mode = #tpu.pipeline_mode<synchronous>, transform_indices = @transform_6, window_bounds = array<i64: 128, 1024>}, {pipeline_mode = #tpu.pipeline_mode<synchronous>, transform_indices = @transform_7, window_bounds = array<i64: 128, 768>}, {pipeline_mode = #tpu.pipeline_mode<synchronous>, transform_indices = @transform_8, window_bounds = array<i64: 16, 768>}, {pipeline_mode = #tpu.pipeline_mode<synchronous>, transform_indices = @transform_9, window_bounds = array<i64: 128, 8>}, {transform_indices = @transform_10, window_bounds = array<i64: 1, 16, 8>}]} {
    %c0 = arith.constant 0 : index
    %c0_0 = arith.constant 0 : index
    %0 = vector.load %arg10[%c0, %c0_0] : memref<128x8xf32, #tpu.memory_space<vmem>>, vector<128x8xf32>
    %c0_1 = arith.constant 0 : index
    %c0_2 = arith.constant 0 : index
    %c0_3 = arith.constant 0 : index
    %1 = vector.load %arg1[%c0_1, %c0_2, %c0_3] : memref<1x128x8xf32, #tpu.memory_space<vmem>>, vector<1x128x8xf32>
    %2 = vector.shape_cast %1 : vector<1x128x8xf32> to vector<128x8xf32>
    %c0_4 = arith.constant 0 : index
    %c0_5 = arith.constant 0 : index
    %c0_6 = arith.constant 0 : index
    %3 = vector.load %arg2[%c0_4, %c0_5, %c0_6] : memref<1x128x8xf32, #tpu.memory_space<vmem>>, vector<1x128x8xf32>
    %4 = vector.shape_cast %3 : vector<1x128x8xf32> to vector<128x8xf32>
    %5 = tpu.concatenate %2, %4 in 0 : vector<128x8xf32>, vector<128x8xf32> -> vector<256x8xf32>
    %6 = vector.extract_strided_slice %0 {offsets = [0, 0], sizes = [128, 1], strides = [1, 1]} : vector<128x8xf32> to vector<128x1xf32>
    %7 = vector.extract_strided_slice %0 {offsets = [0, 1], sizes = [128, 1], strides = [1, 1]} : vector<128x8xf32> to vector<128x1xf32>
    %cst = arith.constant 0.000000e+00 : f32
    %8 = vector.broadcast %cst : f32 to vector<256x13xf32>
    %c0_7 = arith.constant 0 : index
    %c0_8 = arith.constant 0 : index
    %9 = vector.load %arg12[%c0_7, %c0_8] : memref<256x13xf32, #tpu.memory_space<vmem>>, vector<256x13xf32>
    tpu.vector_store %arg12[%c0_7, %c0_8], %8 {strides = array<i32>} : memref<256x13xf32, #tpu.memory_space<vmem>>, vector<256x13xf32>,
    %c0_9 = arith.constant 0 : index
    %c2 = arith.constant 2 : index
    %10 = vector.load %arg12[%c0_9, %c2] : memref<256x13xf32, #tpu.memory_space<vmem>>, vector<256x8xf32>
    tpu.vector_store %arg12[%c0_9, %c2], %5 {strides = array<i32>} : memref<256x13xf32, #tpu.memory_space<vmem>>, vector<256x8xf32>,
    %c0_10 = arith.constant 0 : index
    %c0_11 = arith.constant 0 : index
    %11 = vector.load %arg12[%c0_10, %c0_11] : memref<256x13xf32, #tpu.memory_space<vmem>>, vector<256x8xf32>
    %c0_12 = arith.constant 0 : index
    %c1 = arith.constant 1 : index
    %12 = vector.load %arg12[%c0_12, %c1] : memref<256x13xf32, #tpu.memory_space<vmem>>, vector<256x8xf32>
    %c0_13 = arith.constant 0 : index
    %c2_14 = arith.constant 2 : index
    %13 = vector.load %arg12[%c0_13, %c2_14] : memref<256x13xf32, #tpu.memory_space<vmem>>, vector<256x8xf32>
    %c0_15 = arith.constant 0 : index
    %c3 = arith.constant 3 : index
    %14 = vector.load %arg12[%c0_15, %c3] : memref<256x13xf32, #tpu.memory_space<vmem>>, vector<256x8xf32>
    %c0_16 = arith.constant 0 : index
    %c4 = arith.constant 4 : index
    %15 = vector.load %arg12[%c0_16, %c4] : memref<256x13xf32, #tpu.memory_space<vmem>>, vector<256x8xf32>
    %c0_17 = arith.constant 0 : index
    %c5 = arith.constant 5 : index
    %16 = vector.load %arg12[%c0_17, %c5] : memref<256x13xf32, #tpu.memory_space<vmem>>, vector<256x8xf32>
    %17 = tpu.concatenate %11, %12, %13, %14, %15, %16 in 0 : vector<256x8xf32>, vector<256x8xf32>, vector<256x8xf32>, vector<256x8xf32>, vector<256x8xf32>, vector<256x8xf32> -> vector<1536x8xf32>
    %c0_18 = arith.constant 0 : index
    %c0_19 = arith.constant 0 : index
    %18 = vector.load %arg6[%c0_18, %c0_19] : memref<128x1536xf32, #tpu.memory_space<vmem>>, vector<128x1536xf32>
    %cst_20 = arith.constant dense<0.000000e+00> : vector<128x8xf32>
    %19 = tpu.matmul %18, %17, %cst_20 {dimension_numbers = #tpu.dot_dimension_numbers<[1], [0], [0], [1], [0, 0, 1, 1], [], []>} : vector<128x1536xf32>, vector<1536x8xf32>, vector<128x8xf32> -> vector<128x8xf32>
    %20 = vector.broadcast %6 : vector<128x1xf32> to vector<128x8xf32>
    %21 = arith.addf %19, %20 : vector<128x8xf32>
    %cst_21 = arith.constant 0.000000e+00 : f32
    %22 = vector.broadcast %cst_21 : f32 to vector<128x8xf32>
    %23 = arith.cmpf oge, %21, %22 : vector<128x8xf32>
    %24 = vector.broadcast %7 : vector<128x1xf32> to vector<128x8xf32>
    %25 = arith.mulf %24, %21 : vector<128x8xf32>
    %26 = arith.select %23, %21, %25 : vector<128x8xi1>, vector<128x8xf32>
    %c0_22 = arith.constant 0 : index
    %c0_23 = arith.constant 0 : index
    %c0_24 = arith.constant 0 : index
    %27 = vector.load %arg3[%c0_22, %c0_23, %c0_24] : memref<1x128x8xf32, #tpu.memory_space<vmem>>, vector<1x128x8xf32>
    %28 = vector.shape_cast %27 : vector<1x128x8xf32> to vector<128x8xf32>
    %29 = tpu.concatenate %26, %28 in 0 : vector<128x8xf32>, vector<128x8xf32> -> vector<256x8xf32>
    %30 = vector.extract_strided_slice %0 {offsets = [0, 2], sizes = [128, 1], strides = [1, 1]} : vector<128x8xf32> to vector<128x1xf32>
    %31 = vector.extract_strided_slice %0 {offsets = [0, 3], sizes = [128, 1], strides = [1, 1]} : vector<128x8xf32> to vector<128x1xf32>
    %cst_25 = arith.constant 0.000000e+00 : f32
    %32 = vector.broadcast %cst_25 : f32 to vector<256x13xf32>
    %c0_26 = arith.constant 0 : index
    %c0_27 = arith.constant 0 : index
    %33 = vector.load %arg12[%c0_26, %c0_27] : memref<256x13xf32, #tpu.memory_space<vmem>>, vector<256x13xf32>
    tpu.vector_store %arg12[%c0_26, %c0_27], %32 {strides = array<i32>} : memref<256x13xf32, #tpu.memory_space<vmem>>, vector<256x13xf32>,
    %c0_28 = arith.constant 0 : index
    %c1_29 = arith.constant 1 : index
    %34 = vector.load %arg12[%c0_28, %c1_29] : memref<256x13xf32, #tpu.memory_space<vmem>>, vector<256x8xf32>
    tpu.vector_store %arg12[%c0_28, %c1_29], %29 {strides = array<i32>} : memref<256x13xf32, #tpu.memory_space<vmem>>, vector<256x8xf32>,
    %c0_30 = arith.constant 0 : index
    %c0_31 = arith.constant 0 : index
    %35 = vector.load %arg12[%c0_30, %c0_31] : memref<256x13xf32, #tpu.memory_space<vmem>>, vector<256x8xf32>
    %c0_32 = arith.constant 0 : index
    %c1_33 = arith.constant 1 : index
    %36 = vector.load %arg12[%c0_32, %c1_33] : memref<256x13xf32, #tpu.memory_space<vmem>>, vector<256x8xf32>
    %c0_34 = arith.constant 0 : index
    %c2_35 = arith.constant 2 : index
    %37 = vector.load %arg12[%c0_34, %c2_35] : memref<256x13xf32, #tpu.memory_space<vmem>>, vector<256x8xf32>
    %c0_36 = arith.constant 0 : index
    %c3_37 = arith.constant 3 : index
    %38 = vector.load %arg12[%c0_36, %c3_37] : memref<256x13xf32, #tpu.memory_space<vmem>>, vector<256x8xf32>
    %39 = tpu.concatenate %35, %36, %37, %38 in 0 : vector<256x8xf32>, vector<256x8xf32>, vector<256x8xf32>, vector<256x8xf32> -> vector<1024x8xf32>
    %c0_38 = arith.constant 0 : index
    %c0_39 = arith.constant 0 : index
    %40 = vector.load %arg7[%c0_38, %c0_39] : memref<128x1024xf32, #tpu.memory_space<vmem>>, vector<128x1024xf32>
    %cst_40 = arith.constant dense<0.000000e+00> : vector<128x8xf32>
    %41 = tpu.matmul %40, %39, %cst_40 {dimension_numbers = #tpu.dot_dimension_numbers<[1], [0], [0], [1], [0, 0, 1, 1], [], []>} : vector<128x1024xf32>, vector<1024x8xf32>, vector<128x8xf32> -> vector<128x8xf32>
    %42 = vector.broadcast %30 : vector<128x1xf32> to vector<128x8xf32>
    %43 = arith.addf %41, %42 : vector<128x8xf32>
    %cst_41 = arith.constant 0.000000e+00 : f32
    %44 = vector.broadcast %cst_41 : f32 to vector<128x8xf32>
    %45 = arith.cmpf oge, %43, %44 : vector<128x8xf32>
    %46 = vector.broadcast %31 : vector<128x1xf32> to vector<128x8xf32>
    %47 = arith.mulf %46, %43 : vector<128x8xf32>
    %48 = arith.select %45, %43, %47 : vector<128x8xi1>, vector<128x8xf32>
    %c0_42 = arith.constant 0 : index
    %c0_43 = arith.constant 0 : index
    %c0_44 = arith.constant 0 : index
    %49 = vector.load %arg4[%c0_42, %c0_43, %c0_44] : memref<1x128x8xf32, #tpu.memory_space<vmem>>, vector<1x128x8xf32>
    %50 = vector.shape_cast %49 : vector<1x128x8xf32> to vector<128x8xf32>
    %51 = tpu.concatenate %48, %50 in 0 : vector<128x8xf32>, vector<128x8xf32> -> vector<256x8xf32>
    %52 = vector.extract_strided_slice %0 {offsets = [0, 4], sizes = [128, 1], strides = [1, 1]} : vector<128x8xf32> to vector<128x1xf32>
    %53 = vector.extract_strided_slice %0 {offsets = [0, 5], sizes = [128, 1], strides = [1, 1]} : vector<128x8xf32> to vector<128x1xf32>
    %cst_45 = arith.constant 0.000000e+00 : f32
    %54 = vector.broadcast %cst_45 : f32 to vector<256x13xf32>
    %c0_46 = arith.constant 0 : index
    %c0_47 = arith.constant 0 : index
    %55 = vector.load %arg12[%c0_46, %c0_47] : memref<256x13xf32, #tpu.memory_space<vmem>>, vector<256x13xf32>
    tpu.vector_store %arg12[%c0_46, %c0_47], %54 {strides = array<i32>} : memref<256x13xf32, #tpu.memory_space<vmem>>, vector<256x13xf32>,
    %c0_48 = arith.constant 0 : index
    %c1_49 = arith.constant 1 : index
    %56 = vector.load %arg12[%c0_48, %c1_49] : memref<256x13xf32, #tpu.memory_space<vmem>>, vector<256x8xf32>
    tpu.vector_store %arg12[%c0_48, %c1_49], %51 {strides = array<i32>} : memref<256x13xf32, #tpu.memory_space<vmem>>, vector<256x8xf32>,
    %c0_50 = arith.constant 0 : index
    %c0_51 = arith.constant 0 : index
    %57 = vector.load %arg12[%c0_50, %c0_51] : memref<256x13xf32, #tpu.memory_space<vmem>>, vector<256x8xf32>
    %c0_52 = arith.constant 0 : index
    %c1_53 = arith.constant 1 : index
    %58 = vector.load %arg12[%c0_52, %c1_53] : memref<256x13xf32, #tpu.memory_space<vmem>>, vector<256x8xf32>
    %c0_54 = arith.constant 0 : index
    %c2_55 = arith.constant 2 : index
    %59 = vector.load %arg12[%c0_54, %c2_55] : memref<256x13xf32, #tpu.memory_space<vmem>>, vector<256x8xf32>
    %60 = tpu.concatenate %57, %58, %59 in 0 : vector<256x8xf32>, vector<256x8xf32>, vector<256x8xf32> -> vector<768x8xf32>
    %c0_56 = arith.constant 0 : index
    %c0_57 = arith.constant 0 : index
    %61 = vector.load %arg8[%c0_56, %c0_57] : memref<128x768xf32, #tpu.memory_space<vmem>>, vector<128x768xf32>
    %cst_58 = arith.constant dense<0.000000e+00> : vector<128x8xf32>
    %62 = tpu.matmul %61, %60, %cst_58 {dimension_numbers = #tpu.dot_dimension_numbers<[1], [0], [0], [1], [0, 0, 1, 1], [], []>} : vector<128x768xf32>, vector<768x8xf32>, vector<128x8xf32> -> vector<128x8xf32>
    %63 = vector.broadcast %52 : vector<128x1xf32> to vector<128x8xf32>
    %64 = arith.addf %62, %63 : vector<128x8xf32>
    %cst_59 = arith.constant 0.000000e+00 : f32
    %65 = vector.broadcast %cst_59 : f32 to vector<128x8xf32>
    %66 = arith.cmpf oge, %64, %65 : vector<128x8xf32>
    %67 = vector.broadcast %53 : vector<128x1xf32> to vector<128x8xf32>
    %68 = arith.mulf %67, %64 : vector<128x8xf32>
    %69 = arith.select %66, %64, %68 : vector<128x8xi1>, vector<128x8xf32>
    %c0_60 = arith.constant 0 : index
    %c0_61 = arith.constant 0 : index
    %c0_62 = arith.constant 0 : index
    %70 = vector.load %arg5[%c0_60, %c0_61, %c0_62] : memref<1x128x8xf32, #tpu.memory_space<vmem>>, vector<1x128x8xf32>
    %71 = vector.shape_cast %70 : vector<1x128x8xf32> to vector<128x8xf32>
    %72 = tpu.concatenate %69, %71 in 0 : vector<128x8xf32>, vector<128x8xf32> -> vector<256x8xf32>
    %cst_63 = arith.constant 0.000000e+00 : f32
    %73 = vector.broadcast %cst_63 : f32 to vector<256x13xf32>
    %c0_64 = arith.constant 0 : index
    %c0_65 = arith.constant 0 : index
    %74 = vector.load %arg12[%c0_64, %c0_65] : memref<256x13xf32, #tpu.memory_space<vmem>>, vector<256x13xf32>
    tpu.vector_store %arg12[%c0_64, %c0_65], %73 {strides = array<i32>} : memref<256x13xf32, #tpu.memory_space<vmem>>, vector<256x13xf32>,
    %c0_66 = arith.constant 0 : index
    %c1_67 = arith.constant 1 : index
    %75 = vector.load %arg12[%c0_66, %c1_67] : memref<256x13xf32, #tpu.memory_space<vmem>>, vector<256x8xf32>
    tpu.vector_store %arg12[%c0_66, %c1_67], %72 {strides = array<i32>} : memref<256x13xf32, #tpu.memory_space<vmem>>, vector<256x8xf32>,
    %c0_68 = arith.constant 0 : index
    %c0_69 = arith.constant 0 : index
    %76 = vector.load %arg12[%c0_68, %c0_69] : memref<256x13xf32, #tpu.memory_space<vmem>>, vector<256x8xf32>
    %c0_70 = arith.constant 0 : index
    %c1_71 = arith.constant 1 : index
    %77 = vector.load %arg12[%c0_70, %c1_71] : memref<256x13xf32, #tpu.memory_space<vmem>>, vector<256x8xf32>
    %c0_72 = arith.constant 0 : index
    %c2_73 = arith.constant 2 : index
    %78 = vector.load %arg12[%c0_72, %c2_73] : memref<256x13xf32, #tpu.memory_space<vmem>>, vector<256x8xf32>
    %79 = tpu.concatenate %76, %77, %78 in 0 : vector<256x8xf32>, vector<256x8xf32>, vector<256x8xf32> -> vector<768x8xf32>
    %c0_74 = arith.constant 0 : index
    %c0_75 = arith.constant 0 : index
    %80 = vector.load %arg9[%c0_74, %c0_75] : memref<16x768xf32, #tpu.memory_space<vmem>>, vector<16x768xf32>
    %cst_76 = arith.constant dense<0.000000e+00> : vector<16x8xf32>
    %81 = tpu.matmul %80, %79, %cst_76 {dimension_numbers = #tpu.dot_dimension_numbers<[1], [0], [0], [1], [0, 0, 1, 1], [], []>} : vector<16x768xf32>, vector<768x8xf32>, vector<16x8xf32> -> vector<16x8xf32>
    %82 = vector.extract_strided_slice %0 {offsets = [0, 6], sizes = [16, 1], strides = [1, 1]} : vector<128x8xf32> to vector<16x1xf32>
    %83 = vector.broadcast %82 : vector<16x1xf32> to vector<16x8xf32>
    %84 = arith.addf %81, %83 : vector<16x8xf32>
    %85 = math.tanh %84 : vector<16x8xf32>
    %c0_77 = arith.constant 0 : index
    %c0_78 = arith.constant 0 : index
    %c0_79 = arith.constant 0 : index
    %86 = vector.load %arg11[%c0_77, %c0_78, %c0_79] : memref<1x16x8xf32, #tpu.memory_space<vmem>>, vector<1x16x8xf32>
    %87 = vector.shape_cast %86 : vector<1x16x8xf32> to vector<16x8xf32>
    %88 = vector.shape_cast %85 : vector<16x8xf32> to vector<1x16x8xf32>
    tpu.vector_store %arg11[%c0_77, %c0_78, %c0_79], %88 {strides = array<i32>} : memref<1x16x8xf32, #tpu.memory_space<vmem>>, vector<1x16x8xf32>,
    return
  }
  func.func @transform_0(%arg0: i32) -> (i32, i32, i32) {
    %c0_i32 = arith.constant 0 : i32
    %c0_i32_0 = arith.constant 0 : i32
    %c0_i32_1 = arith.constant 0 : i32
    return %arg0, %c0_i32, %c0_i32_0 : i32, i32, i32
  }
  func.func @transform_1(%arg0: i32) -> (i32, i32, i32) {
    %c0_i32 = arith.constant 0 : i32
    %c0_i32_0 = arith.constant 0 : i32
    %c0_i32_1 = arith.constant 0 : i32
    return %arg0, %c0_i32, %c0_i32_0 : i32, i32, i32
  }
  func.func @transform_2(%arg0: i32) -> (i32, i32, i32) {
    %c0_i32 = arith.constant 0 : i32
    %c0_i32_0 = arith.constant 0 : i32
    %c0_i32_1 = arith.constant 0 : i32
    return %arg0, %c0_i32, %c0_i32_0 : i32, i32, i32
  }
  func.func @transform_3(%arg0: i32) -> (i32, i32, i32) {
    %c0_i32 = arith.constant 0 : i32
    %c0_i32_0 = arith.constant 0 : i32
    %c0_i32_1 = arith.constant 0 : i32
    return %arg0, %c0_i32, %c0_i32_0 : i32, i32, i32
  }
  func.func @transform_4(%arg0: i32) -> (i32, i32, i32) {
    %c0_i32 = arith.constant 0 : i32
    %c0_i32_0 = arith.constant 0 : i32
    %c0_i32_1 = arith.constant 0 : i32
    return %arg0, %c0_i32, %c0_i32_0 : i32, i32, i32
  }
  func.func @transform_5(%arg0: i32) -> (i32, i32) {
    %c0_i32 = arith.constant 0 : i32
    %c0_i32_0 = arith.constant 0 : i32
    %c0_i32_1 = arith.constant 0 : i32
    return %c0_i32, %c0_i32_0 : i32, i32
  }
  func.func @transform_6(%arg0: i32) -> (i32, i32) {
    %c0_i32 = arith.constant 0 : i32
    %c0_i32_0 = arith.constant 0 : i32
    %c0_i32_1 = arith.constant 0 : i32
    return %c0_i32, %c0_i32_0 : i32, i32
  }
  func.func @transform_7(%arg0: i32) -> (i32, i32) {
    %c0_i32 = arith.constant 0 : i32
    %c0_i32_0 = arith.constant 0 : i32
    %c0_i32_1 = arith.constant 0 : i32
    return %c0_i32, %c0_i32_0 : i32, i32
  }
  func.func @transform_8(%arg0: i32) -> (i32, i32) {
    %c0_i32 = arith.constant 0 : i32
    %c0_i32_0 = arith.constant 0 : i32
    %c0_i32_1 = arith.constant 0 : i32
    return %c0_i32, %c0_i32_0 : i32, i32
  }
  func.func @transform_9(%arg0: i32) -> (i32, i32) {
    %c0_i32 = arith.constant 0 : i32
    %c0_i32_0 = arith.constant 0 : i32
    %c0_i32_1 = arith.constant 0 : i32
    return %c0_i32, %c0_i32_0 : i32, i32
  }
  func.func @transform_10(%arg0: i32) -> (i32, i32, i32) {
    %c0_i32 = arith.constant 0 : i32
    %c0_i32_0 = arith.constant 0 : i32
    %c0_i32_1 = arith.constant 0 : i32
    return %arg0, %c0_i32, %c0_i32_0 : i32, i32, i32
  }
}

</mosaic_0001>

<bundles_post_ra>
// kernel: tpu_custom_call.1
= control target key start
LH: loop header
LB: loop body
LE: loop exit
PB: predicated region body
PF: predicated region fallthrough
CT: control target
= control target key end

     0   :  { %15 = vsyncpa [#allocation4], 0  ;;  %s10402_s0 = inlined_call_operand.vmem [shape: f32[2,128,8], index: 0, kind: input, shape index: {}]   ;;  %s10403_s1 = inlined_call_operand.vmem [shape: f32[2,128,8], index: 1, kind: input, shape index: {}]   ;;  %s10404_s2 = inlined_call_operand.vmem [shape: f32[2,128,8], index: 2, kind: input, shape index: {}]   ;;  %s10405_s3 = inlined_call_operand.vmem [shape: f32[2,128,8], index: 3, kind: input, shape index: {}]   ;;  %s10406_s4 = inlined_call_operand.vmem [shape: f32[2,128,8], index: 4, kind: input, shape index: {}]   ;;  %s10407_s5 = inlined_call_operand.hbm [shape: f32[128,1536], index: 5, kind: input, shape index: {}]   ;;  %s10408_s6 = inlined_call_operand.vmem [shape: f32[128,1024], index: 6, kind: input, shape index: {}]   ;;  %s10409_s7 = inlined_call_operand.hbm [shape: f32[128,768], index: 7, kind: input, shape index: {}]   ;;  %s10410_s8 = inlined_call_operand.vmem [shape: f32[16,768], index: 8, kind: input, shape index: {}]   ;;  %s10411_s9 = inlined_call_operand.vmem [shape: f32[128,8], index: 9, kind: input, shape index: {}]   ;;  %s10412_s10 = inlined_call_operand.vmem [shape: f32[2,16,8], index: 10, kind: output, shape index: {}]  }
   0x1   :  { %16 = vsyncpa [#allocation6], 0  ;;  %s6948_s13 = smov 0  }
   0x2 LB: > { %s299_s16 = sshll.u32 %s10407_s5, 4  ;;  %s5687_s17 = sadd.s32 4294967295, %s6870_s13   ;;  %s6870_s13 = sphi %s6948_s13, %s22_s13   ;;  %s300_s16 = int_to_ptr.hbm [resolvable:$true] %s299_s16 }
   0x3   : > { %p5689_p0 = scmp.ge.s32.totalorder %s6870_s13, 1  ;;  %p288_p1 = scmp.lt.s32.totalorder %s6870_s13, 3 }
   0x4   : > { %p5731_p2 = scmp.eq.s32.totalorder %s5687_s17, 0  ;;  %s6872_s19 = smov [#allocation3]  }
   0x5   : > { %p6959_p3 = pnand %p5689_p0, %p288_p1  ;;  %s301_s20 = sshll.u32 %s6872_s19, 4  ;;  %s302_s20 = int_to_ptr.vmem [resolvable:$true] %s301_s20 }
   0x6   : > { %s316_s23 = sshll.u32 %s10409_s7, 4  ;;  %s6873_s24 = smov [#allocation5]   ;;  %s317_s23 = int_to_ptr.hbm [resolvable:$true] %s316_s23 }
   0x7   : > { %p5724_p4 = pneg %p6959_p3  ;;  %s318_s25 = sshll.u32 %s6873_s24, 4  ;;  %s319_s25 = int_to_ptr.vmem [resolvable:$true] %s318_s25 }
   0x8   : > { %s6874_s26 = smov 1536   ;;  %s6875_s27 = smov 96  }
   0x9   : > { %p5725_p5 = pnand %p5731_p2, %p5724_p4  ;;  %s6876_s28 = smov 768  }
   0xa   : > { %s6877_s29 = smov 48   ;;  %380 = sbr.rel (%p6959_p3) target bundleno = 2605 (0xa2d), region = 60 }
   0xb   : > { %5727 = dma.hbm_to_vmem [thread:$0]  (!%p5725_p5), %s300_s16, 24576, %s302_s20, [#allocation4], %s6874_s26, %s6874_s26, %s6875_s27  }
   0xc   : > { %5730 = dma.hbm_to_vmem [thread:$0]  (!%p5725_p5), %s317_s23, 12288, %s319_s25, [#allocation6], %s6876_s28, %s6876_s28, %s6877_s29  }
   0xf   : > { %6861 = dma.done.wait (%p5731_p2), [#allocation4], 24576  }
  0x10   : > { %6863 = vsyncadd (%p5731_p2), [#allocation4], 4294942720 }
  0x11   : > { %6865 = dma.done.wait (%p5731_p2), [#allocation6], 12288  }
  0x12   : > { %6867 = vsyncadd (%p5731_p2), [#allocation6], 4294955008  ;;  %p444_p6 = scmp.lt.s32.totalorder %s5687_s17, 1  ;;  %s6878_s15 = smov 2   ;;  %vm522_vm0 = vcmask 105472   ;;  %v10413_v21 = vmov 0.0  }
  0x13   : > { %527 = vst.msk [vmem:[#allocation2 + $0x20] sm:$0xff] %vm522_vm0, %v10413_v21  ;;  %vm683_vm1 = vcmask 80912   ;;  %s6880_s20 = smov 127   ;;  %s6881_s21 = smov 126   ;;  %vm2600_vm6 = vcmask 72712  }
  0x14   : > { %s10464_s17 = smov (!%p444_p6, %s5687_s17), 1  ;;  %523 = vst.msk [vmem:[#allocation2] sm:$0xff] %vm522_vm0, %v10413_v21  ;;  %s6882_s22 = smov 125  }
  0x15   : > { %s6978_s30 = sshll.u32 %s10464_s17, 7  ;;  %524 = vst.msk [vmem:[#allocation2 + $0x8] sm:$0xff] %vm522_vm0, %v10413_v21  ;;  %s6883_s23 = smov 124  }
  0x16   : > { %s6984_s14 = scalar_lea.vmem %s10402_s0, %s6978_s30  ;;  %s7020_s19 = scalar_lea.vmem %s10403_s1, %s6978_s30  ;;  %525 = vst.msk [vmem:[#allocation2 + $0x10] sm:$0xff] %vm522_vm0, %v10413_v21 }
  0x17   : > { %v492_v0 = vld [vmem:[%s6984_s14 + $0x10] sm:$0xff]  ;;  %v490_v1 = vld [vmem:[%s6984_s14] sm:$0xff]  ;;  %v493_v3 = vld [vmem:[%s6984_s14 + $0x18] sm:$0xff]  ;;  %526 = vst.msk [vmem:[#allocation2 + $0x18] sm:$0xff] %vm522_vm0, %v10413_v21  ;;  %s6884_s24 = smov 123   ;;  %s8132_s12 = scalar_lea.vmem %s10404_s2, %s6978_s30 }
  0x18   : > { %591 = vrot.lane.b32.xlu1 %v492_v0, %s6878_s15  ;;  %587 = vrot.lane.b32.xlu0 %v490_v1, %s6878_s15  ;;  %v494_v2 = vld [vmem:[%s6984_s14 + $0x20] sm:$0xff]  ;;  %v491_v4 = vld [vmem:[%s6984_s14 + $0x8] sm:$0xff]  ;;  %528 = vst.msk [vmem:[#allocation2 + $0x28] sm:$0xff] %vm522_vm0, %v10413_v21  ;;  %s5715_s11 = sshll.u32 %s10464_s17, 4 }
  0x19   : > { %595 = vrot.lane.b32.xlu2 %v494_v2, %s6878_s15  ;;  %v495_v5 = vld [vmem:[%s6984_s14 + $0x28] sm:$0xff]  ;;  %v497_v6 = vld [vmem:[%s6984_s14 + $0x38] sm:$0xff]  ;;  %v496_v7 = vld [vmem:[%s6984_s14 + $0x30] sm:$0xff]  ;;  %529 = vst.msk [vmem:[#allocation2 + $0x30] sm:$0xff] %vm522_vm0, %v10413_v21  ;;  %s473_s16 = scalar_lea.vmem %s10412_s10, %s5715_s11 }
  0x1a   : > { %v498_v8 = vld [vmem:[%s6984_s14 + $0x40] sm:$0xff]  ;;  %v500_v9 = vld [vmem:[%s6984_s14 + $0x50] sm:$0xff]  ;;  %v499_v10 = vld [vmem:[%s6984_s14 + $0x48] sm:$0xff]  ;;  %530 = vst.msk [vmem:[#allocation2 + $0x38] sm:$0xff] %vm522_vm0, %v10413_v21 }
  0x1b   : > { %v501_v11 = vld [vmem:[%s6984_s14 + $0x58] sm:$0xff]  ;;  %v503_v12 = vld [vmem:[%s6984_s14 + $0x68] sm:$0xff]  ;;  %v502_v13 = vld [vmem:[%s6984_s14 + $0x60] sm:$0xff]  ;;  %531 = vst.msk [vmem:[#allocation2 + $0x40] sm:$0xff] %vm522_vm0, %v10413_v21 }
  0x1c   : > { %v504_v14 = vld [vmem:[%s6984_s14 + $0x70] sm:$0xff]  ;;  %v506_v15 = vld [vmem:[%s7020_s19] sm:$0xff]  ;;  %v505_v16 = vld [vmem:[%s6984_s14 + $0x78] sm:$0xff]  ;;  %532 = vst.msk [vmem:[#allocation2 + $0x48] sm:$0xff] %vm522_vm0, %v10413_v21  ;;  %s6887_s14 = smov 1  }
  0x1d   : > { %v507_v17 = vld [vmem:[%s7020_s19 + $0x8] sm:$0xff]  ;;  %v509_v18 = vld [vmem:[%s7020_s19 + $0x18] sm:$0xff]  ;;  %v508_v19 = vld [vmem:[%s7020_s19 + $0x10] sm:$0xff]  ;;  %533 = vst.msk [vmem:[#allocation2 + $0x50] sm:$0xff] %vm522_vm0, %v10413_v21 }
  0x1e   : > { %v510_v20 = vld [vmem:[%s7020_s19 + $0x20] sm:$0xff]  ;;  %v512_v22 = vld [vmem:[%s7020_s19 + $0x30] sm:$0xff]  ;;  %v511_v23 = vld [vmem:[%s7020_s19 + $0x28] sm:$0xff]  ;;  %534 = vst.msk [vmem:[#allocation2 + $0x58] sm:$0xff] %vm522_vm0, %v10413_v21 }
  0x1f   : > { %v513_v24 = vld [vmem:[%s7020_s19 + $0x38] sm:$0xff]  ;;  %v515_v25 = vld [vmem:[%s7020_s19 + $0x48] sm:$0xff]  ;;  %v514_v26 = vld [vmem:[%s7020_s19 + $0x40] sm:$0xff]  ;;  %535 = vst.msk [vmem:[#allocation2 + $0x60] sm:$0xff] %vm522_vm0, %v10413_v21 }
  0x20   : > { %593 = vrot.lane.b32.xlu1 %v493_v3, %s6878_s15  ;;  %589 = vrot.lane.b32.xlu0 %v491_v4, %s6878_s15  ;;  %v516_v27 = vld [vmem:[%s7020_s19 + $0x50] sm:$0xff]  ;;  %536 = vst.msk [vmem:[#allocation2 + $0x68] sm:$0xff] %vm522_vm0, %v10413_v21  ;;  %v518_v28 = vld [vmem:[%s7020_s19 + $0x60] sm:$0xff] }
  0x21   : > { %597 = vrot.lane.b32.xlu2 %v495_v5, %s6878_s15  ;;  %537 = vst.msk [vmem:[#allocation2 + $0x70] sm:$0xff] %vm522_vm0, %v10413_v21  ;;  %v517_v29 = vld [vmem:[%s7020_s19 + $0x58] sm:$0xff]  ;;  %v519_v30 = vld [vmem:[%s7020_s19 + $0x68] sm:$0xff]  ;;  %v520_v32 = vld [vmem:[%s7020_s19 + $0x70] sm:$0xff] }
  0x22   : > { %538 = vst.msk [vmem:[#allocation2 + $0x78] sm:$0xff] %vm522_vm0, %v10413_v21  ;;  %v521_v31 = vld [vmem:[%s7020_s19 + $0x78] sm:$0xff] }
  0x23   : > { %539 = vst.msk [vmem:[#allocation2 + $0x80] sm:$0xff] %vm522_vm0, %v10413_v21 }
  0x24   : > { %540 = vst.msk [vmem:[#allocation2 + $0x88] sm:$0xff] %vm522_vm0, %v10413_v21 }
  0x25   : > { %541 = vst.msk [vmem:[#allocation2 + $0x90] sm:$0xff] %vm522_vm0, %v10413_v21 }
  0x26   : > { %542 = vst.msk [vmem:[#allocation2 + $0x98] sm:$0xff] %vm522_vm0, %v10413_v21 }
  0x27   : > { %543 = vst.msk [vmem:[#allocation2 + $0xa0] sm:$0xff] %vm522_vm0, %v10413_v21 }
  0x28   : > { %601 = vrot.lane.b32.xlu1 %v497_v6, %s6878_s15  ;;  %599 = vrot.lane.b32.xlu0 %v496_v7, %s6878_s15  ;;  %544 = vst.msk [vmem:[#allocation2 + $0xa8] sm:$0xff] %vm522_vm0, %v10413_v21 }
  0x29   : > { %603 = vrot.lane.b32.xlu2 %v498_v8, %s6878_s15  ;;  %545 = vst.msk [vmem:[#allocation2 + $0xb0] sm:$0xff] %vm522_vm0, %v10413_v21 }
  0x2a   : > { %546 = vst.msk [vmem:[#allocation2 + $0xb8] sm:$0xff] %vm522_vm0, %v10413_v21 }
  0x2b   : > { %547 = vst.msk [vmem:[#allocation2 + $0xc0] sm:$0xff] %vm522_vm0, %v10413_v21 }
  0x2c   : > { %548 = vst.msk [vmem:[#allocation2 + $0xc8] sm:$0xff] %vm522_vm0, %v10413_v21 }
  0x2d   : > { %549 = vst.msk [vmem:[#allocation2 + $0xd0] sm:$0xff] %vm522_vm0, %v10413_v21 }
  0x2e   : > { %550 = vst.msk [vmem:[#allocation2 + $0xd8] sm:$0xff] %vm522_vm0, %v10413_v21 }
  0x2f   : > { %551 = vst.msk [vmem:[#allocation2 + $0xe0] sm:$0xff] %vm522_vm0, %v10413_v21 }
  0x30   : > { %607 = vrot.lane.b32.xlu1 %v500_v9, %s6878_s15  ;;  %605 = vrot.lane.b32.xlu0 %v499_v10, %s6878_s15  ;;  %552 = vst.msk [vmem:[#allocation2 + $0xe8] sm:$0xff] %vm522_vm0, %v10413_v21 }
  0x31   : > { %609 = vrot.lane.b32.xlu2 %v501_v11, %s6878_s15  ;;  %553 = vst.msk [vmem:[#allocation2 + $0xf0] sm:$0xff] %vm522_vm0, %v10413_v21 }
  0x32   : > { %554 = vst.msk [vmem:[#allocation2 + $0xf8] sm:$0xff] %vm522_vm0, %v10413_v21 }
  0x38   : > { %613 = vrot.lane.b32.xlu1 %v503_v12, %s6878_s15  ;;  %611 = vrot.lane.b32.xlu0 %v502_v13, %s6878_s15 }
  0x39   : > { %615 = vrot.lane.b32.xlu2 %v504_v14, %s6878_s15 }
  0x40   : > { %619 = vrot.lane.b32.xlu1 %v506_v15, %s6878_s15  ;;  %617 = vrot.lane.b32.xlu0 %v505_v16, %s6878_s15 }
  0x41   : > { %621 = vrot.lane.b32.xlu2 %v507_v17, %s6878_s15 }
  0x48   : > { %625 = vrot.lane.b32.xlu1 %v509_v18, %s6878_s15  ;;  %623 = vrot.lane.b32.xlu0 %v508_v19, %s6878_s15 }
  0x49   : > { %627 = vrot.lane.b32.xlu2 %v510_v20, %s6878_s15 }
  0x50   : > { %631 = vrot.lane.b32.xlu1 %v512_v22, %s6878_s15  ;;  %629 = vrot.lane.b32.xlu0 %v511_v23, %s6878_s15 }
  0x51   : > { %633 = vrot.lane.b32.xlu2 %v513_v24, %s6878_s15 }
  0x58   : > { %637 = vrot.lane.b32.xlu1 %v515_v25, %s6878_s15  ;;  %635 = vrot.lane.b32.xlu0 %v514_v26, %s6878_s15 }
  0x59   : > { %639 = vrot.lane.b32.xlu2 %v516_v27, %s6878_s15 }
  0x60   : > { %643 = vrot.lane.b32.xlu1 %v518_v28, %s6878_s15  ;;  %641 = vrot.lane.b32.xlu0 %v517_v29, %s6878_s15 }
  0x61   : > { %645 = vrot.lane.b32.xlu2 %v519_v30, %s6878_s15 }
  0x68   : > { %649 = vrot.lane.b32.xlu1 %v521_v31, %s6878_s15  ;;  %647 = vrot.lane.b32.xlu0 %v520_v32, %s6878_s15  ;;  %s9346_s15 = scalar_lea.vmem %s10405_s3, %s6978_s30 }
  0x73   : > { %v596_v33 = vpop.permute.xlu2 %595 }
  0x74   : > { %688 = vst.msk [vmem:[#allocation2 + $0x20] sm:$0xff] %vm683_vm1, %v596_v33 }
  0x7b   : > { %v598_v34 = vpop.permute.xlu2 %597  ;;  %v7122_v35 = vld [vmem:[#allocation2 + $0x20] sm:$0xff] }
  0x7c   : > { %689 = vst.msk [vmem:[#allocation2 + $0x28] sm:$0xff] %vm683_vm1, %v598_v34 }
  0x7d   : > { %2444 = vst.msk [vmem:[#allocation2 + $0x20] sm:$0xff] %vm522_vm0, %v10413_v21 }
  0x83   : > { %v7126_v36 = vld [vmem:[#allocation2 + $0x28] sm:$0xff]  ;;  %v604_v37 = vpop.permute.xlu2 %603 }
  0x84   : > { %v7130_v38 = vpack.i.bf16 %v7126_v36, %v7122_v35  ;;  %2445 = vst.msk [vmem:[#allocation2 + $0x28] sm:$0xff] %vm522_vm0, %v10413_v21 }
  0x85   : > { %692 = vst.msk [vmem:[#allocation2 + $0x40] sm:$0xff] %vm683_vm1, %v604_v37 }
  0x86   : > { %5775 = vrot.lane.b32.xlu1 %v7130_v38, %s6880_s20 }
  0x8a   : > { %v592_v39 = vpop.permute.xlu1 %591  ;;  %v588_v40 = vpop.permute.xlu0 %587 }
  0x8b   : > { %686 = vst.msk [vmem:[#allocation2 + $0x10] sm:$0xff] %vm683_vm1, %v592_v39  ;;  %v610_v41 = vpop.permute.xlu2 %609 }
  0x8c   : > { %684 = vst.msk [vmem:[#allocation2] sm:$0xff] %vm683_vm1, %v588_v40  ;;  %v7140_v42 = vld [vmem:[#allocation2 + $0x40] sm:$0xff] }
  0x8d   : > { %695 = vst.msk [vmem:[#allocation2 + $0x58] sm:$0xff] %vm683_vm1, %v610_v41 }
  0x8e   : > { %2448 = vst.msk [vmem:[#allocation2 + $0x40] sm:$0xff] %vm522_vm0, %v10413_v21 }
  0x92   : > { %v594_v43 = vpop.permute.xlu1 %593  ;;  %v590_v44 = vpop.permute.xlu0 %589  ;;  %v7146_v46 = vld [vmem:[#allocation2 + $0x10] sm:$0xff] }
  0x93   : > { %687 = vst.msk [vmem:[#allocation2 + $0x18] sm:$0xff] %vm683_vm1, %v594_v43  ;;  %v616_v45 = vpop.permute.xlu2 %615  ;;  %v7150_v47 = vld [vmem:[#allocation2] sm:$0xff] }
  0x94   : > { %685 = vst.msk [vmem:[#allocation2 + $0x8] sm:$0xff] %vm683_vm1, %v590_v44  ;;  %v7155_v48 = vld [vmem:[#allocation2 + $0x58] sm:$0xff] }
  0x95   : > { %2442 = vst.msk [vmem:[#allocation2 + $0x10] sm:$0xff] %vm522_vm0, %v10413_v21 }
  0x96   : > { %2440 = vst.msk [vmem:[#allocation2] sm:$0xff] %vm522_vm0, %v10413_v21 }
  0x97   : > { %698 = vst.msk [vmem:[#allocation2 + $0x70] sm:$0xff] %vm683_vm1, %v616_v45 }
  0x98   : > { %2451 = vst.msk [vmem:[#allocation2 + $0x58] sm:$0xff] %vm522_vm0, %v10413_v21 }
  0x9a   : > { %v602_v49 = vpop.permute.xlu1 %601  ;;  %v600_v50 = vpop.permute.xlu0 %599  ;;  %v7159_v51 = vld [vmem:[#allocation2 + $0x18] sm:$0xff] }
  0x9b   : > { %691 = vst.msk [vmem:[#allocation2 + $0x38] sm:$0xff] %vm683_vm1, %v602_v49  ;;  %v7164_v52 = vpack.i.bf16 %v7159_v51, %v7146_v46  ;;  %v7166_v53 = vld [vmem:[#allocation2 + $0x8] sm:$0xff]  ;;  %v622_v54 = vpop.permute.xlu2 %621 }
  0x9c   : > { %690 = vst.msk [vmem:[#allocation2 + $0x30] sm:$0xff] %vm683_vm1, %v600_v50  ;;  %v7171_v55 = vpack.i.bf16 %v7166_v53, %v7150_v47 }
  0x9d   : > { %5770 = vrot.lane.b32.xlu0 %v7164_v52, %s6880_s20  ;;  %2443 = vst.msk [vmem:[#allocation2 + $0x18] sm:$0xff] %vm522_vm0, %v10413_v21 }
  0x9e   : > { %5765 = vrot.lane.b32.xlu2 %v7171_v55, %s6880_s20  ;;  %2441 = vst.msk [vmem:[#allocation2 + $0x8] sm:$0xff] %vm522_vm0, %v10413_v21  ;;  %v730_v56 = vld [vmem:[#allocation2 + $0x70] sm:$0xff] }
  0x9f   : > { %701 = vst.msk [vmem:[#allocation2 + $0x88] sm:$0xff] %vm683_vm1, %v622_v54 }
  0xa0   : > { %2454 = vst.msk [vmem:[#allocation2 + $0x70] sm:$0xff] %vm522_vm0, %v10413_v21 }
  0xa2   : > { %v608_v57 = vpop.permute.xlu1 %607  ;;  %v606_v58 = vpop.permute.xlu0 %605  ;;  %v7184_v59 = vld [vmem:[#allocation2 + $0x38] sm:$0xff] }
  0xa3   : > { %694 = vst.msk [vmem:[#allocation2 + $0x50] sm:$0xff] %vm683_vm1, %v608_v57  ;;  %v7187_v60 = vld [vmem:[#allocation2 + $0x30] sm:$0xff]  ;;  %v628_v61 = vpop.permute.xlu2 %627  ;;  %v1260_v57 = vld [vmem:[#allocation3] sm:$0xff] }
  0xa4   : > { %693 = vst.msk [vmem:[#allocation2 + $0x48] sm:$0xff] %vm683_vm1, %v606_v58  ;;  %v7192_v62 = vpack.i.bf16 %v7184_v59, %v7187_v60  ;;  %v1272_v58 = vld [vmem:[#allocation3 + $0x60] sm:$0xff] }
  0xa5   : > { %2446 = vst.msk [vmem:[#allocation2 + $0x30] sm:$0xff] %vm522_vm0, %v10413_v21 }
  0xa6   : > { %5780 = vrot.lane.b32.xlu2 %v7192_v62, %s6880_s20  ;;  %2447 = vst.msk [vmem:[#allocation2 + $0x38] sm:$0xff] %vm522_vm0, %v10413_v21  ;;  %v7201_v63 = vld [vmem:[#allocation2 + $0x88] sm:$0xff] }
  0xa7   : > { %704 = vst.msk [vmem:[#allocation2 + $0xa0] sm:$0xff] %vm683_vm1, %v628_v61  ;;  %v1261_v61 = vld [vmem:[#allocation3 + $0x8] sm:$0xff] }
  0xa8   : > { %2457 = vst.msk [vmem:[#allocation2 + $0x88] sm:$0xff] %vm522_vm0, %v10413_v21 }
  0xaa   : > { %v614_v0 = vpop.permute.xlu1 %613  ;;  %v612_v1 = vpop.permute.xlu0 %611  ;;  %v726_v2 = vld [vmem:[#allocation2 + $0x50] sm:$0xff] }
  0xab   : > { %697 = vst.msk [vmem:[#allocation2 + $0x68] sm:$0xff] %vm683_vm1, %v614_v0  ;;  %v7207_v3 = vpack.i.bf16 %v7155_v48, %v726_v2  ;;  %v725_v4 = vld [vmem:[#allocation2 + $0x48] sm:$0xff]  ;;  %v634_v5 = vpop.permute.xlu2 %633  ;;  %v1308_v0 = vld [vmem:[#allocation3 + $0x180] sm:$0xff] }
  0xac   : > { %696 = vst.msk [vmem:[#allocation2 + $0x60] sm:$0xff] %vm683_vm1, %v612_v1  ;;  %v7211_v6 = vpack.i.bf16 %v725_v4, %v7140_v42  ;;  %v1273_v1 = vld [vmem:[#allocation3 + $0x68] sm:$0xff] }
  0xad   : > { %5790 = vrot.lane.b32.xlu1 %v7207_v3, %s6880_s20  ;;  %2450 = vst.msk [vmem:[#allocation2 + $0x50] sm:$0xff] %vm522_vm0, %v10413_v21 }
  0xae   : > { %5785 = vrot.lane.b32.xlu0 %v7211_v6, %s6880_s20  ;;  %2449 = vst.msk [vmem:[#allocation2 + $0x48] sm:$0xff] %vm522_vm0, %v10413_v21  ;;  %v7222_v7 = vld [vmem:[#allocation2 + $0xa0] sm:$0xff] }
  0xaf   : > { %707 = vst.msk [vmem:[#allocation2 + $0xb8] sm:$0xff] %vm683_vm1, %v634_v5  ;;  %v1332_v5 = vld [vmem:[#allocation3 + $0x240] sm:$0xff] }
  0xb0   : > { %2460 = vst.msk [vmem:[#allocation2 + $0xa0] sm:$0xff] %vm522_vm0, %v10413_v21 }
  0xb2   : > { %v620_v8 = vpop.permute.xlu1 %619  ;;  %v618_v9 = vpop.permute.xlu0 %617  ;;  %v729_v10 = vld [vmem:[#allocation2 + $0x68] sm:$0xff] }
  0xb3   : > { %700 = vst.msk [vmem:[#allocation2 + $0x80] sm:$0xff] %vm683_vm1, %v620_v8  ;;  %v728_v11 = vld [vmem:[#allocation2 + $0x60] sm:$0xff]  ;;  %v640_v12 = vpop.permute.xlu2 %639 }
  0xb4   : > { %699 = vst.msk [vmem:[#allocation2 + $0x78] sm:$0xff] %vm683_vm1, %v618_v9  ;;  %v7228_v13 = vpack.i.bf16 %v729_v10, %v728_v11 }
  0xb5   : > { %2452 = vst.msk [vmem:[#allocation2 + $0x60] sm:$0xff] %vm522_vm0, %v10413_v21 }
  0xb6   : > { %5795 = vrot.lane.b32.xlu2 %v7228_v13, %s6880_s20  ;;  %2453 = vst.msk [vmem:[#allocation2 + $0x68] sm:$0xff] %vm522_vm0, %v10413_v21  ;;  %v7237_v14 = vld [vmem:[#allocation2 + $0xb8] sm:$0xff] }
  0xb7   : > { %710 = vst.msk [vmem:[#allocation2 + $0xd0] sm:$0xff] %vm683_vm1, %v640_v12 }
  0xb8   : > { %2463 = vst.msk [vmem:[#allocation2 + $0xb8] sm:$0xff] %vm522_vm0, %v10413_v21 }
  0xba   : > { %v626_v15 = vpop.permute.xlu1 %625  ;;  %v624_v16 = vpop.permute.xlu0 %623  ;;  %v7241_v17 = vld [vmem:[#allocation2 + $0x80] sm:$0xff] }
  0xbb   : > { %703 = vst.msk [vmem:[#allocation2 + $0x98] sm:$0xff] %vm683_vm1, %v626_v15  ;;  %v731_v18 = vld [vmem:[#allocation2 + $0x78] sm:$0xff]  ;;  %v7246_v19 = vpack.i.bf16 %v7201_v63, %v7241_v17  ;;  %v646_v22 = vpop.permute.xlu2 %645  ;;  %v1356_v15 = vld [vmem:[#allocation3 + $0x300] sm:$0xff] }
  0xbc   : > { %702 = vst.msk [vmem:[#allocation2 + $0x90] sm:$0xff] %vm683_vm1, %v624_v16  ;;  %1532 = vmatpush.msra.mxu0 %v731_v18  ;;  %v7249_v20 = vpack.i.bf16 %v731_v18, %v730_v56  ;;  %v1321_v16 = vld [vmem:[#allocation3 + $0x1e8] sm:$0xff] }
  0xbd   : > { %2455 = vst.msk [vmem:[#allocation2 + $0x78] sm:$0xff] %vm522_vm0, %v10413_v21  ;;  %5805 = vrot.lane.b32.xlu1 %v7246_v19, %s6880_s20 }
  0xbe   : > { %2456 = vst.msk [vmem:[#allocation2 + $0x80] sm:$0xff] %vm522_vm0, %v10413_v21  ;;  %5800 = vrot.lane.b32.xlu0 %v7249_v20, %s6880_s20  ;;  %1533 = vmatpush.msra.mxu0 %v730_v56  ;;  %v7260_v23 = vld [vmem:[#allocation2 + $0xd0] sm:$0xff] }
  0xbf   : > { %713 = vst.msk [vmem:[#allocation2 + $0xe8] sm:$0xff] %vm683_vm1, %v646_v22 }
  0xc0   : > { %1534 = vmatpush.msra.mxu0 %v729_v10  ;;  %2466 = vst.msk [vmem:[#allocation2 + $0xd0] sm:$0xff] %vm522_vm0, %v10413_v21  ;;  %v1344_v10 = vld [vmem:[#allocation3 + $0x2a0] sm:$0xff] }
  0xc2   : > { %1535 = vmatpush.msra.mxu0 %v728_v11  ;;  %v632_v24 = vpop.permute.xlu1 %631  ;;  %v630_v25 = vpop.permute.xlu0 %629  ;;  %v7264_v26 = vld [vmem:[#allocation2 + $0x98] sm:$0xff]  ;;  %v1309_v11 = vld [vmem:[#allocation3 + $0x188] sm:$0xff] }
  0xc3   : > { %706 = vst.msk [vmem:[#allocation2 + $0xb0] sm:$0xff] %vm683_vm1, %v632_v24  ;;  %v7267_v27 = vld [vmem:[#allocation2 + $0x90] sm:$0xff] }
  0xc4   : > { %705 = vst.msk [vmem:[#allocation2 + $0xa8] sm:$0xff] %vm683_vm1, %v630_v25  ;;  %1536 = vmatpush.msra.mxu0 %v7155_v48  ;;  %v7273_v28 = vpack.i.bf16 %v7264_v26, %v7267_v27  ;;  %v1368_v25 = vld [vmem:[#allocation3 + $0x360] sm:$0xff] }
  0xc5   : > { %2458 = vst.msk [vmem:[#allocation2 + $0x90] sm:$0xff] %vm522_vm0, %v10413_v21 }
  0xc6   : > { %1537 = vmatpush.msra.mxu0 %v726_v2  ;;  %5810 = vrot.lane.b32.xlu2 %v7273_v28, %s6880_s20  ;;  %2459 = vst.msk [vmem:[#allocation2 + $0x98] sm:$0xff] %vm522_vm0, %v10413_v21  ;;  %v7281_v29 = vld [vmem:[#allocation2 + $0xe8] sm:$0xff] }
  0xc7   : > { %2469 = vst.msk [vmem:[#allocation2 + $0xe8] sm:$0xff] %vm522_vm0, %v10413_v21  ;;  %v1285_v2 = vld [vmem:[#allocation3 + $0xc8] sm:$0xff] }
  0xc8   : > { %1538 = vmatpush.msra.mxu0 %v725_v4 }
  0xca   : > { %1539 = vmatpush.msra.mxu0 %v7140_v42  ;;  %v638_v30 = vpop.permute.xlu1 %637  ;;  %v636_v31 = vpop.permute.xlu0 %635  ;;  %v7286_v32 = vld [vmem:[#allocation2 + $0xb0] sm:$0xff] }
  0xcb   : > { %709 = vst.msk [vmem:[#allocation2 + $0xc8] sm:$0xff] %vm683_vm1, %v638_v30  ;;  %v7291_v33 = vpack.i.bf16 %v7237_v14, %v7286_v32  ;;  %v7293_v34 = vld [vmem:[#allocation2 + $0xa8] sm:$0xff] }
  0xcc   : > { %708 = vst.msk [vmem:[#allocation2 + $0xc0] sm:$0xff] %vm683_vm1, %v636_v31  ;;  %1540 = vmatpush.msra.mxu0 %v7184_v59  ;;  %v7299_v37 = vpack.i.bf16 %v7293_v34, %v7222_v7  ;;  %v1284_v59 = vld [vmem:[#allocation3 + $0xc0] sm:$0xff] }
  0xcd   : > { %5820 = vrot.lane.b32.xlu1 %v7291_v33, %s6880_s20  ;;  %2462 = vst.msk [vmem:[#allocation2 + $0xb0] sm:$0xff] %vm522_vm0, %v10413_v21 }
  0xce   : > { %1541 = vmatpush.msra.mxu0 %v7187_v60  ;;  %5815 = vrot.lane.b32.xlu0 %v7299_v37, %s6880_s20  ;;  %2461 = vst.msk [vmem:[#allocation2 + $0xa8] sm:$0xff] %vm522_vm0, %v10413_v21  ;;  %v1296_v60 = vld [vmem:[#allocation3 + $0x120] sm:$0xff] }
  0xd0   : > { %1542 = vmatpush.msra.mxu0 %v7126_v36 }
  0xd2   : > { %1543 = vmatpush.msra.mxu0 %v7122_v35  ;;  %v644_v39 = vpop.permute.xlu1 %643  ;;  %v642_v40 = vpop.permute.xlu0 %641  ;;  %v7312_v41 = vld [vmem:[#allocation2 + $0xc8] sm:$0xff] }
  0xd3   : > { %712 = vst.msk [vmem:[#allocation2 + $0xe0] sm:$0xff] %vm683_vm1, %v644_v39  ;;  %v7315_v42 = vld [vmem:[#allocation2 + $0xc0] sm:$0xff] }
  0xd4   : > { %711 = vst.msk [vmem:[#allocation2 + $0xd8] sm:$0xff] %vm683_vm1, %v642_v40  ;;  %1544 = vmatpush.msra.mxu0 %v7159_v51  ;;  %v7321_v43 = vpack.i.bf16 %v7312_v41, %v7315_v42  ;;  %v6159_v35 = vpack.i.bf16 %v7315_v42, %v7312_v41  ;;  %v1380_v40 = vld [vmem:[#allocation3 + $0x3c0] sm:$0xff] }
  0xd5   : > { %2464 = vst.msk [vmem:[#allocation2 + $0xc0] sm:$0xff] %vm522_vm0, %v10413_v21 }
  0xd6   : > { %1545 = vmatpush.msra.mxu0 %v7146_v46  ;;  %5825 = vrot.lane.b32.xlu2 %v7321_v43, %s6880_s20  ;;  %2465 = vst.msk [vmem:[#allocation2 + $0xc8] sm:$0xff] %vm522_vm0, %v10413_v21 }
  0xd8   : > { %1546 = vmatpush.msra.mxu0 %v7166_v53 }
  0xda   : > { %1547 = vmatpush.msra.mxu0 %v7150_v47  ;;  %v650_v36 = vpop.permute.xlu1 %649  ;;  %v648_v44 = vpop.permute.xlu0 %647  ;;  %v7334_v45 = vld [vmem:[#allocation2 + $0xe0] sm:$0xff] }
  0xdb   : > { %715 = vst.msk [vmem:[#allocation2 + $0xf8] sm:$0xff] %vm683_vm1, %v650_v36  ;;  %v7339_v48 = vpack.i.bf16 %v7281_v29, %v7334_v45  ;;  %v7341_v46 = vld [vmem:[#allocation2 + $0xd8] sm:$0xff]  ;;  %v6149_v47 = vpack.i.bf16 %v7334_v45, %v7281_v29  ;;  %1548 = vmatmul.f32.vlgmr.msra.gmra.mxu0 %v1260_v57  ;;  %v1345_v36 = vld [vmem:[#allocation3 + $0x2a8] sm:$0xff] }
  0xdc   : > { %714 = vst.msk [vmem:[#allocation2 + $0xf0] sm:$0xff] %vm683_vm1, %v648_v44  ;;  %v7346_v49 = vpack.i.bf16 %v7341_v46, %v7260_v23  ;;  %v6154_v50 = vpack.i.bf16 %v7260_v23, %v7341_v46 }
  0xdd   : > { %5835 = vrot.lane.b32.xlu1 %v7339_v48, %s6880_s20  ;;  %2468 = vst.msk [vmem:[#allocation2 + $0xe0] sm:$0xff] %vm522_vm0, %v10413_v21 }
  0xde   : > { %5830 = vrot.lane.b32.xlu0 %v7346_v49, %s6880_s20  ;;  %2467 = vst.msk [vmem:[#allocation2 + $0xd8] sm:$0xff] %vm522_vm0, %v10413_v21 }
  0xe2   : > { %v7360_v51 = vld [vmem:[#allocation2 + $0xf8] sm:$0xff] }
  0xe3   : > { %1597 = vmatpush.msra.mxu1 %v7360_v51  ;;  %2471 = vst.msk [vmem:[#allocation2 + $0xf8] sm:$0xff] %vm522_vm0, %v10413_v21  ;;  %v7365_v53 = vld [vmem:[#allocation2 + $0xf0] sm:$0xff]  ;;  %1551 = vmatmul.f32.gmra.mxu0 %v1272_v58 }
  0xe4   : > { %v7369_v54 = vpack.i.bf16 %v7360_v51, %v7365_v53  ;;  %2470 = vst.msk [vmem:[#allocation2 + $0xf0] sm:$0xff] %vm522_vm0, %v10413_v21  ;;  %v6144_v56 = vpack.i.bf16 %v7365_v53, %v7360_v51 }
  0xe5   : > { %5850 = vrot.lane.b32.xlu1 %v7164_v52, %s6881_s21  ;;  %1598 = vmatpush.msra.mxu1 %v7365_v53 }
  0xe6   : > { %5845 = vrot.lane.b32.xlu0 %v7171_v55, %s6881_s21  ;;  %5840 = vrot.lane.b32.xlu2 %v7369_v54, %s6880_s20 }
  0xe7   : > { %1599 = vmatpush.msra.mxu1 %v7281_v29 }
  0xe9   : > { %1600 = vmatpush.msra.mxu1 %v7334_v45 }
  0xeb   : > { %1601 = vmatpush.msra.mxu1 %v7341_v46  ;;  %1554 = vmatmul.f32.gmra.mxu0 %v1284_v59 }
  0xed   : > { %5865 = vrot.lane.b32.xlu1 %v7211_v6, %s6881_s21  ;;  %1602 = vmatpush.msra.mxu1 %v7260_v23 }
  0xee   : > { %5860 = vrot.lane.b32.xlu0 %v7192_v62, %s6881_s21  ;;  %5855 = vrot.lane.b32.xlu2 %v7130_v38, %s6881_s21 }
  0xef   : > { %1603 = vmatpush.msra.mxu1 %v7312_v41 }
  0xf1   : > { %1604 = vmatpush.msra.mxu1 %v7315_v42  ;;  %v477_v42 = vld [vmem:[%s10411_s9 + $0x18] sm:$0xff] }
  0xf3   : > { %1605 = vmatpush.msra.mxu1 %v7237_v14  ;;  %1557 = vmatmul.f32.gmra.mxu0 %v1296_v60 }
  0xf5   : > { %5880 = vrot.lane.b32.xlu1 %v7249_v20, %s6881_s21  ;;  %1606 = vmatpush.msra.mxu1 %v7286_v32 }
  0xf6   : > { %5875 = vrot.lane.b32.xlu0 %v7228_v13, %s6881_s21  ;;  %5870 = vrot.lane.b32.xlu2 %v7207_v3, %s6881_s21 }
  0xf7   : > { %1607 = vmatpush.msra.mxu1 %v7293_v34 }
  0xf8   : > { %v7428_v4 = vpop.permute.xlu2 %5765 }
  0xf9   : > { %1608 = vmatpush.msra.mxu1 %v7222_v7  ;;  %v1297_v7 = vld [vmem:[#allocation3 + $0x128] sm:$0xff] }
  0xfb   : > { %1609 = vmatpush.msra.mxu1 %v7264_v26  ;;  %1560 = vmatmul.f32.gmra.mxu0 %v1308_v0  ;;  %v1333_v26 = vld [vmem:[#allocation3 + $0x248] sm:$0xff] }
  0xfd   : > { %5895 = vrot.lane.b32.xlu1 %v7299_v37, %s6881_s21  ;;  %1610 = vmatpush.msra.mxu1 %v7267_v27 }
  0xfe   : > { %5890 = vrot.lane.b32.xlu0 %v7273_v28, %s6881_s21  ;;  %5885 = vrot.lane.b32.xlu2 %v7246_v19, %s6881_s21 }
  0xff   : > { %1611 = vmatpush.msra.mxu1 %v7201_v63  ;;  %v1320_v63 = vld [vmem:[#allocation3 + $0x1e0] sm:$0xff] }
 0x100   : > { %v7440_v8 = vpop.permute.xlu2 %5780 }
 0x101   : > { %1612 = vmatpush.msra.mxu1 %v7241_v17  ;;  %v5776_v17 = vpop.permute.xlu1 %5775 }
 0x102   : > { %1613 = vmatmul.f32.vlgmr.msra.gmra.mxu1 %v1261_v61  ;;  %v5783_v61 = vunpack.i.h.bf16 %v7440_v8 }
 0x103   : > { %1563 = vmatmul.f32.gmra.mxu0 %v1320_v63  ;;  %v1357_v63 = vld [vmem:[#allocation3 + $0x308] sm:$0xff] }
 0x105   : > { %5910 = vrot.lane.b32.xlu1 %v7346_v49, %s6881_s21 }
 0x106   : > { %5905 = vrot.lane.b32.xlu0 %v7321_v43, %s6881_s21  ;;  %5900 = vrot.lane.b32.xlu2 %v7291_v33, %s6881_s21 }
 0x10a   : > { %1616 = vmatmul.f32.gmra.mxu1 %v1273_v1  ;;  %v1392_v1 = vld [vmem:[#allocation3 + $0x420] sm:$0xff] }
 0x10b   : > { %1566 = vmatmul.f32.gmra.mxu0 %v1332_v5 }
 0x10d   : > { %5925 = vrot.lane.b32.xlu1 %v7171_v55, %s6882_s22 }
 0x10e   : > { %5920 = vrot.lane.b32.xlu0 %v7369_v54, %s6881_s21  ;;  %5915 = vrot.lane.b32.xlu2 %v7339_v48, %s6881_s21 }
 0x10f   : > { %v7442_v9 = vpop.permute.xlu0 %5770 }
 0x110   : > { %v5796_v12 = vpop.permute.xlu2 %5795 }
 0x111   : > { %v5798_v30 = vunpack.i.h.bf16 %v5796_v12  ;;  %v5797_v32 = vunpack.i.l.bf16 %v5796_v12 }
 0x112   : > { %1619 = vmatmul.f32.gmra.mxu1 %v1285_v2  ;;  %v5782_v2 = vunpack.i.l.bf16 %v7440_v8 }
 0x113   : > { %1569 = vmatmul.f32.gmra.mxu0 %v1344_v10 }
 0x115   : > { %5940 = vrot.lane.b32.xlu1 %v7192_v62, %s6882_s22 }
 0x116   : > { %5935 = vrot.lane.b32.xlu0 %v7130_v38, %s6882_s22  ;;  %5930 = vrot.lane.b32.xlu2 %v7164_v52, %s6882_s22 }
 0x11a   : > { %1622 = vmatmul.f32.gmra.mxu1 %v1297_v7  ;;  %v5778_v7 = vunpack.i.h.bf16 %v5776_v17 }
 0x11b   : > { %1572 = vmatmul.f32.gmra.mxu0 %v1356_v15  ;;  %v1404_v15 = vld [vmem:[#allocation3 + $0x480] sm:$0xff] }
 0x11d   : > { %5955 = vrot.lane.b32.xlu1 %v7228_v13, %s6882_s22 }
 0x11e   : > { %5950 = vrot.lane.b32.xlu0 %v7207_v3, %s6882_s22  ;;  %5945 = vrot.lane.b32.xlu2 %v7211_v6, %s6882_s22 }
 0x11f   : > { %v5791_v31 = vpop.permute.xlu1 %5790 }
 0x120   : > { %v5786_v14 = vpop.permute.xlu0 %5785  ;;  %v7456_v18 = vpop.permute.xlu2 %5810  ;;  %v5793_v39 = vunpack.i.h.bf16 %v5791_v31  ;;  %v5792_v44 = vunpack.i.l.bf16 %v5791_v31  ;;  %v1416_v31 = vld [vmem:[#allocation3 + $0x4e0] sm:$0xff] }
 0x121   : > { %v5788_v57 = vunpack.i.h.bf16 %v5786_v14  ;;  %v5787_v59 = vunpack.i.l.bf16 %v5786_v14  ;;  %v5773_v14 = vunpack.i.h.bf16 %v7442_v9 }
 0x122   : > { %1625 = vmatmul.f32.gmra.mxu1 %v1309_v11  ;;  %v5777_v11 = vunpack.i.l.bf16 %v5776_v17  ;;  %v5768_v17 = vunpack.i.h.bf16 %v7428_v4 }
 0x123   : > { %1575 = vmatmul.f32.gmra.mxu0 %v1368_v25  ;;  %v5767_v25 = vunpack.i.l.bf16 %v7428_v4 }
 0x125   : > { %5970 = vrot.lane.b32.xlu1 %v7273_v28, %s6882_s22 }
 0x126   : > { %5965 = vrot.lane.b32.xlu0 %v7246_v19, %s6882_s22  ;;  %5960 = vrot.lane.b32.xlu2 %v7249_v20, %s6882_s22 }
 0x12a   : > { %1628 = vmatmul.f32.gmra.mxu1 %v1321_v16  ;;  %v1369_v16 = vld [vmem:[#allocation3 + $0x368] sm:$0xff] }
 0x12b   : > { %1578 = vmatmul.f32.gmra.mxu0 %v1380_v40 }
 0x12d   : > { %5985 = vrot.lane.b32.xlu1 %v7321_v43, %s6882_s22 }
 0x12e   : > { %5980 = vrot.lane.b32.xlu0 %v7291_v33, %s6882_s22  ;;  %5975 = vrot.lane.b32.xlu2 %v7299_v37, %s6882_s22 }
 0x12f   : > { %v7472_v58 = vpop.permute.xlu1 %5805 }
 0x130   : > { %v5801_v22 = vpop.permute.xlu0 %5800  ;;  %v7464_v34 = vpop.permute.xlu2 %5825 }
 0x131   : > { %v5803_v24 = vunpack.i.h.bf16 %v5801_v22  ;;  %v5802_v27 = vunpack.i.l.bf16 %v5801_v22  ;;  %v5772_v22 = vunpack.i.l.bf16 %v7442_v9 }
 0x132   : > { %1631 = vmatmul.f32.gmra.mxu1 %v1333_v26  ;;  %v1262_v26 = vld [vmem:[#allocation3 + $0x10] sm:$0xff] }
 0x133   : > { %1662 = vmatpush.msra.mxu2 %v5803_v24  ;;  %1581 = vmatmul.f32.gmra.mxu0 %v1392_v1  ;;  %v5827_v1 = vunpack.i.l.bf16 %v7464_v34 }
 0x135   : > { %1663 = vmatpush.msra.mxu2 %v5802_v27  ;;  %6000 = vrot.lane.b32.xlu1 %v7369_v54, %s6882_s22 }
 0x136   : > { %5995 = vrot.lane.b32.xlu0 %v7339_v48, %s6882_s22  ;;  %5990 = vrot.lane.b32.xlu2 %v7346_v49, %s6882_s22 }
 0x137   : > { %1664 = vmatpush.msra.mxu2 %v5798_v30 }
 0x139   : > { %1665 = vmatpush.msra.mxu2 %v5797_v32  ;;  %v1381_v32 = vld [vmem:[#allocation3 + $0x3c8] sm:$0xff] }
 0x13a   : > { %1634 = vmatmul.f32.gmra.mxu1 %v1345_v36 }
 0x13b   : > { %1666 = vmatpush.msra.mxu2 %v5793_v39  ;;  %1584 = vmatmul.f32.gmra.mxu0 %v1404_v15  ;;  %v1405_v15 = vld [vmem:[#allocation3 + $0x488] sm:$0xff] }
 0x13d   : > { %1667 = vmatpush.msra.mxu2 %v5792_v44  ;;  %6015 = vrot.lane.b32.xlu1 %v7130_v38, %s6883_s23  ;;  %v1274_v44 = vld [vmem:[#allocation3 + $0x70] sm:$0xff] }
 0x13e   : > { %6010 = vrot.lane.b32.xlu0 %v7164_v52, %s6883_s23  ;;  %6005 = vrot.lane.b32.xlu2 %v7171_v55, %s6883_s23 }
 0x13f   : > { %1668 = vmatpush.msra.mxu2 %v5788_v57  ;;  %v7482_v10 = vpop.permute.xlu1 %5820 }
 0x140   : > { %v5841_v60 = vpop.permute.xlu2 %5840  ;;  %v7484_v12 = vpop.permute.xlu0 %5815 }
 0x141   : > { %1669 = vmatpush.msra.mxu2 %v5787_v59  ;;  %v5843_v0 = vunpack.i.h.bf16 %v5841_v60  ;;  %v5842_v5 = vunpack.i.l.bf16 %v5841_v60  ;;  %v5828_v60 = vunpack.i.h.bf16 %v7464_v34  ;;  %v1286_v34 = vld [vmem:[#allocation3 + $0xd0] sm:$0xff] }
 0x142   : > { %1637 = vmatmul.f32.gmra.mxu1 %v1357_v63  ;;  %v5823_v63 = vunpack.i.h.bf16 %v7482_v10 }
 0x143   : > { %1670 = vmatpush.msra.mxu2 %v5783_v61  ;;  %1727 = vmatpush.msra.mxu3 %v5843_v0  ;;  %v1428_v61 = vld [vmem:[#allocation3 + $0x540] sm:$0xff]  ;;  %v1393_v0 = vld [vmem:[#allocation3 + $0x428] sm:$0xff] }
 0x144   : > { %1587 = vmatmul.f32.gmra.mxu0 %v1416_v31 }
 0x145   : > { %1671 = vmatpush.msra.mxu2 %v5782_v2  ;;  %6030 = vrot.lane.b32.xlu1 %v7207_v3, %s6883_s23 }
 0x146   : > { %6025 = vrot.lane.b32.xlu0 %v7211_v6, %s6883_s23  ;;  %6020 = vrot.lane.b32.xlu2 %v7192_v62, %s6883_s23 }
 0x147   : > { %1672 = vmatpush.msra.mxu2 %v5778_v7  ;;  %1728 = vmatpush.msra.mxu3 %v5842_v5  ;;  %v5822_v5 = vunpack.i.l.bf16 %v7482_v10 }
 0x148   : > { %v7486_v8 = vpop.permute.xlu2 %5855 }
 0x149   : > { %1673 = vmatpush.msra.mxu2 %v5777_v11 }
 0x14a   : > { %1640 = vmatmul.f32.gmra.mxu1 %v1369_v16  ;;  %v5812_v16 = vunpack.i.l.bf16 %v7456_v18 }
 0x14b   : > { %1674 = vmatpush.msra.mxu2 %v5773_v14  ;;  %v1440_v14 = vld [vmem:[#allocation3 + $0x5a0] sm:$0xff] }
 0x14c   : > { %1590 = vmatmul.f32.gmra.mxu0 %v1428_v61 }
 0x14d   : > { %1675 = vmatpush.msra.mxu2 %v5772_v22  ;;  %6045 = vrot.lane.b32.xlu1 %v7246_v19, %s6883_s23 }
 0x14e   : > { %6040 = vrot.lane.b32.xlu0 %v7249_v20, %s6883_s23  ;;  %6035 = vrot.lane.b32.xlu2 %v7228_v13, %s6883_s23 }
 0x14f   : > { %1676 = vmatpush.msra.mxu2 %v5768_v17  ;;  %v5836_v24 = vpop.permute.xlu1 %5835 }
 0x150   : > { %v7498_v27 = vpop.permute.xlu2 %5870  ;;  %v5831_v9 = vpop.permute.xlu0 %5830  ;;  %v5838_v30 = vunpack.i.h.bf16 %v5836_v24  ;;  %v5837_v39 = vunpack.i.l.bf16 %v5836_v24 }
 0x151   : > { %1677 = vmatpush.msra.mxu2 %v5767_v25  ;;  %v5833_v40 = vunpack.i.h.bf16 %v5831_v9  ;;  %v5832_v36 = vunpack.i.l.bf16 %v5831_v9 }
 0x152   : > { %1678 = vmatmul.f32.vlgmr.msra.gmra.mxu2 %v1262_v26  ;;  %1729 = vmatpush.msra.mxu3 %v5838_v30  ;;  %v1417_v26 = vld [vmem:[#allocation3 + $0x4e8] sm:$0xff]  ;;  %v1310_v30 = vld [vmem:[#allocation3 + $0x190] sm:$0xff] }
 0x153   : > { %1643 = vmatmul.f32.gmra.mxu1 %v1381_v32 }
 0x154   : > { %1730 = vmatpush.msra.mxu3 %v5837_v39  ;;  %1593 = vmatmul.f32.gmra.mxu0 %v1440_v14  ;;  %v6885_v39 = vmov 0  }
 0x155   : > { %6060 = vrot.lane.b32.xlu1 %v7291_v33, %s6883_s23  ;;  %6166 = vset.pattern.permute.xlu0 %v6885_v39 }
 0x156   : > { %6055 = vrot.lane.b32.xlu0 %v7299_v37, %s6883_s23  ;;  %6050 = vrot.lane.b32.xlu2 %v7273_v28, %s6883_s23 }
 0x157   : > { %1731 = vmatpush.msra.mxu3 %v5833_v40  ;;  %v7506_v4 = vpop.permute.xlu1 %5850  ;;  %6164 = vset.pattern.permute.xlu1 %v6885_v39  ;;  %v1275_v40 = vld [vmem:[#allocation3 + $0x78] sm:$0xff] }
 0x158   : > { %v7508_v57 = vpop.permute.xlu2 %5885  ;;  %v7510_v59 = vpop.permute.xlu0 %5845  ;;  %6165 = vset.pattern.permute.xlu2 %v6885_v39 }
 0x159   : > { %1732 = vmatpush.msra.mxu3 %v5832_v36  ;;  %v5847_v45 = vunpack.i.l.bf16 %v7510_v59 }
 0x15a   : > { %1681 = vmatmul.f32.gmra.mxu2 %v1274_v44 }
 0x15b   : > { %1733 = vmatpush.msra.mxu3 %v5828_v60  ;;  %1646 = vmatmul.f32.gmra.mxu1 %v1393_v0  ;;  %v1322_v60 = vld [vmem:[#allocation3 + $0x1f0] sm:$0xff] }
 0x15d   : > { %1734 = vmatpush.msra.mxu3 %v5827_v1  ;;  %6075 = vrot.lane.b32.xlu1 %v7339_v48, %s6883_s23  ;;  %v5818_v48 = vunpack.i.h.bf16 %v7484_v12  ;;  %v1441_v1 = vld [vmem:[#allocation3 + $0x5a8] sm:$0xff] }
 0x15e   : > { %6070 = vrot.lane.b32.xlu0 %v7346_v49, %s6883_s23  ;;  %6065 = vrot.lane.b32.xlu2 %v7321_v43, %s6883_s23  ;;  %v5817_v49 = vunpack.i.l.bf16 %v7484_v12  ;;  %v5813_v43 = vunpack.i.h.bf16 %v7456_v18  ;;  %v1298_v12 = vld [vmem:[#allocation3 + $0x130] sm:$0xff] }
 0x15f   : > { %1735 = vmatpush.msra.mxu3 %v5823_v63  ;;  %v7521_v2 = vpop.permute.xlu1 %5865  ;;  %v5858_v63 = vunpack.i.h.bf16 %v7486_v8 }
 0x160   : > { %v7524_v7 = vpop.permute.xlu2 %5900  ;;  %v7526_v11 = vpop.permute.xlu0 %5860  ;;  %v5868_v36 = vunpack.i.h.bf16 %v7521_v2 }
 0x161   : > { %1736 = vmatpush.msra.mxu3 %v5822_v5  ;;  %v5857_v5 = vunpack.i.l.bf16 %v7486_v8  ;;  %v5848_v8 = vunpack.i.h.bf16 %v7510_v59  ;;  %v1311_v59 = vld [vmem:[#allocation3 + $0x198] sm:$0xff]  ;;  %v5903_v41 = vunpack.i.h.bf16 %v7524_v7 }
 0x162   : > { %1684 = vmatmul.f32.gmra.mxu2 %v1286_v34  ;;  %v1334_v34 = vld [vmem:[#allocation3 + $0x250] sm:$0xff] }
 0x163   : > { %1737 = vmatpush.msra.mxu3 %v5818_v48  ;;  %1649 = vmatmul.f32.gmra.mxu1 %v1405_v15 }
 0x165   : > { %1738 = vmatpush.msra.mxu3 %v5817_v49  ;;  %6090 = vrot.lane.b32.xlu1 %v7164_v52, %s6884_s24  ;;  %v5808_v52 = vunpack.i.h.bf16 %v7472_v58 }
 0x166   : > { %6085 = vrot.lane.b32.xlu0 %v7171_v55, %s6884_s24  ;;  %6080 = vrot.lane.b32.xlu2 %v7369_v54, %s6883_s23  ;;  %v5807_v55 = vunpack.i.l.bf16 %v7472_v58  ;;  %v1263_v54 = vld [vmem:[#allocation3 + $0x18] sm:$0xff] }
 0x167   : > { %1739 = vmatpush.msra.mxu3 %v5813_v43  ;;  %v5881_v10 = vpop.permute.xlu1 %5880  ;;  %v1299_v43 = vld [vmem:[#allocation3 + $0x138] sm:$0xff] }
 0x168   : > { %v7538_v22 = vpop.permute.xlu2 %5915  ;;  %v5876_v17 = vpop.permute.xlu0 %5875  ;;  %v5883_v24 = vunpack.i.h.bf16 %v5881_v10  ;;  %v5882_v25 = vunpack.i.l.bf16 %v5881_v10 }
 0x169   : > { %1740 = vmatpush.msra.mxu3 %v5812_v16  ;;  %v5878_v18 = vunpack.i.h.bf16 %v5876_v17  ;;  %v5877_v58 = vunpack.i.l.bf16 %v5876_v17  ;;  %v1346_v16 = vld [vmem:[#allocation3 + $0x2b0] sm:$0xff]  ;;  %v5917_v51 = vunpack.i.l.bf16 %v7538_v22 }
 0x16a   : > { %1687 = vmatmul.f32.gmra.mxu2 %v1298_v12  ;;  %1792 = vmatpush.msrb.mxu0 %v5883_v24 }
 0x16b   : > { %1741 = vmatpush.msra.mxu3 %v5808_v52  ;;  %1652 = vmatmul.f32.gmra.mxu1 %v1417_v26 }
 0x16c   : > { %1793 = vmatpush.msrb.mxu0 %v5882_v25  ;;  %v1358_v25 = vld [vmem:[#allocation3 + $0x310] sm:$0xff] }
 0x16d   : > { %1742 = vmatpush.msra.mxu3 %v5807_v55  ;;  %6105 = vrot.lane.b32.xlu1 %v7211_v6, %s6884_s24  ;;  %v5873_v6 = vunpack.i.h.bf16 %v7498_v27 }
 0x16e   : > { %6100 = vrot.lane.b32.xlu0 %v7192_v62, %s6884_s24  ;;  %6095 = vrot.lane.b32.xlu2 %v7130_v38, %s6884_s24  ;;  %v5872_v38 = vunpack.i.l.bf16 %v7498_v27  ;;  %v1429_v62 = vld [vmem:[#allocation3 + $0x548] sm:$0xff]  ;;  %v5867_v27 = vunpack.i.l.bf16 %v7521_v2 }
 0x16f   : > { %1743 = vmatmul.f32.vlgmr.msra.gmra.mxu3 %v1263_v54  ;;  %1794 = vmatpush.msrb.mxu0 %v5878_v18  ;;  %v7548_v9 = vpop.permute.xlu1 %5895  ;;  %v1276_v54 = vld [vmem:[#allocation3 + $0x80] sm:$0xff] }
 0x170   : > { %v7550_v31 = vpop.permute.xlu2 %5930  ;;  %v7552_v32 = vpop.permute.xlu0 %5890 }
 0x171   : > { %1795 = vmatpush.msrb.mxu0 %v5877_v58 }
 0x172   : > { %1690 = vmatmul.f32.gmra.mxu2 %v1310_v30  ;;  %v1323_v30 = vld [vmem:[#allocation3 + $0x1f8] sm:$0xff] }
 0x173   : > { %1796 = vmatpush.msrb.mxu0 %v5873_v6  ;;  %1655 = vmatmul.f32.gmra.mxu1 %v1429_v62  ;;  %v475_v6 = vld [vmem:[%s10411_s9 + $0x8] sm:$0xff] }
 0x175   : > { %1797 = vmatpush.msrb.mxu0 %v5872_v38  ;;  %6120 = vrot.lane.b32.xlu1 %v7249_v20, %s6884_s24  ;;  %v5863_v20 = vunpack.i.h.bf16 %v7526_v11  ;;  %v5898_v38 = vunpack.i.h.bf16 %v7548_v9 }
 0x176   : > { %6115 = vrot.lane.b32.xlu0 %v7228_v13, %s6884_s24  ;;  %6110 = vrot.lane.b32.xlu2 %v7207_v3, %s6884_s24  ;;  %v5862_v13 = vunpack.i.l.bf16 %v7526_v11  ;;  %v1287_v3 = vld [vmem:[#allocation3 + $0xd8] sm:$0xff] }
 0x177   : > { %1746 = vmatmul.f32.gmra.mxu3 %v1275_v40  ;;  %1798 = vmatpush.msrb.mxu0 %v5868_v36  ;;  %v7563_v44 = vpop.permute.xlu1 %5910 }
 0x178   : > { %v7566_v61 = vpop.permute.xlu2 %5945  ;;  %v7568_v0 = vpop.permute.xlu0 %5905  ;;  %v5913_v53 = vunpack.i.h.bf16 %v7563_v44  ;;  %v5912_v17 = vunpack.i.l.bf16 %v7563_v44 }
 0x179   : > { %1799 = vmatpush.msrb.mxu0 %v5867_v27  ;;  %v5907_v58 = vunpack.i.l.bf16 %v7568_v0  ;;  %v1370_v27 = vld [vmem:[#allocation3 + $0x370] sm:$0xff] }
 0x17a   : > { %1693 = vmatmul.f32.gmra.mxu2 %v1322_v60  ;;  %v5897_v60 = vunpack.i.l.bf16 %v7548_v9  ;;  %v481_v9 = vld [vmem:[%s10411_s9 + $0x38] sm:$0xff] }
 0x17b   : > { %1800 = vmatpush.msrb.mxu0 %v5863_v20  ;;  %1658 = vmatmul.f32.gmra.mxu1 %v1441_v1  ;;  %v5948_v20 = vunpack.i.h.bf16 %v7566_v61  ;;  %v479_v1 = vld [vmem:[%s10411_s9 + $0x28] sm:$0xff] }
 0x17d   : > { %1801 = vmatpush.msrb.mxu0 %v5862_v13  ;;  %6135 = vrot.lane.b32.xlu1 %v7299_v37, %s6884_s24  ;;  %v5853_v37 = vunpack.i.h.bf16 %v7506_v4  ;;  %v5893_v13 = vunpack.i.h.bf16 %v7552_v32 }
 0x17e   : > { %6130 = vrot.lane.b32.xlu0 %v7273_v28, %s6884_s24  ;;  %6125 = vrot.lane.b32.xlu2 %v7246_v19, %s6884_s24  ;;  %v5852_v28 = vunpack.i.l.bf16 %v7506_v4  ;;  %v5918_v4 = vunpack.i.h.bf16 %v7538_v22  ;;  %v5908_v22 = vunpack.i.h.bf16 %v7568_v0  ;;  %v1288_v0 = vld [vmem:[#allocation3 + $0xe0] sm:$0xff] }
 0x17f   : > { %1749 = vmatmul.f32.gmra.mxu3 %v1287_v3  ;;  %1802 = vmatpush.msrb.mxu0 %v5858_v63  ;;  %v7579_v2 = vpop.permute.xlu1 %5925  ;;  %v7611_v24 = vpop.f32.mrf.mxu1  ;;  %v5947_v3 = vunpack.i.l.bf16 %v7566_v61  ;;  %v5892_v63 = vunpack.i.l.bf16 %v7552_v32  ;;  %v5888_v61 = vunpack.i.h.bf16 %v7508_v57 }
 0x180   : > { %v5961_v11 = vpop.permute.xlu2 %5960  ;;  %v5921_v48 = vpop.permute.xlu0 %5920 }
 0x181   : > { %1803 = vmatpush.msrb.mxu0 %v5857_v5  ;;  %v5923_v14 = vunpack.i.h.bf16 %v5921_v48  ;;  %v5963_v15 = vunpack.i.h.bf16 %v5961_v11  ;;  %v5922_v19 = vunpack.i.l.bf16 %v5921_v48  ;;  %v5962_v49 = vunpack.i.l.bf16 %v5961_v11  ;;  %v1335_v5 = vld [vmem:[#allocation3 + $0x258] sm:$0xff]  ;;  %v478_v11 = vld [vmem:[%s10411_s9 + $0x20] sm:$0xff] }
 0x182   : > { %1696 = vmatmul.f32.gmra.mxu2 %v1334_v34 }
 0x183   : > { %1804 = vmatpush.msrb.mxu0 %v5853_v37  ;;  %1857 = vmatpush.msrb.mxu1 %v5923_v14 }
 0x184   : > { %1922 = vmatpush.msrb.mxu2 %v5963_v15 }
 0x185   : > { %1805 = vmatpush.msrb.mxu0 %v5852_v28  ;;  %1858 = vmatpush.msrb.mxu1 %v5922_v19  ;;  %v1382_v28 = vld [vmem:[#allocation3 + $0x3d0] sm:$0xff]  ;;  %v5887_v19 = vunpack.i.l.bf16 %v7508_v57  ;;  %v1347_v57 = vld [vmem:[#allocation3 + $0x2b8] sm:$0xff] }
 0x186   : > { %1923 = vmatpush.msrb.mxu2 %v5962_v49  ;;  %6150 = vrot.lane.b32.xlu1 %v6149_v47, %s6884_s24  ;;  %v1264_v47 = vld [vmem:[#allocation3 + $0x20] sm:$0xff] }
 0x187   : > { %6145 = vrot.lane.b32.xlu0 %v6144_v56, %s6884_s24  ;;  %6140 = vrot.lane.b32.xlu2 %v7291_v33, %s6884_s24  ;;  %v7596_v10 = vpop.permute.xlu1 %5940  ;;  %v7604_v33 = vpop.f32.mrf.mxu0  ;;  %v474_v56 = vld [vmem:[%s10411_s9] sm:$0xff] }
 0x188   : > { %1752 = vmatmul.f32.gmra.mxu3 %v1299_v43  ;;  %1806 = vmatpush.msrb.mxu0 %v5848_v8  ;;  %v7598_v12 = vpop.permute.xlu2 %5975  ;;  %v7600_v29 = vpop.permute.xlu0 %5935  ;;  %v5943_v34 = vunpack.i.h.bf16 %v7596_v10  ;;  %v5942_v15 = vunpack.i.l.bf16 %v7596_v10  ;;  %v1300_v49 = vld [vmem:[#allocation3 + $0x140] sm:$0xff]  ;;  %v1265_v43 = vld [vmem:[#allocation3 + $0x28] sm:$0xff] }
 0x189   : > { %1859 = vmatpush.msrb.mxu1 %v5918_v4  ;;  %v7641_v40 = vpop.f32.mrf.mxu1  ;;  %v5938_v4 = vunpack.i.h.bf16 %v7600_v29  ;;  %v5937_v10 = vunpack.i.l.bf16 %v7600_v29  ;;  %v5932_v29 = vunpack.i.l.bf16 %v7550_v31 }
 0x18a   : > { %1807 = vmatpush.msrb.mxu0 %v5847_v45  ;;  %1699 = vmatmul.f32.gmra.mxu2 %v1346_v16  ;;  %v482_v16 = vld [vmem:[%s10411_s9 + $0x40] sm:$0xff]  ;;  %v480_v45 = vld [vmem:[%s10411_s9 + $0x30] sm:$0xff] }
 0x18b   : > { %1860 = vmatpush.msrb.mxu1 %v5917_v51  ;;  %1808 = vmatmul.f32.vlgmr.msrb.gmra.mxu0 %v1264_v47  ;;  %v5933_v47 = vunpack.i.h.bf16 %v7550_v31  ;;  %v5927_v31 = vunpack.i.l.bf16 %v7579_v2 }
 0x18d   : > { %1861 = vmatpush.msrb.mxu1 %v5913_v53 }
 0x18e   : > { %1454 = vperm.xlu1 %6164, %v474_v56  }
 0x18f   : > { %1862 = vmatpush.msrb.mxu1 %v5912_v17  ;;  %6160 = vrot.lane.b32.xlu0 %v6159_v35, %s6884_s24  ;;  %v5956_v52 = vpop.permute.xlu1 %5955  ;;  %v476_v35 = vld [vmem:[%s10411_s9 + $0x10] sm:$0xff]  ;;  %v7632_v46 = vpop.f32.mrf.mxu0 }
 0x190   : > { %6155 = vrot.lane.b32.xlu2 %v6154_v50, %s6884_s24  ;;  %1755 = vmatmul.f32.gmra.mxu3 %v1311_v59  ;;  %v7622_v55 = vpop.permute.xlu2 %5990  ;;  %v5951_v26 = vpop.permute.xlu0 %5950  ;;  %v5958_v18 = vunpack.i.h.bf16 %v5956_v52  ;;  %v5957_v23 = vunpack.i.l.bf16 %v5956_v52  ;;  %v5902_v50 = vunpack.i.l.bf16 %v7524_v7  ;;  %v1312_v52 = vld [vmem:[#allocation3 + $0x1a0] sm:$0xff]  ;;  %s10034_s24 = scalar_lea.vmem %s10406_s4, %s6978_s30 }
 0x191   : > { %1863 = vmatpush.msrb.mxu1 %v5908_v22  ;;  %v5953_v39 = vunpack.i.h.bf16 %v5951_v26  ;;  %v5952_v44 = vunpack.i.l.bf16 %v5951_v26  ;;  %v7673_v8 = vpop.f32.mrf.mxu1  ;;  %v1394_v22 = vld [vmem:[#allocation3 + $0x430] sm:$0xff]  ;;  %v5928_v26 = vunpack.i.h.bf16 %v7579_v2  ;;  %v5993_v2 = vunpack.i.h.bf16 %v7622_v55 }
 0x192   : > { %1702 = vmatmul.f32.gmra.mxu2 %v1358_v25  ;;  %v1277_v25 = vld [vmem:[#allocation3 + $0x88] sm:$0xff] }
 0x193   : > { %1864 = vmatpush.msrb.mxu1 %v5907_v58  ;;  %1811 = vmatmul.f32.gmra.mxu0 %v1276_v54 }
 0x194   : > { %1924 = vmatpush.msrb.mxu2 %v5958_v18  ;;  %v484_v18 = vld [vmem:[%s10411_s9 + $0x50] sm:$0xff] }
 0x195   : > { %1865 = vmatpush.msrb.mxu1 %v5903_v41  ;;  %v1359_v41 = vld [vmem:[#allocation3 + $0x318] sm:$0xff] }
 0x196   : > { %1925 = vmatpush.msrb.mxu2 %v5957_v23  ;;  %1469 = vperm.xlu1 %6164, %v477_v42  }
 0x197   : > { %1866 = vmatpush.msrb.mxu1 %v5902_v50  ;;  %1464 = vperm.xlu0 %6166, %v476_v35   ;;  %v7639_v62 = vpop.permute.xlu1 %5970  ;;  %v7662_v48 = vpop.f32.mrf.mxu0 }
 0x198   : > { %1758 = vmatmul.f32.gmra.mxu3 %v1323_v30  ;;  %1926 = vmatpush.msrb.mxu2 %v5953_v39  ;;  %v7643_v36 = vpop.permute.xlu2 %6005  ;;  %v7645_v7 = vpop.permute.xlu0 %5965  ;;  %v1406_v39 = vld [vmem:[#allocation3 + $0x490] sm:$0xff] }
 0x199   : > { %1867 = vmatpush.msrb.mxu1 %v5898_v38  ;;  %1459 = vperm.xlu2 %6165, %v475_v6   ;;  %v7690_v54 = vpop.f32.mrf.mxu1  ;;  %v1324_v6 = vld [vmem:[#allocation3 + $0x200] sm:$0xff]  ;;  %v1289_v38 = vld [vmem:[#allocation3 + $0xe8] sm:$0xff] }
 0x19a   : > { %1927 = vmatpush.msrb.mxu2 %v5952_v44 }
 0x19b   : > { %1868 = vmatpush.msrb.mxu1 %v5897_v60  ;;  %1705 = vmatmul.f32.gmra.mxu2 %v1370_v27  ;;  %v485_v27 = vld [vmem:[%s10411_s9 + $0x58] sm:$0xff]  ;;  %v5992_v60 = vunpack.i.l.bf16 %v7622_v55  ;;  %v1301_v55 = vld [vmem:[#allocation3 + $0x148] sm:$0xff] }
 0x19c   : > { %1814 = vmatmul.f32.gmra.mxu0 %v1288_v0  ;;  %1928 = vmatpush.msrb.mxu2 %v5948_v20  ;;  %v1371_v0 = vld [vmem:[#allocation3 + $0x378] sm:$0xff] }
 0x19d   : > { %1869 = vmatpush.msrb.mxu1 %v5893_v13 }
 0x19e   : > { %1929 = vmatpush.msrb.mxu2 %v5947_v3  ;;  %1479 = vperm.xlu1 %6164, %v479_v1  }
 0x19f   : > { %1870 = vmatpush.msrb.mxu1 %v5892_v63  ;;  %v7665_v37 = vpop.permute.xlu1 %5985  ;;  %1489 = vperm.xlu0 %6166, %v481_v9   ;;  %v7686_v59 = vpop.f32.mrf.mxu0 }
 0x1a0   : > { %1761 = vmatmul.f32.gmra.mxu3 %v1335_v5  ;;  %1930 = vmatpush.msrb.mxu2 %v5943_v34  ;;  %v7667_v32 = vpop.permute.xlu2 %6020  ;;  %v7669_v14 = vpop.permute.xlu0 %5980  ;;  %v5988_v13 = vunpack.i.h.bf16 %v7665_v37  ;;  %v5987_v63 = vunpack.i.l.bf16 %v7665_v37  ;;  %v1418_v5 = vld [vmem:[#allocation3 + $0x4f0] sm:$0xff]  ;;  %v1336_v34 = vld [vmem:[#allocation3 + $0x260] sm:$0xff]  ;;  %v5978_v37 = vunpack.i.h.bf16 %v7598_v12 }
 0x1a1   : > { %1871 = vmatpush.msrb.mxu1 %v5888_v61  ;;  %1474 = vperm.xlu2 %6165, %v478_v11   ;;  %v7709_v20 = vpop.f32.mrf.mxu1  ;;  %v5983_v11 = vunpack.i.h.bf16 %v7669_v14  ;;  %v483_v61 = vld [vmem:[%s10411_s9 + $0x48] sm:$0xff] }
 0x1a2   : > { %1931 = vmatpush.msrb.mxu2 %v5942_v15 }
 0x1a3   : > { %1872 = vmatpush.msrb.mxu1 %v5887_v19  ;;  %1708 = vmatmul.f32.gmra.mxu2 %v1382_v28  ;;  %v5982_v28 = vunpack.i.l.bf16 %v7669_v14  ;;  %v1383_v19 = vld [vmem:[#allocation3 + $0x3d8] sm:$0xff]  ;;  %v1313_v14 = vld [vmem:[#allocation3 + $0x1a8] sm:$0xff] }
 0x1a4   : > { %1817 = vmatmul.f32.gmra.mxu0 %v1300_v49  ;;  %1873 = vmatmul.f32.vlgmr.msrb.gmra.mxu1 %v1265_v43 }
 0x1a5   : > { %1932 = vmatpush.msrb.mxu2 %v5938_v4 }
 0x1a6   : > { %1494 = vperm.xlu1 %6164, %v482_v16  }
 0x1a7   : > { %1933 = vmatpush.msrb.mxu2 %v5937_v10  ;;  %v6001_v51 = vpop.permute.xlu1 %6000  ;;  %1504 = vperm.xlu0 %6166, %v484_v18   ;;  %v7702_v44 = vpop.f32.mrf.mxu0  ;;  %v5968_v18 = vunpack.i.h.bf16 %v7645_v7 }
 0x1a8   : > { %1764 = vmatmul.f32.gmra.mxu3 %v1347_v57  ;;  %v7684_v53 = vpop.permute.xlu2 %6035  ;;  %v5996_v56 = vpop.permute.xlu0 %5995  ;;  %v6003_v17 = vunpack.i.h.bf16 %v6001_v51  ;;  %v6002_v58 = vunpack.i.l.bf16 %v6001_v51  ;;  %v5977_v57 = vunpack.i.l.bf16 %v7598_v12  ;;  %v1395_v12 = vld [vmem:[#allocation3 + $0x438] sm:$0xff] }
 0x1a9   : > { %1934 = vmatpush.msrb.mxu2 %v5933_v47  ;;  %1484 = vperm.xlu2 %6165, %v480_v45   ;;  %v5998_v42 = vunpack.i.h.bf16 %v5996_v56  ;;  %v5997_v30 = vunpack.i.l.bf16 %v5996_v56  ;;  %v7729_v43 = vpop.f32.mrf.mxu1  ;;  %v1430_v45 = vld [vmem:[#allocation3 + $0x550] sm:$0xff]  ;;  %v1348_v47 = vld [vmem:[#allocation3 + $0x2c0] sm:$0xff]  ;;  %v5973_v56 = vunpack.i.h.bf16 %v7639_v62 }
 0x1aa   : > { %1987 = vmatpush.msrb.mxu3 %v6003_v17 }
 0x1ab   : > { %1935 = vmatpush.msrb.mxu2 %v5932_v29  ;;  %v487_v29 = vld [vmem:[%s10411_s9 + $0x68] sm:$0xff] }
 0x1ac   : > { %1711 = vmatmul.f32.gmra.mxu2 %v1394_v22  ;;  %1820 = vmatmul.f32.gmra.mxu0 %v1312_v52  ;;  %v5972_v22 = vunpack.i.l.bf16 %v7639_v62  ;;  %v6037_v62 = vunpack.i.l.bf16 %v7684_v53 }
 0x1ad   : > { %1876 = vmatmul.f32.gmra.mxu1 %v1277_v25  ;;  %1936 = vmatpush.msrb.mxu2 %v5928_v26  ;;  %v6038_v25 = vunpack.i.h.bf16 %v7684_v53 }
 0x1ae   : > { %1988 = vmatpush.msrb.mxu3 %v6002_v58  ;;  %1509 = vperm.xlu1 %6164, %v485_v27   ;;  %v488_v27 = vld [vmem:[%s10411_s9 + $0x70] sm:$0xff] }
 0x1af   : > { %1937 = vmatpush.msrb.mxu2 %v5927_v31  ;;  %v7696_v23 = vpop.permute.xlu1 %6015  ;;  %v7723_v15 = vpop.f32.mrf.mxu0  ;;  %1519 = vperm.xlu0 %6166, %v487_v29   ;;  %v1278_v29 = vld [vmem:[#allocation3 + $0x90] sm:$0xff] }
 0x1b0   : > { %1767 = vmatmul.f32.gmra.mxu3 %v1359_v41  ;;  %v7698_v35 = vpop.permute.xlu2 %6050  ;;  %v7700_v50 = vpop.permute.xlu0 %6010 }
 0x1b1   : > { %1989 = vmatpush.msrb.mxu3 %v5998_v42  ;;  %1499 = vperm.xlu2 %6165, %v483_v61   ;;  %v5967_v42 = vunpack.i.l.bf16 %v7645_v7  ;;  %v1407_v7 = vld [vmem:[#allocation3 + $0x498] sm:$0xff] }
 0x1b3   : > { %1990 = vmatpush.msrb.mxu3 %v5997_v30  ;;  %v1442_v30 = vld [vmem:[#allocation3 + $0x5b0] sm:$0xff] }
 0x1b4   : > { %1714 = vmatmul.f32.gmra.mxu2 %v1406_v39  ;;  %1823 = vmatmul.f32.gmra.mxu0 %v1324_v6  ;;  %v1360_v39 = vld [vmem:[#allocation3 + $0x320] sm:$0xff]  ;;  %v1325_v6 = vld [vmem:[#allocation3 + $0x208] sm:$0xff] }
 0x1b5   : > { %1879 = vmatmul.f32.gmra.mxu1 %v1289_v38  ;;  %1991 = vmatpush.msrb.mxu3 %v5993_v2  ;;  %v7749_v38 = vpop.f32.mrf.mxu1 }
 0x1b6   : > { %1524 = vperm.xlu1 %6164, %v488_v27   ;;  %v6007_v27 = vunpack.i.l.bf16 %v7643_v36 }
 0x1b7   : > { %1992 = vmatpush.msrb.mxu3 %v5992_v60  ;;  %v7712_v1 = vpop.permute.xlu1 %6030  ;;  %v7738_v26 = vpop.f32.mrf.mxu0 }
 0x1b8   : > { %1770 = vmatmul.f32.gmra.mxu3 %v1371_v0  ;;  %v7714_v3 = vpop.permute.xlu2 %6065  ;;  %v7716_v9 = vpop.permute.xlu0 %6025  ;;  %v6033_v2 = vunpack.i.h.bf16 %v7712_v1  ;;  %v6032_v53 = vunpack.i.l.bf16 %v7712_v1  ;;  %v1337_v1 = vld [vmem:[#allocation3 + $0x268] sm:$0xff] }
 0x1b9   : > { %1993 = vmatpush.msrb.mxu3 %v5988_v13  ;;  %v6028_v60 = vunpack.i.h.bf16 %v7716_v9 }
 0x1bb   : > { %1994 = vmatpush.msrb.mxu3 %v5987_v63 }
 0x1bc   : > { %1717 = vmatmul.f32.gmra.mxu2 %v1418_v5  ;;  %1826 = vmatmul.f32.gmra.mxu0 %v1336_v34  ;;  %v6027_v34 = vunpack.i.l.bf16 %v7716_v9  ;;  %v6022_v9 = vunpack.i.l.bf16 %v7667_v32 }
 0x1bd   : > { %1882 = vmatmul.f32.gmra.mxu1 %v1301_v55  ;;  %1995 = vmatpush.msrb.mxu3 %v5983_v11  ;;  %v1372_v55 = vld [vmem:[#allocation3 + $0x380] sm:$0xff]  ;;  %v1266_v11 = vld [vmem:[#allocation3 + $0x30] sm:$0xff] }
 0x1bf   : > { %1996 = vmatpush.msrb.mxu3 %v5982_v28  ;;  %v7727_v49 = vpop.permute.xlu1 %6045  ;;  %v7760_v61 = vpop.f32.mrf.mxu0  ;;  %v6023_v28 = vunpack.i.h.bf16 %v7667_v32 }
 0x1c0   : > { %1773 = vmatmul.f32.gmra.mxu3 %v1383_v19  ;;  %v6081_v4 = vpop.permute.xlu2 %6080  ;;  %v6041_v16 = vpop.permute.xlu0 %6040  ;;  %v7766_v19 = vld [vmem:[%s10411_s9 + $0x60] sm:$0xff] }
 0x1c1   : > { %1997 = vmatpush.msrb.mxu3 %v5978_v37  ;;  %v6043_v10 = vunpack.i.h.bf16 %v6041_v16  ;;  %v6083_v51 = vunpack.i.h.bf16 %v6081_v4  ;;  %v6042_v17 = vunpack.i.l.bf16 %v6041_v16  ;;  %v6082_v52 = vunpack.i.l.bf16 %v6081_v4  ;;  %v7768_v4 = vpop.f32.mrf.mxu1  ;;  %1514 = vperm.xlu2 %6165, %v7766_v19  }
 0x1c3   : > { %1998 = vmatpush.msrb.mxu3 %v5977_v57  ;;  %2052 = vmatpush.msra.mxu0 %v6043_v10  ;;  %v1419_v10 = vld [vmem:[#allocation3 + $0x4f8] sm:$0xff] }
 0x1c4   : > { %1720 = vmatmul.f32.gmra.mxu2 %v1430_v45  ;;  %1829 = vmatmul.f32.gmra.mxu0 %v1348_v47  ;;  %v6018_v45 = vunpack.i.h.bf16 %v7696_v23 }
 0x1c5   : > { %1885 = vmatmul.f32.gmra.mxu1 %v1313_v14  ;;  %1999 = vmatpush.msrb.mxu3 %v5973_v56  ;;  %v6017_v56 = vunpack.i.l.bf16 %v7696_v23  ;;  %v1431_v23 = vld [vmem:[#allocation3 + $0x558] sm:$0xff] }
 0x1c6   : > { %2117 = vmatpush.msra.mxu1 %v6083_v51  ;;  %2053 = vmatpush.msra.mxu0 %v6042_v17  ;;  %v1384_v17 = vld [vmem:[#allocation3 + $0x3e0] sm:$0xff] }
 0x1c7   : > { %2000 = vmatpush.msrb.mxu3 %v5972_v22  ;;  %v7741_v58 = vpop.permute.xlu1 %6060  ;;  %v1349_v22 = vld [vmem:[#allocation3 + $0x2c8] sm:$0xff] }
 0x1c8   : > { %2118 = vmatpush.msra.mxu1 %v6082_v52  ;;  %1776 = vmatmul.f32.gmra.mxu3 %v1395_v12  ;;  %v7743_v31 = vpop.permute.xlu2 %6095  ;;  %v7745_v41 = vpop.permute.xlu0 %6055  ;;  %v6013_v12 = vunpack.i.h.bf16 %v7700_v50  ;;  %v6068_v52 = vunpack.i.h.bf16 %v7714_v3 }
 0x1c9   : > { %2001 = vmatpush.msrb.mxu3 %v5968_v18  ;;  %2054 = vmatpush.msra.mxu0 %v6038_v25  ;;  %v7784_v25 = vpop.f32.mrf.mxu0  ;;  %v6012_v18 = vunpack.i.l.bf16 %v7700_v50 }
 0x1cb   : > { %2002 = vmatpush.msrb.mxu3 %v5967_v42  ;;  %2055 = vmatpush.msra.mxu0 %v6037_v62  ;;  %v6067_v42 = vunpack.i.l.bf16 %v7714_v3  ;;  %v1396_v3 = vld [vmem:[#allocation3 + $0x440] sm:$0xff] }
 0x1cc   : > { %1723 = vmatmul.f32.gmra.mxu2 %v1442_v30  ;;  %1832 = vmatmul.f32.gmra.mxu0 %v1360_v39  ;;  %v7790_v30 = vpop.f32.mrf.mxu1  ;;  %v6008_v39 = vunpack.i.h.bf16 %v7643_v36  ;;  %v6057_v36 = vunpack.i.l.bf16 %v7745_v41 }
 0x1cd   : > { %1888 = vmatmul.f32.gmra.mxu1 %v1325_v6  ;;  %2056 = vmatpush.msra.mxu0 %v6033_v2  ;;  %v6063_v2 = vunpack.i.h.bf16 %v7741_v58 }
 0x1cf   : > { %2057 = vmatpush.msra.mxu0 %v6032_v53  ;;  %v6076_v0 = vpop.permute.xlu1 %6075 }
 0x1d0   : > { %1779 = vmatmul.f32.gmra.mxu3 %v1407_v7  ;;  %v6078_v13 = vunpack.i.h.bf16 %v6076_v0  ;;  %v7757_v63 = vpop.permute.xlu2 %6110  ;;  %v6071_v5 = vpop.permute.xlu0 %6070  ;;  %v6077_v37 = vunpack.i.l.bf16 %v6076_v0  ;;  %v6062_v7 = vunpack.i.l.bf16 %v7741_v58  ;;  %v1290_v0 = vld [vmem:[#allocation3 + $0xf0] sm:$0xff]  ;;  %v6053_v58 = vunpack.i.h.bf16 %v7698_v35 }
 0x1d1   : > { %2058 = vmatpush.msra.mxu0 %v6028_v60  ;;  %v6073_v57 = vunpack.i.h.bf16 %v6071_v5  ;;  %v6072_v51 = vunpack.i.l.bf16 %v6071_v5  ;;  %v1361_v60 = vld [vmem:[#allocation3 + $0x328] sm:$0xff] }
 0x1d2   : > { %2119 = vmatpush.msra.mxu1 %v6078_v13  ;;  %v6058_v13 = vunpack.i.h.bf16 %v7745_v41 }
 0x1d3   : > { %2059 = vmatpush.msra.mxu0 %v6027_v34  ;;  %v1443_v34 = vld [vmem:[#allocation3 + $0x5b8] sm:$0xff] }
 0x1d4   : > { %1835 = vmatmul.f32.gmra.mxu0 %v1372_v55  ;;  %1938 = vmatmul.f32.vlgmr.msrb.gmra.mxu2 %v1266_v11  ;;  %v7806_v55 = vpop.f32.mrf.mxu0 }
 0x1d5   : > { %1891 = vmatmul.f32.gmra.mxu1 %v1337_v1  ;;  %2060 = vmatpush.msra.mxu0 %v6023_v28  ;;  %v7771_v16 = vpop.f32.mrf.mxu2  ;;  %v7809_v1 = vpop.f32.mrf.mxu1 }
 0x1d6   : > { %2120 = vmatpush.msra.mxu1 %v6077_v37 }
 0x1d7   : > { %2061 = vmatpush.msra.mxu0 %v6022_v9  ;;  %v7775_v47 = vpop.permute.xlu1 %6090  ;;  %v1408_v9 = vld [vmem:[#allocation3 + $0x4a0] sm:$0xff] }
 0x1d8   : > { %1782 = vmatmul.f32.gmra.mxu3 %v1419_v10  ;;  %2121 = vmatpush.msra.mxu1 %v6073_v57  ;;  %v7777_v14 = vpop.permute.xlu2 %6125  ;;  %v7779_v32 = vpop.permute.xlu0 %6085  ;;  %v6052_v10 = vunpack.i.l.bf16 %v7698_v35  ;;  %v1373_v57 = vld [vmem:[#allocation3 + $0x388] sm:$0xff]  ;;  %v1267_v35 = vld [vmem:[#allocation3 + $0x38] sm:$0xff] }
 0x1d9   : > { %2062 = vmatpush.msra.mxu0 %v6018_v45  ;;  %v1302_v45 = vld [vmem:[#allocation3 + $0x150] sm:$0xff] }
 0x1da   : > { %2122 = vmatpush.msra.mxu1 %v6072_v51  ;;  %v6048_v51 = vunpack.i.h.bf16 %v7727_v49 }
 0x1db   : > { %2063 = vmatpush.msra.mxu0 %v6017_v56 }
 0x1dc   : > { %1838 = vmatmul.f32.gmra.mxu0 %v1384_v17  ;;  %1941 = vmatmul.f32.gmra.mxu2 %v1278_v29  ;;  %v7818_v17 = vld [vmem:[%s10411_s9 + $0x78] sm:$0xff] }
 0x1dd   : > { %1894 = vmatmul.f32.gmra.mxu1 %v1349_v22  ;;  %2064 = vmatpush.msra.mxu0 %v6013_v12  ;;  %v7787_v62 = vpop.f32.mrf.mxu2  ;;  %v6047_v22 = vunpack.i.l.bf16 %v7727_v49  ;;  %v1385_v49 = vld [vmem:[#allocation3 + $0x3e8] sm:$0xff] }
 0x1de   : > { %2123 = vmatpush.msra.mxu1 %v6068_v52  ;;  %1529 = vperm.xlu2 %6165, %v7818_v17  }
 0x1df   : > { %2065 = vmatpush.msra.mxu0 %v6012_v18  ;;  %v7793_v6 = vpop.permute.xlu1 %6105  ;;  %v7826_v18 = vpop.f32.mrf.mxu0 }
 0x1e0   : > { %2124 = vmatpush.msra.mxu1 %v6067_v42  ;;  %1785 = vmatmul.f32.gmra.mxu3 %v1431_v23  ;;  %v7796_v50 = vpop.permute.xlu0 %6100 }
 0x1e1   : > { %2066 = vmatpush.msra.mxu0 %v6008_v39  ;;  %v7799_v53 = vpop.permute.xlu2 %6140  ;;  %v1420_v39 = vld [vmem:[#allocation3 + $0x500] sm:$0xff] }
 0x1e2   : > { %2125 = vmatpush.msra.mxu1 %v6063_v2  ;;  %v7830_v2 = vpop.f32.mrf.mxu1 }
 0x1e3   : > { %2067 = vmatpush.msra.mxu0 %v6007_v27 }
 0x1e4   : > { %2126 = vmatpush.msra.mxu1 %v6062_v7  ;;  %1841 = vmatmul.f32.gmra.mxu0 %v1396_v3  ;;  %v1314_v3 = vld [vmem:[#allocation3 + $0x1b0] sm:$0xff] }
 0x1e5   : > { %1897 = vmatmul.f32.gmra.mxu1 %v1361_v60  ;;  %1944 = vmatmul.f32.gmra.mxu2 %v1290_v0  ;;  %v7803_v5 = vpop.f32.mrf.mxu2  ;;  %v6113_v60 = vunpack.i.h.bf16 %v7757_v63 }
 0x1e6   : > { %2127 = vmatpush.msra.mxu1 %v6058_v13 }
 0x1e7   : > { %v6121_v11 = vpop.permute.xlu1 %6120 }
 0x1e8   : > { %2128 = vmatpush.msra.mxu1 %v6057_v36  ;;  %1788 = vmatmul.f32.gmra.mxu3 %v1443_v34  ;;  %v6123_v28 = vunpack.i.h.bf16 %v6121_v11  ;;  %v6116_v37 = vpop.permute.xlu0 %6115  ;;  %v6122_v56 = vunpack.i.l.bf16 %v6121_v11  ;;  %v1279_v34 = vld [vmem:[#allocation3 + $0x98] sm:$0xff]  ;;  %v6112_v36 = vunpack.i.l.bf16 %v7757_v63  ;;  %v1397_v63 = vld [vmem:[#allocation3 + $0x448] sm:$0xff] }
 0x1e9   : > { %v6118_v12 = vunpack.i.h.bf16 %v6116_v37  ;;  %v6117_v42 = vunpack.i.l.bf16 %v6116_v37 }
 0x1ea   : > { %2129 = vmatpush.msra.mxu1 %v6053_v58  ;;  %2182 = vmatpush.msra.mxu2 %v6123_v28  ;;  %v7812_v41 = vpop.permute.xlu2 %6155  ;;  %v6108_v58 = vunpack.i.h.bf16 %v7793_v6 }
 0x1ec   : > { %2130 = vmatpush.msra.mxu1 %v6052_v10  ;;  %1844 = vmatmul.f32.gmra.mxu0 %v1408_v9  ;;  %v1432_v10 = vld [vmem:[#allocation3 + $0x560] sm:$0xff] }
 0x1ed   : > { %1900 = vmatmul.f32.gmra.mxu1 %v1373_v57  ;;  %1947 = vmatmul.f32.gmra.mxu2 %v1302_v45  ;;  %v7820_v29 = vpop.f32.mrf.mxu2  ;;  %v6107_v57 = vunpack.i.l.bf16 %v7793_v6 }
 0x1ee   : > { %2131 = vmatpush.msra.mxu1 %v6048_v51  ;;  %2183 = vmatpush.msra.mxu2 %v6122_v56  ;;  %v1326_v56 = vld [vmem:[#allocation3 + $0x210] sm:$0xff] }
 0x1ef   : > { %v7823_v52 = vpop.permute.xlu1 %6135 }
 0x1f0   : > { %2132 = vmatpush.msra.mxu1 %v6047_v22  ;;  %2003 = vmatmul.f32.vlgmr.msrb.gmra.mxu3 %v1267_v35  ;;  %v7828_v23 = vpop.permute.xlu0 %6130  ;;  %v7848_v22 = vpop.f32.mrf.mxu1 }
 0x1f1   : > { %2184 = vmatpush.msra.mxu2 %v6118_v12  ;;  %v6102_v12 = vunpack.i.l.bf16 %v7796_v50 }
 0x1f2   : > { %v7832_v27 = vpop.f32.mrf.mxu3 }
 0x1f3   : > { %2185 = vmatpush.msra.mxu2 %v6117_v42  ;;  %v1460_v7 = vpop.permute.xlu2 %1459  ;;  %v1291_v42 = vld [vmem:[#allocation3 + $0xf8] sm:$0xff] }
 0x1f4   : > { %1847 = vmatmul.f32.gmra.mxu0 %v1420_v39  ;;  %v1553_v0 = vadd.f32 %v7632_v46, %v1460_v7  ;;  %v7842_v46 = vpop.f32.mrf.mxu0  ;;  %v6098_v39 = vunpack.i.h.bf16 %v7743_v31 }
 0x1f5   : > { %1903 = vmatmul.f32.gmra.mxu1 %v1385_v49  ;;  %1950 = vmatmul.f32.gmra.mxu2 %v1314_v3  ;;  %v7836_v13 = vpop.f32.mrf.mxu2 }
 0x1f6   : > { %2186 = vmatpush.msra.mxu2 %v6113_v60  ;;  %v1618_v11 = vadd.f32 %v7641_v40, %v1553_v0  ;;  %v6103_v40 = vunpack.i.h.bf16 %v7796_v50  ;;  %v6097_v0 = vunpack.i.l.bf16 %v7743_v31 }
 0x1f8   : > { %2187 = vmatpush.msra.mxu2 %v6112_v36  ;;  %2006 = vmatmul.f32.gmra.mxu3 %v1279_v34  ;;  %v6151_v28 = vpop.permute.xlu1 %6150  ;;  %v1683_v37 = vadd.f32 %v7787_v62, %v1618_v11  ;;  %v1444_v36 = vld [vmem:[#allocation3 + $0x5c0] sm:$0xff]  ;;  %v1409_v11 = vld [vmem:[#allocation3 + $0x4a8] sm:$0xff] }
 0x1f9   : > { %v6146_v9 = vpop.permute.xlu0 %6145  ;;  %v6152_v49 = vunpack.i.l.bf16 %v6151_v28  ;;  %v6153_v34 = vunpack.i.h.bf16 %v6151_v28 }
 0x1fa   : > { %2188 = vmatpush.msra.mxu2 %v6108_v58  ;;  %v6147_v45 = vunpack.i.l.bf16 %v6146_v9  ;;  %v1747_v51 = vpop.f32.mrf.mxu3  ;;  %v6148_v6 = vunpack.i.h.bf16 %v6146_v9 }
 0x1fb   : > { %v7845_v35 = vadd.f32 %v1747_v51, %v1683_v37  ;;  %v1338_v37 = vld [vmem:[#allocation3 + $0x270] sm:$0xff]  ;;  %v1475_v28 = vpop.permute.xlu2 %1474  ;;  %v7865_v51 = vpop.f32.mrf.mxu1 }
 0x1fc   : > { %2189 = vmatpush.msra.mxu2 %v6107_v57  ;;  %1850 = vmatmul.f32.gmra.mxu0 %v1432_v10  ;;  %v7857_v9 = vpop.f32.mrf.mxu0  ;;  %v6157_v10 = vunpack.i.l.bf16 %v7812_v41  ;;  %v6093_v57 = vunpack.i.h.bf16 %v7775_v47 }
 0x1fd   : > { %1906 = vmatmul.f32.gmra.mxu1 %v1397_v63  ;;  %1953 = vmatmul.f32.gmra.mxu2 %v1326_v56  ;;  %v7850_v62 = vpop.f32.mrf.mxu2  ;;  %v6092_v63 = vunpack.i.l.bf16 %v7775_v47 }
 0x1fe   : > { %2190 = vmatpush.msra.mxu2 %v6103_v40  ;;  %2247 = vmatpush.msra.mxu3 %v6147_v45  ;;  %v6158_v45 = vunpack.i.h.bf16 %v7812_v41 }
 0x200   : > { %2191 = vmatpush.msra.mxu2 %v6102_v12  ;;  %2248 = vmatpush.msra.mxu3 %v6148_v6  ;;  %v1455_v3 = vpop.permute.xlu1 %1454  ;;  %v1562_v6 = vadd.f32 %v7702_v44, %v1475_v28  ;;  %v1268_v44 = vld [vmem:[#allocation3 + $0x40] sm:$0xff] }
 0x201   : > { %2009 = vmatmul.f32.gmra.mxu3 %v1291_v42  ;;  %v6161_v7 = vpop.permute.xlu0 %6160  ;;  %v1550_v60 = vadd.f32 %v7604_v33, %v1455_v3 }
 0x202   : > { %2192 = vmatpush.msra.mxu2 %v6098_v39  ;;  %2249 = vmatpush.msra.mxu3 %v6152_v49  ;;  %v1750_v50 = vpop.f32.mrf.mxu3  ;;  %v6162_v40 = vunpack.i.l.bf16 %v6161_v7  ;;  %v6163_v39 = vunpack.i.h.bf16 %v6161_v7  ;;  %v1421_v49 = vld [vmem:[#allocation3 + $0x508] sm:$0xff] }
 0x203   : > { %v1615_v58 = vadd.f32 %v7611_v24, %v1550_v60  ;;  %v1303_v24 = vld [vmem:[#allocation3 + $0x158] sm:$0xff] }
 0x204   : > { %2193 = vmatpush.msra.mxu2 %v6097_v0  ;;  %2250 = vmatpush.msra.mxu3 %v6153_v34  ;;  %v1350_v0 = vld [vmem:[#allocation3 + $0x2d0] sm:$0xff] }
 0x205   : > { %1853 = vmatmul.f32.gmra.mxu0 %v1444_v36  ;;  %1909 = vmatmul.f32.gmra.mxu1 %v1409_v11  ;;  %v7861_v33 = vpop.f32.mrf.mxu2  ;;  %v1680_v31 = vadd.f32 %v7771_v16, %v1615_v58  ;;  %v6088_v16 = vunpack.i.h.bf16 %v7779_v32  ;;  %v1627_v36 = vadd.f32 %v7709_v20, %v1562_v6  ;;  %v7885_v11 = vpop.f32.mrf.mxu0  ;;  %v1315_v20 = vld [vmem:[#allocation3 + $0x1b8] sm:$0xff] }
 0x206   : > { %1956 = vmatmul.f32.gmra.mxu2 %v1338_v37  ;;  %2251 = vmatpush.msra.mxu3 %v6157_v10  ;;  %v7889_v58 = vpop.f32.mrf.mxu1 }
 0x207   : > { %2194 = vmatpush.msra.mxu2 %v6093_v57  ;;  %v7869_v56 = vadd.f32 %v7832_v27, %v1680_v31  ;;  %v6087_v27 = vunpack.i.l.bf16 %v7779_v32  ;;  %v6142_v32 = vunpack.i.l.bf16 %v7799_v53  ;;  %v6138_v57 = vunpack.i.h.bf16 %v7823_v52 }
 0x208   : > { %2252 = vmatpush.msra.mxu3 %v6158_v45  ;;  %v1470_v12 = vpop.permute.xlu1 %1469  ;;  %v6137_v31 = vunpack.i.l.bf16 %v7823_v52  ;;  %v1362_v45 = vld [vmem:[#allocation3 + $0x330] sm:$0xff]  ;;  %v1327_v52 = vld [vmem:[#allocation3 + $0x218] sm:$0xff] }
 0x209   : > { %2195 = vmatpush.msra.mxu2 %v6092_v63  ;;  %2012 = vmatmul.f32.gmra.mxu3 %v1303_v24  ;;  %v1465_v41 = vpop.permute.xlu0 %1464  ;;  %v1559_v42 = vadd.f32 %v7686_v59, %v1470_v12  ;;  %v6143_v59 = vunpack.i.h.bf16 %v7799_v53  ;;  %v1433_v53 = vld [vmem:[#allocation3 + $0x568] sm:$0xff]  ;;  %v1280_v24 = vld [vmem:[#allocation3 + $0xa0] sm:$0xff]  ;;  %v1485_v12 = vpop.permute.xlu2 %1484 }
 0x20a   : > { %2253 = vmatpush.msra.mxu3 %v6162_v40  ;;  %v1556_v47 = vadd.f32 %v7662_v48, %v1465_v41  ;;  %v6128_v41 = vunpack.i.h.bf16 %v7777_v14 }
 0x20b   : > { %2196 = vmatpush.msra.mxu2 %v6088_v16  ;;  %v1624_v3 = vadd.f32 %v7690_v54, %v1559_v42  ;;  %v1753_v60 = vpop.f32.mrf.mxu3  ;;  %v1568_v16 = vadd.f32 %v7738_v26, %v1485_v12  ;;  %v1363_v12 = vld [vmem:[#allocation3 + $0x338] sm:$0xff] }
 0x20c   : > { %v1621_v34 = vadd.f32 %v7673_v8, %v1556_v47  ;;  %2254 = vmatpush.msra.mxu3 %v6163_v39  ;;  %v1445_v39 = vld [vmem:[#allocation3 + $0x5c8] sm:$0xff]  ;;  %v6127_v47 = vunpack.i.l.bf16 %v7777_v14 }
 0x20d   : > { %v1689_v7 = vadd.f32 %v7820_v29, %v1624_v3  ;;  %2197 = vmatpush.msra.mxu2 %v6087_v27  ;;  %1912 = vmatmul.f32.gmra.mxu1 %v1421_v49  ;;  %v7881_v48 = vpop.f32.mrf.mxu2  ;;  %v1692_v29 = vadd.f32 %v7836_v13, %v1627_v36  ;;  %v1292_v27 = vld [vmem:[#allocation3 + $0x100] sm:$0xff]  ;;  %v1269_v14 = vld [vmem:[#allocation3 + $0x48] sm:$0xff] }
 0x20e   : > { %1959 = vmatmul.f32.gmra.mxu2 %v1350_v0  ;;  %2068 = vmatmul.f32.vlgmr.msra.gmra.mxu0 %v1268_v44  ;;  %v1686_v54 = vadd.f32 %v7803_v5, %v1621_v34  ;;  %v7909_v42 = vpop.f32.mrf.mxu1  ;;  %v1339_v0 = vld [vmem:[#allocation3 + $0x278] sm:$0xff] }
 0x20f   : > { %v7887_v8 = vadd.f32 %v1753_v60, %v1689_v7  ;;  %2255 = vmatpush.msra.mxu3 %v6143_v59  ;;  %v1386_v59 = vld [vmem:[#allocation3 + $0x3f0] sm:$0xff]  ;;  %v1304_v7 = vld [vmem:[#allocation3 + $0x160] sm:$0xff] }
 0x210   : > { %v1480_v37 = vpop.permute.xlu1 %1479  ;;  %v7892_v10 = vadd.f32 %v1750_v50, %v1686_v54  ;;  %v6133_v50 = vunpack.i.h.bf16 %v7828_v23 }
 0x211   : > { %2256 = vmatpush.msra.mxu3 %v6142_v32  ;;  %v1565_v5 = vadd.f32 %v7723_v15, %v1480_v37  ;;  %v6132_v15 = vunpack.i.l.bf16 %v7828_v23  ;;  %v1374_v23 = vld [vmem:[#allocation3 + $0x390] sm:$0xff]  ;;  %v1490_v26 = vpop.permute.xlu0 %1489  ;;  %v1351_v37 = vld [vmem:[#allocation3 + $0x2d8] sm:$0xff] }
 0x212   : > { %2015 = vmatmul.f32.gmra.mxu3 %v1315_v20  ;;  %v1571_v34 = vadd.f32 %v7760_v61, %v1490_v26  ;;  %v1305_v26 = vld [vmem:[#allocation3 + $0x168] sm:$0xff] }
 0x213   : > { %2257 = vmatpush.msra.mxu3 %v6138_v57  ;;  %v1756_v28 = vpop.f32.mrf.mxu3  ;;  %v1630_v13 = vadd.f32 %v7729_v43, %v1565_v5  ;;  %v7907_v43 = vpop.f32.mrf.mxu0  ;;  %v1281_v5 = vld [vmem:[#allocation3 + $0xa8] sm:$0xff] }
 0x214   : > { %v7897_v63 = vadd.f32 %v1756_v28, %v1692_v29  ;;  %v1636_v20 = vadd.f32 %v7768_v4, %v1571_v34  ;;  %v1316_v28 = vld [vmem:[#allocation3 + $0x1c0] sm:$0xff]  ;;  %v1500_v4 = vpop.permute.xlu2 %1499 }
 0x215   : > { %2258 = vmatpush.msra.mxu3 %v6137_v31  ;;  %1915 = vmatmul.f32.gmra.mxu1 %v1433_v53  ;;  %v7901_v40 = vpop.f32.mrf.mxu2  ;;  %v1695_v6 = vadd.f32 %v7850_v62, %v1630_v13  ;;  %v1633_v62 = vadd.f32 %v7749_v38, %v1568_v16  ;;  %v1398_v31 = vld [vmem:[#allocation3 + $0x450] sm:$0xff]  ;;  %v1340_v34 = vld [vmem:[#allocation3 + $0x280] sm:$0xff] }
 0x216   : > { %1962 = vmatmul.f32.gmra.mxu2 %v1362_v45  ;;  %2071 = vmatmul.f32.gmra.mxu0 %v1280_v24  ;;  %v7919_v32 = vpop.f32.mrf.mxu1  ;;  %v1701_v61 = vadd.f32 %v7881_v48, %v1636_v20  ;;  %v1410_v16 = vld [vmem:[#allocation3 + $0x4b0] sm:$0xff] }
 0x217   : > { %2259 = vmatpush.msra.mxu3 %v6133_v50  ;;  %v1698_v44 = vadd.f32 %v7861_v33, %v1633_v62 }
 0x218   : > { %v1495_v29 = vpop.permute.xlu1 %1494 }
 0x219   : > { %2260 = vmatpush.msra.mxu3 %v6132_v15  ;;  %v1574_v57 = vadd.f32 %v7784_v25, %v1495_v29  ;;  %v1577_v15 = vadd.f32 %v7806_v55, %v1500_v4 }
 0x21a   : > { %2018 = vmatmul.f32.gmra.mxu3 %v1327_v52  ;;  %v1293_v52 = vld [vmem:[#allocation3 + $0x108] sm:$0xff] }
 0x21b   : > { %2261 = vmatpush.msra.mxu3 %v6128_v41  ;;  %v1759_v49 = vpop.f32.mrf.mxu3  ;;  %v7917_v54 = vpop.f32.mrf.mxu0  ;;  %v1639_v24 = vadd.f32 %v7790_v30, %v1574_v57  ;;  %v1328_v41 = vld [vmem:[#allocation3 + $0x220] sm:$0xff] }
 0x21c   : > { %v7912_v3 = vadd.f32 %v1759_v49, %v1695_v6  ;;  %v1515_v29 = vpop.permute.xlu2 %1514 }
 0x21d   : > { %2262 = vmatpush.msra.mxu3 %v6127_v47  ;;  %1918 = vmatmul.f32.gmra.mxu1 %v1445_v39  ;;  %v1704_v25 = vadd.f32 %v7901_v40, %v1639_v24  ;;  %v1642_v39 = vadd.f32 %v7809_v1, %v1577_v15  ;;  %v1505_v47 = vpop.permute.xlu0 %1504  ;;  %v1586_v24 = vadd.f32 %v7857_v9, %v1515_v29 }
 0x21e   : > { %1965 = vmatmul.f32.gmra.mxu2 %v1374_v23  ;;  %2074 = vmatmul.f32.gmra.mxu0 %v1292_v27  ;;  %v1706_v60 = vpop.f32.mrf.mxu2  ;;  %v1375_v23 = vld [vmem:[#allocation3 + $0x398] sm:$0xff]  ;;  %v1580_v62 = vadd.f32 %v7826_v18, %v1505_v47 }
 0x21f   : > { %v1707_v55 = vadd.f32 %v1706_v60, %v1642_v39  ;;  %v1651_v39 = vadd.f32 %v7865_v51, %v1586_v24 }
 0x220   : > { %v1645_v1 = vadd.f32 %v7830_v2, %v1580_v62 }
 0x221   : > { %v7931_v50 = vpop.f32.mrf.mxu1 }
 0x222   : > { %2021 = vmatmul.f32.gmra.mxu3 %v1339_v0 }
 0x223   : > { %v1762_v36 = vpop.f32.mrf.mxu3  ;;  %v7929_v13 = vpop.f32.mrf.mxu0 }
 0x224   : > { %v7921_v38 = vadd.f32 %v1762_v36, %v1698_v44  ;;  %v1422_v44 = vld [vmem:[#allocation3 + $0x510] sm:$0xff]  ;;  %v1510_v36 = vpop.permute.xlu1 %1509  ;;  %v1810_v51 = vadd.f32 %v7929_v13, %v7869_v56  ;;  %v1353_v13 = vld [vmem:[#allocation3 + $0x2e8] sm:$0xff] }
 0x225   : > { %2133 = vmatmul.f32.vlgmr.msra.gmra.mxu1 %v1269_v14  ;;  %v1583_v60 = vadd.f32 %v7842_v46, %v1510_v36  ;;  %v1520_v9 = vpop.permute.xlu0 %1519 }
 0x226   : > { %1968 = vmatmul.f32.gmra.mxu2 %v1386_v59  ;;  %2077 = vmatmul.f32.gmra.mxu0 %v1304_v7  ;;  %v1709_v33 = vpop.f32.mrf.mxu2  ;;  %v1387_v7 = vld [vmem:[#allocation3 + $0x3f8] sm:$0xff] }
 0x227   : > { %v1710_v20 = vadd.f32 %v1709_v33, %v1645_v1 }
 0x22a   : > { %2024 = vmatmul.f32.gmra.mxu3 %v1351_v37  ;;  %v7940_v40 = vpop.f32.mrf.mxu1 }
 0x22b   : > { %v1765_v53 = vpop.f32.mrf.mxu3  ;;  %v7938_v27 = vpop.f32.mrf.mxu0 }
 0x22c   : > { %v7926_v45 = vadd.f32 %v1765_v53, %v1701_v61  ;;  %v1317_v61 = vld [vmem:[#allocation3 + $0x1c8] sm:$0xff]  ;;  %v1352_v53 = vld [vmem:[#allocation3 + $0x2e0] sm:$0xff]  ;;  %v1525_v36 = vpop.permute.xlu1 %1524 }
 0x22d   : > { %2136 = vmatmul.f32.gmra.mxu1 %v1281_v5  ;;  %v1434_v5 = vld [vmem:[#allocation3 + $0x570] sm:$0xff]  ;;  %v1592_v56 = vadd.f32 %v7907_v43, %v1525_v36  ;;  %v6752_v36 = vld [vmem:[%s10411_s9 + $0x18] sm:$0xff] }
 0x22e   : > { %1971 = vmatmul.f32.gmra.mxu2 %v1398_v31  ;;  %2080 = vmatmul.f32.gmra.mxu0 %v1316_v28  ;;  %v1648_v31 = vadd.f32 %v7848_v22, %v1583_v60  ;;  %v1399_v28 = vld [vmem:[#allocation3 + $0x458] sm:$0xff] }
 0x22f   : > { %v1712_v48 = vpop.f32.mrf.mxu2  ;;  %v1423_v60 = vld [vmem:[#allocation3 + $0x518] sm:$0xff] }
 0x230   : > { %v1713_v46 = vadd.f32 %v1712_v48, %v1648_v31  ;;  %v1657_v31 = vadd.f32 %v7909_v42, %v1592_v56 }
 0x232   : > { %2027 = vmatmul.f32.gmra.mxu3 %v1363_v12  ;;  %v7949_v37 = vpop.f32.mrf.mxu1  ;;  %v1329_v12 = vld [vmem:[#allocation3 + $0x228] sm:$0xff] }
 0x233   : > { %v1768_v6 = vpop.f32.mrf.mxu3  ;;  %v7947_v18 = vpop.f32.mrf.mxu0 }
 0x234   : > { %v7935_v30 = vadd.f32 %v1768_v6, %v1704_v25  ;;  %v1364_v6 = vld [vmem:[#allocation3 + $0x340] sm:$0xff] }
 0x235   : > { %2139 = vmatmul.f32.gmra.mxu1 %v1293_v52  ;;  %v1446_v52 = vld [vmem:[#allocation3 + $0x5d0] sm:$0xff] }
 0x236   : > { %1974 = vmatmul.f32.gmra.mxu2 %v1410_v16  ;;  %2083 = vmatmul.f32.gmra.mxu0 %v1328_v41 }
 0x237   : > { %v1715_v49 = vpop.f32.mrf.mxu2 }
 0x238   : > { %v1530_v4 = vpop.permute.xlu2 %1529 }
 0x239   : > { %v1595_v25 = vadd.f32 %v7917_v54, %v1530_v4  ;;  %v1716_v54 = vadd.f32 %v1715_v49, %v1651_v39  ;;  %v1875_v49 = vadd.f32 %v7931_v50, %v1810_v51  ;;  %v1813_v50 = vadd.f32 %v7938_v27, %v7845_v35  ;;  %v1365_v35 = vld [vmem:[#allocation3 + $0x348] sm:$0xff]  ;;  %v1447_v39 = vld [vmem:[#allocation3 + $0x5d8] sm:$0xff] }
 0x23a   : > { %2030 = vmatmul.f32.gmra.mxu3 %v1375_v23  ;;  %v7958_v41 = vpop.f32.mrf.mxu1  ;;  %v1411_v23 = vld [vmem:[#allocation3 + $0x4b8] sm:$0xff] }
 0x23b   : > { %v1771_v0 = vpop.f32.mrf.mxu3  ;;  %v7956_v16 = vpop.f32.mrf.mxu0  ;;  %v1660_v48 = vadd.f32 %v7919_v32, %v1595_v25  ;;  %v1400_v25 = vld [vmem:[#allocation3 + $0x460] sm:$0xff] }
 0x23c   : > { %v7943_v14 = vadd.f32 %v1771_v0, %v1707_v55  ;;  %v1589_v55 = vadd.f32 %v7885_v11, %v1520_v9 }
 0x23d   : > { %2142 = vmatmul.f32.gmra.mxu1 %v1305_v26  ;;  %v1341_v26 = vld [vmem:[#allocation3 + $0x288] sm:$0xff] }
 0x23e   : > { %1977 = vmatmul.f32.gmra.mxu2 %v1422_v44  ;;  %2086 = vmatmul.f32.gmra.mxu0 %v1340_v34  ;;  %v1376_v44 = vld [vmem:[#allocation3 + $0x3a0] sm:$0xff]  ;;  %v1270_v34 = vld [vmem:[#allocation3 + $0x50] sm:$0xff]  ;;  %v1654_v1 = vadd.f32 %v7889_v58, %v1589_v55 }
 0x23f   : > { %v1718_v59 = vpop.f32.mrf.mxu2  ;;  %v1412_v55 = vld [vmem:[#allocation3 + $0x4c0] sm:$0xff] }
 0x242   : > { %2033 = vmatmul.f32.gmra.mxu3 %v1387_v7  ;;  %v7975_v11 = vpop.f32.mrf.mxu1 }
 0x243   : > { %v1774_v57 = vpop.f32.mrf.mxu3  ;;  %v7973_v7 = vpop.f32.mrf.mxu0 }
 0x244   : > { %v7951_v2 = vadd.f32 %v1774_v57, %v1710_v20  ;;  %v1388_v57 = vld [vmem:[#allocation3 + $0x400] sm:$0xff] }
 0x245   : > { %2145 = vmatmul.f32.gmra.mxu1 %v1317_v61  ;;  %v1719_v61 = vadd.f32 %v1718_v59, %v1654_v1  ;;  %v1271_v1 = vld [vmem:[#allocation3 + $0x58] sm:$0xff] }
 0x246   : > { %1980 = vmatmul.f32.gmra.mxu2 %v1434_v5  ;;  %2089 = vmatmul.f32.gmra.mxu0 %v1352_v53  ;;  %v1282_v5 = vld [vmem:[#allocation3 + $0xb0] sm:$0xff] }
 0x247   : > { %v1721_v33 = vpop.f32.mrf.mxu2 }
 0x24a   : > { %2036 = vmatmul.f32.gmra.mxu3 %v1399_v28  ;;  %v1878_v28 = vadd.f32 %v7940_v40, %v1813_v50  ;;  %v7988_v24 = vpop.f32.mrf.mxu1  ;;  %v1816_v40 = vadd.f32 %v7947_v18, %v7892_v10  ;;  %v6750_v10 = vld [vmem:[%s10411_s9 + $0x10] sm:$0xff]  ;;  %v1283_v50 = vld [vmem:[#allocation3 + $0xb8] sm:$0xff] }
 0x24b   : > { %v1777_v15 = vpop.f32.mrf.mxu3  ;;  %v7986_v43 = vpop.f32.mrf.mxu0 }
 0x24c   : > { %v7960_v22 = vadd.f32 %v1777_v15, %v1713_v46  ;;  %v1435_v46 = vld [vmem:[#allocation3 + $0x578] sm:$0xff]  ;;  %v1294_v15 = vld [vmem:[#allocation3 + $0x110] sm:$0xff] }
 0x24d   : > { %2148 = vmatmul.f32.gmra.mxu1 %v1329_v12  ;;  %v1722_v12 = vadd.f32 %v1721_v33, %v1657_v31  ;;  %v1881_v33 = vadd.f32 %v7949_v37, %v1816_v40  ;;  %v1377_v37 = vld [vmem:[#allocation3 + $0x3a8] sm:$0xff]  ;;  %v6755_v31 = vld [vmem:[%s10411_s9 + $0x30] sm:$0xff]  ;;  %v1295_v40 = vld [vmem:[#allocation3 + $0x118] sm:$0xff] }
 0x24e   : > { %1983 = vmatmul.f32.gmra.mxu2 %v1446_v52  ;;  %2092 = vmatmul.f32.gmra.mxu0 %v1364_v6  ;;  %v6886_v52 = vmov 1   ;;  %v6748_v6 = vld [vmem:[%s10411_s9] sm:$0xff] }
 0x24f   : > { %v1724_v47 = vpop.f32.mrf.mxu2  ;;  %6167 = vset.pattern.permute.xlu0 %v6886_v52  ;;  %6168 = vset.pattern.permute.xlu1 %v6886_v52 }
 0x250   : > { %v7965_v62 = vadd.f32 %v1724_v47, %v1660_v48  ;;  %2329 = vperm.xlu0 %6167, %v6748_v6   ;;  %v6749_v48 = vld [vmem:[%s10411_s9 + $0x8] sm:$0xff]  ;;  %6169 = vset.pattern.permute.xlu2 %v6886_v52 }
 0x251   : > { %2333 = vperm.xlu1 %6168, %v6749_v48   ;;  %2337 = vperm.xlu2 %6169, %v6750_v10   ;;  %v1342_v48 = vld [vmem:[#allocation3 + $0x290] sm:$0xff] }
 0x252   : > { %2039 = vmatmul.f32.gmra.mxu3 %v1411_v23  ;;  %v8010_v23 = vpop.f32.mrf.mxu1  ;;  %v6760_v10 = vld [vmem:[%s10411_s9 + $0x70] sm:$0xff] }
 0x253   : > { %v1780_v0 = vpop.f32.mrf.mxu3  ;;  %v8008_v47 = vpop.f32.mrf.mxu0 }
 0x254   : > { %v7969_v32 = vadd.f32 %v1780_v0, %v1716_v54 }
 0x255   : > { %2151 = vmatmul.f32.gmra.mxu1 %v1341_v26  ;;  %v1306_v26 = vld [vmem:[#allocation3 + $0x170] sm:$0xff] }
 0x256   : > { %2095 = vmatmul.f32.gmra.mxu0 %v1376_v44  ;;  %2198 = vmatmul.f32.vlgmr.msra.gmra.mxu2 %v1270_v34  ;;  %v1819_v44 = vadd.f32 %v7956_v16, %v7887_v8  ;;  %v6751_v34 = vld [vmem:[%s10411_s9 + $0x28] sm:$0xff]  ;;  %v6753_v8 = vld [vmem:[%s10411_s9 + $0x20] sm:$0xff] }
 0x257   : > { %v1939_v20 = vpop.f32.mrf.mxu2 }
 0x258   : > { %v7977_v29 = vadd.f32 %v1939_v20, %v1875_v49  ;;  %2349 = vperm.xlu0 %6167, %v6751_v34   ;;  %v1884_v51 = vadd.f32 %v7958_v41, %v1819_v44  ;;  %v1389_v49 = vld [vmem:[#allocation3 + $0x408] sm:$0xff] }
 0x259   : > { %2341 = vperm.xlu1 %6168, %v6752_v36   ;;  %2345 = vperm.xlu2 %6169, %v6753_v8   ;;  %v6761_v44 = vld [vmem:[%s10411_s9 + $0x68] sm:$0xff] }
 0x25a   : > { %2042 = vmatmul.f32.gmra.mxu3 %v1423_v60  ;;  %v1424_v60 = vld [vmem:[#allocation3 + $0x520] sm:$0xff]  ;;  %v8031_v56 = vpop.f32.mrf.mxu1 }
 0x25b   : > { %v1783_v58 = vpop.f32.mrf.mxu3  ;;  %v8029_v41 = vpop.f32.mrf.mxu0 }
 0x25c   : > { %v7982_v53 = vadd.f32 %v1783_v58, %v1719_v61  ;;  %v1318_v61 = vld [vmem:[#allocation3 + $0x1d0] sm:$0xff]  ;;  %v1822_v58 = vadd.f32 %v7973_v7, %v7897_v63  ;;  %v6756_v63 = vld [vmem:[%s10411_s9 + $0x38] sm:$0xff] }
 0x25d   : > { %2154 = vmatmul.f32.gmra.mxu1 %v1353_v13 }
 0x25e   : > { %2098 = vmatmul.f32.gmra.mxu0 %v1388_v57  ;;  %2201 = vmatmul.f32.gmra.mxu2 %v1282_v5  ;;  %v6754_v57 = vld [vmem:[%s10411_s9 + $0x40] sm:$0xff]  ;;  %v1887_v5 = vadd.f32 %v7975_v11, %v1822_v58 }
 0x25f   : > { %v1942_v59 = vpop.f32.mrf.mxu2 }
 0x260   : > { %v7990_v4 = vadd.f32 %v1942_v59, %v1878_v28  ;;  %2361 = vperm.xlu0 %6167, %v6754_v57   ;;  %v1401_v28 = vld [vmem:[#allocation3 + $0x468] sm:$0xff] }
 0x261   : > { %2353 = vperm.xlu1 %6168, %v6755_v31   ;;  %2357 = vperm.xlu2 %6169, %v6756_v63   ;;  %v1343_v63 = vld [vmem:[#allocation3 + $0x298] sm:$0xff] }
 0x262   : > { %2045 = vmatmul.f32.gmra.mxu3 %v1435_v46  ;;  %v1436_v46 = vld [vmem:[#allocation3 + $0x580] sm:$0xff] }
 0x263   : > { %v1786_v27 = vpop.f32.mrf.mxu3 }
 0x264   : > { %v7992_v42 = vadd.f32 %v1786_v27, %v1722_v12  ;;  %v1330_v12 = vld [vmem:[#allocation3 + $0x230] sm:$0xff]  ;;  %v6757_v27 = vld [vmem:[%s10411_s9 + $0x58] sm:$0xff] }
 0x265   : > { %2157 = vmatmul.f32.gmra.mxu1 %v1365_v35  ;;  %v1825_v35 = vadd.f32 %v7986_v43, %v7912_v3  ;;  %v6759_v43 = vld [vmem:[%s10411_s9 + $0x50] sm:$0xff] }
 0x266   : > { %10417 = vst [vmem:[#allocation9_spill] sm:$0xff] %v7992_v42  ;;  %2101 = vmatmul.f32.gmra.mxu0 %v1400_v25  ;;  %2204 = vmatmul.f32.gmra.mxu2 %v1294_v15  ;;  %v8058_v25 = vpop.f32.mrf.mxu0  ;;  %v8060_v15 = vpop.f32.mrf.mxu1 }
 0x267   : > { %v1890_v52 = vadd.f32 %v7988_v24, %v1825_v35 }
 0x268   : > { %v1945_v9 = vpop.f32.mrf.mxu2  ;;  %2373 = vperm.xlu0 %6167, %v6757_v27   ;;  %v1355_v27 = vld [vmem:[#allocation3 + $0x2f8] sm:$0xff] }
 0x269   : > { %v8006_v18 = vadd.f32 %v1945_v9, %v1881_v33  ;;  %2369 = vperm.xlu2 %6169, %v6759_v43   ;;  %v1413_v33 = vld [vmem:[#allocation3 + $0x4c8] sm:$0xff]  ;;  %v1367_v43 = vld [vmem:[#allocation3 + $0x358] sm:$0xff] }
 0x26a   : > { %2048 = vmatmul.f32.gmra.mxu3 %v1447_v39  ;;  %v1448_v39 = vld [vmem:[#allocation3 + $0x5e0] sm:$0xff] }
 0x26b   : > { %v1789_v54 = vpop.f32.mrf.mxu3 }
 0x26c   : > { %v8013_v0 = vadd.f32 %v1789_v54, %v7965_v62  ;;  %v1307_v54 = vld [vmem:[#allocation3 + $0x178] sm:$0xff] }
 0x26d   : > { %2160 = vmatmul.f32.gmra.mxu1 %v1377_v37  ;;  %v1828_v37 = vadd.f32 %v8008_v47, %v7921_v38  ;;  %v1425_v38 = vld [vmem:[#allocation3 + $0x528] sm:$0xff]  ;;  %v1354_v47 = vld [vmem:[#allocation3 + $0x2f0] sm:$0xff] }
 0x26e   : > { %10418 = vst [vmem:[#allocation10_spill] sm:$0xff] %v8013_v0  ;;  %2104 = vmatmul.f32.gmra.mxu0 %v1412_v55  ;;  %2207 = vmatmul.f32.gmra.mxu2 %v1306_v26  ;;  %v8078_v55 = vpop.f32.mrf.mxu0 }
 0x26f   : > { %v1893_v26 = vadd.f32 %v8010_v23, %v1828_v37  ;;  %v1319_v23 = vld [vmem:[#allocation3 + $0x1d8] sm:$0xff] }
 0x270   : > { %v1948_v62 = vpop.f32.mrf.mxu2  ;;  %2385 = vperm.xlu0 %6167, %v6760_v10   ;;  %v1379_v10 = vld [vmem:[#allocation3 + $0x3b8] sm:$0xff] }
 0x271   : > { %v8027_v16 = vadd.f32 %v1948_v62, %v1884_v51  ;;  %2381 = vperm.xlu2 %6169, %v6761_v44   ;;  %v2426_v44 = vld [vmem:[%s8132_s12 + $0x10] sm:$0xff] }
 0x272   : > { %2263 = vmatmul.f32.vlgmr.msra.gmra.mxu3 %v1271_v1 }
 0x273   : > { %v2004_v20 = vpop.f32.mrf.mxu3 }
 0x274   : > { %v8034_v13 = vadd.f32 %v2004_v20, %v7977_v29 }
 0x275   : > { %2163 = vmatmul.f32.gmra.mxu1 %v1389_v49 }
 0x276   : > { %2107 = vmatmul.f32.gmra.mxu0 %v1424_v60  ;;  %2210 = vmatmul.f32.gmra.mxu2 %v1318_v61  ;;  %v8093_v49 = vpop.f32.mrf.mxu0  ;;  %v1437_v61 = vld [vmem:[#allocation3 + $0x588] sm:$0xff] }
 0x278   : > { %v1951_v29 = vpop.f32.mrf.mxu2 }
 0x279   : > { %v8048_v7 = vadd.f32 %v1951_v29, %v1887_v5  ;;  %2540 = vrot.lane.b32.xlu2 %v2426_v44, %s6887_s14  ;;  %v1427_v44 = vld [vmem:[#allocation3 + $0x538] sm:$0xff] }
 0x27a   : > { %2266 = vmatmul.f32.gmra.mxu3 %v1283_v50 }
 0x27b   : > { %v2007_v59 = vpop.f32.mrf.mxu3 }
 0x27c   : > { %v8051_v11 = vadd.f32 %v2007_v59, %v7990_v4  ;;  %v6758_v4 = vld [vmem:[%s10411_s9 + $0x48] sm:$0xff] }
 0x27d   : > { %2166 = vmatmul.f32.gmra.mxu1 %v1401_v28  ;;  %2365 = vperm.xlu1 %6168, %v6758_v4  }
 0x27e   : > { %2110 = vmatmul.f32.gmra.mxu0 %v1436_v46  ;;  %2213 = vmatmul.f32.gmra.mxu2 %v1330_v12  ;;  %v8102_v5 = vpop.f32.mrf.mxu0 }
 0x280   : > { %v1954_v3 = vpop.f32.mrf.mxu2 }
 0x281   : > { %v1955_v6 = vadd.f32 %v1954_v3, %v1890_v52 }
 0x282   : > { %2269 = vmatmul.f32.gmra.mxu3 %v1295_v40  ;;  %v1402_v40 = vld [vmem:[#allocation3 + $0x470] sm:$0xff] }
 0x284   : > { %v2010_v9 = vpop.f32.mrf.mxu3 }
 0x285   : > { %v8070_v24 = vadd.f32 %v2010_v9, %v8006_v18  ;;  %2169 = vmatmul.f32.gmra.mxu1 %v1413_v33  ;;  %2377 = vperm.xlu1 %6168, %v7766_v19   ;;  %v8081_v18 = vpop.f32.mrf.mxu1  ;;  %v1831_v19 = vadd.f32 %v8029_v41, %v7926_v45  ;;  %v1331_v45 = vld [vmem:[#allocation3 + $0x238] sm:$0xff] }
 0x286   : > { %2113 = vmatmul.f32.gmra.mxu0 %v1448_v39  ;;  %2216 = vmatmul.f32.gmra.mxu2 %v1342_v48  ;;  %v8110_v46 = vpop.f32.mrf.mxu0  ;;  %v1414_v48 = vld [vmem:[#allocation3 + $0x4d0] sm:$0xff] }
 0x287   : > { %v1896_v62 = vadd.f32 %v8031_v56, %v1831_v19  ;;  %v1378_v56 = vld [vmem:[#allocation3 + $0x3b0] sm:$0xff]  ;;  %v2429_v19 = vld [vmem:[%s8132_s12 + $0x28] sm:$0xff] }
 0x288   : > { %2546 = vrot.lane.b32.xlu2 %v2429_v19, %s6887_s14  ;;  %v2436_v19 = vld [vmem:[%s8132_s12 + $0x60] sm:$0xff] }
 0x289   : > { %v1957_v34 = vpop.f32.mrf.mxu2 }
 0x28a   : > { %v1958_v51 = vadd.f32 %v1957_v34, %v1893_v26  ;;  %2272 = vmatmul.f32.gmra.mxu3 %v1307_v54  ;;  %v2424_v34 = vld [vmem:[%s8132_s12] sm:$0xff] }
 0x28b   : > { %2536 = vrot.lane.b32.xlu0 %v2424_v34, %s6887_s14 }
 0x28c   : > { %v2013_v1 = vpop.f32.mrf.mxu3 }
 0x28d   : > { %v8087_v36 = vadd.f32 %v2013_v1, %v8027_v16  ;;  %2172 = vmatmul.f32.gmra.mxu1 %v1425_v38  ;;  %2389 = vperm.xlu1 %6168, %v7818_v17   ;;  %v8095_v20 = vpop.f32.mrf.mxu1  ;;  %v1366_v16 = vld [vmem:[#allocation3 + $0x350] sm:$0xff]  ;;  %v1449_v17 = vld [vmem:[#allocation3 + $0x5e8] sm:$0xff] }
 0x28e   : > { %2219 = vmatmul.f32.gmra.mxu2 %v1354_v47  ;;  %v1391_v47 = vld [vmem:[#allocation3 + $0x418] sm:$0xff] }
 0x291   : > { %v1960_v8 = vpop.f32.mrf.mxu2 }
 0x292   : > { %v1961_v60 = vadd.f32 %v1960_v8, %v1896_v62  ;;  %2275 = vmatmul.f32.gmra.mxu3 %v1319_v23  ;;  %v2427_v23 = vld [vmem:[%s8132_s12 + $0x18] sm:$0xff]  ;;  %v1438_v62 = vld [vmem:[#allocation3 + $0x590] sm:$0xff] }
 0x293   : > { %2542 = vrot.lane.b32.xlu0 %v2427_v23, %s6887_s14  ;;  %v2431_v23 = vld [vmem:[%s8132_s12 + $0x38] sm:$0xff] }
 0x295   : > { %v2016_v58 = vpop.f32.mrf.mxu3  ;;  %2175 = vmatmul.f32.gmra.mxu1 %v1437_v61  ;;  %v8104_v50 = vpop.f32.mrf.mxu1 }
 0x296   : > { %v8098_v57 = vadd.f32 %v2016_v58, %v8048_v7  ;;  %2222 = vmatmul.f32.gmra.mxu2 %v1366_v16  ;;  %v1390_v7 = vld [vmem:[#allocation3 + $0x410] sm:$0xff]  ;;  %v1403_v16 = vld [vmem:[#allocation3 + $0x478] sm:$0xff] }
 0x299   : > { %v8100_v41 = vpop.f32.mrf.mxu2 }
 0x29a   : > { %2278 = vmatmul.f32.gmra.mxu3 %v1331_v45  ;;  %v2432_v45 = vld [vmem:[%s8132_s12 + $0x40] sm:$0xff] }
 0x29b   : > { %2552 = vrot.lane.b32.xlu2 %v2432_v45, %s6887_s14 }
 0x29d   : > { %v2019_v31 = vpop.f32.mrf.mxu3  ;;  %2178 = vmatmul.f32.gmra.mxu1 %v1449_v17  ;;  %v8112_v12 = vpop.f32.mrf.mxu1  ;;  %v2430_v17 = vld [vmem:[%s8132_s12 + $0x30] sm:$0xff] }
 0x29e   : > { %v8106_v29 = vadd.f32 %v2019_v31, %v1955_v6  ;;  %2225 = vmatmul.f32.gmra.mxu2 %v1378_v56  ;;  %v8120_v6 = vpop.f32.mrf.mxu0  ;;  %v2425_v56 = vld [vmem:[%s8132_s12 + $0x8] sm:$0xff]  ;;  %v1450_v31 = vld [vmem:[#allocation3 + $0x5f0] sm:$0xff]  ;;  %2548 = vrot.lane.b32.xlu0 %v2430_v17, %s6887_s14 }
 0x29f   : > { %2538 = vrot.lane.b32.xlu1 %v2425_v56, %s6887_s14 }
 0x2a1   : > { %v8108_v28 = vpop.f32.mrf.mxu2 }
 0x2a2   : > { %2281 = vmatmul.f32.gmra.mxu3 %v1343_v63 }
 0x2a5   : > { %v2022_v59 = vpop.f32.mrf.mxu3  ;;  %v8122_v33 = vpop.f32.mrf.mxu1 }
 0x2a6   : > { %v8114_v35 = vadd.f32 %v2022_v59, %v1958_v51  ;;  %2228 = vmatmul.f32.gmra.mxu2 %v1390_v7  ;;  %v8136_v54 = vpop.f32.mrf.mxu0  ;;  %v1426_v51 = vld [vmem:[#allocation3 + $0x530] sm:$0xff] }
 0x2a7   : > { %10419 = vst [vmem:[#allocation11_spill] sm:$0xff] %v8136_v54 }
 0x2a9   : > { %v8116_v52 = vpop.f32.mrf.mxu2 }
 0x2aa   : > { %2284 = vmatmul.f32.gmra.mxu3 %v1355_v27  ;;  %v1415_v27 = vld [vmem:[#allocation3 + $0x4d8] sm:$0xff] }
 0x2ad   : > { %v2025_v4 = vpop.f32.mrf.mxu3  ;;  %v8138_v26 = vpop.f32.mrf.mxu1 }
 0x2ae   : > { %v8118_v3 = vadd.f32 %v2025_v4, %v1961_v60  ;;  %2231 = vmatmul.f32.gmra.mxu2 %v1402_v40  ;;  %10420 = vst [vmem:[#allocation12_spill] sm:$0xff] %v8138_v26  ;;  %v8152_v8 = vpop.f32.mrf.mxu0  ;;  %v2435_v4 = vld [vmem:[%s8132_s12 + $0x58] sm:$0xff] }
 0x2af   : > { %10422 = vst [vmem:[#allocation14_spill] sm:$0xff] %v8152_v8  ;;  %2558 = vrot.lane.b32.xlu2 %v2435_v4, %s6887_s14  ;;  %v1451_v4 = vld [vmem:[#allocation3 + $0x5f8] sm:$0xff] }
 0x2b1   : > { %v8124_v39 = vpop.f32.mrf.mxu2 }
 0x2b2   : > { %2287 = vmatmul.f32.gmra.mxu3 %v1367_v43  ;;  %v2433_v43 = vld [vmem:[%s8132_s12 + $0x48] sm:$0xff] }
 0x2b3   : > { %2554 = vrot.lane.b32.xlu0 %v2433_v43, %s6887_s14 }
 0x2b5   : > { %v8126_v9 = vpop.f32.mrf.mxu3  ;;  %v8154_v60 = vpop.f32.mrf.mxu1 }
 0x2b6   : > { %2234 = vmatmul.f32.gmra.mxu2 %v1414_v48  ;;  %10423 = vst [vmem:[#allocation15_spill] sm:$0xff] %v8154_v60  ;;  %v2069_v7 = vpop.f32.mrf.mxu0  ;;  %v2428_v48 = vld [vmem:[%s8132_s12 + $0x20] sm:$0xff] }
 0x2b7   : > { %2544 = vrot.lane.b32.xlu1 %v2428_v48, %s6887_s14  ;;  %v2070_v21 = vadd.f32 %v2069_v7, %v8034_v13 }
 0x2b9   : > { %v8134_v37 = vpop.f32.mrf.mxu2 }
 0x2ba   : > { %2290 = vmatmul.f32.gmra.mxu3 %v1379_v10 }
 0x2bb   : > { %2560 = vrot.lane.b32.xlu0 %v2436_v19, %s6887_s14 }
 0x2bd   : > { %v8144_v38 = vpop.f32.mrf.mxu3  ;;  %v2134_v59 = vpop.f32.mrf.mxu1 }
 0x2be   : > { %2237 = vmatmul.f32.gmra.mxu2 %v1426_v51  ;;  %v2072_v34 = vpop.f32.mrf.mxu0  ;;  %v2135_v60 = vadd.f32 %v2134_v59, %v2070_v21 }
 0x2bf   : > { %2550 = vrot.lane.b32.xlu1 %v2431_v23, %s6887_s14  ;;  %v2338_v23 = vpop.permute.xlu2 %2337 }
 0x2c1   : > { %v8146_v1 = vpop.f32.mrf.mxu2 }
 0x2c2   : > { %10421 = vst [vmem:[#allocation13_spill] sm:$0xff] %v8146_v1  ;;  %2293 = vmatmul.f32.gmra.mxu3 %v1391_v47  ;;  %v2330_v0 = vpop.permute.xlu0 %2329 }
 0x2c3   : > { %v2334_v13 = vpop.permute.xlu1 %2333 }
 0x2c5   : > { %v8156_v61 = vpop.f32.mrf.mxu3  ;;  %v2137_v51 = vpop.f32.mrf.mxu1 }
 0x2c6   : > { %2240 = vmatmul.f32.gmra.mxu2 %v1438_v62  ;;  %v2075_v17 = vpop.f32.mrf.mxu0 }
 0x2c7   : > { %v2076_v59 = vadd.f32 %v2075_v17, %v8070_v24 }
 0x2c9   : > { %v8158_v58 = vpop.f32.mrf.mxu2 }
 0x2ca   : > { %10424 = vst [vmem:[#allocation16_spill] sm:$0xff] %v8158_v58  ;;  %2296 = vmatmul.f32.gmra.mxu3 %v1403_v16  ;;  %v1439_v16 = vld [vmem:[#allocation3 + $0x598] sm:$0xff]  ;;  %v2346_v58 = vpop.permute.xlu2 %2345 }
 0x2cd   : > { %v8166_v63 = vpop.f32.mrf.mxu3  ;;  %v2140_v56 = vpop.f32.mrf.mxu1 }
 0x2ce   : > { %2243 = vmatmul.f32.gmra.mxu2 %v1450_v31  ;;  %v2434_v31 = vld [vmem:[%s8132_s12 + $0x50] sm:$0xff]  ;;  %v2078_v48 = vpop.f32.mrf.mxu0 }
 0x2cf   : > { %2556 = vrot.lane.b32.xlu1 %v2434_v31, %s6887_s14 }
 0x2d1   : > { %v8168_v40 = vpop.f32.mrf.mxu2 }
 0x2d2   : > { %10425 = vst [vmem:[#allocation17_spill] sm:$0xff] %v8168_v40  ;;  %2299 = vmatmul.f32.gmra.mxu3 %v1415_v27  ;;  %v8193_v21 = vpop.permute.xlu2 %2357 }
 0x2d5   : > { %v8176_v10 = vpop.f32.mrf.mxu3 }
 0x2d6   : > { %v2081_v26 = vpop.f32.mrf.mxu0 }
 0x2d9   : > { %v2199_v47 = vpop.f32.mrf.mxu2 }
 0x2da   : > { %2302 = vmatmul.f32.gmra.mxu3 %v1427_v44  ;;  %v2143_v44 = vpop.f32.mrf.mxu1  ;;  %v2200_v8 = vadd.f32 %v2199_v47, %v2135_v60 }
 0x2dd   : > { %v8182_v62 = vpop.f32.mrf.mxu3 }
 0x2de   : > { %10426 = vst [vmem:[#allocation18_spill] sm:$0xff] %v8182_v62  ;;  %v2084_v47 = vpop.f32.mrf.mxu0 }
 0x2e1   : > { %v2202_v45 = vpop.f32.mrf.mxu2 }
 0x2e2   : > { %2305 = vmatmul.f32.gmra.mxu3 %v1439_v16  ;;  %v2146_v54 = vpop.f32.mrf.mxu1 }
 0x2e5   : > { %v8186_v27 = vpop.f32.mrf.mxu3 }
 0x2e6   : > { %10427 = vst [vmem:[#allocation19_spill] sm:$0xff] %v8186_v27  ;;  %v2073_v27 = vadd.f32 %v2072_v34, %v8051_v11  ;;  %v2141_v11 = vadd.f32 %v2140_v56, %v2076_v59 }
 0x2e8   : > { %v2138_v62 = vadd.f32 %v2137_v51, %v2073_v27 }
 0x2e9   : > { %v2205_v43 = vpop.f32.mrf.mxu2 }
 0x2ea   : > { %2308 = vmatmul.f32.gmra.mxu3 %v1451_v4 }
 0x2ed   : > { %v8188_v19 = vpop.f32.mrf.mxu3 }
 0x2ee   : > { %10428 = vst [vmem:[#allocation20_spill] sm:$0xff] %v8188_v19  ;;  %v2203_v19 = vadd.f32 %v2202_v45, %v2138_v62  ;;  %v2079_v45 = vadd.f32 %v2078_v48, %v8087_v36 }
 0x2f0   : > { %v2144_v24 = vadd.f32 %v2143_v44, %v2079_v45 }
 0x2f1   : > { %v2208_v40 = vpop.f32.mrf.mxu2 }
 0x2f2   : > { %v2209_v56 = vadd.f32 %v2208_v40, %v2144_v24 }
 0x2f5   : > { %v2264_v16 = vpop.f32.mrf.mxu3 }
 0x2f6   : > { %v2265_v31 = vadd.f32 %v2264_v16, %v2200_v8  ;;  %v2149_v16 = vpop.f32.mrf.mxu1 }
 0x2f8   : > { %v2392_v42 = vmul.f32 %v2330_v0, %v2265_v31  ;;  %vm2312_vm2 = vcmp.ge.f32.partialorder %v2265_v31, 0.0 }
 0x2f9   : > { %v2211_v4 = vpop.f32.mrf.mxu2 }
 0x2fa   : > { %v2408_v1 = vsel %vm2312_vm2, %v2265_v31, %v2392_v42  ;;  %v2206_v42 = vadd.f32 %v2205_v43, %v2141_v11  ;;  %v2082_v11 = vadd.f32 %v2081_v26, %v8098_v57  ;;  %v2085_v57 = vadd.f32 %v2084_v47, %v8106_v29 }
 0x2fb   : > { %2504 = vrot.lane.b32.xlu2 %v2408_v1, %s6887_s14  ;;  %v8197_v1 = vpop.permute.xlu2 %2369 }
 0x2fc   : > { %v2147_v36 = vadd.f32 %v2146_v54, %v2082_v11  ;;  %v2150_v54 = vadd.f32 %v2149_v16, %v2085_v57 }
 0x2fd   : > { %v2267_v7 = vpop.f32.mrf.mxu3 }
 0x2fe   : > { %v2268_v60 = vadd.f32 %v2267_v7, %v2203_v19  ;;  %v2087_v19 = vpop.f32.mrf.mxu0  ;;  %v2152_v31 = vpop.f32.mrf.mxu1 }
 0x2ff   : > { %v2342_v7 = vpop.permute.xlu1 %2341 }
 0x300   : > { %v2393_v8 = vmul.f32 %v2334_v13, %v2268_v60  ;;  %vm2313_vm3 = vcmp.ge.f32.partialorder %v2268_v60, 0.0 }
 0x301   : > { %v2214_v0 = vpop.f32.mrf.mxu2 }
 0x302   : > { %v2409_v34 = vsel %vm2313_vm3, %v2268_v60, %v2393_v8  ;;  %v2350_v8 = vpop.permute.xlu0 %2349 }
 0x303   : > { %2506 = vrot.lane.b32.xlu0 %v2409_v34, %s6887_s14  ;;  %v8201_v59 = vpop.permute.xlu2 %2381 }
 0x305   : > { %v2270_v51 = vpop.f32.mrf.mxu3 }
 0x306   : > { %v2271_v62 = vadd.f32 %v2270_v51, %v2206_v42  ;;  %v2090_v44 = vpop.f32.mrf.mxu0  ;;  %v2155_v40 = vpop.f32.mrf.mxu1 }
 0x308   : > { %v2394_v27 = vmul.f32 %v2338_v23, %v2271_v62  ;;  %vm2314_vm4 = vcmp.ge.f32.partialorder %v2271_v62, 0.0  ;;  %v2212_v23 = vadd.f32 %v2211_v4, %v2147_v36  ;;  %v2215_v4 = vadd.f32 %v2214_v0, %v2150_v54 }
 0x309   : > { %v2217_v13 = vpop.f32.mrf.mxu2 }
 0x30a   : > { %v2410_v17 = vsel %vm2314_vm4, %v2271_v62, %v2394_v27  ;;  %v8205_v45 = vpop.permute.xlu0 %2361 }
 0x30b   : > { %2508 = vrot.lane.b32.xlu1 %v2410_v17, %s6887_s14  ;;  %v2541_v51 = vpop.permute.xlu2 %2540  ;;  %v2354_v17 = vpop.permute.xlu1 %2353 }
 0x30c   : > { %2619 = vst.msk [vmem:[#allocation2 + $0x90] sm:$0xff] %vm2600_vm6, %v2541_v51 }
 0x30d   : > { %v2273_v60 = vpop.f32.mrf.mxu3 }
 0x30e   : > { %v2274_v43 = vadd.f32 %v2273_v60, %v2209_v56  ;;  %v2093_v11 = vpop.f32.mrf.mxu0  ;;  %v2158_v36 = vpop.f32.mrf.mxu1 }
 0x310   : > { %v2395_v34 = vmul.f32 %v2342_v7, %v2274_v43  ;;  %vm2315_vm5 = vcmp.ge.f32.partialorder %v2274_v43, 0.0 }
 0x311   : > { %v2220_v27 = vpop.f32.mrf.mxu2 }
 0x312   : > { %v2411_v48 = vsel %vm2315_vm5, %v2274_v43, %v2395_v34  ;;  %v8211_v43 = vpop.permute.xlu0 %2373  ;;  %v2088_v34 = vadd.f32 %v2087_v19, %v8114_v35  ;;  %v1834_v35 = vadd.f32 %v8058_v25, %v7935_v30  ;;  %v2091_v19 = vadd.f32 %v2090_v44, %v8118_v3 }
 0x313   : > { %2510 = vrot.lane.b32.xlu2 %v2411_v48, %s6887_s14  ;;  %v2547_v7 = vpop.permute.xlu2 %2546  ;;  %v8214_v48 = vpop.permute.xlu1 %2365 }
 0x314   : > { %2622 = vst.msk [vmem:[#allocation2 + $0xa8] sm:$0xff] %vm2600_vm6, %v2547_v7  ;;  %v2153_v47 = vadd.f32 %v2152_v31, %v2088_v34  ;;  %v1899_v57 = vadd.f32 %v8060_v15, %v1834_v35  ;;  %v1837_v15 = vadd.f32 %v8078_v55, %v7943_v14 }
 0x315   : > { %v2276_v42 = vpop.f32.mrf.mxu3 }
 0x316   : > { %v2277_v62 = vadd.f32 %v2276_v42, %v2212_v23  ;;  %v2218_v0 = vadd.f32 %v2217_v13, %v2153_v47  ;;  %v2096_v31 = vpop.f32.mrf.mxu0  ;;  %v2161_v54 = vpop.f32.mrf.mxu1 }
 0x318   : > { %v2396_v26 = vmul.f32 %v2346_v58, %v2277_v62  ;;  %vm2316_vm7 = vcmp.ge.f32.partialorder %v2277_v62, 0.0 }
 0x319   : > { %v2223_v58 = vpop.f32.mrf.mxu2 }
 0x31a   : > { %v2412_v24 = vsel %vm2316_vm7, %v2277_v62, %v2396_v26  ;;  %v8218_v62 = vpop.permute.xlu0 %2385  ;;  %v2156_v26 = vadd.f32 %v2155_v40, %v2091_v19 }
 0x31b   : > { %2512 = vrot.lane.b32.xlu0 %v2412_v24, %s6887_s14  ;;  %v2553_v42 = vpop.permute.xlu2 %2552  ;;  %v8226_v7 = vpop.permute.xlu1 %2377 }
 0x31c   : > { %2625 = vst.msk [vmem:[#allocation2 + $0xc0] sm:$0xff] %vm2600_vm6, %v2553_v42 }
 0x31d   : > { %v2279_v56 = vpop.f32.mrf.mxu3 }
 0x31e   : > { %v2280_v60 = vadd.f32 %v2279_v56, %v2215_v4  ;;  %v1964_v4 = vadd.f32 %v8100_v41, %v1899_v57  ;;  %v2221_v56 = vadd.f32 %v2220_v27, %v2156_v26  ;;  %v1902_v41 = vadd.f32 %v8081_v18, %v1837_v15  ;;  %v2164_v47 = vpop.f32.mrf.mxu1  ;;  %v8247_v57 = vld [vmem:[#allocation2 + $0x90] sm:$0xff] }
 0x31f   : > { %v1840_v18 = vadd.f32 %v8093_v49, %v7951_v2 }
 0x320   : > { %v2397_v29 = vmul.f32 %v2350_v8, %v2280_v60  ;;  %vm2317_vm8 = vcmp.ge.f32.partialorder %v2280_v60, 0.0  ;;  %v2029_v25 = vadd.f32 %v8126_v9, %v1964_v4  ;;  %v1967_v9 = vadd.f32 %v8108_v28, %v1902_v41 }
 0x321   : > { %v2226_v24 = vpop.f32.mrf.mxu2  ;;  %v1905_v28 = vadd.f32 %v8095_v20, %v1840_v18 }
 0x322   : > { %v2413_v16 = vsel %vm2317_vm8, %v2280_v60, %v2397_v29  ;;  %v2537_v44 = vpop.permute.xlu0 %2536  ;;  %v2094_v40 = vadd.f32 %v2093_v11, %v2029_v25  ;;  %v2099_v29 = vpop.f32.mrf.mxu0  ;;  %v2032_v42 = vadd.f32 %v8144_v38, %v1967_v9 }
 0x323   : > { %2514 = vrot.lane.b32.xlu1 %v2413_v16, %s6887_s14  ;;  %v2559_v30 = vpop.permute.xlu2 %2558  ;;  %2617 = vst.msk [vmem:[#allocation2 + $0x80] sm:$0xff] %vm2600_vm6, %v2537_v44  ;;  %v8238_v55 = vpop.permute.xlu1 %2389  ;;  %v1970_v38 = vadd.f32 %v8116_v52, %v1905_v28 }
 0x324   : > { %2628 = vst.msk [vmem:[#allocation2 + $0xd8] sm:$0xff] %vm2600_vm6, %v2559_v30  ;;  %v2159_v27 = vadd.f32 %v2158_v36, %v2094_v40  ;;  %v2097_v11 = vadd.f32 %v2096_v31, %v2032_v42 }
 0x325   : > { %v2282_v23 = vpop.f32.mrf.mxu3  ;;  %v2035_v26 = vadd.f32 %v8156_v61, %v1970_v38  ;;  %v10432_v38 = vld [vmem:[#allocation9_spill] sm:$0xff] }
 0x326   : > { %v2283_v51 = vadd.f32 %v2282_v23, %v2218_v0  ;;  %v2224_v16 = vadd.f32 %v2223_v58, %v2159_v27  ;;  %v2162_v58 = vadd.f32 %v2161_v54, %v2097_v11  ;;  %v2167_v20 = vpop.f32.mrf.mxu1  ;;  %v1843_v54 = vadd.f32 %v8102_v5, %v7960_v22 }
 0x327   : > { %v2100_v52 = vadd.f32 %v2099_v29, %v2035_v26 }
 0x328   : > { %v2398_v8 = vmul.f32 %v2354_v17, %v2283_v51  ;;  %vm2318_vm9 = vcmp.ge.f32.partialorder %v2283_v51, 0.0  ;;  %v2227_v35 = vadd.f32 %v2226_v24, %v2162_v58  ;;  %v1908_v61 = vadd.f32 %v8104_v50, %v1843_v54 }
 0x329   : > { %v2229_v0 = vpop.f32.mrf.mxu2  ;;  %v2165_v4 = vadd.f32 %v2164_v47, %v2100_v52 }
 0x32a   : > { %v2414_v13 = vsel %vm2318_vm9, %v2283_v51, %v2398_v8  ;;  %v2102_v19 = vpop.f32.mrf.mxu0 }
 0x32b   : > { %2516 = vrot.lane.b32.xlu2 %v2414_v13, %s6887_s14  ;;  %v2539_v31 = vpop.permute.xlu1 %2538  ;;  %v2230_v30 = vadd.f32 %v2229_v0, %v2165_v4 }
 0x32c   : > { %2618 = vst.msk [vmem:[#allocation2 + $0x88] sm:$0xff] %vm2600_vm6, %v2539_v31 }
 0x32d   : > { %v2285_v60 = vpop.f32.mrf.mxu3 }
 0x32e   : > { %v2286_v3 = vadd.f32 %v2285_v60, %v2221_v56  ;;  %v1973_v60 = vadd.f32 %v8124_v39, %v1908_v61  ;;  %v2170_v39 = vpop.f32.mrf.mxu1 }
 0x330   : > { %v2399_v17 = vmul.f32 %v8193_v21, %v2286_v3  ;;  %vm2319_vm10 = vcmp.ge.f32.partialorder %v2286_v3, 0.0  ;;  %v2543_v21 = vpop.permute.xlu0 %2542 }
 0x331   : > { %2620 = vst.msk [vmem:[#allocation2 + $0x98] sm:$0xff] %vm2600_vm6, %v2543_v21  ;;  %v2232_v13 = vpop.f32.mrf.mxu2  ;;  %v10430_v21 = vld [vmem:[#allocation13_spill] sm:$0xff] }
 0x332   : > { %v2415_v34 = vsel %vm2319_vm10, %v2286_v3, %v2399_v17  ;;  %v2038_v3 = vadd.f32 %v8166_v63, %v1973_v60  ;;  %v2105_v15 = vpop.f32.mrf.mxu0  ;;  %v10436_v60 = vld [vmem:[#allocation19_spill] sm:$0xff] }
 0x333   : > { %2518 = vrot.lane.b32.xlu0 %v2415_v34, %s6887_s14  ;;  %v2545_v44 = vpop.permute.xlu1 %2544 }
 0x334   : > { %v2103_v50 = vadd.f32 %v2102_v19, %v2038_v3  ;;  %2621 = vst.msk [vmem:[#allocation2 + $0xa0] sm:$0xff] %vm2600_vm6, %v2545_v44 }
 0x335   : > { %v2288_v23 = vpop.f32.mrf.mxu3 }
 0x336   : > { %v2289_v14 = vadd.f32 %v2288_v23, %v2224_v16  ;;  %v2168_v41 = vadd.f32 %v2167_v20, %v2103_v50  ;;  %v1849_v16 = vadd.f32 %v8120_v6, %v7982_v53  ;;  %v10431_v6 = vld [vmem:[#allocation18_spill] sm:$0xff]  ;;  %v10439_v50 = vld [vmem:[#allocation15_spill] sm:$0xff] }
 0x338   : > { %v2400_v36 = vmul.f32 %v8205_v45, %v2289_v14  ;;  %vm2320_vm11 = vcmp.ge.f32.partialorder %v2289_v14, 0.0  ;;  %v2549_v49 = vpop.permute.xlu0 %2548  ;;  %v10429_v45 = vmov 0.0   ;;  %v2233_v29 = vadd.f32 %v2232_v13, %v2168_v41  ;;  %v10435_v13 = vld [vmem:[#allocation16_spill] sm:$0xff]  ;;  %v10440_v41 = vld [vmem:[#allocation17_spill] sm:$0xff] }
 0x339   : > { %3843 = vst.msk [vmem:[#allocation2 + $0x90] sm:$0xff] %vm522_vm0, %v10429_v45  ;;  %v2235_v63 = vpop.f32.mrf.mxu2 }
 0x33a   : > { %v2416_v51 = vsel %vm2320_vm11, %v2289_v14, %v2400_v36  ;;  %2623 = vst.msk [vmem:[#allocation2 + $0xb0] sm:$0xff] %vm2600_vm6, %v2549_v49  ;;  %v2108_v23 = vpop.f32.mrf.mxu0  ;;  %v10434_v49 = vld [vmem:[#allocation12_spill] sm:$0xff] }
 0x33b   : > { %2520 = vrot.lane.b32.xlu1 %v2416_v51, %s6887_s14 }
 0x33d   : > { %v2291_v8 = vpop.f32.mrf.mxu3 }
 0x33e   : > { %v2292_v2 = vadd.f32 %v2291_v8, %v2227_v35  ;;  %v10433_v35 = vld [vmem:[#allocation11_spill] sm:$0xff] }
 0x33f   : > { %v1852_v19 = vadd.f32 %v10433_v35, %v10432_v38 }
 0x340   : > { %v2401_v24 = vmul.f32 %v8214_v48, %v2292_v2  ;;  %vm2321_vm12 = vcmp.ge.f32.partialorder %v2292_v2, 0.0  ;;  %v2555_v5 = vpop.permute.xlu0 %2554  ;;  %v1846_v48 = vadd.f32 %v8110_v46, %v7969_v32 }
 0x341   : > { %2626 = vst.msk [vmem:[#allocation2 + $0xc8] sm:$0xff] %vm2600_vm6, %v2555_v5  ;;  %v2238_v36 = vpop.f32.mrf.mxu2  ;;  %v1917_v31 = vadd.f32 %v10434_v49, %v1852_v19  ;;  %v10438_v5 = vld [vmem:[#allocation14_spill] sm:$0xff]  ;;  %v8348_v38 = vld [vmem:[#allocation2 + $0xb0] sm:$0xff] }
 0x342   : > { %v2417_v56 = vsel %vm2321_vm12, %v2292_v2, %v2401_v24  ;;  %v1911_v17 = vadd.f32 %v8112_v12, %v1846_v48  ;;  %v8288_v2 = vld [vmem:[#allocation2 + $0xa8] sm:$0xff]  ;;  %v2111_v52 = vpop.f32.mrf.mxu0  ;;  %3847 = vst.msk [vmem:[#allocation2 + $0xb0] sm:$0xff] %vm522_vm0, %v10429_v45 }
 0x343   : > { %2522 = vrot.lane.b32.xlu2 %v2417_v56, %s6887_s14  ;;  %3846 = vst.msk [vmem:[#allocation2 + $0xa8] sm:$0xff] %vm522_vm0, %v10429_v45  ;;  %v1982_v24 = vadd.f32 %v10435_v13, %v1917_v31 }
 0x344   : > { %v1976_v34 = vadd.f32 %v8134_v37, %v1911_v17  ;;  %v1914_v37 = vadd.f32 %v8122_v33, %v1849_v16  ;;  %v8281_v33 = vld [vmem:[#allocation2 + $0x98] sm:$0xff] }
 0x345   : > { %v2294_v25 = vpop.f32.mrf.mxu3  ;;  %3844 = vst.msk [vmem:[#allocation2 + $0x98] sm:$0xff] %vm522_vm0, %v10429_v45 }
 0x346   : > { %v2295_v22 = vadd.f32 %v2294_v25, %v2230_v30  ;;  %v2041_v32 = vadd.f32 %v8176_v10, %v1976_v34  ;;  %v2173_v10 = vpop.f32.mrf.mxu1  ;;  %v1979_v18 = vadd.f32 %v10430_v21, %v1914_v37  ;;  %v2047_v30 = vadd.f32 %v10436_v60, %v1982_v24 }
 0x348   : > { %v2402_v40 = vmul.f32 %v8197_v1, %v2295_v22  ;;  %vm2322_vm13 = vcmp.ge.f32.partialorder %v2295_v22, 0.0  ;;  %v2561_v47 = vpop.permute.xlu0 %2560  ;;  %v2551_v1 = vpop.permute.xlu1 %2550  ;;  %v2106_v12 = vadd.f32 %v2105_v15, %v2041_v32  ;;  %v2044_v58 = vadd.f32 %v10431_v6, %v1979_v18  ;;  %v8316_v18 = vld [vmem:[#allocation2 + $0xc0] sm:$0xff]  ;;  %v8326_v6 = vld [vmem:[#allocation2 + $0x88] sm:$0xff] }
 0x349   : > { %2629 = vst.msk [vmem:[#allocation2 + $0xe0] sm:$0xff] %vm2600_vm6, %v2561_v47  ;;  %v2241_v3 = vpop.f32.mrf.mxu2  ;;  %v2112_v15 = vadd.f32 %v2111_v52, %v2047_v30  ;;  %v8307_v47 = vld [vmem:[#allocation2 + $0xa0] sm:$0xff]  ;;  %v8390_v24 = vld [vmem:[#allocation2 + $0xc8] sm:$0xff] }
 0x34a   : > { %v2418_v27 = vsel %vm2322_vm13, %v2295_v22, %v2402_v40  ;;  %2624 = vst.msk [vmem:[#allocation2 + $0xb8] sm:$0xff] %vm2600_vm6, %v2551_v1  ;;  %v2171_v42 = vadd.f32 %v2170_v39, %v2106_v12  ;;  %v2109_v8 = vadd.f32 %v2108_v23, %v2044_v58  ;;  %v10437_v22 = vld [vmem:[#allocation10_spill] sm:$0xff]  ;;  %v2114_v34 = vpop.f32.mrf.mxu0  ;;  %v2439_v12 = vld [vmem:[%s8132_s12 + $0x78] sm:$0xff] }
 0x34b   : > { %2524 = vrot.lane.b32.xlu0 %v2418_v27, %s6887_s14  ;;  %v1855_v44 = vadd.f32 %v10438_v5, %v10437_v22  ;;  %3845 = vst.msk [vmem:[#allocation2 + $0xa0] sm:$0xff] %vm522_vm0, %v10429_v45 }
 0x34c   : > { %v2236_v11 = vadd.f32 %v2235_v63, %v2171_v42  ;;  %v2174_v20 = vadd.f32 %v2173_v10, %v2109_v8  ;;  %3849 = vst.msk [vmem:[#allocation2 + $0xc0] sm:$0xff] %vm522_vm0, %v10429_v45 }
 0x34d   : > { %v2297_v9 = vpop.f32.mrf.mxu3  ;;  %v1920_v40 = vadd.f32 %v10439_v50, %v1855_v44  ;;  %3842 = vst.msk [vmem:[#allocation2 + $0x88] sm:$0xff] %vm522_vm0, %v10429_v45 }
 0x34e   : > { %v2298_v46 = vadd.f32 %v2297_v9, %v2233_v29  ;;  %v2239_v61 = vadd.f32 %v2238_v36, %v2174_v20  ;;  %v10441_v9 = vld [vmem:[#allocation20_spill] sm:$0xff]  ;;  %3850 = vst.msk [vmem:[#allocation2 + $0xc8] sm:$0xff] %vm522_vm0, %v10429_v45 }
 0x34f   : > { %v1985_v63 = vadd.f32 %v10440_v41, %v1920_v40 }
 0x350   : > { %v2403_v0 = vmul.f32 %v8211_v43, %v2298_v46  ;;  %vm2323_vm14 = vcmp.ge.f32.partialorder %v2298_v46, 0.0  ;;  %v2557_v51 = vpop.permute.xlu1 %2556 }
 0x351   : > { %2627 = vst.msk [vmem:[#allocation2 + $0xd0] sm:$0xff] %vm2600_vm6, %v2557_v51  ;;  %v2050_v32 = vadd.f32 %v10441_v9, %v1985_v63  ;;  %v2438_v51 = vld [vmem:[%s8132_s12 + $0x70] sm:$0xff]  ;;  %v8360_v8 = vld [vmem:[#allocation2 + $0xb8] sm:$0xff] }
 0x352   : > { %v2419_v14 = vsel %vm2323_vm14, %v2298_v46, %v2403_v0  ;;  %v2244_v0 = vpop.f32.mrf.mxu2  ;;  %3848 = vst.msk [vmem:[#allocation2 + $0xb8] sm:$0xff] %vm522_vm0, %v10429_v45 }
 0x353   : > { %2526 = vrot.lane.b32.xlu1 %v2419_v14, %s6887_s14 }
 0x355   : > { %v2300_v28 = vpop.f32.mrf.mxu3  ;;  %v2505_v53 = vpop.permute.xlu2 %2504 }
 0x356   : > { %v2301_v43 = vadd.f32 %v2300_v28, %v2236_v11  ;;  %2601 = vst.msk [vmem:[#allocation2] sm:$0xff] %vm2600_vm6, %v2505_v53  ;;  %v2437_v11 = vld [vmem:[%s8132_s12 + $0x68] sm:$0xff]  ;;  %v8324_v53 = vld [vmem:[#allocation2 + $0x80] sm:$0xff] }
 0x357   : > { %3841 = vst.msk [vmem:[#allocation2 + $0x80] sm:$0xff] %vm522_vm0, %v10429_v45 }
 0x358   : > { %v2404_v26 = vmul.f32 %v8226_v7, %v2301_v43  ;;  %vm2324_vm15 = vcmp.ge.f32.partialorder %v2301_v43, 0.0  ;;  %v2176_v7 = vpop.f32.mrf.mxu1  ;;  %v8403_v60 = vld [vmem:[#allocation2 + $0xd0] sm:$0xff] }
 0x359   : > { %v2177_v39 = vadd.f32 %v2176_v7, %v2112_v15  ;;  %3851 = vst.msk [vmem:[#allocation2 + $0xd0] sm:$0xff] %vm522_vm0, %v10429_v45 }
 0x35a   : > { %v2420_v54 = vsel %vm2324_vm15, %v2301_v43, %v2404_v26  ;;  %v8337_v43 = vpack.i.bf16 %v8281_v33, %v8247_v57 }
 0x35b   : > { %2528 = vrot.lane.b32.xlu2 %v2420_v54, %s6887_s14  ;;  %v2242_v27 = vadd.f32 %v2241_v3, %v2177_v39  ;;  %v8379_v54 = vld [vmem:[#allocation2 + $0xd8] sm:$0xff] }
 0x35c   : > { %3852 = vst.msk [vmem:[#allocation2 + $0xd8] sm:$0xff] %vm522_vm0, %v10429_v45 }
 0x35d   : > { %v2303_v4 = vpop.f32.mrf.mxu3  ;;  %v8295_v56 = vld [vmem:[#allocation2] sm:$0xff] }
 0x35e   : > { %v2304_v25 = vadd.f32 %v2303_v4, %v2239_v61  ;;  %3825 = vst.msk [vmem:[#allocation2] sm:$0xff] %vm522_vm0, %v10429_v45  ;;  %v8399_v4 = vld [vmem:[#allocation2 + $0xe0] sm:$0xff] }
 0x35f   : > { %3853 = vst.msk [vmem:[#allocation2 + $0xe0] sm:$0xff] %vm522_vm0, %v10429_v45 }
 0x360   : > { %v2405_v48 = vmul.f32 %v8201_v59, %v2304_v25  ;;  %vm2325_vm1 = vcmp.ge.f32.partialorder %v2304_v25, 0.0  ;;  %v2179_v1 = vpop.f32.mrf.mxu1  ;;  %v2115_v59 = vadd.f32 %v2114_v34, %v2050_v32 }
 0x362   : > { %v2421_v17 = vsel %vm2325_vm1, %v2304_v25, %v2405_v48  ;;  %v2180_v23 = vadd.f32 %v2179_v1, %v2115_v59 }
 0x363   : > { %2530 = vrot.lane.b32.xlu0 %v2421_v17, %s6887_s14 }
 0x364   : > { %v2245_v42 = vadd.f32 %v2244_v0, %v2180_v23 }
 0x365   : > { %v2306_v29 = vpop.f32.mrf.mxu3 }
 0x366   : > { %v2307_v46 = vadd.f32 %v2306_v29, %v2242_v27 }
 0x368   : > { %v2406_v16 = vmul.f32 %v8218_v62, %v2307_v46  ;;  %vm2326_vm2 = vcmp.ge.f32.partialorder %v2307_v46, 0.0 }
 0x36a   : > { %v2422_v37 = vsel %vm2326_vm2, %v2307_v46, %v2406_v16 }
 0x36b   : > { %2532 = vrot.lane.b32.xlu1 %v2422_v37, %s6887_s14  ;;  %2566 = vrot.lane.b32.xlu0 %v2439_v12, %s6887_s14 }
 0x36d   : > { %v2309_v14 = vpop.f32.mrf.mxu3  ;;  %v2511_v10 = vpop.permute.xlu2 %2510 }
 0x36e   : > { %v2310_v21 = vadd.f32 %v2309_v14, %v2245_v42  ;;  %2604 = vst.msk [vmem:[#allocation2 + $0x18] sm:$0xff] %vm2600_vm6, %v2511_v10 }
 0x370   : > { %v2407_v62 = vmul.f32 %v8238_v55, %v2310_v21  ;;  %vm2327_vm3 = vcmp.ge.f32.partialorder %v2310_v21, 0.0  ;;  %v8333_v55 = vpack.i.bf16 %v8326_v6, %v8324_v53 }
 0x372   : > { %v2423_v36 = vsel %vm2327_vm3, %v2310_v21, %v2407_v62  ;;  %v6230_v21 = vpack.i.bf16 %v8379_v54, %v8399_v4 }
 0x373   : > { %2562 = vrot.lane.b32.xlu1 %v2437_v11, %s6887_s14  ;;  %2534 = vrot.lane.b32.xlu2 %v2423_v36, %s6887_s14 }
 0x374   : > { %6171 = vrot.lane.b32.xlu0 %v8333_v55, %s6880_s20 }
 0x375   : > { %v2507_v28 = vpop.permute.xlu0 %2506  ;;  %v8329_v58 = vld [vmem:[#allocation2 + $0x18] sm:$0xff] }
 0x376   : > { %2602 = vst.msk [vmem:[#allocation2 + $0x8] sm:$0xff] %vm2600_vm6, %v2507_v28 }
 0x377   : > { %3828 = vst.msk [vmem:[#allocation2 + $0x18] sm:$0xff] %vm522_vm0, %v10429_v45 }
 0x37b   : > { %6176 = vrot.lane.b32.xlu1 %v8337_v43, %s6880_s20  ;;  %2564 = vrot.lane.b32.xlu2 %v2438_v51, %s6887_s14  ;;  %v6245_v51 = vpack.i.bf16 %v8288_v2, %v8348_v38 }
 0x37d   : > { %v2509_v35 = vpop.permute.xlu1 %2508  ;;  %v8356_v19 = vld [vmem:[#allocation2 + $0x8] sm:$0xff] }
 0x37e   : > { %2603 = vst.msk [vmem:[#allocation2 + $0x10] sm:$0xff] %vm2600_vm6, %v2509_v35  ;;  %v8366_v26 = vpack.i.bf16 %v8356_v19, %v8295_v56 }
 0x37f   : > { %3826 = vst.msk [vmem:[#allocation2 + $0x8] sm:$0xff] %vm522_vm0, %v10429_v45 }
 0x383   : > { %6181 = vrot.lane.b32.xlu1 %v8366_v26, %s6880_s20 }
 0x385   : > { %v2517_v49 = vpop.permute.xlu2 %2516  ;;  %v8370_v31 = vld [vmem:[#allocation2 + $0x10] sm:$0xff] }
 0x386   : > { %2607 = vst.msk [vmem:[#allocation2 + $0x30] sm:$0xff] %vm2600_vm6, %v2517_v49  ;;  %v8375_v20 = vpack.i.bf16 %v8329_v58, %v8370_v31 }
 0x387   : > { %3827 = vst.msk [vmem:[#allocation2 + $0x10] sm:$0xff] %vm522_vm0, %v10429_v45 }
 0x388   : > { %6186 = vrot.lane.b32.xlu2 %v8375_v20, %s6880_s20 }
 0x38d   : > { %v2513_v52 = vpop.permute.xlu0 %2512  ;;  %v8386_v13 = vld [vmem:[#allocation2 + $0x30] sm:$0xff] }
 0x38e   : > { %2605 = vst.msk [vmem:[#allocation2 + $0x20] sm:$0xff] %vm2600_vm6, %v2513_v52  ;;  %v6235_v52 = vpack.i.bf16 %v8390_v24, %v8403_v60 }
 0x38f   : > { %3831 = vst.msk [vmem:[#allocation2 + $0x30] sm:$0xff] %vm522_vm0, %v10429_v45 }
 0x395   : > { %v2515_v61 = vpop.permute.xlu1 %2514  ;;  %v8395_v7 = vld [vmem:[#allocation2 + $0x20] sm:$0xff] }
 0x396   : > { %2606 = vst.msk [vmem:[#allocation2 + $0x28] sm:$0xff] %vm2600_vm6, %v2515_v61  ;;  %v6240_v61 = vpack.i.bf16 %v8360_v8, %v8316_v18 }
 0x397   : > { %3829 = vst.msk [vmem:[#allocation2 + $0x20] sm:$0xff] %vm522_vm0, %v10429_v45 }
 0x39d   : > { %v2523_v30 = vpop.permute.xlu2 %2522  ;;  %v8407_v25 = vld [vmem:[#allocation2 + $0x28] sm:$0xff] }
 0x39e   : > { %2610 = vst.msk [vmem:[#allocation2 + $0x48] sm:$0xff] %vm2600_vm6, %v2523_v30  ;;  %v8412_v3 = vpack.i.bf16 %v8407_v25, %v8395_v7  ;;  %v6310_v30 = vpack.i.bf16 %v8379_v54, %v8403_v60 }
 0x39f   : > { %3830 = vst.msk [vmem:[#allocation2 + $0x28] sm:$0xff] %vm522_vm0, %v10429_v45 }
 0x3a0   : > { %6191 = vrot.lane.b32.xlu0 %v8412_v3, %s6880_s20 }
 0x3a5   : > { %v2519_v22 = vpop.permute.xlu0 %2518  ;;  %v8419_v5 = vld [vmem:[#allocation2 + $0x48] sm:$0xff] }
 0x3a6   : > { %2608 = vst.msk [vmem:[#allocation2 + $0x38] sm:$0xff] %vm2600_vm6, %v2519_v22  ;;  %v2986_v22 = vld [vmem:[%s10408_s6 + $0x8] sm:$0xff] }
 0x3a7   : > { %3834 = vst.msk [vmem:[#allocation2 + $0x48] sm:$0xff] %vm522_vm0, %v10429_v45 }
 0x3ad   : > { %v2521_v44 = vpop.permute.xlu1 %2520  ;;  %v8423_v15 = vld [vmem:[#allocation2 + $0x38] sm:$0xff] }
 0x3ae   : > { %2609 = vst.msk [vmem:[#allocation2 + $0x40] sm:$0xff] %vm2600_vm6, %v2521_v44  ;;  %v8428_v48 = vpack.i.bf16 %v8423_v15, %v8386_v13 }
 0x3af   : > { %3832 = vst.msk [vmem:[#allocation2 + $0x38] sm:$0xff] %vm522_vm0, %v10429_v45 }
 0x3b0   : > { %6196 = vrot.lane.b32.xlu1 %v8428_v48, %s6880_s20 }
 0x3b5   : > { %v2529_v50 = vpop.permute.xlu2 %2528  ;;  %v8434_v40 = vld [vmem:[#allocation2 + $0x40] sm:$0xff] }
 0x3b6   : > { %2613 = vst.msk [vmem:[#allocation2 + $0x60] sm:$0xff] %vm2600_vm6, %v2529_v50  ;;  %v8439_v39 = vpack.i.bf16 %v8419_v5, %v8434_v40  ;;  %v2993_v50 = vld [vmem:[%s10408_s6 + $0x40] sm:$0xff] }
 0x3b7   : > { %3833 = vst.msk [vmem:[#allocation2 + $0x40] sm:$0xff] %vm522_vm0, %v10429_v45 }
 0x3b8   : > { %6201 = vrot.lane.b32.xlu2 %v8439_v39, %s6880_s20 }
 0x3bd   : > { %v2525_v17 = vpop.permute.xlu0 %2524  ;;  %v8446_v41 = vld [vmem:[#allocation2 + $0x60] sm:$0xff] }
 0x3be   : > { %2611 = vst.msk [vmem:[#allocation2 + $0x50] sm:$0xff] %vm2600_vm6, %v2525_v17  ;;  %v2994_v17 = vld [vmem:[%s10408_s6 + $0x48] sm:$0xff] }
 0x3bf   : > { %3837 = vst.msk [vmem:[#allocation2 + $0x60] sm:$0xff] %vm522_vm0, %v10429_v45 }
 0x3c5   : > { %v2527_v63 = vpop.permute.xlu1 %2526  ;;  %v8451_v27 = vld [vmem:[#allocation2 + $0x50] sm:$0xff] }
 0x3c6   : > { %2612 = vst.msk [vmem:[#allocation2 + $0x58] sm:$0xff] %vm2600_vm6, %v2527_v63  ;;  %v3001_v63 = vld [vmem:[%s10408_s6 + $0x80] sm:$0xff] }
 0x3c7   : > { %3835 = vst.msk [vmem:[#allocation2 + $0x50] sm:$0xff] %vm522_vm0, %v10429_v45 }
 0x3cd   : > { %v2535_v34 = vpop.permute.xlu2 %2534  ;;  %v8455_v29 = vld [vmem:[#allocation2 + $0x58] sm:$0xff] }
 0x3ce   : > { %2616 = vst.msk [vmem:[#allocation2 + $0x78] sm:$0xff] %vm2600_vm6, %v2535_v34  ;;  %v8460_v9 = vpack.i.bf16 %v8455_v29, %v8451_v27 }
 0x3cf   : > { %3836 = vst.msk [vmem:[#allocation2 + $0x58] sm:$0xff] %vm522_vm0, %v10429_v45 }
 0x3d0   : > { %6206 = vrot.lane.b32.xlu0 %v8460_v9, %s6880_s20 }
 0x3d5   : > { %v2531_v32 = vpop.permute.xlu0 %2530  ;;  %v2565_v46 = vpop.permute.xlu2 %2564  ;;  %v8466_v1 = vld [vmem:[#allocation2 + $0x78] sm:$0xff] }
 0x3d6   : > { %2614 = vst.msk [vmem:[#allocation2 + $0x68] sm:$0xff] %vm2600_vm6, %v2531_v32  ;;  %3177 = vmatpush.msrb.mxu0 %v8466_v1  ;;  %v6360_v32 = vpack.i.bf16 %v8434_v40, %v8403_v60 }
 0x3d7   : > { %2631 = vst.msk [vmem:[#allocation2 + $0xf0] sm:$0xff] %vm2600_vm6, %v2565_v46 }
 0x3d8   : > { %3840 = vst.msk [vmem:[#allocation2 + $0x78] sm:$0xff] %vm522_vm0, %v10429_v45 }
 0x3dd   : > { %v2567_v59 = vpop.permute.xlu0 %2566  ;;  %v2533_v16 = vpop.permute.xlu1 %2532  ;;  %v8473_v12 = vld [vmem:[#allocation2 + $0x68] sm:$0xff] }
 0x3de   : > { %2632 = vst.msk [vmem:[#allocation2 + $0xf8] sm:$0xff] %vm2600_vm6, %v2567_v59  ;;  %v8478_v0 = vpack.i.bf16 %v8473_v12, %v8446_v41  ;;  %v8480_v23 = vld [vmem:[#allocation2 + $0xf0] sm:$0xff] }
 0x3df   : > { %2615 = vst.msk [vmem:[#allocation2 + $0x70] sm:$0xff] %vm2600_vm6, %v2533_v16  ;;  %v6330_v37 = vpack.i.bf16 %v8446_v41, %v8480_v23 }
 0x3e0   : > { %6211 = vrot.lane.b32.xlu1 %v8478_v0, %s6880_s20  ;;  %3838 = vst.msk [vmem:[#allocation2 + $0x68] sm:$0xff] %vm522_vm0, %v10429_v45 }
 0x3e1   : > { %3855 = vst.msk [vmem:[#allocation2 + $0xf0] sm:$0xff] %vm522_vm0, %v10429_v45 }
 0x3e2   : > { %v8640_v34 = vpop.permute.xlu2 %6186 }
 0x3e5   : > { %v2563_v42 = vpop.permute.xlu1 %2562  ;;  %v8491_v14 = vld [vmem:[#allocation2 + $0xf8] sm:$0xff] }
 0x3e6   : > { %2630 = vst.msk [vmem:[#allocation2 + $0xe8] sm:$0xff] %vm2600_vm6, %v2563_v42  ;;  %v8494_v10 = vld [vmem:[#allocation2 + $0x70] sm:$0xff]  ;;  %3242 = vmatpush.msrb.mxu1 %v8491_v14  ;;  %v6320_v62 = vpack.i.bf16 %v8491_v14, %v8480_v23  ;;  %v6220_v49 = vpack.i.bf16 %v8491_v14, %v8307_v47  ;;  %v6325_v44 = vpack.i.bf16 %v8473_v12, %v8491_v14 }
 0x3e7   : > { %3178 = vmatpush.msrb.mxu0 %v8494_v10  ;;  %3839 = vst.msk [vmem:[#allocation2 + $0x70] sm:$0xff] %vm522_vm0, %v10429_v45  ;;  %v8506_v11 = vpack.i.bf16 %v8466_v1, %v8494_v10  ;;  %v6355_v36 = vpack.i.bf16 %v8494_v10, %v8466_v1  ;;  %v8677_v1 = vpop.permute.xlu0 %6171 }
 0x3e8   : > { %6231 = vrot.lane.b32.xlu1 %v6230_v21, %s6880_s20  ;;  %3856 = vst.msk [vmem:[#allocation2 + $0xf8] sm:$0xff] %vm522_vm0, %v10429_v45  ;;  %3243 = vmatpush.msrb.mxu1 %v8480_v23 }
 0x3e9   : > { %6216 = vrot.lane.b32.xlu2 %v8506_v11, %s6880_s20  ;;  %3179 = vmatpush.msrb.mxu0 %v8473_v12 }
 0x3eb   : > { %3180 = vmatpush.msrb.mxu0 %v8446_v41  ;;  %v6380_v41 = vpack.i.bf16 %v8395_v7, %v8348_v38 }
 0x3ed   : > { %3181 = vmatpush.msrb.mxu0 %v8455_v29  ;;  %v8519_v28 = vld [vmem:[#allocation2 + $0xe8] sm:$0xff] }
 0x3ee   : > { %3244 = vmatpush.msrb.mxu1 %v8519_v28  ;;  %3854 = vst.msk [vmem:[#allocation2 + $0xe8] sm:$0xff] %vm522_vm0, %v10429_v45  ;;  %v6225_v35 = vpack.i.bf16 %v8519_v28, %v8480_v23 }
 0x3ef   : > { %3182 = vmatpush.msrb.mxu0 %v8451_v27 }
 0x3f0   : > { %6246 = vrot.lane.b32.xlu1 %v6245_v51, %s6880_s20  ;;  %6226 = vrot.lane.b32.xlu0 %v6225_v35, %s6880_s20  ;;  %v3049_v51 = vld [vmem:[%s10408_s6 + $0x200] sm:$0xff]  ;;  %v3050_v35 = vld [vmem:[%s10408_s6 + $0x208] sm:$0xff] }
 0x3f1   : > { %6221 = vrot.lane.b32.xlu2 %v6220_v49, %s6880_s20  ;;  %3183 = vmatpush.msrb.mxu0 %v8419_v5 }
 0x3f2   : > { %3245 = vmatpush.msrb.mxu1 %v8399_v4 }
 0x3f3   : > { %3184 = vmatpush.msrb.mxu0 %v8434_v40 }
 0x3f4   : > { %3246 = vmatpush.msrb.mxu1 %v8379_v54 }
 0x3f5   : > { %3185 = vmatpush.msrb.mxu0 %v8423_v15 }
 0x3f6   : > { %3247 = vmatpush.msrb.mxu1 %v8403_v60  ;;  %v6370_v60 = vpack.i.bf16 %v8386_v13, %v8316_v18 }
 0x3f7   : > { %3186 = vmatpush.msrb.mxu0 %v8386_v13  ;;  %v6390_v13 = vpack.i.bf16 %v8370_v31, %v8307_v47 }
 0x3f8   : > { %3248 = vmatpush.msrb.mxu1 %v8390_v24  ;;  %6261 = vrot.lane.b32.xlu1 %v8412_v3, %s6881_s21  ;;  %v2985_v3 = vld [vmem:[%s10408_s6] sm:$0xff] }
 0x3f9   : > { %6236 = vrot.lane.b32.xlu2 %v6235_v52, %s6880_s20  ;;  %3187 = vmatpush.msrb.mxu0 %v8407_v25 }
 0x3fa   : > { %6241 = vrot.lane.b32.xlu0 %v6240_v61, %s6880_s20  ;;  %3249 = vmatpush.msrb.mxu1 %v8316_v18 }
 0x3fb   : > { %3188 = vmatpush.msrb.mxu0 %v8395_v7  ;;  %v6395_v7 = vpack.i.bf16 %v8356_v19, %v8281_v33 }
 0x3fc   : > { %3250 = vmatpush.msrb.mxu1 %v8360_v8 }
 0x3fd   : > { %3189 = vmatpush.msrb.mxu0 %v8329_v58 }
 0x3fe   : > { %3251 = vmatpush.msrb.mxu1 %v8348_v38 }
 0x3ff   : > { %3190 = vmatpush.msrb.mxu0 %v8370_v31 }
 0x400   : > { %3252 = vmatpush.msrb.mxu1 %v8288_v2  ;;  %6276 = vrot.lane.b32.xlu1 %v8460_v9, %s6881_s21  ;;  %v8652_v9 = vpop.permute.xlu1 %6176 }
 0x401   : > { %6251 = vrot.lane.b32.xlu2 %v8366_v26, %s6881_s21  ;;  %3191 = vmatpush.msrb.mxu0 %v8356_v19  ;;  %v6300_v26 = vpack.i.bf16 %v8360_v8, %v8348_v38  ;;  %v3017_v38 = vld [vmem:[%s10408_s6 + $0x100] sm:$0xff] }
 0x402   : > { %6256 = vrot.lane.b32.xlu0 %v8375_v20, %s6881_s21  ;;  %3253 = vmatpush.msrb.mxu1 %v8307_v47  ;;  %v6295_v20 = vpack.i.bf16 %v8288_v2, %v8307_v47  ;;  %v6400_v47 = vpack.i.bf16 %v8295_v56, %v8247_v57 }
 0x403   : > { %3192 = vmatpush.msrb.mxu0 %v8295_v56 }
 0x404   : > { %3254 = vmatpush.msrb.mxu1 %v8281_v33  ;;  %3193 = vmatmul.f32.vlgmr.msrb.gmra.mxu0 %v2985_v3  ;;  %v3025_v33 = vld [vmem:[%s10408_s6 + $0x140] sm:$0xff] }
 0x406   : > { %3255 = vmatpush.msrb.mxu1 %v8247_v57  ;;  %v3042_v57 = vld [vmem:[%s10408_s6 + $0x1c8] sm:$0xff] }
 0x408   : > { %3256 = vmatpush.msrb.mxu1 %v8326_v6  ;;  %6286 = vrot.lane.b32.xlu1 %v8333_v55, %s6881_s21  ;;  %v6315_v55 = vpack.i.bf16 %v8519_v28, %v8399_v4  ;;  %v8675_v40 = vpop.permute.xlu1 %6181 }
 0x409   : > { %6266 = vrot.lane.b32.xlu2 %v8428_v48, %s6881_s21  ;;  %v6305_v48 = vpack.i.bf16 %v8390_v24, %v8316_v18  ;;  %v3026_v18 = vld [vmem:[%s10408_s6 + $0x148] sm:$0xff] }
 0x40a   : > { %6271 = vrot.lane.b32.xlu0 %v8439_v39, %s6881_s21  ;;  %3257 = vmatpush.msrb.mxu1 %v8324_v53  ;;  %v6340_v39 = vpack.i.bf16 %v8451_v27, %v8399_v4  ;;  %v6365_v4 = vpack.i.bf16 %v8423_v15, %v8390_v24  ;;  %v3002_v27 = vld [vmem:[%s10408_s6 + $0x88] sm:$0xff]  ;;  %v3009_v24 = vld [vmem:[%s10408_s6 + $0xc0] sm:$0xff] }
 0x40b   : > { %3258 = vmatmul.f32.vlgmr.msrb.gmra.mxu1 %v2986_v22  ;;  %v3010_v15 = vld [vmem:[%s10408_s6 + $0xc8] sm:$0xff] }
 0x40c   : > { %3196 = vmatmul.f32.gmra.mxu0 %v2993_v50 }
 0x410   : > { %6301 = vrot.lane.b32.xlu1 %v6300_v26, %s6881_s21 }
 0x411   : > { %6281 = vrot.lane.b32.xlu2 %v8478_v0, %s6881_s21 }
 0x412   : > { %6296 = vrot.lane.b32.xlu0 %v6295_v20, %s6881_s21  ;;  %v8659_v46 = vpop.permute.xlu2 %6201  ;;  %v6192_v0 = vpop.permute.xlu0 %6191 }
 0x413   : > { %3261 = vmatmul.f32.gmra.mxu1 %v2994_v17  ;;  %v6194_v20 = vunpack.i.h.bf16 %v6192_v0  ;;  %v6193_v3 = vunpack.i.l.bf16 %v6192_v0 }
 0x414   : > { %3199 = vmatmul.f32.gmra.mxu0 %v3001_v63 }
 0x418   : > { %6316 = vrot.lane.b32.xlu1 %v6315_v55, %s6881_s21 }
 0x419   : > { %6291 = vrot.lane.b32.xlu2 %v8337_v43, %s6881_s21  ;;  %v6335_v43 = vpack.i.bf16 %v8455_v29, %v8519_v28  ;;  %v6345_v29 = vpack.i.bf16 %v8419_v5, %v8379_v54  ;;  %v3018_v54 = vld [vmem:[%s10408_s6 + $0x108] sm:$0xff]  ;;  %v6375_v5 = vpack.i.bf16 %v8407_v25, %v8360_v8  ;;  %v6385_v8 = vpack.i.bf16 %v8329_v58, %v8288_v2 }
 0x41a   : > { %6311 = vrot.lane.b32.xlu0 %v6310_v30, %s6881_s21  ;;  %v3034_v2 = vld [vmem:[%s10408_s6 + $0x188] sm:$0xff]  ;;  %v6405_v58 = vpack.i.bf16 %v8324_v53, %v8326_v6  ;;  %v6203_v28 = vunpack.i.l.bf16 %v8659_v46 }
 0x41b   : > { %3264 = vmatmul.f32.gmra.mxu1 %v3002_v27 }
 0x41c   : > { %3202 = vmatmul.f32.gmra.mxu0 %v3009_v24 }
 0x420   : > { %6326 = vrot.lane.b32.xlu1 %v6325_v44, %s6882_s22  ;;  %v3057_v44 = vld [vmem:[%s10408_s6 + $0x240] sm:$0xff] }
 0x421   : > { %6306 = vrot.lane.b32.xlu2 %v6305_v48, %s6881_s21  ;;  %v3058_v48 = vld [vmem:[%s10408_s6 + $0x248] sm:$0xff] }
 0x422   : > { %6336 = vrot.lane.b32.xlu0 %v6335_v43, %s6882_s22  ;;  %v6197_v25 = vpop.permute.xlu1 %6196  ;;  %v6189_v43 = vunpack.i.h.bf16 %v8640_v34 }
 0x423   : > { %3267 = vmatmul.f32.gmra.mxu1 %v3010_v15  ;;  %v6199_v49 = vunpack.i.h.bf16 %v6197_v25  ;;  %v6198_v52 = vunpack.i.l.bf16 %v6197_v25  ;;  %v3074_v25 = vld [vmem:[%s10408_s6 + $0x2c8] sm:$0xff] }
 0x424   : > { %3205 = vmatmul.f32.gmra.mxu0 %v3017_v38  ;;  %v3066_v38 = vld [vmem:[%s10408_s6 + $0x288] sm:$0xff] }
 0x428   : > { %6341 = vrot.lane.b32.xlu1 %v6340_v39, %s6882_s22  ;;  %v6188_v39 = vunpack.i.l.bf16 %v8640_v34  ;;  %v2987_v34 = vld [vmem:[%s10408_s6 + $0x10] sm:$0xff] }
 0x429   : > { %6321 = vrot.lane.b32.xlu2 %v6320_v62, %s6881_s21  ;;  %v3041_v62 = vld [vmem:[%s10408_s6 + $0x1c0] sm:$0xff] }
 0x42a   : > { %6351 = vrot.lane.b32.xlu0 %v8506_v11, %s6881_s21  ;;  %v6204_v11 = vunpack.i.h.bf16 %v8659_v46  ;;  %v6888_v46 = vmov 2  }
 0x42b   : > { %3270 = vmatmul.f32.gmra.mxu1 %v3018_v54  ;;  %6410 = vset.pattern.permute.xlu1 %v6888_v46 }
 0x42c   : > { %3208 = vmatmul.f32.gmra.mxu0 %v3025_v33  ;;  %6412 = vset.pattern.permute.xlu0 %v6888_v46 }
 0x42d   : > { %6411 = vset.pattern.permute.xlu2 %v6888_v46 }
 0x430   : > { %6366 = vrot.lane.b32.xlu1 %v6365_v4, %s6882_s22  ;;  %v6184_v4 = vunpack.i.h.bf16 %v8675_v40 }
 0x431   : > { %6331 = vrot.lane.b32.xlu2 %v6330_v37, %s6882_s22  ;;  %v3033_v37 = vld [vmem:[%s10408_s6 + $0x180] sm:$0xff] }
 0x432   : > { %6356 = vrot.lane.b32.xlu0 %v6355_v36, %s6882_s22 }
 0x433   : > { %3273 = vmatmul.f32.gmra.mxu1 %v3026_v18  ;;  %v8776_v18 = vld [vmem:[%s10411_s9 + $0x8] sm:$0xff] }
 0x434   : > { %3211 = vmatmul.f32.gmra.mxu0 %v3033_v37  ;;  %v6179_v37 = vunpack.i.h.bf16 %v8652_v9 }
 0x438   : > { %6381 = vrot.lane.b32.xlu1 %v6380_v41, %s6882_s22  ;;  %v6183_v41 = vunpack.i.l.bf16 %v8675_v40 }
 0x439   : > { %6346 = vrot.lane.b32.xlu2 %v6345_v29, %s6882_s22 }
 0x43a   : > { %6361 = vrot.lane.b32.xlu0 %v6360_v32, %s6882_s22  ;;  %v3065_v32 = vld [vmem:[%s10408_s6 + $0x280] sm:$0xff] }
 0x43b   : > { %3276 = vmatmul.f32.gmra.mxu1 %v3034_v2 }
 0x43c   : > { %3214 = vmatmul.f32.gmra.mxu0 %v3041_v62  ;;  %v2988_v62 = vld [vmem:[%s10408_s6 + $0x18] sm:$0xff] }
 0x440   : > { %6396 = vrot.lane.b32.xlu1 %v6395_v7, %s6882_s22  ;;  %v8757_v7 = vld [vmem:[%s10411_s9] sm:$0xff] }
 0x441   : > { %6371 = vrot.lane.b32.xlu2 %v6370_v60, %s6882_s22 }
 0x442   : > { %6376 = vrot.lane.b32.xlu0 %v6375_v5, %s6882_s22  ;;  %v6207_v10 = vpop.permute.xlu0 %6206 }
 0x443   : > { %v6217_v59 = vpop.permute.xlu2 %6216  ;;  %v6209_v56 = vunpack.i.h.bf16 %v6207_v10  ;;  %3279 = vmatmul.f32.gmra.mxu1 %v3042_v57  ;;  %v6208_v53 = vunpack.i.l.bf16 %v6207_v10  ;;  %v3081_v10 = vld [vmem:[%s10408_s6 + $0x300] sm:$0xff]  ;;  %v3082_v57 = vld [vmem:[%s10408_s6 + $0x308] sm:$0xff] }
 0x444   : > { %v6219_v16 = vunpack.i.h.bf16 %v6217_v59  ;;  %v6218_v19 = vunpack.i.l.bf16 %v6217_v59  ;;  %3217 = vmatmul.f32.gmra.mxu0 %v3049_v51  ;;  %v8849_v51 = vld [vmem:[%s10411_s9 + $0x30] sm:$0xff] }
 0x446   : > { %3307 = vmatpush.msrb.mxu2 %v6219_v16  ;;  %v8768_v16 = vld [vmem:[%s10411_s9 + $0x10] sm:$0xff] }
 0x448   : > { %3308 = vmatpush.msrb.mxu2 %v6218_v19  ;;  %3114 = vperm.xlu1 %6410, %v8757_v7  }
 0x449   : > { %6386 = vrot.lane.b32.xlu2 %v6385_v8, %s6882_s22  ;;  %v2995_v8 = vld [vmem:[%s10408_s6 + $0x50] sm:$0xff] }
 0x44a   : > { %6391 = vrot.lane.b32.xlu0 %v6390_v13, %s6882_s22  ;;  %v3073_v13 = vld [vmem:[%s10408_s6 + $0x2c0] sm:$0xff] }
 0x44b   : > { %v8692_v12 = vpop.permute.xlu2 %6221  ;;  %3282 = vmatmul.f32.gmra.mxu1 %v3050_v35  ;;  %v3011_v35 = vld [vmem:[%s10408_s6 + $0xd0] sm:$0xff] }
 0x44c   : > { %v6224_v23 = vunpack.i.h.bf16 %v8692_v12  ;;  %3220 = vmatmul.f32.gmra.mxu0 %v3057_v44  ;;  %v6223_v0 = vunpack.i.l.bf16 %v8692_v12  ;;  %v8805_v12 = vld [vmem:[%s10411_s9 + $0x38] sm:$0xff] }
 0x44e   : > { %3372 = vmatpush.msrb.mxu3 %v6224_v23  ;;  %v8793_v23 = vld [vmem:[%s10411_s9 + $0x18] sm:$0xff] }
 0x450   : > { %3126 = vperm.xlu1 %6410, %v8793_v23  }
 0x451   : > { %6401 = vrot.lane.b32.xlu2 %v6400_v47, %s6882_s22  ;;  %v6178_v47 = vunpack.i.l.bf16 %v8652_v9  ;;  %v6174_v9 = vunpack.i.h.bf16 %v8677_v1 }
 0x452   : > { %6406 = vrot.lane.b32.xlu0 %v6405_v58, %s6882_s22  ;;  %v6212_v31 = vpop.permute.xlu1 %6211 }
 0x453   : > { %v8707_v42 = vpop.permute.xlu2 %6236  ;;  %v6214_v14 = vunpack.i.h.bf16 %v6212_v31  ;;  %v6213_v21 = vunpack.i.l.bf16 %v6212_v31  ;;  %3285 = vmatmul.f32.gmra.mxu1 %v3058_v48  ;;  %v8879_v48 = vld [vmem:[%s10411_s9 + $0x48] sm:$0xff] }
 0x454   : > { %v6238_v27 = vunpack.i.l.bf16 %v8707_v42  ;;  %v6239_v29 = vunpack.i.h.bf16 %v8707_v42  ;;  %3223 = vmatmul.f32.gmra.mxu0 %v3065_v32  ;;  %v8813_v42 = vld [vmem:[%s10411_s9 + $0x20] sm:$0xff] }
 0x455   : > { %3309 = vmatpush.msrb.mxu2 %v6214_v14  ;;  %v3003_v14 = vld [vmem:[%s10408_s6 + $0x90] sm:$0xff] }
 0x457   : > { %3310 = vmatpush.msrb.mxu2 %v6213_v21  ;;  %v6173_v21 = vunpack.i.l.bf16 %v8677_v1 }
 0x459   : > { %3311 = vmatpush.msrb.mxu2 %v6209_v56  ;;  %3118 = vperm.xlu2 %6411, %v8776_v18   ;;  %v8833_v56 = vld [vmem:[%s10411_s9 + $0x28] sm:$0xff] }
 0x45a   : > { %v6232_v6 = vpop.permute.xlu1 %6231  ;;  %3122 = vperm.xlu0 %6412, %v8768_v16   ;;  %3134 = vperm.xlu1 %6410, %v8833_v56  }
 0x45b   : > { %v8716_v36 = vpop.permute.xlu2 %6251  ;;  %3312 = vmatpush.msrb.mxu2 %v6208_v53  ;;  %v6233_v50 = vunpack.i.l.bf16 %v6232_v6  ;;  %v6234_v17 = vunpack.i.h.bf16 %v6232_v6  ;;  %3288 = vmatmul.f32.gmra.mxu1 %v3066_v38  ;;  %v8841_v6 = vld [vmem:[%s10411_s9 + $0x50] sm:$0xff] }
 0x45c   : > { %3226 = vmatmul.f32.gmra.mxu0 %v3073_v13 }
 0x45d   : > { %3313 = vmatpush.msrb.mxu2 %v6204_v11 }
 0x45f   : > { %3314 = vmatpush.msrb.mxu2 %v6203_v28 }
 0x461   : > { %3315 = vmatpush.msrb.mxu2 %v6199_v49  ;;  %3130 = vperm.xlu2 %6411, %v8813_v42   ;;  %v3089_v49 = vld [vmem:[%s10408_s6 + $0x340] sm:$0xff] }
 0x462   : > { %v6227_v61 = vpop.permute.xlu0 %6226  ;;  %v8725_v26 = vpop.permute.xlu1 %6246  ;;  %3142 = vperm.xlu0 %6412, %v8805_v12  }
 0x463   : > { %v8727_v55 = vpop.permute.xlu2 %6266  ;;  %v6228_v30 = vunpack.i.l.bf16 %v6227_v61  ;;  %3316 = vmatpush.msrb.mxu2 %v6198_v52  ;;  %v6229_v22 = vunpack.i.h.bf16 %v6227_v61  ;;  %v6248_v40 = vunpack.i.l.bf16 %v8725_v26  ;;  %v6249_v19 = vunpack.i.h.bf16 %v8725_v26  ;;  %3291 = vmatmul.f32.gmra.mxu1 %v3074_v25  ;;  %v2996_v61 = vld [vmem:[%s10408_s6 + $0x58] sm:$0xff]  ;;  %v3090_v26 = vld [vmem:[%s10408_s6 + $0x348] sm:$0xff] }
 0x464   : > { %3229 = vmatmul.f32.gmra.mxu0 %v3081_v10 }
 0x465   : > { %3317 = vmatpush.msrb.mxu2 %v6194_v20  ;;  %3373 = vmatpush.msrb.mxu3 %v6228_v30  ;;  %v8867_v20 = vld [vmem:[%s10411_s9 + $0x40] sm:$0xff] }
 0x466   : > { %3146 = vperm.xlu1 %6410, %v8867_v20  }
 0x467   : > { %3318 = vmatpush.msrb.mxu2 %v6193_v3  ;;  %3374 = vmatpush.msrb.mxu3 %v6229_v22  ;;  %v8873_v22 = vld [vmem:[%s10411_s9 + $0x68] sm:$0xff] }
 0x469   : > { %3319 = vmatpush.msrb.mxu2 %v6189_v43  ;;  %3375 = vmatpush.msrb.mxu3 %v6233_v50  ;;  %v3019_v50 = vld [vmem:[%s10408_s6 + $0x110] sm:$0xff] }
 0x46a   : > { %v8737_v63 = vpop.permute.xlu1 %6261  ;;  %3154 = vperm.xlu0 %6412, %v8841_v6   ;;  %3138 = vperm.xlu2 %6411, %v8849_v51  }
 0x46b   : > { %v8741_v24 = vpop.permute.xlu2 %6281  ;;  %3320 = vmatpush.msrb.mxu2 %v6188_v39  ;;  %3376 = vmatpush.msrb.mxu3 %v6234_v17  ;;  %v3097_v39 = vld [vmem:[%s10408_s6 + $0x380] sm:$0xff] }
 0x46c   : > { %v6242_v15 = vpop.permute.xlu0 %6241  ;;  %3294 = vmatmul.f32.gmra.mxu1 %v3082_v57  ;;  %3232 = vmatmul.f32.gmra.mxu0 %v3089_v49  ;;  %v8946_v57 = vld [vmem:[%s10411_s9 + $0x78] sm:$0xff] }
 0x46d   : > { %3321 = vmatpush.msrb.mxu2 %v6184_v4  ;;  %3377 = vmatpush.msrb.mxu3 %v6238_v27  ;;  %v6243_v54 = vunpack.i.l.bf16 %v6242_v15  ;;  %v6244_v60 = vunpack.i.h.bf16 %v6242_v15  ;;  %v3004_v4 = vld [vmem:[%s10408_s6 + $0x98] sm:$0xff]  ;;  %v3098_v27 = vld [vmem:[%s10408_s6 + $0x388] sm:$0xff] }
 0x46f   : > { %3322 = vmatpush.msrb.mxu2 %v6183_v41  ;;  %3378 = vmatpush.msrb.mxu3 %v6239_v29  ;;  %v8899_v29 = vld [vmem:[%s10411_s9 + $0x58] sm:$0xff] }
 0x470   : > { %3323 = vmatmul.f32.vlgmr.msrb.gmra.mxu2 %v2987_v34  ;;  %3158 = vperm.xlu1 %6410, %v8899_v29  }
 0x471   : > { %3379 = vmatpush.msrb.mxu3 %v6243_v54  ;;  %v8911_v54 = vld [vmem:[%s10411_s9 + $0x60] sm:$0xff] }
 0x472   : > { %v8760_v5 = vpop.permute.xlu1 %6276  ;;  %3166 = vperm.xlu0 %6412, %v8873_v22   ;;  %3150 = vperm.xlu2 %6411, %v8879_v48  }
 0x473   : > { %v8763_v59 = vpop.permute.xlu2 %6291  ;;  %3380 = vmatpush.msrb.mxu3 %v6244_v60 }
 0x474   : > { %v8771_v33 = vpop.permute.xlu0 %6256  ;;  %3297 = vmatmul.f32.gmra.mxu1 %v3090_v26  ;;  %3235 = vmatmul.f32.gmra.mxu0 %v3097_v39  ;;  %v6294_v49 = vunpack.i.h.bf16 %v8763_v59  ;;  %v6293_v26 = vunpack.i.l.bf16 %v8763_v59  ;;  %v3043_v39 = vld [vmem:[%s10408_s6 + $0x1d0] sm:$0xff] }
 0x475   : > { %3381 = vmatpush.msrb.mxu3 %v6248_v40 }
 0x477   : > { %3382 = vmatpush.msrb.mxu3 %v6249_v19  ;;  %v3027_v19 = vld [vmem:[%s10408_s6 + $0x150] sm:$0xff] }
 0x478   : > { %3326 = vmatmul.f32.gmra.mxu2 %v2995_v8  ;;  %v3105_v8 = vld [vmem:[%s10408_s6 + $0x3c0] sm:$0xff] }
 0x479   : > { %3383 = vmatpush.msrb.mxu3 %v6223_v0  ;;  %v3012_v0 = vld [vmem:[%s10408_s6 + $0xd8] sm:$0xff] }
 0x47a   : > { %v8797_v2 = vpop.permute.xlu1 %6286  ;;  %3162 = vperm.xlu2 %6411, %v8911_v54  }
 0x47b   : > { %v8800_v58 = vpop.permute.xlu2 %6306  ;;  %3384 = vmatpush.msrb.mxu3 %v6179_v37  ;;  %v3106_v37 = vld [vmem:[%s10408_s6 + $0x3c8] sm:$0xff]  ;;  %v6288_v59 = vunpack.i.l.bf16 %v8797_v2 }
 0x47c   : > { %v8808_v31 = vpop.permute.xlu0 %6271  ;;  %3300 = vmatmul.f32.gmra.mxu1 %v3098_v27  ;;  %v6309_v32 = vunpack.i.h.bf16 %v8800_v58  ;;  %v6308_v60 = vunpack.i.l.bf16 %v8800_v58  ;;  %3238 = vmatmul.f32.gmra.mxu0 %v3105_v8  ;;  %v2990_v27 = vld [vmem:[%s10408_s6 + $0x28] sm:$0xff] }
 0x47d   : > { %3385 = vmatpush.msrb.mxu3 %v6178_v47 }
 0x47f   : > { %3386 = vmatpush.msrb.mxu3 %v6174_v9 }
 0x480   : > { %3329 = vmatmul.f32.gmra.mxu2 %v3003_v14 }
 0x481   : > { %3387 = vmatpush.msrb.mxu3 %v6173_v21  ;;  %v8940_v21 = vld [vmem:[%s10411_s9 + $0x70] sm:$0xff] }
 0x482   : > { %v8836_v1 = vpop.permute.xlu1 %6301  ;;  %3388 = vmatmul.f32.vlgmr.msrb.gmra.mxu3 %v2988_v62  ;;  %3170 = vperm.xlu1 %6410, %v8940_v21  }
 0x483   : > { %v6322_v53 = vpop.permute.xlu2 %6321  ;;  %v6304_v13 = vunpack.i.h.bf16 %v8836_v1  ;;  %v6303_v47 = vunpack.i.l.bf16 %v8836_v1  ;;  %3174 = vperm.xlu2 %6411, %v8946_v57  }
 0x484   : > { %v6324_v11 = vunpack.i.h.bf16 %v6322_v53  ;;  %v8844_v28 = vpop.permute.xlu0 %6296  ;;  %v6323_v52 = vunpack.i.l.bf16 %v6322_v53  ;;  %3303 = vmatmul.f32.gmra.mxu1 %v3106_v37 }
 0x485   : > { %v6299_v9 = vunpack.i.h.bf16 %v8844_v28  ;;  %v6298_v1 = vunpack.i.l.bf16 %v8844_v28  ;;  %v6284_v28 = vunpack.i.h.bf16 %v8741_v24 }
 0x486   : > { %3502 = vmatpush.msra.mxu1 %v6324_v11  ;;  %v3035_v11 = vld [vmem:[%s10408_s6 + $0x190] sm:$0xff] }
 0x488   : > { %3503 = vmatpush.msra.mxu1 %v6323_v52  ;;  %3332 = vmatmul.f32.gmra.mxu2 %v3011_v35 }
 0x48a   : > { %v6317_v30 = vpop.permute.xlu1 %6316  ;;  %3391 = vmatmul.f32.gmra.mxu3 %v2996_v61  ;;  %v3020_v61 = vld [vmem:[%s10408_s6 + $0x118] sm:$0xff] }
 0x48b   : > { %v6319_v3 = vunpack.i.h.bf16 %v6317_v30  ;;  %v6318_v43 = vunpack.i.l.bf16 %v6317_v30  ;;  %v8894_v15 = vpop.permute.xlu2 %6331  ;;  %v6283_v30 = vunpack.i.l.bf16 %v8741_v24  ;;  %v3028_v24 = vld [vmem:[%s10408_s6 + $0x158] sm:$0xff] }
 0x48c   : > { %v6312_v44 = vpop.permute.xlu0 %6311  ;;  %v6333_v40 = vunpack.i.l.bf16 %v8894_v15 }
 0x48d   : > { %3504 = vmatpush.msra.mxu1 %v6319_v3  ;;  %v6314_v17 = vunpack.i.h.bf16 %v6312_v44  ;;  %v6313_v41 = vunpack.i.l.bf16 %v6312_v44  ;;  %v6289_v3 = vunpack.i.h.bf16 %v8797_v2 }
 0x48f   : > { %3505 = vmatpush.msra.mxu1 %v6318_v43  ;;  %v6279_v43 = vunpack.i.h.bf16 %v8760_v5 }
 0x490   : > { %3335 = vmatmul.f32.gmra.mxu2 %v3019_v50 }
 0x491   : > { %3506 = vmatpush.msra.mxu1 %v6314_v17  ;;  %v6278_v17 = vunpack.i.l.bf16 %v8760_v5 }
 0x492   : > { %v8902_v34 = vpop.permute.xlu1 %6326  ;;  %3394 = vmatmul.f32.gmra.mxu3 %v3004_v4 }
 0x493   : > { %v6328_v46 = vunpack.i.l.bf16 %v8902_v34  ;;  %3507 = vmatpush.msra.mxu1 %v6313_v41  ;;  %v8934_v14 = vpop.permute.xlu2 %6346  ;;  %v6329_v2 = vunpack.i.h.bf16 %v8902_v34  ;;  %v3051_v34 = vld [vmem:[%s10408_s6 + $0x210] sm:$0xff] }
 0x494   : > { %v8906_v38 = vpop.permute.xlu0 %6336  ;;  %v6348_v35 = vunpack.i.l.bf16 %v8934_v14  ;;  %v6349_v37 = vunpack.i.h.bf16 %v8934_v14  ;;  %v6259_v14 = vunpack.i.h.bf16 %v8771_v33 }
 0x495   : > { %3508 = vmatpush.msra.mxu1 %v6309_v32  ;;  %3632 = vmatpush.msra.mxu3 %v6328_v46  ;;  %v6338_v25 = vunpack.i.l.bf16 %v8906_v38  ;;  %v6274_v32 = vunpack.i.h.bf16 %v8808_v31  ;;  %v6273_v46 = vunpack.i.l.bf16 %v8808_v31  ;;  %v6339_v8 = vunpack.i.h.bf16 %v8906_v38 }
 0x496   : > { %v6264_v38 = vunpack.i.h.bf16 %v8737_v63 }
 0x497   : > { %3509 = vmatpush.msra.mxu1 %v6308_v60  ;;  %3633 = vmatpush.msra.mxu3 %v6333_v40  ;;  %v6334_v60 = vunpack.i.h.bf16 %v8894_v15  ;;  %v2998_v15 = vld [vmem:[%s10408_s6 + $0x68] sm:$0xff] }
 0x498   : > { %3338 = vmatmul.f32.gmra.mxu2 %v3027_v19  ;;  %v6269_v19 = vunpack.i.h.bf16 %v8727_v55 }
 0x499   : > { %3510 = vmatpush.msra.mxu1 %v6304_v13  ;;  %3634 = vmatpush.msra.mxu3 %v6338_v25  ;;  %v6268_v25 = vunpack.i.l.bf16 %v8727_v55  ;;  %v3036_v55 = vld [vmem:[%s10408_s6 + $0x198] sm:$0xff] }
 0x49a   : > { %v8931_v58 = vpop.permute.xlu1 %6341  ;;  %3397 = vmatmul.f32.gmra.mxu3 %v3012_v0 }
 0x49b   : > { %v6343_v10 = vunpack.i.l.bf16 %v8931_v58  ;;  %3511 = vmatpush.msra.mxu1 %v6303_v47  ;;  %v6372_v5 = vpop.permute.xlu2 %6371  ;;  %v6344_v31 = vunpack.i.h.bf16 %v8931_v58  ;;  %v6263_v58 = vunpack.i.l.bf16 %v8737_v63  ;;  %v3006_v63 = vld [vmem:[%s10408_s6 + $0xa8] sm:$0xff] }
 0x49c   : > { %v6352_v62 = vpop.permute.xlu0 %6351  ;;  %v6373_v47 = vunpack.i.l.bf16 %v6372_v5 }
 0x49d   : > { %v6354_v53 = vunpack.i.h.bf16 %v6352_v62  ;;  %3512 = vmatpush.msra.mxu1 %v6299_v9  ;;  %3635 = vmatpush.msra.mxu3 %v6343_v10  ;;  %v6353_v52 = vunpack.i.l.bf16 %v6352_v62 }
 0x49f   : > { %3437 = vmatpush.msra.mxu0 %v6354_v53  ;;  %3513 = vmatpush.msra.mxu1 %v6298_v1 }
 0x4a0   : > { %3636 = vmatpush.msra.mxu3 %v6348_v35  ;;  %3341 = vmatmul.f32.gmra.mxu2 %v3035_v11  ;;  %v6258_v35 = vunpack.i.l.bf16 %v8771_v33  ;;  %v3044_v33 = vld [vmem:[%s10408_s6 + $0x1d8] sm:$0xff] }
 0x4a1   : > { %3438 = vmatpush.msra.mxu0 %v6353_v52  ;;  %3514 = vmatpush.msra.mxu1 %v6294_v49  ;;  %v6374_v52 = vunpack.i.h.bf16 %v6372_v5 }
 0x4a2   : > { %3400 = vmatmul.f32.gmra.mxu3 %v3020_v61  ;;  %v6367_v41 = vpop.permute.xlu1 %6366  ;;  %v3059_v61 = vld [vmem:[%s10408_s6 + $0x250] sm:$0xff] }
 0x4a3   : > { %3439 = vmatpush.msra.mxu0 %v6284_v28  ;;  %3515 = vmatpush.msra.mxu1 %v6293_v26  ;;  %v6368_v0 = vunpack.i.l.bf16 %v6367_v41  ;;  %v6387_v10 = vpop.permute.xlu2 %6386  ;;  %v6369_v11 = vunpack.i.h.bf16 %v6367_v41  ;;  %v6254_v28 = vunpack.i.h.bf16 %v8716_v36 }
 0x4a4   : > { %v6357_v44 = vpop.permute.xlu0 %6356  ;;  %v6388_v26 = vunpack.i.l.bf16 %v6387_v10 }
 0x4a5   : > { %v6358_v50 = vunpack.i.l.bf16 %v6357_v44  ;;  %3440 = vmatpush.msra.mxu0 %v6283_v30  ;;  %3516 = vmatpush.msra.mxu1 %v6289_v3  ;;  %v6359_v4 = vunpack.i.h.bf16 %v6357_v44  ;;  %v6253_v3 = vunpack.i.l.bf16 %v8716_v36  ;;  %v2989_v44 = vld [vmem:[%s10408_s6 + $0x20] sm:$0xff]  ;;  %v9010_v36 = vpop.f32.mrf.mxu0 }
 0x4a7   : > { %3441 = vmatpush.msra.mxu0 %v6279_v43  ;;  %3567 = vmatpush.msra.mxu2 %v6358_v50 }
 0x4a8   : > { %3517 = vmatpush.msra.mxu1 %v6288_v59  ;;  %3344 = vmatmul.f32.gmra.mxu2 %v3043_v39 }
 0x4a9   : > { %3442 = vmatpush.msra.mxu0 %v6278_v17  ;;  %3568 = vmatpush.msra.mxu2 %v6359_v4  ;;  %v6389_v17 = vunpack.i.h.bf16 %v6387_v10  ;;  %v3013_v10 = vld [vmem:[%s10408_s6 + $0xe0] sm:$0xff] }
 0x4aa   : > { %3403 = vmatmul.f32.gmra.mxu3 %v3028_v24  ;;  %3518 = vmatmul.f32.vlgmr.msra.gmra.mxu1 %v2990_v27  ;;  %v6382_v9 = vpop.permute.xlu1 %6381  ;;  %v3014_v27 = vld [vmem:[%s10408_s6 + $0xe8] sm:$0xff] }
 0x4ab   : > { %3443 = vmatpush.msra.mxu0 %v6274_v32  ;;  %3569 = vmatpush.msra.mxu2 %v6329_v2  ;;  %v6383_v49 = vunpack.i.l.bf16 %v6382_v9  ;;  %v6384_v43 = vunpack.i.h.bf16 %v6382_v9  ;;  %v6402_v4 = vpop.permute.xlu2 %6401  ;;  %v3067_v32 = vld [vmem:[%s10408_s6 + $0x290] sm:$0xff] }
 0x4ac   : > { %v6362_v40 = vpop.permute.xlu0 %6361  ;;  %v6403_v2 = vunpack.i.l.bf16 %v6402_v4  ;;  %v3083_v9 = vld [vmem:[%s10408_s6 + $0x310] sm:$0xff] }
 0x4ad   : > { %v6363_v13 = vunpack.i.l.bf16 %v6362_v40  ;;  %3444 = vmatpush.msra.mxu0 %v6273_v46  ;;  %3570 = vmatpush.msra.mxu2 %v6334_v60  ;;  %v6364_v62 = vunpack.i.h.bf16 %v6362_v40  ;;  %v3052_v46 = vld [vmem:[%s10408_s6 + $0x218] sm:$0xff]  ;;  %v9021_v60 = vpop.f32.mrf.mxu1  ;;  %v2997_v40 = vld [vmem:[%s10408_s6 + $0x60] sm:$0xff] }
 0x4af   : > { %3445 = vmatpush.msra.mxu0 %v6269_v19  ;;  %3571 = vmatpush.msra.mxu2 %v6339_v8  ;;  %v6404_v19 = vunpack.i.h.bf16 %v6402_v4 }
 0x4b0   : > { %3637 = vmatpush.msra.mxu3 %v6363_v13  ;;  %3347 = vmatmul.f32.gmra.mxu2 %v3051_v34 }
 0x4b1   : > { %3446 = vmatpush.msra.mxu0 %v6268_v25  ;;  %3572 = vmatpush.msra.mxu2 %v6344_v31  ;;  %v3022_v25 = vld [vmem:[%s10408_s6 + $0x128] sm:$0xff]  ;;  %v3075_v31 = vld [vmem:[%s10408_s6 + $0x2d0] sm:$0xff] }
 0x4b2   : > { %3638 = vmatpush.msra.mxu3 %v6368_v0  ;;  %3521 = vmatmul.f32.gmra.mxu1 %v2998_v15  ;;  %v6397_v50 = vpop.permute.xlu1 %6396  ;;  %v9032_v15 = vpop.f32.mrf.mxu0  ;;  %v3060_v0 = vld [vmem:[%s10408_s6 + $0x258] sm:$0xff] }
 0x4b3   : > { %3447 = vmatpush.msra.mxu0 %v6264_v38  ;;  %3573 = vmatpush.msra.mxu2 %v6349_v37  ;;  %v6398_v24 = vunpack.i.l.bf16 %v6397_v50  ;;  %v6399_v5 = vunpack.i.h.bf16 %v6397_v50  ;;  %v3005_v38 = vld [vmem:[%s10408_s6 + $0xa0] sm:$0xff]  ;;  %v3062_v50 = vld [vmem:[%s10408_s6 + $0x268] sm:$0xff] }
 0x4b4   : > { %3639 = vmatpush.msra.mxu3 %v6373_v47  ;;  %v6377_v1 = vpop.permute.xlu0 %6376  ;;  %v3030_v47 = vld [vmem:[%s10408_s6 + $0x168] sm:$0xff] }
 0x4b5   : > { %v6378_v53 = vunpack.i.l.bf16 %v6377_v1  ;;  %3406 = vmatmul.f32.gmra.mxu3 %v3036_v55  ;;  %3448 = vmatpush.msra.mxu0 %v6263_v58  ;;  %v6379_v30 = vunpack.i.h.bf16 %v6377_v1  ;;  %v9040_v37 = vpop.f32.mrf.mxu1  ;;  %v3068_v55 = vld [vmem:[%s10408_s6 + $0x298] sm:$0xff]  ;;  %v3038_v1 = vld [vmem:[%s10408_s6 + $0x1a8] sm:$0xff] }
 0x4b6   : > { %3574 = vmatpush.msra.mxu2 %v6364_v62 }
 0x4b7   : > { %3449 = vmatpush.msra.mxu0 %v6259_v14  ;;  %3640 = vmatpush.msra.mxu3 %v6378_v53  ;;  %v3091_v14 = vld [vmem:[%s10408_s6 + $0x350] sm:$0xff]  ;;  %v3076_v53 = vld [vmem:[%s10408_s6 + $0x2d8] sm:$0xff] }
 0x4b8   : > { %3575 = vmatpush.msra.mxu2 %v6369_v11  ;;  %v3021_v11 = vld [vmem:[%s10408_s6 + $0x120] sm:$0xff] }
 0x4b9   : > { %3450 = vmatpush.msra.mxu0 %v6258_v35  ;;  %3641 = vmatpush.msra.mxu3 %v6383_v49  ;;  %v3046_v49 = vld [vmem:[%s10408_s6 + $0x1e8] sm:$0xff] }
 0x4ba   : > { %3576 = vmatpush.msra.mxu2 %v6374_v52  ;;  %3524 = vmatmul.f32.gmra.mxu1 %v3006_v63  ;;  %v9051_v58 = vpop.f32.mrf.mxu0  ;;  %v3099_v63 = vld [vmem:[%s10408_s6 + $0x390] sm:$0xff] }
 0x4bb   : > { %3350 = vmatmul.f32.gmra.mxu2 %v3059_v61  ;;  %3451 = vmatpush.msra.mxu0 %v6254_v28  ;;  %v3084_v61 = vld [vmem:[%s10408_s6 + $0x318] sm:$0xff]  ;;  %v3029_v28 = vld [vmem:[%s10408_s6 + $0x160] sm:$0xff] }
 0x4bc   : > { %3577 = vmatpush.msra.mxu2 %v6379_v30  ;;  %3642 = vmatpush.msra.mxu3 %v6388_v26  ;;  %v6392_v39 = vpop.permute.xlu0 %6391  ;;  %v3054_v30 = vld [vmem:[%s10408_s6 + $0x228] sm:$0xff] }
 0x4bd   : > { %v6393_v59 = vunpack.i.l.bf16 %v6392_v39  ;;  %3409 = vmatmul.f32.gmra.mxu3 %v3044_v33  ;;  %3452 = vmatpush.msra.mxu0 %v6253_v3  ;;  %v6394_v41 = vunpack.i.h.bf16 %v6392_v39  ;;  %v9056_v62 = vpop.f32.mrf.mxu1  ;;  %v3107_v33 = vld [vmem:[%s10408_s6 + $0x3d0] sm:$0xff]  ;;  %v3092_v3 = vld [vmem:[%s10408_s6 + $0x358] sm:$0xff] }
 0x4be   : > { %3578 = vmatpush.msra.mxu2 %v6384_v43  ;;  %3453 = vmatmul.f32.vlgmr.msra.gmra.mxu0 %v2989_v44  ;;  %v3037_v43 = vld [vmem:[%s10408_s6 + $0x1a0] sm:$0xff]  ;;  %v2991_v39 = vld [vmem:[%s10408_s6 + $0x30] sm:$0xff] }
 0x4bf   : > { %3643 = vmatpush.msra.mxu3 %v6393_v59 }
 0x4c0   : > { %3579 = vmatpush.msra.mxu2 %v6389_v17  ;;  %v3100_v17 = vld [vmem:[%s10408_s6 + $0x398] sm:$0xff] }
 0x4c1   : > { %3644 = vmatpush.msra.mxu3 %v6398_v24  ;;  %v3045_v24 = vld [vmem:[%s10408_s6 + $0x1e0] sm:$0xff] }
 0x4c2   : > { %3580 = vmatpush.msra.mxu2 %v6394_v41  ;;  %3527 = vmatmul.f32.gmra.mxu1 %v3014_v27  ;;  %v9070_v35 = vpop.f32.mrf.mxu0  ;;  %v6889_v41 = vmov 3  }
 0x4c3   : > { %3353 = vmatmul.f32.gmra.mxu2 %v3067_v32  ;;  %3645 = vmatpush.msra.mxu3 %v6403_v2  ;;  %v3115_v32 = vpop.permute.xlu1 %3114  ;;  %v3070_v2 = vld [vmem:[%s10408_s6 + $0x2a8] sm:$0xff] }
 0x4c4   : > { %3581 = vmatpush.msra.mxu2 %v6399_v5  ;;  %v6407_v8 = vpop.permute.xlu0 %6406  ;;  %6413 = vset.pattern.permute.xlu0 %v6889_v41  ;;  %v2999_v5 = vld [vmem:[%s10408_s6 + $0x70] sm:$0xff] }
 0x4c5   : > { %v6408_v13 = vunpack.i.l.bf16 %v6407_v8  ;;  %3412 = vmatmul.f32.gmra.mxu3 %v3052_v46  ;;  %v6409_v34 = vunpack.i.h.bf16 %v6407_v8  ;;  %v9078_v52 = vpop.f32.mrf.mxu1  ;;  %3714 = vperm.xlu0 %6413, %v8757_v7   ;;  %v3108_v46 = vld [vmem:[%s10408_s6 + $0x3d8] sm:$0xff]  ;;  %v3053_v8 = vld [vmem:[%s10408_s6 + $0x220] sm:$0xff] }
 0x4c6   : > { %3582 = vmatpush.msra.mxu2 %v6404_v19  ;;  %3456 = vmatmul.f32.gmra.mxu0 %v2997_v40  ;;  %v3195_v40 = vadd.f32 %v9010_v36, %v3115_v32  ;;  %v3078_v36 = vld [vmem:[%s10408_s6 + $0x2e8] sm:$0xff] }
 0x4c7   : > { %3646 = vmatpush.msra.mxu3 %v6408_v13  ;;  %6414 = vset.pattern.permute.xlu1 %v6889_v41  ;;  %v3119_v13 = vpop.permute.xlu2 %3118 }
 0x4c8   : > { %3718 = vperm.xlu1 %6414, %v8776_v18   ;;  %6415 = vset.pattern.permute.xlu2 %v6889_v41  ;;  %v3260_v18 = vadd.f32 %v9021_v60, %v3195_v40  ;;  %v2992_v60 = vld [vmem:[%s10408_s6 + $0x38] sm:$0xff]  ;;  %v3085_v41 = vld [vmem:[%s10408_s6 + $0x320] sm:$0xff] }
 0x4c9   : > { %3647 = vmatpush.msra.mxu3 %v6409_v34  ;;  %3722 = vperm.xlu2 %6415, %v8768_v16   ;;  %v3007_v34 = vld [vmem:[%s10408_s6 + $0xb0] sm:$0xff]  ;;  %v3024_v40 = vld [vmem:[%s10408_s6 + $0x138] sm:$0xff] }
 0x4ca   : > { %3530 = vmatmul.f32.gmra.mxu1 %v3022_v25  ;;  %v9086_v26 = vpop.f32.mrf.mxu0 }
 0x4cb   : > { %3356 = vmatmul.f32.gmra.mxu2 %v3075_v31  ;;  %v3198_v31 = vadd.f32 %v9032_v15, %v3119_v13  ;;  %v3086_v15 = vld [vmem:[%s10408_s6 + $0x328] sm:$0xff]  ;;  %v3093_v13 = vld [vmem:[%s10408_s6 + $0x360] sm:$0xff] }
 0x4cd   : > { %3415 = vmatmul.f32.gmra.mxu3 %v3060_v0  ;;  %v9097_v44 = vpop.f32.mrf.mxu1  ;;  %3734 = vperm.xlu0 %6413, %v8833_v56   ;;  %v3061_v56 = vld [vmem:[%s10408_s6 + $0x260] sm:$0xff] }
 0x4ce   : > { %3459 = vmatmul.f32.gmra.mxu0 %v3005_v38 }
 0x4d0   : > { %3726 = vperm.xlu1 %6414, %v8793_v23  }
 0x4d1   : > { %3730 = vperm.xlu2 %6415, %v8813_v42  }
 0x4d2   : > { %3533 = vmatmul.f32.gmra.mxu1 %v3030_v47  ;;  %v9108_v59 = vpop.f32.mrf.mxu0  ;;  %v3263_v47 = vadd.f32 %v9040_v37, %v3198_v31  ;;  %v3000_v37 = vld [vmem:[%s10408_s6 + $0x78] sm:$0xff] }
 0x4d3   : > { %3359 = vmatmul.f32.gmra.mxu2 %v3083_v9  ;;  %v3123_v9 = vpop.permute.xlu0 %3122 }
 0x4d5   : > { %3418 = vmatmul.f32.gmra.mxu3 %v3068_v55  ;;  %v9116_v27 = vpop.f32.mrf.mxu1  ;;  %3746 = vperm.xlu0 %6413, %v8867_v20   ;;  %v3015_v55 = vld [vmem:[%s10408_s6 + $0xf0] sm:$0xff] }
 0x4d6   : > { %3462 = vmatmul.f32.gmra.mxu0 %v3013_v10 }
 0x4d8   : > { %3738 = vperm.xlu1 %6414, %v8849_v51  }
 0x4d9   : > { %3742 = vperm.xlu2 %6415, %v8805_v12  }
 0x4da   : > { %3536 = vmatmul.f32.gmra.mxu1 %v3038_v1  ;;  %v9131_v19 = vpop.f32.mrf.mxu0 }
 0x4db   : > { %3362 = vmatmul.f32.gmra.mxu2 %v3091_v14  ;;  %v3201_v14 = vadd.f32 %v9051_v58, %v3123_v9  ;;  %v3094_v58 = vld [vmem:[%s10408_s6 + $0x368] sm:$0xff] }
 0x4dd   : > { %3421 = vmatmul.f32.gmra.mxu3 %v3076_v53  ;;  %v9137_v16 = vpop.f32.mrf.mxu1  ;;  %v3069_v53 = vld [vmem:[%s10408_s6 + $0x2a0] sm:$0xff]  ;;  %v3266_v12 = vadd.f32 %v9056_v62, %v3201_v14  ;;  %3758 = vperm.xlu0 %6413, %v8899_v29   ;;  %v3008_v62 = vld [vmem:[%s10408_s6 + $0xb8] sm:$0xff] }
 0x4de   : > { %3465 = vmatmul.f32.gmra.mxu0 %v3021_v11  ;;  %v3040_v14 = vld [vmem:[%s10408_s6 + $0x1b8] sm:$0xff] }
 0x4e0   : > { %3750 = vperm.xlu1 %6414, %v8879_v48  }
 0x4e1   : > { %3754 = vperm.xlu2 %6415, %v8841_v6  }
 0x4e2   : > { %3539 = vmatmul.f32.gmra.mxu1 %v3046_v49  ;;  %v9155_v38 = vpop.f32.mrf.mxu0 }
 0x4e3   : > { %3365 = vmatmul.f32.gmra.mxu2 %v3099_v63  ;;  %v3127_v63 = vpop.permute.xlu1 %3126 }
 0x4e5   : > { %3424 = vmatmul.f32.gmra.mxu3 %v3084_v61  ;;  %v9168_v10 = vpop.f32.mrf.mxu1  ;;  %v3023_v61 = vld [vmem:[%s10408_s6 + $0x130] sm:$0xff]  ;;  %3770 = vperm.xlu0 %6413, %v8940_v21  }
 0x4e6   : > { %3468 = vmatmul.f32.gmra.mxu0 %v3029_v28 }
 0x4e8   : > { %3762 = vperm.xlu1 %6414, %v8911_v54  }
 0x4e9   : > { %3766 = vperm.xlu2 %6415, %v8873_v22  }
 0x4ea   : > { %3542 = vmatmul.f32.gmra.mxu1 %v3054_v30  ;;  %v9181_v49 = vpop.f32.mrf.mxu0  ;;  %v3204_v30 = vadd.f32 %v9070_v35, %v3127_v63  ;;  %v3102_v35 = vld [vmem:[%s10408_s6 + $0x3a8] sm:$0xff] }
 0x4eb   : > { %3368 = vmatmul.f32.gmra.mxu2 %v3107_v33 }
 0x4ed   : > { %3427 = vmatmul.f32.gmra.mxu3 %v3092_v3  ;;  %v9196_v33 = vpop.f32.mrf.mxu1  ;;  %v3077_v3 = vld [vmem:[%s10408_s6 + $0x2e0] sm:$0xff] }
 0x4ee   : > { %3471 = vmatmul.f32.gmra.mxu0 %v3037_v43  ;;  %v3269_v43 = vadd.f32 %v9078_v52, %v3204_v30  ;;  %v3016_v52 = vld [vmem:[%s10408_s6 + $0xf8] sm:$0xff] }
 0x4f0   : > { %3774 = vperm.xlu1 %6414, %v8946_v57  }
 0x4f2   : > { %3545 = vmatmul.f32.gmra.mxu1 %v3062_v50  ;;  %v3131_v50 = vpop.permute.xlu2 %3130 }
 0x4f3   : > { %3583 = vmatmul.f32.vlgmr.msra.gmra.mxu2 %v2991_v39  ;;  %v3324_v4 = vpop.f32.mrf.mxu2  ;;  %v3031_v39 = vld [vmem:[%s10408_s6 + $0x170] sm:$0xff] }
 0x4f4   : > { %v3325_v25 = vadd.f32 %v3324_v4, %v3260_v18 }
 0x4f5   : > { %3430 = vmatmul.f32.gmra.mxu3 %v3100_v17  ;;  %v9212_v17 = vpop.f32.mrf.mxu0  ;;  %v9222_v32 = vpop.f32.mrf.mxu1 }
 0x4f6   : > { %3474 = vmatmul.f32.gmra.mxu0 %v3045_v24  ;;  %v3207_v24 = vadd.f32 %v9086_v26, %v3131_v50  ;;  %v3110_v26 = vld [vmem:[%s10408_s6 + $0x3e8] sm:$0xff] }
 0x4fa   : > { %3548 = vmatmul.f32.gmra.mxu1 %v3070_v2  ;;  %v3272_v2 = vadd.f32 %v9097_v44, %v3207_v24  ;;  %v3064_v24 = vld [vmem:[%s10408_s6 + $0x278] sm:$0xff] }
 0x4fb   : > { %3586 = vmatmul.f32.gmra.mxu2 %v2999_v5  ;;  %v3327_v7 = vpop.f32.mrf.mxu2  ;;  %v3135_v5 = vpop.permute.xlu1 %3134 }
 0x4fc   : > { %v3328_v1 = vadd.f32 %v3327_v7, %v3263_v47 }
 0x4fd   : > { %3433 = vmatmul.f32.gmra.mxu3 %v3108_v46  ;;  %v3039_v46 = vld [vmem:[%s10408_s6 + $0x1b0] sm:$0xff]  ;;  %v9238_v44 = vpop.f32.mrf.mxu0 }
 0x4fe   : > { %3477 = vmatmul.f32.gmra.mxu0 %v3053_v8  ;;  %v3210_v8 = vadd.f32 %v9108_v59, %v3135_v5  ;;  %v3047_v59 = vld [vmem:[%s10408_s6 + $0x1f0] sm:$0xff] }
 0x4ff   : > { %v3087_v5 = vld [vmem:[%s10408_s6 + $0x330] sm:$0xff] }
 0x502   : > { %3551 = vmatmul.f32.gmra.mxu1 %v3078_v36 }
 0x503   : > { %3589 = vmatmul.f32.gmra.mxu2 %v3007_v34  ;;  %v3330_v0 = vpop.f32.mrf.mxu2  ;;  %v3275_v34 = vadd.f32 %v9116_v27, %v3210_v8  ;;  %v3095_v8 = vld [vmem:[%s10408_s6 + $0x370] sm:$0xff] }
 0x504   : > { %v3331_v28 = vadd.f32 %v3330_v0, %v3266_v12  ;;  %v3139_v0 = vpop.permute.xlu2 %3138 }
 0x505   : > { %3648 = vmatmul.f32.vlgmr.msra.gmra.mxu3 %v2992_v60  ;;  %v3389_v23 = vpop.f32.mrf.mxu3  ;;  %v9246_v60 = vpop.f32.mrf.mxu1  ;;  %v3213_v9 = vadd.f32 %v9131_v19, %v3139_v0  ;;  %v3109_v19 = vld [vmem:[%s10408_s6 + $0x3e0] sm:$0xff]  ;;  %v3088_v0 = vld [vmem:[%s10408_s6 + $0x338] sm:$0xff] }
 0x506   : > { %3480 = vmatmul.f32.gmra.mxu0 %v3061_v56  ;;  %v9157_v42 = vadd.f32 %v3389_v23, %v3325_v25  ;;  %v3032_v25 = vld [vmem:[%s10408_s6 + $0x178] sm:$0xff]  ;;  %v3101_v23 = vld [vmem:[%s10408_s6 + $0x3a0] sm:$0xff]  ;;  %v9257_v47 = vpop.f32.mrf.mxu0 }
 0x50a   : > { %3554 = vmatmul.f32.gmra.mxu1 %v3086_v15 }
 0x50b   : > { %3592 = vmatmul.f32.gmra.mxu2 %v3015_v55  ;;  %v3333_v20 = vpop.f32.mrf.mxu2  ;;  %v3055_v55 = vld [vmem:[%s10408_s6 + $0x230] sm:$0xff] }
 0x50c   : > { %v3334_v4 = vadd.f32 %v3333_v20, %v3269_v43  ;;  %v3143_v20 = vpop.permute.xlu0 %3142 }
 0x50d   : > { %3651 = vmatmul.f32.gmra.mxu3 %v3000_v37  ;;  %v3392_v51 = vpop.f32.mrf.mxu3  ;;  %v9265_v37 = vpop.f32.mrf.mxu1  ;;  %v3216_v12 = vadd.f32 %v9155_v38, %v3143_v20  ;;  %v3821_v20 = vld [vmem:[%s9346_s15 + $0x60] sm:$0xff] }
 0x50e   : > { %3483 = vmatmul.f32.gmra.mxu0 %v3069_v53  ;;  %v9178_v11 = vadd.f32 %v3392_v51, %v3328_v1  ;;  %v3278_v1 = vadd.f32 %v9137_v16, %v3213_v9  ;;  %v9277_v63 = vpop.f32.mrf.mxu0  ;;  %3945 = vrot.lane.b32.xlu0 %v3821_v20, %s6887_s14 }
 0x512   : > { %3557 = vmatmul.f32.gmra.mxu1 %v3094_v58  ;;  %v3063_v58 = vld [vmem:[%s10408_s6 + $0x270] sm:$0xff] }
 0x513   : > { %3595 = vmatmul.f32.gmra.mxu2 %v3023_v61  ;;  %v3336_v29 = vpop.f32.mrf.mxu2 }
 0x514   : > { %v3337_v7 = vadd.f32 %v3336_v29, %v3272_v2 }
 0x515   : > { %3654 = vmatmul.f32.gmra.mxu3 %v3008_v62  ;;  %v3395_v48 = vpop.f32.mrf.mxu3  ;;  %v3281_v62 = vadd.f32 %v9168_v10, %v3216_v12  ;;  %v9288_v30 = vpop.f32.mrf.mxu1  ;;  %v3056_v10 = vld [vmem:[%s10408_s6 + $0x238] sm:$0xff] }
 0x516   : > { %3486 = vmatmul.f32.gmra.mxu0 %v3077_v3  ;;  %v9201_v6 = vadd.f32 %v3395_v48, %v3331_v28  ;;  %v3048_v28 = vld [vmem:[%s10408_s6 + $0x1f8] sm:$0xff]  ;;  %v3071_v48 = vld [vmem:[%s10408_s6 + $0x2b0] sm:$0xff]  ;;  %v9295_v43 = vpop.f32.mrf.mxu0 }
 0x51a   : > { %3560 = vmatmul.f32.gmra.mxu1 %v3102_v35 }
 0x51b   : > { %3598 = vmatmul.f32.gmra.mxu2 %v3031_v39  ;;  %v3339_v21 = vpop.f32.mrf.mxu2 }
 0x51c   : > { %v3340_v31 = vadd.f32 %v3339_v21, %v3275_v34 }
 0x51d   : > { %3657 = vmatmul.f32.gmra.mxu3 %v3016_v52  ;;  %v3398_v54 = vpop.f32.mrf.mxu3  ;;  %v9302_v35 = vpop.f32.mrf.mxu1 }
 0x51e   : > { %3489 = vmatmul.f32.gmra.mxu0 %v3085_v41  ;;  %v9224_v22 = vadd.f32 %v3398_v54, %v3334_v4  ;;  %v3079_v4 = vld [vmem:[%s10408_s6 + $0x2f0] sm:$0xff]  ;;  %v9314_v21 = vpop.f32.mrf.mxu0 }
 0x51f   : > { %10442 = vst [vmem:[#allocation13_spill] sm:$0xff] %v9314_v21 }
 0x522   : > { %3563 = vmatmul.f32.gmra.mxu1 %v3110_v26  ;;  %v3072_v26 = vld [vmem:[%s10408_s6 + $0x2b8] sm:$0xff] }
 0x523   : > { %3601 = vmatmul.f32.gmra.mxu2 %v3039_v46  ;;  %v3342_v18 = vpop.f32.mrf.mxu2 }
 0x524   : > { %v3343_v51 = vadd.f32 %v3342_v18, %v3278_v1 }
 0x525   : > { %3660 = vmatmul.f32.gmra.mxu3 %v3024_v40  ;;  %v3401_v36 = vpop.f32.mrf.mxu3  ;;  %v9318_v54 = vpop.f32.mrf.mxu1 }
 0x526   : > { %3492 = vmatmul.f32.gmra.mxu0 %v3093_v13  ;;  %v9243_v57 = vadd.f32 %v3401_v36, %v3337_v7  ;;  %10443 = vst [vmem:[#allocation18_spill] sm:$0xff] %v9318_v54  ;;  %v9328_v46 = vpop.f32.mrf.mxu0  ;;  %v3080_v13 = vld [vmem:[%s10408_s6 + $0x2f8] sm:$0xff] }
 0x527   : > { %10444 = vst [vmem:[#allocation9_spill] sm:$0xff] %v9328_v46  ;;  %v3824_v36 = vld [vmem:[%s9346_s15 + $0x78] sm:$0xff] }
 0x528   : > { %3951 = vrot.lane.b32.xlu2 %v3824_v36, %s6887_s14 }
 0x52b   : > { %3604 = vmatmul.f32.gmra.mxu2 %v3047_v59  ;;  %v3345_v56 = vpop.f32.mrf.mxu2 }
 0x52c   : > { %v3346_v38 = vadd.f32 %v3345_v56, %v3281_v62  ;;  %v3823_v62 = vld [vmem:[%s9346_s15 + $0x70] sm:$0xff] }
 0x52d   : > { %3663 = vmatmul.f32.gmra.mxu3 %v3032_v25  ;;  %v3404_v27 = vpop.f32.mrf.mxu3  ;;  %v9337_v18 = vpop.f32.mrf.mxu1  ;;  %3949 = vrot.lane.b32.xlu1 %v3823_v62, %s6887_s14 }
 0x52e   : > { %3495 = vmatmul.f32.gmra.mxu0 %v3101_v23  ;;  %v9260_v15 = vadd.f32 %v3404_v27, %v3340_v31  ;;  %10445 = vst [vmem:[#allocation11_spill] sm:$0xff] %v9337_v18  ;;  %v3103_v31 = vld [vmem:[%s10408_s6 + $0x3b0] sm:$0xff]  ;;  %v3822_v23 = vld [vmem:[%s9346_s15 + $0x68] sm:$0xff] }
 0x530   : > { %3947 = vrot.lane.b32.xlu2 %v3822_v23, %s6887_s14 }
 0x533   : > { %3607 = vmatmul.f32.gmra.mxu2 %v3055_v55  ;;  %v9274_v53 = vpop.f32.mrf.mxu2  ;;  %v3111_v55 = vld [vmem:[%s10408_s6 + $0x3f0] sm:$0xff] }
 0x535   : > { %3666 = vmatmul.f32.gmra.mxu3 %v3040_v14  ;;  %v3519_v56 = vpop.f32.mrf.mxu1  ;;  %v3096_v14 = vld [vmem:[%s10408_s6 + $0x378] sm:$0xff] }
 0x536   : > { %3498 = vmatmul.f32.gmra.mxu0 %v3109_v19 }
 0x538   : > { %v3407_v16 = vpop.f32.mrf.mxu3 }
 0x539   : > { %v9282_v61 = vadd.f32 %v3407_v16, %v3343_v51  ;;  %v3104_v16 = vld [vmem:[%s10408_s6 + $0x3b8] sm:$0xff] }
 0x53b   : > { %3610 = vmatmul.f32.gmra.mxu2 %v3063_v58  ;;  %v3454_v59 = vpop.f32.mrf.mxu0 }
 0x53d   : > { %3669 = vmatmul.f32.gmra.mxu3 %v3048_v28  ;;  %v3522_v19 = vpop.f32.mrf.mxu1  ;;  %v9383_v28 = vpop.permute.xlu1 %3146 }
 0x53e   : > { %v9290_v29 = vpop.f32.mrf.mxu2 }
 0x540   : > { %v3410_v3 = vpop.f32.mrf.mxu3 }
 0x541   : > { %v9297_v50 = vadd.f32 %v3410_v3, %v3346_v38  ;;  %v9385_v3 = vpop.permute.xlu2 %3150 }
 0x543   : > { %3613 = vmatmul.f32.gmra.mxu2 %v3071_v48  ;;  %v3457_v1 = vpop.f32.mrf.mxu0 }
 0x544   : > { %v3458_v18 = vadd.f32 %v3457_v1, %v9178_v11 }
 0x545   : > { %3672 = vmatmul.f32.gmra.mxu3 %v3056_v10  ;;  %v3525_v48 = vpop.f32.mrf.mxu1  ;;  %v9387_v10 = vpop.permute.xlu0 %3154 }
 0x546   : > { %v9304_v39 = vpop.f32.mrf.mxu2 }
 0x548   : > { %v9306_v52 = vpop.f32.mrf.mxu3 }
 0x54b   : > { %3616 = vmatmul.f32.gmra.mxu2 %v3079_v4  ;;  %v3460_v58 = vpop.f32.mrf.mxu0 }
 0x54d   : > { %3675 = vmatmul.f32.gmra.mxu3 %v3064_v24  ;;  %v3112_v24 = vld [vmem:[%s10408_s6 + $0x3f8] sm:$0xff]  ;;  %v9398_v36 = vpop.permute.xlu0 %3166  ;;  %v3528_v23 = vpop.f32.mrf.mxu1 }
 0x54e   : > { %v9316_v41 = vpop.f32.mrf.mxu2 }
 0x550   : > { %v9320_v2 = vpop.f32.mrf.mxu3 }
 0x553   : > { %3619 = vmatmul.f32.gmra.mxu2 %v3087_v5  ;;  %v3463_v5 = vpop.f32.mrf.mxu0 }
 0x555   : > { %3678 = vmatmul.f32.gmra.mxu3 %v3072_v26  ;;  %v9394_v26 = vpop.permute.xlu1 %3158  ;;  %v3715_v45 = vpop.permute.xlu0 %3714 }
 0x556   : > { %v9330_v40 = vpop.f32.mrf.mxu2  ;;  %v3531_v46 = vpop.f32.mrf.mxu1 }
 0x558   : > { %v9332_v7 = vpop.f32.mrf.mxu3 }
 0x55b   : > { %3622 = vmatmul.f32.gmra.mxu2 %v3095_v8 }
 0x55d   : > { %3681 = vmatmul.f32.gmra.mxu3 %v3080_v13  ;;  %v9396_v13 = vpop.permute.xlu2 %3162 }
 0x55e   : > { %v9349_v34 = vpop.f32.mrf.mxu2  ;;  %v3534_v1 = vpop.f32.mrf.mxu1 }
 0x560   : > { %v9352_v25 = vpop.f32.mrf.mxu3 }
 0x563   : > { %3625 = vmatmul.f32.gmra.mxu2 %v3103_v31 }
 0x565   : > { %3684 = vmatmul.f32.gmra.mxu3 %v3088_v0  ;;  %v3455_v0 = vadd.f32 %v3454_v59, %v9157_v42 }
 0x566   : > { %v9361_v27 = vpop.f32.mrf.mxu2 }
 0x567   : > { %10446 = vst [vmem:[#allocation12_spill] sm:$0xff] %v9361_v27 }
 0x568   : > { %v9364_v9 = vpop.f32.mrf.mxu3 }
 0x56b   : > { %3628 = vmatmul.f32.gmra.mxu2 %v3111_v55  ;;  %v3520_v55 = vadd.f32 %v3519_v56, %v3455_v0 }
 0x56d   : > { %3687 = vmatmul.f32.gmra.mxu3 %v3096_v14  ;;  %v9403_v14 = vpop.permute.xlu1 %3170 }
 0x56e   : > { %v9374_v51 = vpop.f32.mrf.mxu2 }
 0x56f   : > { %10447 = vst [vmem:[#allocation16_spill] sm:$0xff] %v9374_v51  ;;  %v9405_v51 = vpop.permute.xlu2 %3174 }
 0x570   : > { %v9376_v12 = vpop.f32.mrf.mxu3  ;;  %10451 = vst [vmem:[#allocation15_spill] sm:$0xff] %v9405_v51 }
 0x571   : > { %10448 = vst [vmem:[#allocation19_spill] sm:$0xff] %v9376_v12 }
 0x575   : > { %3690 = vmatmul.f32.gmra.mxu3 %v3104_v16  ;;  %v3466_v16 = vpop.f32.mrf.mxu0  ;;  %v3719_v12 = vpop.permute.xlu1 %3718 }
 0x576   : > { %v3584_v38 = vpop.f32.mrf.mxu2 }
 0x577   : > { %v3585_v62 = vadd.f32 %v3584_v38, %v3520_v55  ;;  %v3723_v56 = vpop.permute.xlu2 %3722  ;;  %v3461_v38 = vadd.f32 %v3460_v58, %v9201_v6 }
 0x578   : > { %v9389_v4 = vpop.f32.mrf.mxu3 }
 0x579   : > { %10449 = vst [vmem:[#allocation10_spill] sm:$0xff] %v9389_v4  ;;  %v3526_v11 = vadd.f32 %v3525_v48, %v3461_v38 }
 0x57d   : > { %3693 = vmatmul.f32.gmra.mxu3 %v3112_v24  ;;  %v3469_v55 = vpop.f32.mrf.mxu0 }
 0x57e   : > { %v3587_v8 = vpop.f32.mrf.mxu2 }
 0x580   : > { %v9400_v31 = vpop.f32.mrf.mxu3 }
 0x581   : > { %10450 = vst [vmem:[#allocation14_spill] sm:$0xff] %v9400_v31  ;;  %v3523_v31 = vadd.f32 %v3522_v19, %v3458_v18 }
 0x583   : > { %v3588_v59 = vadd.f32 %v3587_v8, %v3523_v31 }
 0x585   : > { %v3472_v8 = vpop.f32.mrf.mxu0 }
 0x586   : > { %v3590_v20 = vpop.f32.mrf.mxu2 }
 0x587   : > { %v3591_v18 = vadd.f32 %v3590_v20, %v3526_v11  ;;  %v3467_v20 = vadd.f32 %v3466_v16, %v9243_v57 }
 0x588   : > { %v3649_v24 = vpop.f32.mrf.mxu3 }
 0x589   : > { %v3650_v4 = vadd.f32 %v3649_v24, %v3585_v62 }
 0x58b   : > { %v3777_v27 = vmul.f32 %v3715_v45, %v3650_v4  ;;  %vm3697_vm4 = vcmp.ge.f32.partialorder %v3650_v4, 0.0 }
 0x58d   : > { %v3793_v54 = vsel %vm3697_vm4, %v3650_v4, %v3777_v27  ;;  %v3731_v27 = vpop.permute.xlu2 %3730 }
 0x58e   : > { %v3593_v42 = vpop.f32.mrf.mxu2  ;;  %3889 = vrot.lane.b32.xlu2 %v3793_v54, %s6887_s14  ;;  %v3464_v54 = vadd.f32 %v3463_v5, %v9224_v22  ;;  %v3532_v22 = vadd.f32 %v3531_v46, %v3467_v20  ;;  %v3475_v5 = vpop.f32.mrf.mxu0 }
 0x590   : > { %v3652_v0 = vpop.f32.mrf.mxu3  ;;  %v3529_v6 = vadd.f32 %v3528_v23, %v3464_v54 }
 0x591   : > { %v3653_v51 = vadd.f32 %v3652_v0, %v3588_v59  ;;  %v3727_v59 = vpop.permute.xlu1 %3726 }
 0x592   : > { %v3594_v48 = vadd.f32 %v3593_v42, %v3529_v6  ;;  %v3470_v42 = vadd.f32 %v3469_v55, %v9260_v15  ;;  %v3219_v15 = vadd.f32 %v9181_v49, %v9383_v28 }
 0x593   : > { %v3778_v21 = vmul.f32 %v3719_v12, %v3653_v51  ;;  %vm3698_vm5 = vcmp.ge.f32.partialorder %v3653_v51, 0.0  ;;  %v3537_v12 = vpop.f32.mrf.mxu1 }
 0x594   : > { %v3535_v57 = vadd.f32 %v3534_v1, %v3470_v42 }
 0x595   : > { %v3794_v62 = vsel %vm3698_vm5, %v3653_v51, %v3778_v21  ;;  %v9413_v21 = vpop.permute.xlu2 %3742 }
 0x596   : > { %v3596_v45 = vpop.f32.mrf.mxu2  ;;  %3891 = vrot.lane.b32.xlu0 %v3794_v62, %s6887_s14  ;;  %v3478_v46 = vpop.f32.mrf.mxu0 }
 0x597   : > { %v3597_v23 = vadd.f32 %v3596_v45, %v3532_v22  ;;  %v3735_v45 = vpop.permute.xlu0 %3734 }
 0x598   : > { %v3655_v19 = vpop.f32.mrf.mxu3 }
 0x599   : > { %v3656_v4 = vadd.f32 %v3655_v19, %v3591_v18  ;;  %v3739_v22 = vpop.permute.xlu1 %3738 }
 0x59b   : > { %v3779_v31 = vmul.f32 %v3723_v56, %v3656_v4  ;;  %vm3699_vm7 = vcmp.ge.f32.partialorder %v3656_v4, 0.0  ;;  %v3540_v54 = vpop.f32.mrf.mxu1 }
 0x59d   : > { %v3795_v58 = vsel %vm3699_vm7, %v3656_v4, %v3779_v31  ;;  %v9417_v62 = vpop.permute.xlu2 %3754 }
 0x59e   : > { %v3599_v24 = vpop.f32.mrf.mxu2  ;;  %3893 = vrot.lane.b32.xlu1 %v3795_v58, %s6887_s14  ;;  %v3481_v49 = vpop.f32.mrf.mxu0 }
 0x59f   : > { %v3600_v6 = vadd.f32 %v3599_v24, %v3535_v57  ;;  %v3284_v24 = vadd.f32 %v9196_v33, %v3219_v15 }
 0x5a0   : > { %v3658_v51 = vpop.f32.mrf.mxu3 }
 0x5a1   : > { %v3659_v0 = vadd.f32 %v3658_v51, %v3594_v48  ;;  %v3473_v51 = vadd.f32 %v3472_v8, %v9282_v61  ;;  %v3476_v61 = vadd.f32 %v3475_v5, %v9297_v50  ;;  %v3349_v28 = vadd.f32 %v9274_v53, %v3284_v24 }
 0x5a3   : > { %v3780_v38 = vmul.f32 %v3727_v59, %v3659_v0  ;;  %vm3700_vm8 = vcmp.ge.f32.partialorder %v3659_v0, 0.0  ;;  %v3538_v1 = vadd.f32 %v3537_v12, %v3473_v51  ;;  %v3222_v12 = vadd.f32 %v9212_v17, %v9385_v3 }
 0x5a4   : > { %v3541_v42 = vadd.f32 %v3540_v54, %v3476_v61  ;;  %v3225_v3 = vadd.f32 %v9238_v44, %v9387_v10  ;;  %v3228_v10 = vadd.f32 %v9257_v47, %v9394_v26  ;;  %v3231_v26 = vadd.f32 %v9277_v63, %v9396_v13 }
 0x5a5   : > { %v3796_v56 = vsel %vm3700_vm8, %v3659_v0, %v3780_v38  ;;  %v9421_v58 = vpop.permute.xlu2 %3766  ;;  %v3287_v50 = vadd.f32 %v9222_v32, %v3222_v12  ;;  %v3234_v13 = vadd.f32 %v9295_v43, %v9398_v36 }
 0x5a6   : > { %v3602_v11 = vpop.f32.mrf.mxu2  ;;  %3895 = vrot.lane.b32.xlu2 %v3796_v56, %s6887_s14 }
 0x5a7   : > { %v3603_v38 = vadd.f32 %v3602_v11, %v3538_v1  ;;  %v3414_v11 = vadd.f32 %v9306_v52, %v3349_v28  ;;  %v3352_v17 = vadd.f32 %v9290_v29, %v3287_v50  ;;  %v3484_v52 = vpop.f32.mrf.mxu0 }
 0x5a8   : > { %v3661_v18 = vpop.f32.mrf.mxu3 }
 0x5a9   : > { %v3662_v19 = vadd.f32 %v3661_v18, %v3597_v23 }
 0x5ab   : > { %v3781_v4 = vmul.f32 %v3731_v27, %v3662_v19  ;;  %vm3701_vm9 = vcmp.ge.f32.partialorder %v3662_v19, 0.0  ;;  %v3543_v27 = vpop.f32.mrf.mxu1 }
 0x5ad   : > { %v3797_v16 = vsel %vm3701_vm9, %v3662_v19, %v3781_v4  ;;  %v3952_v23 = vpop.permute.xlu2 %3951 }
 0x5ae   : > { %v3605_v31 = vpop.f32.mrf.mxu2  ;;  %3897 = vrot.lane.b32.xlu0 %v3797_v16, %s6887_s14  ;;  %4016 = vst.msk [vmem:[#allocation2 + $0xf8] sm:$0xff] %vm2600_vm6, %v3952_v23 }
 0x5af   : > { %v3606_v5 = vadd.f32 %v3605_v31, %v3541_v42  ;;  %v3417_v31 = vadd.f32 %v9320_v2, %v3352_v17  ;;  %v3487_v2 = vpop.f32.mrf.mxu0 }
 0x5b0   : > { %v3664_v48 = vpop.f32.mrf.mxu3 }
 0x5b1   : > { %v3665_v59 = vadd.f32 %v3664_v48, %v3600_v6  ;;  %v3479_v6 = vadd.f32 %v3478_v46, %v3414_v11  ;;  %v3747_v48 = vpop.permute.xlu0 %3746  ;;  %v3290_v46 = vadd.f32 %v9246_v60, %v3225_v3  ;;  %v3482_v29 = vadd.f32 %v3481_v49, %v3417_v31  ;;  %v10453_v31 = vld [vmem:[#allocation19_spill] sm:$0xff] }
 0x5b3   : > { %v3782_v55 = vmul.f32 %v3735_v45, %v3665_v59  ;;  %vm3702_vm10 = vcmp.ge.f32.partialorder %v3665_v59, 0.0  ;;  %v3546_v33 = vpop.f32.mrf.mxu1  ;;  %v3544_v45 = vadd.f32 %v3543_v27, %v3479_v6  ;;  %v3355_v44 = vadd.f32 %v9304_v39, %v3290_v46  ;;  %v3751_v27 = vpop.permute.xlu1 %3750 }
 0x5b4   : > { %v3299_v6 = vadd.f32 %v9302_v35, %v3234_v13 }
 0x5b5   : > { %v3798_v20 = vsel %vm3702_vm10, %v3665_v59, %v3782_v55  ;;  %v3948_v16 = vpop.permute.xlu2 %3947  ;;  %v3420_v60 = vadd.f32 %v9332_v7, %v3355_v44  ;;  %v3296_v7 = vadd.f32 %v9288_v30, %v3231_v26 }
 0x5b6   : > { %v3608_v0 = vpop.f32.mrf.mxu2  ;;  %3899 = vrot.lane.b32.xlu1 %v3798_v20, %s6887_s14  ;;  %4014 = vst.msk [vmem:[#allocation2 + $0xe8] sm:$0xff] %vm2600_vm6, %v3948_v16  ;;  %v3547_v20 = vadd.f32 %v3546_v33, %v3482_v29 }
 0x5b7   : > { %v3609_v51 = vadd.f32 %v3608_v0, %v3544_v45  ;;  %v3293_v0 = vadd.f32 %v9265_v37, %v3228_v10  ;;  %v3485_v23 = vadd.f32 %v3484_v52, %v3420_v60  ;;  %v3490_v33 = vpop.f32.mrf.mxu0  ;;  %v3361_v63 = vadd.f32 %v9330_v40, %v3296_v7  ;;  %v10455_v10 = vld [vmem:[#allocation12_spill] sm:$0xff] }
 0x5b8   : > { %v3667_v56 = vpop.f32.mrf.mxu3 }
 0x5b9   : > { %v3668_v8 = vadd.f32 %v3667_v56, %v3603_v38  ;;  %v3759_v38 = vpop.permute.xlu0 %3758  ;;  %v3358_v47 = vadd.f32 %v9316_v41, %v3293_v0  ;;  %v3426_v30 = vadd.f32 %v9364_v9, %v3361_v63  ;;  %v10462_v63 = vld [vmem:[#allocation14_spill] sm:$0xff] }
 0x5bb   : > { %v3783_v18 = vmul.f32 %v3739_v22, %v3668_v8  ;;  %vm3703_vm11 = vcmp.ge.f32.partialorder %v3668_v8, 0.0  ;;  %v3549_v59 = vpop.f32.mrf.mxu1  ;;  %v3763_v12 = vpop.permute.xlu1 %3762  ;;  %v3423_v37 = vadd.f32 %v9352_v25, %v3358_v47  ;;  %v3491_v43 = vadd.f32 %v3490_v33, %v3426_v30  ;;  %v3819_v33 = vld [vmem:[%s9346_s15 + $0x50] sm:$0xff]  ;;  %v3816_v30 = vld [vmem:[%s9346_s15 + $0x38] sm:$0xff] }
 0x5bc   : > { %v3550_v28 = vadd.f32 %v3549_v59, %v3485_v23  ;;  %v10459_v23 = vld [vmem:[#allocation11_spill] sm:$0xff] }
 0x5bd   : > { %v3799_v19 = vsel %vm3703_vm11, %v3668_v8, %v3783_v18  ;;  %v3488_v11 = vadd.f32 %v3487_v2, %v3423_v37  ;;  %v10461_v37 = vld [vmem:[#allocation16_spill] sm:$0xff] }
 0x5be   : > { %3901 = vrot.lane.b32.xlu2 %v3799_v19, %s6887_s14  ;;  %v3611_v4 = vpop.f32.mrf.mxu2 }
 0x5bf   : > { %v3612_v22 = vadd.f32 %v3611_v4, %v3547_v20  ;;  %v10457_v20 = vld [vmem:[#allocation9_spill] sm:$0xff] }
 0x5c0   : > { %v3670_v57 = vpop.f32.mrf.mxu3 }
 0x5c1   : > { %v3671_v53 = vadd.f32 %v3670_v57, %v3606_v5  ;;  %v9456_v19 = vpop.permute.xlu0 %3770 }
 0x5c3   : > { %v3784_v54 = vmul.f32 %v9413_v21, %v3671_v53  ;;  %vm3704_vm12 = vcmp.ge.f32.partialorder %v3671_v53, 0.0  ;;  %v3552_v61 = vpop.f32.mrf.mxu1  ;;  %v9465_v17 = vpop.permute.xlu1 %3774 }
 0x5c4   : > { %v3553_v57 = vadd.f32 %v3552_v61, %v3488_v11 }
 0x5c5   : > { %v3800_v32 = vsel %vm3704_vm12, %v3671_v53, %v3784_v54  ;;  %v3364_v54 = vadd.f32 %v9349_v34, %v3299_v6 }
 0x5c6   : > { %3903 = vrot.lane.b32.xlu0 %v3800_v32, %s6887_s14  ;;  %v3614_v55 = vpop.f32.mrf.mxu2 }
 0x5c7   : > { %v3615_v42 = vadd.f32 %v3614_v55, %v3550_v28  ;;  %v3429_v46 = vadd.f32 %v10453_v31, %v3364_v54 }
 0x5c8   : > { %v3673_v15 = vpop.f32.mrf.mxu3 }
 0x5c9   : > { %v3674_v1 = vadd.f32 %v3673_v15, %v3609_v51  ;;  %v3946_v40 = vpop.permute.xlu0 %3945  ;;  %v10454_v51 = vld [vmem:[#allocation18_spill] sm:$0xff] }
 0x5ca   : > { %4013 = vst.msk [vmem:[#allocation2 + $0xe0] sm:$0xff] %vm2600_vm6, %v3946_v40 }
 0x5cb   : > { %v3785_v21 = vmul.f32 %v3747_v48, %v3674_v1  ;;  %vm3705_vm13 = vcmp.ge.f32.partialorder %v3674_v1, 0.0  ;;  %v3555_v4 = vpop.f32.mrf.mxu1  ;;  %v10452_v48 = vld [vmem:[#allocation13_spill] sm:$0xff]  ;;  %v3950_v55 = vpop.permute.xlu1 %3949 }
 0x5cc   : > { %v3237_v52 = vadd.f32 %v10452_v48, %v9403_v14  ;;  %v3556_v9 = vadd.f32 %v3555_v4, %v3491_v43  ;;  %4015 = vst.msk [vmem:[#allocation2 + $0xf0] sm:$0xff] %vm2600_vm6, %v3950_v55  ;;  %v3813_v48 = vld [vmem:[%s9346_s15 + $0x20] sm:$0xff]  ;;  %v3811_v55 = vld [vmem:[%s9346_s15 + $0x10] sm:$0xff] }
 0x5cd   : > { %v3801_v24 = vsel %vm3705_vm13, %v3674_v1, %v3785_v21 }
 0x5ce   : > { %3905 = vrot.lane.b32.xlu1 %v3801_v24, %s6887_s14  ;;  %v3617_v8 = vpop.f32.mrf.mxu2  ;;  %v3302_v59 = vadd.f32 %v10454_v51, %v3237_v52  ;;  %v3815_v51 = vld [vmem:[%s9346_s15 + $0x30] sm:$0xff] }
 0x5cf   : > { %v3618_v53 = vadd.f32 %v3617_v8, %v3553_v57 }
 0x5d0   : > { %v3676_v56 = vpop.f32.mrf.mxu3  ;;  %v3367_v21 = vadd.f32 %v10455_v10, %v3302_v59 }
 0x5d1   : > { %v3677_v39 = vadd.f32 %v3676_v56, %v3612_v22  ;;  %v10458_v22 = vld [vmem:[#allocation10_spill] sm:$0xff] }
 0x5d2   : > { %v3432_v56 = vadd.f32 %v10458_v22, %v3367_v21  ;;  %v9540_v21 = vld [vmem:[#allocation2 + $0xf8] sm:$0xff] }
 0x5d3   : > { %v3786_v49 = vmul.f32 %v3751_v27, %v3677_v39  ;;  %vm3706_vm14 = vcmp.ge.f32.partialorder %v3677_v39, 0.0  ;;  %v3558_v35 = vpop.f32.mrf.mxu1  ;;  %v10456_v27 = vld [vmem:[#allocation15_spill] sm:$0xff]  ;;  %4498 = vmatpush.msrb.mxu1 %v9540_v21 }
 0x5d4   : > { %v3240_v24 = vadd.f32 %v10457_v20, %v10456_v27  ;;  %v9542_v27 = vld [vmem:[#allocation2 + $0xf0] sm:$0xff]  ;;  %v9549_v20 = vld [vmem:[#allocation2 + $0xe8] sm:$0xff] }
 0x5d5   : > { %v3802_v18 = vsel %vm3706_vm14, %v3677_v39, %v3786_v49  ;;  %4499 = vmatpush.msrb.mxu1 %v9542_v27 }
 0x5d6   : > { %3907 = vrot.lane.b32.xlu2 %v3802_v18, %s6887_s14  ;;  %v3620_v25 = vpop.f32.mrf.mxu2  ;;  %v3305_v39 = vadd.f32 %v10459_v23, %v3240_v24  ;;  %v10460_v18 = vmov 0.0  }
 0x5d7   : > { %v3621_v15 = vadd.f32 %v3620_v25, %v3556_v9  ;;  %4982 = vst.msk [vmem:[#allocation2 + $0xf8] sm:$0xff] %vm522_vm0, %v10460_v18  ;;  %4500 = vmatpush.msrb.mxu1 %v9549_v20 }
 0x5d8   : > { %v3679_v41 = vpop.f32.mrf.mxu3  ;;  %v3370_v7 = vadd.f32 %v10461_v37, %v3305_v39  ;;  %4981 = vst.msk [vmem:[#allocation2 + $0xf0] sm:$0xff] %vm522_vm0, %v10460_v18 }
 0x5d9   : > { %v3680_v50 = vadd.f32 %v3679_v41, %v3615_v42  ;;  %4980 = vst.msk [vmem:[#allocation2 + $0xe8] sm:$0xff] %vm522_vm0, %v10460_v18 }
 0x5da   : > { %v3435_v13 = vadd.f32 %v10462_v63, %v3370_v7 }
 0x5db   : > { %v3787_v5 = vmul.f32 %v9417_v62, %v3680_v50  ;;  %vm3707_vm15 = vcmp.ge.f32.partialorder %v3680_v50, 0.0  ;;  %v3493_v62 = vpop.f32.mrf.mxu0  ;;  %v3561_v47 = vpop.f32.mrf.mxu1 }
 0x5dc   : > { %v3494_v34 = vadd.f32 %v3493_v62, %v3429_v46  ;;  %v3814_v46 = vld [vmem:[%s9346_s15 + $0x28] sm:$0xff] }
 0x5dd   : > { %v3803_v16 = vsel %vm3707_vm15, %v3680_v50, %v3787_v5 }
 0x5de   : > { %3909 = vrot.lane.b32.xlu0 %v3803_v16, %s6887_s14  ;;  %v3623_v29 = vpop.f32.mrf.mxu2  ;;  %v3559_v60 = vadd.f32 %v3558_v35, %v3494_v34 }
 0x5e0   : > { %v3682_v3 = vpop.f32.mrf.mxu3  ;;  %v3624_v61 = vadd.f32 %v3623_v29, %v3559_v60 }
 0x5e1   : > { %v3683_v36 = vadd.f32 %v3682_v3, %v3618_v53 }
 0x5e3   : > { %v3788_v45 = vmul.f32 %v3759_v38, %v3683_v36  ;;  %vm3708_vm1 = vcmp.ge.f32.partialorder %v3683_v36, 0.0  ;;  %v3496_v2 = vpop.f32.mrf.mxu0  ;;  %v3564_v16 = vpop.f32.mrf.mxu1 }
 0x5e4   : > { %v3497_v49 = vadd.f32 %v3496_v2, %v3432_v56  ;;  %v9560_v2 = vld [vmem:[#allocation2 + $0xe0] sm:$0xff] }
 0x5e5   : > { %v3804_v32 = vsel %vm3708_vm1, %v3683_v36, %v3788_v45  ;;  %4501 = vmatpush.msrb.mxu1 %v9560_v2  ;;  %4979 = vst.msk [vmem:[#allocation2 + $0xe0] sm:$0xff] %vm522_vm0, %v10460_v18 }
 0x5e6   : > { %3911 = vrot.lane.b32.xlu1 %v3804_v32, %s6887_s14  ;;  %v3562_v41 = vadd.f32 %v3561_v47, %v3497_v49  ;;  %v3818_v32 = vld [vmem:[%s9346_s15 + $0x48] sm:$0xff] }
 0x5e8   : > { %v3685_v1 = vpop.f32.mrf.mxu3  ;;  %v3890_v44 = vpop.permute.xlu2 %3889 }
 0x5e9   : > { %v3686_v14 = vadd.f32 %v3685_v1, %v3621_v15  ;;  %3985 = vst.msk [vmem:[#allocation2] sm:$0xff] %vm2600_vm6, %v3890_v44  ;;  %v3810_v15 = vld [vmem:[%s9346_s15 + $0x8] sm:$0xff]  ;;  %v3812_v1 = vld [vmem:[%s9346_s15 + $0x18] sm:$0xff] }
 0x5eb   : > { %v3789_v38 = vmul.f32 %v3763_v12, %v3686_v14  ;;  %vm3709_vm2 = vcmp.ge.f32.partialorder %v3686_v14, 0.0  ;;  %v3626_v12 = vpop.f32.mrf.mxu2  ;;  %v3499_v50 = vpop.f32.mrf.mxu0 }
 0x5ec   : > { %v3627_v5 = vadd.f32 %v3626_v12, %v3562_v41  ;;  %v3500_v57 = vadd.f32 %v3499_v50, %v3435_v13 }
 0x5ed   : > { %v3805_v0 = vsel %vm3709_vm2, %v3686_v14, %v3789_v38  ;;  %v3809_v14 = vld [vmem:[%s9346_s15] sm:$0xff] }
 0x5ee   : > { %3913 = vrot.lane.b32.xlu2 %v3805_v0, %s6887_s14  ;;  %v3565_v53 = vadd.f32 %v3564_v16, %v3500_v57  ;;  %v6436_v0 = vpack.i.bf16 %v9549_v20, %v9542_v27 }
 0x5f0   : > { %v3688_v26 = vpop.f32.mrf.mxu3  ;;  %v9482_v8 = vld [vmem:[#allocation2] sm:$0xff] }
 0x5f1   : > { %v3689_v28 = vadd.f32 %v3688_v26, %v3624_v61  ;;  %4951 = vst.msk [vmem:[#allocation2] sm:$0xff] %vm522_vm0, %v10460_v18 }
 0x5f3   : > { %v3790_v42 = vmul.f32 %v9421_v58, %v3689_v28  ;;  %vm3710_vm3 = vcmp.ge.f32.partialorder %v3689_v28, 0.0  ;;  %v3629_v6 = vpop.f32.mrf.mxu2 }
 0x5f4   : > { %v3630_v3 = vadd.f32 %v3629_v6, %v3565_v53 }
 0x5f5   : > { %v3806_v11 = vsel %vm3710_vm3, %v3689_v28, %v3790_v42 }
 0x5f6   : > { %3915 = vrot.lane.b32.xlu0 %v3806_v11, %s6887_s14  ;;  %3941 = vrot.lane.b32.xlu2 %v3819_v33, %s6887_s14 }
 0x5f8   : > { %v3691_v4 = vpop.f32.mrf.mxu3 }
 0x5f9   : > { %v3692_v25 = vadd.f32 %v3691_v4, %v3627_v5 }
 0x5fb   : > { %vm3711_vm4 = vcmp.ge.f32.partialorder %v3692_v25, 0.0  ;;  %v3791_v58 = vmul.f32 %v9456_v19, %v3692_v25  ;;  %v3820_v19 = vld [vmem:[%s9346_s15 + $0x58] sm:$0xff] }
 0x5fd   : > { %v3807_v40 = vsel %vm3711_vm4, %v3692_v25, %v3791_v58 }
 0x5fe   : > { %3917 = vrot.lane.b32.xlu1 %v3807_v40, %s6887_s14  ;;  %3935 = vrot.lane.b32.xlu2 %v3816_v30, %s6887_s14 }
 0x600   : > { %v3694_v43 = vpop.f32.mrf.mxu3  ;;  %v3896_v36 = vpop.permute.xlu2 %3895 }
 0x601   : > { %v3695_v62 = vadd.f32 %v3694_v43, %v3630_v3  ;;  %3988 = vst.msk [vmem:[#allocation2 + $0x18] sm:$0xff] %vm2600_vm6, %v3896_v36 }
 0x603   : > { %vm3712_vm5 = vcmp.ge.f32.partialorder %v3695_v62, 0.0  ;;  %v3792_v54 = vmul.f32 %v9465_v17, %v3695_v62  ;;  %v3817_v17 = vld [vmem:[%s9346_s15 + $0x40] sm:$0xff] }
 0x605   : > { %v3808_v52 = vsel %vm3712_vm5, %v3695_v62, %v3792_v54 }
 0x606   : > { %3943 = vrot.lane.b32.xlu1 %v3820_v19, %s6887_s14  ;;  %3919 = vrot.lane.b32.xlu0 %v3808_v52, %s6887_s14 }
 0x607   : > { %3929 = vrot.lane.b32.xlu2 %v3813_v48, %s6887_s14 }
 0x608   : > { %v3892_v45 = vpop.permute.xlu0 %3891  ;;  %v9504_v9 = vld [vmem:[#allocation2 + $0x18] sm:$0xff] }
 0x609   : > { %3986 = vst.msk [vmem:[#allocation2 + $0x8] sm:$0xff] %vm2600_vm6, %v3892_v45 }
 0x60a   : > { %4954 = vst.msk [vmem:[#allocation2 + $0x18] sm:$0xff] %vm522_vm0, %v10460_v18 }
 0x60e   : > { %3937 = vrot.lane.b32.xlu1 %v3817_v17, %s6887_s14  ;;  %3939 = vrot.lane.b32.xlu0 %v3818_v32, %s6887_s14 }
 0x60f   : > { %3923 = vrot.lane.b32.xlu2 %v3810_v15, %s6887_s14 }
 0x610   : > { %v3894_v35 = vpop.permute.xlu1 %3893  ;;  %v9513_v31 = vld [vmem:[#allocation2 + $0x8] sm:$0xff] }
 0x611   : > { %3987 = vst.msk [vmem:[#allocation2 + $0x10] sm:$0xff] %vm2600_vm6, %v3894_v35 }
 0x612   : > { %4952 = vst.msk [vmem:[#allocation2 + $0x8] sm:$0xff] %vm522_vm0, %v10460_v18 }
 0x616   : > { %3931 = vrot.lane.b32.xlu1 %v3814_v46, %s6887_s14  ;;  %3933 = vrot.lane.b32.xlu0 %v3815_v51, %s6887_s14 }
 0x618   : > { %v3902_v59 = vpop.permute.xlu2 %3901  ;;  %v9523_v29 = vld [vmem:[#allocation2 + $0x10] sm:$0xff] }
 0x619   : > { %3991 = vst.msk [vmem:[#allocation2 + $0x30] sm:$0xff] %vm2600_vm6, %v3902_v59 }
 0x61a   : > { %4953 = vst.msk [vmem:[#allocation2 + $0x10] sm:$0xff] %vm522_vm0, %v10460_v18 }
 0x61e   : > { %3925 = vrot.lane.b32.xlu1 %v3811_v55, %s6887_s14  ;;  %3927 = vrot.lane.b32.xlu0 %v3812_v1, %s6887_s14 }
 0x620   : > { %v3898_v44 = vpop.permute.xlu0 %3897  ;;  %v9533_v34 = vld [vmem:[#allocation2 + $0x30] sm:$0xff] }
 0x621   : > { %3989 = vst.msk [vmem:[#allocation2 + $0x20] sm:$0xff] %vm2600_vm6, %v3898_v44 }
 0x622   : > { %4957 = vst.msk [vmem:[#allocation2 + $0x30] sm:$0xff] %vm522_vm0, %v10460_v18 }
 0x626   : > { %3921 = vrot.lane.b32.xlu0 %v3809_v14, %s6887_s14 }
 0x628   : > { %v3900_v10 = vpop.permute.xlu1 %3899  ;;  %v9554_v24 = vld [vmem:[#allocation2 + $0x20] sm:$0xff] }
 0x629   : > { %3990 = vst.msk [vmem:[#allocation2 + $0x28] sm:$0xff] %vm2600_vm6, %v3900_v10  ;;  %v6461_v10 = vpack.i.bf16 %v9504_v9, %v9523_v29 }
 0x62a   : > { %4955 = vst.msk [vmem:[#allocation2 + $0x20] sm:$0xff] %vm522_vm0, %v10460_v18 }
 0x630   : > { %v3908_v38 = vpop.permute.xlu2 %3907  ;;  %v9565_v60 = vld [vmem:[#allocation2 + $0x28] sm:$0xff] }
 0x631   : > { %3994 = vst.msk [vmem:[#allocation2 + $0x48] sm:$0xff] %vm2600_vm6, %v3908_v38 }
 0x632   : > { %4956 = vst.msk [vmem:[#allocation2 + $0x28] sm:$0xff] %vm522_vm0, %v10460_v18 }
 0x638   : > { %v3904_v22 = vpop.permute.xlu0 %3903  ;;  %v9572_v56 = vld [vmem:[#allocation2 + $0x48] sm:$0xff] }
 0x639   : > { %3992 = vst.msk [vmem:[#allocation2 + $0x38] sm:$0xff] %vm2600_vm6, %v3904_v22 }
 0x63a   : > { %4960 = vst.msk [vmem:[#allocation2 + $0x48] sm:$0xff] %vm522_vm0, %v10460_v18 }
 0x640   : > { %v3906_v23 = vpop.permute.xlu1 %3905  ;;  %v9577_v39 = vld [vmem:[#allocation2 + $0x38] sm:$0xff] }
 0x641   : > { %3993 = vst.msk [vmem:[#allocation2 + $0x40] sm:$0xff] %vm2600_vm6, %v3906_v23 }
 0x642   : > { %4958 = vst.msk [vmem:[#allocation2 + $0x38] sm:$0xff] %vm522_vm0, %v10460_v18 }
 0x648   : > { %v3914_v61 = vpop.permute.xlu2 %3913  ;;  %v9582_v47 = vld [vmem:[#allocation2 + $0x40] sm:$0xff] }
 0x649   : > { %3997 = vst.msk [vmem:[#allocation2 + $0x60] sm:$0xff] %vm2600_vm6, %v3914_v61 }
 0x64a   : > { %4959 = vst.msk [vmem:[#allocation2 + $0x40] sm:$0xff] %vm522_vm0, %v10460_v18 }
 0x650   : > { %v3910_v26 = vpop.permute.xlu0 %3909  ;;  %v3942_v49 = vpop.permute.xlu2 %3941  ;;  %v9586_v28 = vld [vmem:[#allocation2 + $0x60] sm:$0xff] }
 0x651   : > { %3995 = vst.msk [vmem:[#allocation2 + $0x50] sm:$0xff] %vm2600_vm6, %v3910_v26  ;;  %v6486_v12 = vpack.i.bf16 %v9586_v28, %v9542_v27  ;;  %v4279_v27 = vld [vmem:[#allocation5 + $0x30] sm:$0xff] }
 0x652   : > { %4011 = vst.msk [vmem:[#allocation2 + $0xd0] sm:$0xff] %vm2600_vm6, %v3942_v49 }
 0x653   : > { %4963 = vst.msk [vmem:[#allocation2 + $0x60] sm:$0xff] %vm522_vm0, %v10460_v18 }
 0x658   : > { %v3912_v37 = vpop.permute.xlu1 %3911  ;;  %v3936_v7 = vpop.permute.xlu2 %3935  ;;  %v9600_v33 = vld [vmem:[#allocation2 + $0x50] sm:$0xff] }
 0x659   : > { %3996 = vst.msk [vmem:[#allocation2 + $0x58] sm:$0xff] %vm2600_vm6, %v3912_v37  ;;  %v9596_v42 = vld [vmem:[#allocation2 + $0xd0] sm:$0xff] }
 0x65a   : > { %4008 = vst.msk [vmem:[#allocation2 + $0xb8] sm:$0xff] %vm2600_vm6, %v3936_v7  ;;  %v6456_v7 = vpack.i.bf16 %v9513_v31, %v9482_v8 }
 0x65b   : > { %4977 = vst.msk [vmem:[#allocation2 + $0xd0] sm:$0xff] %vm522_vm0, %v10460_v18 }
 0x65c   : > { %4961 = vst.msk [vmem:[#allocation2 + $0x50] sm:$0xff] %vm522_vm0, %v10460_v18 }
 0x660   : > { %v9604_v41 = vld [vmem:[#allocation2 + $0x58] sm:$0xff] }
 0x661   : > { %v3930_v11 = vpop.permute.xlu2 %3929  ;;  %4962 = vst.msk [vmem:[#allocation2 + $0x58] sm:$0xff] %vm522_vm0, %v10460_v18  ;;  %v6481_v50 = vpack.i.bf16 %v9604_v41, %v9600_v33  ;;  %v6506_v63 = vpack.i.bf16 %v9604_v41, %v9549_v20  ;;  %v9613_v13 = vld [vmem:[#allocation2 + $0xb8] sm:$0xff] }
 0x662   : > { %4005 = vst.msk [vmem:[#allocation2 + $0xa0] sm:$0xff] %vm2600_vm6, %v3930_v11  ;;  %v4273_v11 = vld [vmem:[#allocation5] sm:$0xff]  ;;  %v4280_v20 = vld [vmem:[#allocation5 + $0x38] sm:$0xff] }
 0x663   : > { %4974 = vst.msk [vmem:[#allocation2 + $0xb8] sm:$0xff] %vm522_vm0, %v10460_v18 }
 0x668   : > { %v3916_v5 = vpop.permute.xlu0 %3915 }
 0x669   : > { %3998 = vst.msk [vmem:[#allocation2 + $0x68] sm:$0xff] %vm2600_vm6, %v3916_v5  ;;  %v9618_v4 = vld [vmem:[#allocation2 + $0xa0] sm:$0xff]  ;;  %v3924_v58 = vpop.permute.xlu2 %3923  ;;  %v4274_v5 = vld [vmem:[#allocation5 + $0x8] sm:$0xff] }
 0x66a   : > { %4971 = vst.msk [vmem:[#allocation2 + $0xa0] sm:$0xff] %vm522_vm0, %v10460_v18 }
 0x66b   : > { %4002 = vst.msk [vmem:[#allocation2 + $0x88] sm:$0xff] %vm2600_vm6, %v3924_v58  ;;  %v4304_v58 = vld [vmem:[#allocation5 + $0xf8] sm:$0xff] }
 0x670   : > { %v3918_v57 = vpop.permute.xlu1 %3917  ;;  %v9622_v25 = vld [vmem:[#allocation2 + $0x68] sm:$0xff] }
 0x671   : > { %3999 = vst.msk [vmem:[#allocation2 + $0x70] sm:$0xff] %vm2600_vm6, %v3918_v57  ;;  %v6491_v16 = vpack.i.bf16 %v9622_v25, %v9586_v28  ;;  %v6496_v26 = vpack.i.bf16 %v9622_v25, %v9540_v21 }
 0x672   : > { %4964 = vst.msk [vmem:[#allocation2 + $0x68] sm:$0xff] %vm522_vm0, %v10460_v18  ;;  %v9652_v54 = vld [vmem:[#allocation2 + $0x88] sm:$0xff] }
 0x673   : > { %4968 = vst.msk [vmem:[#allocation2 + $0x88] sm:$0xff] %vm522_vm0, %v10460_v18 }
 0x678   : > { %v3944_v30 = vpop.permute.xlu1 %3943  ;;  %v3920_v6 = vpop.permute.xlu0 %3919  ;;  %v9632_v53 = vld [vmem:[#allocation2 + $0x70] sm:$0xff] }
 0x679   : > { %4012 = vst.msk [vmem:[#allocation2 + $0xd8] sm:$0xff] %vm2600_vm6, %v3944_v30  ;;  %v9841_v30 = vld [vmem:[%s10411_s9 + $0x8] sm:$0xff] }
 0x67a   : > { %4000 = vst.msk [vmem:[#allocation2 + $0x78] sm:$0xff] %vm2600_vm6, %v3920_v6 }
 0x67b   : > { %4965 = vst.msk [vmem:[#allocation2 + $0x70] sm:$0xff] %vm522_vm0, %v10460_v18 }
 0x680   : > { %v3938_v40 = vpop.permute.xlu1 %3937  ;;  %v3940_v3 = vpop.permute.xlu0 %3939  ;;  %v9636_v43 = vld [vmem:[#allocation2 + $0xd8] sm:$0xff] }
 0x681   : > { %4009 = vst.msk [vmem:[#allocation2 + $0xc0] sm:$0xff] %vm2600_vm6, %v3938_v40  ;;  %v9639_v36 = vld [vmem:[#allocation2 + $0x78] sm:$0xff]  ;;  %4502 = vmatpush.msrb.mxu1 %v9636_v43  ;;  %v6441_v1 = vpack.i.bf16 %v9636_v43, %v9560_v2  ;;  %v4310_v40 = vld [vmem:[#allocation5 + $0x128] sm:$0xff] }
 0x682   : > { %4010 = vst.msk [vmem:[#allocation2 + $0xc8] sm:$0xff] %vm2600_vm6, %v3940_v3  ;;  %4433 = vmatpush.msrb.mxu0 %v9639_v36  ;;  %v6511_v62 = vpack.i.bf16 %v9632_v53, %v9639_v36  ;;  %v6501_v37 = vpack.i.bf16 %v9639_v36, %v9632_v53  ;;  %v9849_v3 = vld [vmem:[%s10411_s9 + $0x28] sm:$0xff]  ;;  %v4315_v36 = vld [vmem:[#allocation5 + $0x150] sm:$0xff] }
 0x683   : > { %4966 = vst.msk [vmem:[#allocation2 + $0x78] sm:$0xff] %vm522_vm0, %v10460_v18  ;;  %4503 = vmatpush.msrb.mxu1 %v9596_v42 }
 0x684   : > { %4434 = vmatpush.msrb.mxu0 %v9632_v53  ;;  %4978 = vst.msk [vmem:[#allocation2 + $0xd8] sm:$0xff] %vm522_vm0, %v10460_v18  ;;  %v4309_v53 = vld [vmem:[#allocation5 + $0x120] sm:$0xff] }
 0x686   : > { %4435 = vmatpush.msrb.mxu0 %v9622_v25 }
 0x688   : > { %4436 = vmatpush.msrb.mxu0 %v9586_v28  ;;  %v3932_v19 = vpop.permute.xlu1 %3931  ;;  %v3934_v48 = vpop.permute.xlu0 %3933  ;;  %v9666_v45 = vld [vmem:[#allocation2 + $0xc0] sm:$0xff]  ;;  %v6890_v28 = vmov 4  }
 0x689   : > { %4006 = vst.msk [vmem:[#allocation2 + $0xa8] sm:$0xff] %vm2600_vm6, %v3932_v19  ;;  %v9659_v52 = vld [vmem:[#allocation2 + $0xc8] sm:$0xff]  ;;  %v6451_v49 = vpack.i.bf16 %v9613_v13, %v9666_v45  ;;  %6576 = vset.pattern.permute.xlu0 %v6890_v28  ;;  %6577 = vset.pattern.permute.xlu1 %v6890_v28  ;;  %v4316_v19 = vld [vmem:[#allocation5 + $0x158] sm:$0xff] }
 0x68a   : > { %4007 = vst.msk [vmem:[#allocation2 + $0xb0] sm:$0xff] %vm2600_vm6, %v3934_v48  ;;  %4437 = vmatpush.msrb.mxu0 %v9604_v41  ;;  %4504 = vmatpush.msrb.mxu1 %v9659_v52  ;;  %v6446_v61 = vpack.i.bf16 %v9659_v52, %v9596_v42  ;;  %v4285_v41 = vld [vmem:[#allocation5 + $0x60] sm:$0xff] }
 0x68b   : > { %4976 = vst.msk [vmem:[#allocation2 + $0xc8] sm:$0xff] %vm522_vm0, %v10460_v18  ;;  %6578 = vset.pattern.permute.xlu2 %v6890_v28  ;;  %v9869_v48 = vld [vmem:[%s10411_s9 + $0x40] sm:$0xff] }
 0x68c   : > { %4438 = vmatpush.msrb.mxu0 %v9600_v33  ;;  %4505 = vmatpush.msrb.mxu1 %v9666_v45  ;;  %4975 = vst.msk [vmem:[#allocation2 + $0xc0] sm:$0xff] %vm522_vm0, %v10460_v18 }
 0x68e   : > { %4439 = vmatpush.msrb.mxu0 %v9572_v56  ;;  %4506 = vmatpush.msrb.mxu1 %v9613_v13 }
 0x690   : > { %4440 = vmatpush.msrb.mxu0 %v9582_v47  ;;  %v3926_v17 = vpop.permute.xlu1 %3925  ;;  %v3928_v32 = vpop.permute.xlu0 %3927  ;;  %v9675_v35 = vld [vmem:[#allocation2 + $0xa8] sm:$0xff] }
 0x691   : > { %4003 = vst.msk [vmem:[#allocation2 + $0x90] sm:$0xff] %vm2600_vm6, %v3926_v17  ;;  %v9678_v46 = vld [vmem:[#allocation2 + $0xb0] sm:$0xff]  ;;  %v6426_v51 = vpack.i.bf16 %v9675_v35, %v9618_v4 }
 0x692   : > { %4004 = vst.msk [vmem:[#allocation2 + $0x98] sm:$0xff] %vm2600_vm6, %v3928_v32  ;;  %4441 = vmatpush.msrb.mxu0 %v9577_v39  ;;  %4507 = vmatpush.msrb.mxu1 %v9678_v46  ;;  %v6431_v23 = vpack.i.bf16 %v9540_v21, %v9678_v46  ;;  %v6471_v21 = vpack.i.bf16 %v9577_v39, %v9533_v34  ;;  %v9881_v17 = vld [vmem:[%s10411_s9 + $0x30] sm:$0xff] }
 0x693   : > { %4973 = vst.msk [vmem:[#allocation2 + $0xb0] sm:$0xff] %vm522_vm0, %v10460_v18  ;;  %6427 = vrot.lane.b32.xlu2 %v6426_v51, %s6880_s20  ;;  %v6546_v57 = vpack.i.bf16 %v9554_v24, %v9678_v46  ;;  %v9889_v46 = vld [vmem:[%s10411_s9 + $0x58] sm:$0xff]  ;;  %v9895_v51 = vld [vmem:[%s10411_s9 + $0x68] sm:$0xff] }
 0x694   : > { %4442 = vmatpush.msrb.mxu0 %v9533_v34  ;;  %4972 = vst.msk [vmem:[#allocation2 + $0xa8] sm:$0xff] %vm522_vm0, %v10460_v18  ;;  %4508 = vmatpush.msrb.mxu1 %v9675_v35 }
 0x696   : > { %4443 = vmatpush.msrb.mxu0 %v9565_v60  ;;  %4509 = vmatpush.msrb.mxu1 %v9618_v4 }
 0x698   : > { %4444 = vmatpush.msrb.mxu0 %v9554_v24  ;;  %v3922_v59 = vpop.permute.xlu0 %3921  ;;  %v9695_v15 = vld [vmem:[#allocation2 + $0x90] sm:$0xff] }
 0x699   : > { %4001 = vst.msk [vmem:[#allocation2 + $0x80] sm:$0xff] %vm2600_vm6, %v3922_v59  ;;  %v9698_v55 = vld [vmem:[#allocation2 + $0x98] sm:$0xff]  ;;  %v4327_v59 = vld [vmem:[#allocation5 + $0x1b0] sm:$0xff] }
 0x69a   : > { %4445 = vmatpush.msrb.mxu0 %v9504_v9  ;;  %4510 = vmatpush.msrb.mxu1 %v9698_v55  ;;  %4970 = vst.msk [vmem:[#allocation2 + $0x98] sm:$0xff] %vm522_vm0, %v10460_v18  ;;  %v6421_v44 = vpack.i.bf16 %v9698_v55, %v9695_v15 }
 0x69b   : > { %4969 = vst.msk [vmem:[#allocation2 + $0x90] sm:$0xff] %vm522_vm0, %v10460_v18  ;;  %6442 = vrot.lane.b32.xlu2 %v6441_v1, %s6880_s20 }
 0x69c   : > { %6422 = vrot.lane.b32.xlu1 %v6421_v44, %s6880_s20  ;;  %4446 = vmatpush.msrb.mxu0 %v9523_v29 }
 0x69d   : > { %4511 = vmatpush.msrb.mxu1 %v9695_v15 }
 0x69e   : > { %4447 = vmatpush.msrb.mxu0 %v9513_v31 }
 0x69f   : > { %4512 = vmatpush.msrb.mxu1 %v9652_v54 }
 0x6a0   : > { %4448 = vmatpush.msrb.mxu0 %v9482_v8  ;;  %v9717_v14 = vld [vmem:[#allocation2 + $0x80] sm:$0xff] }
 0x6a1   : > { %4513 = vmatpush.msrb.mxu1 %v9717_v14  ;;  %4967 = vst.msk [vmem:[#allocation2 + $0x80] sm:$0xff] %vm522_vm0, %v10460_v18  ;;  %v6416_v38 = vpack.i.bf16 %v9652_v54, %v9717_v14  ;;  %v6571_v22 = vpack.i.bf16 %v9717_v14, %v9652_v54  ;;  %v6476_v18 = vpack.i.bf16 %v9572_v56, %v9582_v47  ;;  %v4328_v14 = vld [vmem:[#allocation5 + $0x1b8] sm:$0xff] }
 0x6a2   : > { %4449 = vmatmul.f32.vlgmr.msrb.gmra.mxu0 %v4273_v11  ;;  %4514 = vmatmul.f32.vlgmr.msrb.gmra.mxu1 %v4274_v5 }
 0x6a3   : > { %6462 = vrot.lane.b32.xlu2 %v6461_v10, %s6880_s20  ;;  %6417 = vrot.lane.b32.xlu0 %v6416_v38, %s6880_s20  ;;  %v9912_v10 = vld [vmem:[%s10411_s9 + $0x70] sm:$0xff]  ;;  %v4333_v38 = vld [vmem:[#allocation5 + $0x1e0] sm:$0xff] }
 0x6a4   : > { %6437 = vrot.lane.b32.xlu1 %v6436_v0, %s6880_s20  ;;  %v6466_v0 = vpack.i.bf16 %v9565_v60, %v9554_v24  ;;  %v6566_v24 = vpack.i.bf16 %v9482_v8, %v9695_v15  ;;  %v9829_v8 = vld [vmem:[%s10411_s9] sm:$0xff]  ;;  %v9901_v15 = vld [vmem:[%s10411_s9 + $0x48] sm:$0xff] }
 0x6aa   : > { %4452 = vmatmul.f32.gmra.mxu0 %v4279_v27  ;;  %4517 = vmatmul.f32.gmra.mxu1 %v4280_v20 }
 0x6ab   : > { %6477 = vrot.lane.b32.xlu2 %v6476_v18, %s6880_s20  ;;  %6432 = vrot.lane.b32.xlu0 %v6431_v23, %s6880_s20 }
 0x6ac   : > { %6447 = vrot.lane.b32.xlu1 %v6446_v61, %s6880_s20 }
 0x6b2   : > { %4455 = vmatmul.f32.gmra.mxu0 %v4285_v41 }
 0x6b3   : > { %6497 = vrot.lane.b32.xlu2 %v6496_v26, %s6881_s21  ;;  %6467 = vrot.lane.b32.xlu0 %v6466_v0, %s6880_s20  ;;  %v4334_v0 = vld [vmem:[#allocation5 + $0x1e8] sm:$0xff] }
 0x6b4   : > { %6452 = vrot.lane.b32.xlu1 %v6451_v49, %s6880_s20 }
 0x6bb   : > { %6502 = vrot.lane.b32.xlu2 %v6501_v37, %s6880_s20  ;;  %6482 = vrot.lane.b32.xlu0 %v6481_v50, %s6880_s20  ;;  %v6526_v50 = vpack.i.bf16 %v9582_v47, %v9596_v42  ;;  %v6516_v47 = vpack.i.bf16 %v9600_v33, %v9560_v2  ;;  %v6521_v42 = vpack.i.bf16 %v9572_v56, %v9636_v43  ;;  %v4291_v33 = vld [vmem:[#allocation5 + $0x90] sm:$0xff]  ;;  %v9855_v43 = vld [vmem:[%s10411_s9 + $0x38] sm:$0xff] }
 0x6bc   : > { %6457 = vrot.lane.b32.xlu1 %v6456_v7, %s6880_s20  ;;  %v6556_v2 = vpack.i.bf16 %v9523_v29, %v9618_v4  ;;  %v6536_v56 = vpack.i.bf16 %v9533_v34, %v9666_v45  ;;  %4458 = vmatmul.f32.gmra.mxu0 %v4291_v33  ;;  %v6551_v29 = vpack.i.bf16 %v9504_v9, %v9675_v35  ;;  %v4298_v34 = vld [vmem:[#allocation5 + $0xc8] sm:$0xff]  ;;  %v9820_v9 = vld [vmem:[%s10411_s9 + $0x10] sm:$0xff]  ;;  %v4321_v45 = vld [vmem:[#allocation5 + $0x180] sm:$0xff] }
 0x6bd   : > { %v6561_v4 = vpack.i.bf16 %v9513_v31, %v9698_v55  ;;  %v9835_v31 = vld [vmem:[%s10411_s9 + $0x20] sm:$0xff]  ;;  %v4322_v35 = vld [vmem:[#allocation5 + $0x188] sm:$0xff]  ;;  %v4339_v37 = vld [vmem:[#allocation5 + $0x210] sm:$0xff] }
 0x6be   : > { %v9926_v7 = vld [vmem:[%s10411_s9 + $0x78] sm:$0xff] }
 0x6c3   : > { %6507 = vrot.lane.b32.xlu2 %v6506_v63, %s6881_s21  ;;  %6487 = vrot.lane.b32.xlu0 %v6486_v12, %s6881_s21  ;;  %v6541_v12 = vpack.i.bf16 %v9565_v60, %v9613_v13  ;;  %v4286_v63 = vld [vmem:[#allocation5 + $0x68] sm:$0xff]  ;;  %v6531_v60 = vpack.i.bf16 %v9577_v39, %v9659_v52  ;;  %v4292_v13 = vld [vmem:[#allocation5 + $0x98] sm:$0xff]  ;;  %v4297_v39 = vld [vmem:[#allocation5 + $0xc0] sm:$0xff] }
 0x6c4   : > { %6472 = vrot.lane.b32.xlu1 %v6471_v21, %s6880_s20  ;;  %4520 = vmatmul.f32.gmra.mxu1 %v4286_v63  ;;  %v9875_v52 = vld [vmem:[%s10411_s9 + $0x50] sm:$0xff]  ;;  %v4346_v63 = vld [vmem:[#allocation5 + $0x248] sm:$0xff] }
 0x6c5   : > { %4461 = vmatmul.f32.gmra.mxu0 %v4297_v39  ;;  %v4352_v39 = vld [vmem:[#allocation5 + $0x278] sm:$0xff] }
 0x6cb   : > { %6527 = vrot.lane.b32.xlu2 %v6526_v50, %s6881_s21  ;;  %6512 = vrot.lane.b32.xlu0 %v6511_v62, %s6881_s21  ;;  %v9861_v62 = vld [vmem:[%s10411_s9 + $0x18] sm:$0xff] }
 0x6cc   : > { %6492 = vrot.lane.b32.xlu1 %v6491_v16, %s6880_s20  ;;  %4523 = vmatmul.f32.gmra.mxu1 %v4292_v13  ;;  %v4303_v16 = vld [vmem:[#allocation5 + $0xf0] sm:$0xff]  ;;  %v4340_v50 = vld [vmem:[#allocation5 + $0x218] sm:$0xff] }
 0x6cd   : > { %4464 = vmatmul.f32.gmra.mxu0 %v4303_v16  ;;  %v4351_v13 = vld [vmem:[#allocation5 + $0x270] sm:$0xff] }
 0x6d3   : > { %6542 = vrot.lane.b32.xlu2 %v6541_v12, %s6881_s21  ;;  %6517 = vrot.lane.b32.xlu0 %v6516_v47, %s6881_s21 }
 0x6d4   : > { %6522 = vrot.lane.b32.xlu1 %v6521_v42, %s6881_s21  ;;  %4526 = vmatmul.f32.gmra.mxu1 %v4298_v34  ;;  %v4345_v42 = vld [vmem:[#allocation5 + $0x240] sm:$0xff] }
 0x6d5   : > { %4467 = vmatmul.f32.gmra.mxu0 %v4309_v53 }
 0x6db   : > { %6557 = vrot.lane.b32.xlu2 %v6556_v2, %s6881_s21  ;;  %6532 = vrot.lane.b32.xlu0 %v6531_v60, %s6881_s21 }
 0x6dc   : > { %6537 = vrot.lane.b32.xlu1 %v6536_v56, %s6881_s21  ;;  %4529 = vmatmul.f32.gmra.mxu1 %v4304_v58 }
 0x6dd   : > { %4470 = vmatmul.f32.gmra.mxu0 %v4315_v36 }
 0x6e3   : > { %6572 = vrot.lane.b32.xlu2 %v6571_v22, %s6881_s21  ;;  %6547 = vrot.lane.b32.xlu0 %v6546_v57, %s6881_s21  ;;  %v9918_v22 = vld [vmem:[%s10411_s9 + $0x60] sm:$0xff] }
 0x6e4   : > { %6552 = vrot.lane.b32.xlu1 %v6551_v29, %s6881_s21  ;;  %4532 = vmatmul.f32.gmra.mxu1 %v4310_v40 }
 0x6e5   : > { %4473 = vmatmul.f32.gmra.mxu0 %v4321_v45 }
 0x6eb   : > { %6562 = vrot.lane.b32.xlu0 %v6561_v4, %s6881_s21  ;;  %4378 = vperm.xlu2 %6578, %v9820_v9  }
 0x6ec   : > { %6567 = vrot.lane.b32.xlu1 %v6566_v24, %s6881_s21  ;;  %4535 = vmatmul.f32.gmra.mxu1 %v4316_v19  ;;  %v4358_v19 = vld [vmem:[#allocation5 + $0x2a8] sm:$0xff] }
 0x6ed   : > { %v9824_v25 = vpop.permute.xlu2 %6427  ;;  %4476 = vmatmul.f32.gmra.mxu0 %v4327_v59 }
 0x6ee   : > { %v6430_v4 = vunpack.i.h.bf16 %v9824_v25  ;;  %v6429_v24 = vunpack.i.l.bf16 %v9824_v25 }
 0x6f3   : > { %4370 = vperm.xlu0 %6576, %v9829_v8   ;;  %4386 = vperm.xlu2 %6578, %v9835_v31  }
 0x6f4   : > { %4374 = vperm.xlu1 %6577, %v9841_v30   ;;  %4538 = vmatmul.f32.gmra.mxu1 %v4322_v35 }
 0x6f5   : > { %v9844_v6 = vpop.permute.xlu2 %6442  ;;  %4479 = vmatmul.f32.gmra.mxu0 %v4333_v38 }
 0x6f6   : > { %v6444_v12 = vunpack.i.l.bf16 %v9844_v6  ;;  %v6445_v41 = vunpack.i.h.bf16 %v9844_v6  ;;  %v4357_v6 = vld [vmem:[#allocation5 + $0x2a0] sm:$0xff] }
 0x6fb   : > { %4390 = vperm.xlu0 %6576, %v9849_v3   ;;  %4398 = vperm.xlu2 %6578, %v9855_v43  }
 0x6fc   : > { %4382 = vperm.xlu1 %6577, %v9861_v62   ;;  %4541 = vmatmul.f32.gmra.mxu1 %v4328_v14  ;;  %v4363_v14 = vld [vmem:[#allocation5 + $0x2d0] sm:$0xff] }
 0x6fd   : > { %v9864_v54 = vpop.permute.xlu2 %6462  ;;  %4482 = vmatmul.f32.gmra.mxu0 %v4339_v37 }
 0x703   : > { %4402 = vperm.xlu0 %6576, %v9869_v48   ;;  %4410 = vperm.xlu2 %6578, %v9875_v52  }
 0x704   : > { %4394 = vperm.xlu1 %6577, %v9881_v17   ;;  %4544 = vmatmul.f32.gmra.mxu1 %v4334_v0 }
 0x705   : > { %v9884_v32 = vpop.permute.xlu2 %6477  ;;  %4485 = vmatmul.f32.gmra.mxu0 %v4345_v42 }
 0x70b   : > { %4414 = vperm.xlu0 %6576, %v9889_v46   ;;  %4422 = vperm.xlu2 %6578, %v9895_v51  }
 0x70c   : > { %4406 = vperm.xlu1 %6577, %v9901_v15   ;;  %4547 = vmatmul.f32.gmra.mxu1 %v4340_v50 }
 0x70d   : > { %v9904_v55 = vpop.permute.xlu2 %6497  ;;  %4488 = vmatmul.f32.gmra.mxu0 %v4351_v13 }
 0x70e   : > { %v9906_v1 = vpop.permute.xlu1 %6422  ;;  %v6499_v44 = vunpack.i.l.bf16 %v9904_v55 }
 0x70f   : > { %v6425_v53 = vunpack.i.h.bf16 %v9906_v1  ;;  %v6424_v45 = vunpack.i.l.bf16 %v9906_v1  ;;  %v4364_v1 = vld [vmem:[#allocation5 + $0x2d8] sm:$0xff] }
 0x710   : > { %4758 = vmatpush.msra.mxu1 %v6499_v44 }
 0x713   : > { %4426 = vperm.xlu0 %6576, %v9912_v10  }
 0x714   : > { %4418 = vperm.xlu1 %6577, %v9918_v22   ;;  %4550 = vmatmul.f32.gmra.mxu1 %v4346_v63 }
 0x715   : > { %v9921_v18 = vpop.permute.xlu0 %6417  ;;  %v6503_v23 = vpop.permute.xlu2 %6502  ;;  %4491 = vmatmul.f32.gmra.mxu0 %v4357_v6 }
 0x716   : > { %v6438_v61 = vpop.permute.xlu1 %6437  ;;  %v6505_v26 = vunpack.i.h.bf16 %v6503_v23  ;;  %v6504_v49 = vunpack.i.l.bf16 %v6503_v23  ;;  %v6420_v25 = vunpack.i.h.bf16 %v9921_v18  ;;  %v6419_v59 = vunpack.i.l.bf16 %v9921_v18 }
 0x717   : > { %v6439_v27 = vunpack.i.l.bf16 %v6438_v61  ;;  %v6440_v20 = vunpack.i.h.bf16 %v6438_v61  ;;  %v4276_v61 = vld [vmem:[#allocation5 + $0x18] sm:$0xff] }
 0x718   : > { %4563 = vmatpush.msrb.mxu2 %v6505_v26 }
 0x71a   : > { %4564 = vmatpush.msrb.mxu2 %v6504_v49 }
 0x71c   : > { %4430 = vperm.xlu1 %6577, %v9926_v7   ;;  %4553 = vmatmul.f32.gmra.mxu1 %v4352_v39 }
 0x71d   : > { %v6433_v21 = vpop.permute.xlu0 %6432  ;;  %v6508_v16 = vpop.permute.xlu2 %6507  ;;  %4494 = vmatmul.f32.gmra.mxu0 %v4363_v14 }
 0x71e   : > { %v6448_v11 = vpop.permute.xlu1 %6447  ;;  %v6435_v5 = vunpack.i.h.bf16 %v6433_v21  ;;  %v6434_v34 = vunpack.i.l.bf16 %v6433_v21  ;;  %v6509_v35 = vunpack.i.l.bf16 %v6508_v16  ;;  %v6500_v21 = vunpack.i.h.bf16 %v9904_v55 }
 0x71f   : > { %v6449_v2 = vunpack.i.l.bf16 %v6448_v11  ;;  %v6450_v60 = vunpack.i.h.bf16 %v6448_v11  ;;  %v9946_v18 = vpop.f32.mrf.mxu0  ;;  %v9949_v50 = vpop.f32.mrf.mxu1  ;;  %v6510_v42 = vunpack.i.h.bf16 %v6508_v16  ;;  %v6480_v55 = vunpack.i.h.bf16 %v9884_v32 }
 0x720   : > { %4628 = vmatpush.msrb.mxu3 %v6435_v5 }
 0x722   : > { %4629 = vmatpush.msrb.mxu3 %v6439_v27  ;;  %v4282_v27 = vld [vmem:[#allocation5 + $0x48] sm:$0xff] }
 0x724   : > { %4630 = vmatpush.msrb.mxu3 %v6440_v20  ;;  %4556 = vmatmul.f32.gmra.mxu1 %v4358_v19 }
 0x725   : > { %v9930_v47 = vpop.permute.xlu0 %6467  ;;  %v6528_v49 = vpop.permute.xlu2 %6527 }
 0x726   : > { %v6453_v28 = vpop.permute.xlu1 %6452  ;;  %4631 = vmatpush.msrb.mxu3 %v6444_v12 }
 0x727   : > { %v6454_v56 = vunpack.i.l.bf16 %v6453_v28  ;;  %v6455_v57 = vunpack.i.h.bf16 %v6453_v28 }
 0x728   : > { %4632 = vmatpush.msrb.mxu3 %v6445_v41 }
 0x72a   : > { %4633 = vmatpush.msrb.mxu3 %v6449_v2 }
 0x72c   : > { %4634 = vmatpush.msrb.mxu3 %v6450_v60  ;;  %4559 = vmatmul.f32.gmra.mxu1 %v4364_v1  ;;  %v6479_v60 = vunpack.i.l.bf16 %v9884_v32 }
 0x72d   : > { %v9933_v33 = vpop.permute.xlu0 %6482 }
 0x72e   : > { %v9935_v29 = vpop.permute.xlu1 %6457  ;;  %4635 = vmatpush.msrb.mxu3 %v6454_v56  ;;  %v6485_v11 = vunpack.i.h.bf16 %v9933_v33  ;;  %v6484_v20 = vunpack.i.l.bf16 %v9933_v33  ;;  %v6529_v56 = vunpack.i.l.bf16 %v6528_v49  ;;  %v9954_v33 = vpop.f32.mrf.mxu0 }
 0x730   : > { %4636 = vmatpush.msrb.mxu3 %v6455_v57  ;;  %v6543_v57 = vpop.permute.xlu2 %6542 }
 0x732   : > { %4637 = vmatpush.msrb.mxu3 %v6434_v34  ;;  %v6530_v34 = vunpack.i.h.bf16 %v6528_v49  ;;  %v6460_v49 = vunpack.i.h.bf16 %v9935_v29 }
 0x734   : > { %4638 = vmatpush.msrb.mxu3 %v6430_v4  ;;  %v9957_v4 = vpop.f32.mrf.mxu1 }
 0x735   : > { %v6488_v58 = vpop.permute.xlu0 %6487 }
 0x736   : > { %v9940_v40 = vpop.permute.xlu1 %6472  ;;  %v6489_v36 = vunpack.i.l.bf16 %v6488_v58  ;;  %4639 = vmatpush.msrb.mxu3 %v6429_v24  ;;  %v6490_v5 = vunpack.i.h.bf16 %v6488_v58  ;;  %v4288_v24 = vld [vmem:[#allocation5 + $0x78] sm:$0xff] }
 0x737   : > { %v6475_v39 = vunpack.i.h.bf16 %v9940_v40  ;;  %v6474_v16 = vunpack.i.l.bf16 %v9940_v40  ;;  %v9962_v40 = vpop.f32.mrf.mxu0 }
 0x738   : > { %4640 = vmatpush.msrb.mxu3 %v6425_v53  ;;  %4759 = vmatpush.msra.mxu1 %v6489_v36  ;;  %v6470_v36 = vunpack.i.h.bf16 %v9930_v47 }
 0x73a   : > { %4641 = vmatpush.msrb.mxu3 %v6424_v45  ;;  %4760 = vmatpush.msra.mxu1 %v6509_v35  ;;  %v6469_v35 = vunpack.i.l.bf16 %v9930_v47 }
 0x73c   : > { %4642 = vmatpush.msrb.mxu3 %v6420_v25  ;;  %v6545_v25 = vunpack.i.h.bf16 %v6543_v57 }
 0x73d   : > { %v6513_v44 = vpop.permute.xlu0 %6512 }
 0x73e   : > { %v6493_v38 = vpop.permute.xlu1 %6492  ;;  %v6514_v23 = vunpack.i.l.bf16 %v6513_v44  ;;  %4643 = vmatpush.msrb.mxu3 %v6419_v59  ;;  %v6515_v0 = vunpack.i.h.bf16 %v6513_v44  ;;  %v6544_v59 = vunpack.i.l.bf16 %v6543_v57  ;;  %v6465_v44 = vunpack.i.h.bf16 %v9864_v54 }
 0x73f   : > { %v6495_v26 = vunpack.i.h.bf16 %v6493_v38  ;;  %4644 = vmatmul.f32.vlgmr.msrb.gmra.mxu3 %v4276_v61  ;;  %v6494_v37 = vunpack.i.l.bf16 %v6493_v38  ;;  %v4294_v38 = vld [vmem:[#allocation5 + $0xa8] sm:$0xff]  ;;  %v6558_v61 = vpop.permute.xlu2 %6557 }
 0x740   : > { %4693 = vmatpush.msra.mxu0 %v6514_v23  ;;  %v6464_v23 = vunpack.i.l.bf16 %v9864_v54  ;;  %v6560_v54 = vunpack.i.h.bf16 %v6558_v61 }
 0x741   : > { %4565 = vmatpush.msrb.mxu2 %v6495_v26  ;;  %v9965_v14 = vpop.f32.mrf.mxu1 }
 0x742   : > { %4694 = vmatpush.msra.mxu0 %v6515_v0 }
 0x743   : > { %4566 = vmatpush.msrb.mxu2 %v6494_v37 }
 0x744   : > { %4695 = vmatpush.msra.mxu0 %v6500_v21 }
 0x745   : > { %4567 = vmatpush.msrb.mxu2 %v6485_v11  ;;  %v6518_v12 = vpop.permute.xlu0 %6517  ;;  %v6459_v11 = vunpack.i.l.bf16 %v9935_v29 }
 0x746   : > { %v6523_v41 = vpop.permute.xlu1 %6522  ;;  %v6519_v28 = vunpack.i.l.bf16 %v6518_v12  ;;  %4696 = vmatpush.msra.mxu0 %v6490_v5  ;;  %v6520_v2 = vunpack.i.h.bf16 %v6518_v12  ;;  %v4275_v5 = vld [vmem:[#allocation5 + $0x10] sm:$0xff]  ;;  %v6559_v12 = vunpack.i.l.bf16 %v6558_v61 }
 0x747   : > { %4568 = vmatpush.msrb.mxu2 %v6484_v20  ;;  %4647 = vmatmul.f32.gmra.mxu3 %v4282_v27  ;;  %v6524_v63 = vunpack.i.l.bf16 %v6523_v41  ;;  %v6525_v13 = vunpack.i.h.bf16 %v6523_v41  ;;  %v6891_v27 = vmov 5   ;;  %v9970_v20 = vpop.f32.mrf.mxu0  ;;  %v4300_v41 = vld [vmem:[#allocation5 + $0xd8] sm:$0xff] }
 0x748   : > { %4697 = vmatpush.msra.mxu0 %v6510_v42  ;;  %4761 = vmatpush.msra.mxu1 %v6519_v28 }
 0x749   : > { %4569 = vmatpush.msrb.mxu2 %v6480_v55  ;;  %6580 = vset.pattern.permute.xlu0 %v6891_v27  ;;  %v9973_v42 = vpop.f32.mrf.mxu1 }
 0x74a   : > { %4698 = vmatpush.msra.mxu0 %v6520_v2  ;;  %4762 = vmatpush.msra.mxu1 %v6524_v63  ;;  %v6573_v2 = vpop.permute.xlu2 %6572 }
 0x74b   : > { %4570 = vmatpush.msrb.mxu2 %v6479_v60  ;;  %4844 = vperm.xlu0 %6580, %v9841_v30   ;;  %v6574_v57 = vunpack.i.l.bf16 %v6573_v2 }
 0x74c   : > { %4699 = vmatpush.msra.mxu0 %v6525_v13  ;;  %4763 = vmatpush.msra.mxu1 %v6529_v56  ;;  %v4277_v56 = vld [vmem:[#allocation5 + $0x20] sm:$0xff] }
 0x74d   : > { %4571 = vmatpush.msrb.mxu2 %v6475_v39  ;;  %v6533_v32 = vpop.permute.xlu0 %6532  ;;  %6581 = vset.pattern.permute.xlu1 %v6891_v27  ;;  %v4281_v13 = vld [vmem:[#allocation5 + $0x40] sm:$0xff] }
 0x74e   : > { %v6538_v58 = vpop.permute.xlu1 %6537  ;;  %v6535_v6 = vunpack.i.h.bf16 %v6533_v32  ;;  %v6534_v53 = vunpack.i.l.bf16 %v6533_v32  ;;  %4700 = vmatpush.msra.mxu0 %v6530_v34  ;;  %4848 = vperm.xlu1 %6581, %v9820_v9   ;;  %v6575_v9 = vunpack.i.h.bf16 %v6573_v2  ;;  %v4278_v34 = vld [vmem:[#allocation5 + $0x28] sm:$0xff]  ;;  %v4287_v32 = vld [vmem:[#allocation5 + $0x70] sm:$0xff]  ;;  %v4313_v2 = vld [vmem:[#allocation5 + $0x140] sm:$0xff] }
 0x74f   : > { %4572 = vmatpush.msrb.mxu2 %v6474_v16  ;;  %4650 = vmatmul.f32.gmra.mxu3 %v4288_v24  ;;  %v6540_v19 = vunpack.i.h.bf16 %v6538_v58  ;;  %v6539_v45 = vunpack.i.l.bf16 %v6538_v58  ;;  %v9977_v39 = vpop.f32.mrf.mxu0  ;;  %v4283_v16 = vld [vmem:[#allocation5 + $0x50] sm:$0xff] }
 0x750   : > { %4701 = vmatpush.msra.mxu0 %v6535_v6  ;;  %4764 = vmatpush.msra.mxu1 %v6534_v53  ;;  %v4312_v6 = vld [vmem:[#allocation5 + $0x138] sm:$0xff] }
 0x751   : > { %4573 = vmatpush.msrb.mxu2 %v6470_v36  ;;  %6579 = vset.pattern.permute.xlu2 %v6891_v27  ;;  %v9980_v24 = vpop.f32.mrf.mxu1  ;;  %v4293_v36 = vld [vmem:[#allocation5 + $0xa0] sm:$0xff] }
 0x752   : > { %4702 = vmatpush.msra.mxu0 %v6540_v19  ;;  %4765 = vmatpush.msra.mxu1 %v6539_v45  ;;  %v4318_v45 = vld [vmem:[#allocation5 + $0x168] sm:$0xff] }
 0x753   : > { %4574 = vmatpush.msrb.mxu2 %v6469_v35  ;;  %4840 = vperm.xlu2 %6579, %v9829_v8   ;;  %v4306_v8 = vld [vmem:[#allocation5 + $0x108] sm:$0xff] }
 0x754   : > { %4703 = vmatpush.msra.mxu0 %v6545_v25  ;;  %4766 = vmatpush.msra.mxu1 %v6544_v59  ;;  %v10002_v59 = vpop.permute.xlu2 %4378 }
 0x755   : > { %4575 = vmatpush.msrb.mxu2 %v6465_v44  ;;  %v6548_v47 = vpop.permute.xlu0 %6547  ;;  %4864 = vperm.xlu0 %6580, %v9881_v17   ;;  %v4284_v17 = vld [vmem:[#allocation5 + $0x58] sm:$0xff] }
 0x756   : > { %v6553_v26 = vpop.permute.xlu1 %6552  ;;  %v6550_v1 = vunpack.i.h.bf16 %v6548_v47  ;;  %v6549_v0 = vunpack.i.l.bf16 %v6548_v47  ;;  %4856 = vperm.xlu1 %6581, %v9835_v31   ;;  %v4289_v31 = vld [vmem:[#allocation5 + $0x80] sm:$0xff]  ;;  %v4296_v44 = vld [vmem:[#allocation5 + $0xb8] sm:$0xff] }
 0x757   : > { %4576 = vmatpush.msrb.mxu2 %v6464_v23  ;;  %4653 = vmatmul.f32.gmra.mxu3 %v4294_v38  ;;  %v6555_v37 = vunpack.i.h.bf16 %v6553_v26  ;;  %v6554_v21 = vunpack.i.l.bf16 %v6553_v26  ;;  %v9985_v58 = vpop.f32.mrf.mxu0  ;;  %v4324_v23 = vld [vmem:[#allocation5 + $0x198] sm:$0xff]  ;;  %v4305_v47 = vld [vmem:[#allocation5 + $0x100] sm:$0xff] }
 0x758   : > { %4704 = vmatpush.msra.mxu0 %v6550_v1  ;;  %4767 = vmatpush.msra.mxu1 %v6549_v0  ;;  %v4302_v1 = vld [vmem:[#allocation5 + $0xe8] sm:$0xff] }
 0x759   : > { %4577 = vmatpush.msrb.mxu2 %v6460_v49  ;;  %v9987_v53 = vpop.f32.mrf.mxu1  ;;  %v4330_v49 = vld [vmem:[#allocation5 + $0x1c8] sm:$0xff] }
 0x75a   : > { %4705 = vmatpush.msra.mxu0 %v6555_v37  ;;  %4768 = vmatpush.msra.mxu1 %v6554_v21 }
 0x75b   : > { %4578 = vmatpush.msrb.mxu2 %v6459_v11  ;;  %4852 = vperm.xlu2 %6579, %v9861_v62  }
 0x75c   : > { %4579 = vmatmul.f32.vlgmr.msrb.gmra.mxu2 %v4275_v5  ;;  %4706 = vmatpush.msra.mxu0 %v6560_v54  ;;  %v4307_v5 = vld [vmem:[#allocation5 + $0x110] sm:$0xff]  ;;  %v4308_v54 = vld [vmem:[#allocation5 + $0x118] sm:$0xff] }
 0x75d   : > { %4769 = vmatpush.msra.mxu1 %v6559_v12  ;;  %v6563_v29 = vpop.permute.xlu0 %6562  ;;  %4876 = vperm.xlu0 %6580, %v9901_v15   ;;  %v4290_v15 = vld [vmem:[#allocation5 + $0x88] sm:$0xff] }
 0x75e   : > { %v6568_v28 = vpop.permute.xlu1 %6567  ;;  %v6565_v55 = vunpack.i.h.bf16 %v6563_v29  ;;  %v6564_v63 = vunpack.i.l.bf16 %v6563_v29  ;;  %4868 = vperm.xlu1 %6581, %v9855_v43   ;;  %v4299_v43 = vld [vmem:[#allocation5 + $0xd0] sm:$0xff] }
 0x75f   : > { %4656 = vmatmul.f32.gmra.mxu3 %v4300_v41  ;;  %v6570_v60 = vunpack.i.h.bf16 %v6568_v28  ;;  %v6569_v30 = vunpack.i.l.bf16 %v6568_v28  ;;  %v9994_v19 = vpop.f32.mrf.mxu0  ;;  %v4336_v41 = vld [vmem:[#allocation5 + $0x1f8] sm:$0xff] }
 0x760   : > { %4707 = vmatpush.msra.mxu0 %v6565_v55  ;;  %4770 = vmatpush.msra.mxu1 %v6564_v63 }
 0x761   : > { %v9998_v25 = vpop.f32.mrf.mxu1 }
 0x762   : > { %4708 = vmatpush.msra.mxu0 %v6570_v60  ;;  %4771 = vmatpush.msra.mxu1 %v6569_v30  ;;  %v4317_v60 = vld [vmem:[#allocation5 + $0x160] sm:$0xff] }
 0x763   : > { %4709 = vmatmul.f32.vlgmr.msra.gmra.mxu0 %v4277_v56  ;;  %4860 = vperm.xlu2 %6579, %v9849_v3   ;;  %v4295_v3 = vld [vmem:[#allocation5 + $0xb0] sm:$0xff]  ;;  %v4342_v56 = vld [vmem:[#allocation5 + $0x228] sm:$0xff] }
 0x764   : > { %4582 = vmatmul.f32.gmra.mxu2 %v4281_v13  ;;  %4772 = vmatpush.msra.mxu1 %v6574_v57 }
 0x765   : > { %4900 = vperm.xlu0 %6580, %v9926_v7   ;;  %v9996_v35 = vpop.permute.xlu0 %4370 }
 0x766   : > { %4773 = vmatpush.msra.mxu1 %v6575_v9  ;;  %v9991_v62 = vpop.permute.xlu1 %4374  ;;  %4880 = vperm.xlu1 %6581, %v9875_v52  }
 0x767   : > { %4774 = vmatmul.f32.vlgmr.msra.gmra.mxu1 %v4278_v34  ;;  %4659 = vmatmul.f32.gmra.mxu3 %v4306_v8  ;;  %v10007_v38 = vpop.f32.mrf.mxu0  ;;  %v4319_v8 = vld [vmem:[#allocation5 + $0x170] sm:$0xff] }
 0x769   : > { %v10011_v52 = vpop.f32.mrf.mxu1 }
 0x76b   : > { %4712 = vmatmul.f32.gmra.mxu0 %v4283_v16  ;;  %4872 = vperm.xlu2 %6579, %v9869_v48   ;;  %v4301_v48 = vld [vmem:[#allocation5 + $0xe0] sm:$0xff]  ;;  %v4323_v16 = vld [vmem:[#allocation5 + $0x190] sm:$0xff] }
 0x76c   : > { %4585 = vmatmul.f32.gmra.mxu2 %v4287_v32  ;;  %v4320_v32 = vld [vmem:[#allocation5 + $0x178] sm:$0xff] }
 0x76d   : > { %4888 = vperm.xlu0 %6580, %v9918_v22   ;;  %v10009_v61 = vpop.permute.xlu0 %4390  ;;  %v10015_v22 = vpop.permute.xlu2 %4386 }
 0x76e   : > { %v10005_v7 = vpop.permute.xlu1 %4382  ;;  %4896 = vperm.xlu1 %6581, %v9912_v10  }
 0x76f   : > { %4777 = vmatmul.f32.gmra.mxu1 %v4284_v17  ;;  %4662 = vmatmul.f32.gmra.mxu3 %v4312_v6  ;;  %v4474_v0 = vpop.f32.mrf.mxu0  ;;  %v4348_v6 = vld [vmem:[#allocation5 + $0x258] sm:$0xff] }
 0x771   : > { %v4539_v21 = vpop.f32.mrf.mxu1 }
 0x773   : > { %4715 = vmatmul.f32.gmra.mxu0 %v4289_v31  ;;  %4884 = vperm.xlu2 %6579, %v9889_v46   ;;  %v4311_v46 = vld [vmem:[#allocation5 + $0x130] sm:$0xff] }
 0x774   : > { %4588 = vmatmul.f32.gmra.mxu2 %v4293_v36 }
 0x775   : > { %v4403_v37 = vpop.permute.xlu0 %4402  ;;  %v10022_v27 = vpop.permute.xlu2 %4398 }
 0x776   : > { %v10017_v26 = vpop.permute.xlu1 %4394  ;;  %v4475_v11 = vadd.f32 %v4474_v0, %v4403_v37  ;;  %v4949_v37 = vld [vmem:[%s10034_s24 + $0x70] sm:$0xff] }
 0x777   : > { %4780 = vmatmul.f32.gmra.mxu1 %v4290_v15  ;;  %4665 = vmatmul.f32.gmra.mxu3 %v4318_v45  ;;  %v4477_v12 = vpop.f32.mrf.mxu0 }
 0x778   : > { %v10019_v10 = vadd.f32 %v4539_v21, %v4475_v11  ;;  %v4950_v21 = vld [vmem:[%s10034_s24 + $0x78] sm:$0xff] }
 0x779   : > { %v4542_v55 = vpop.f32.mrf.mxu1  ;;  %5077 = vrot.lane.b32.xlu0 %v4950_v21, %s6887_s14 }
 0x77b   : > { %4718 = vmatmul.f32.gmra.mxu0 %v4295_v3  ;;  %4892 = vperm.xlu2 %6579, %v9895_v51   ;;  %v4314_v51 = vld [vmem:[#allocation5 + $0x148] sm:$0xff]  ;;  %v4325_v3 = vld [vmem:[#allocation5 + $0x1a0] sm:$0xff] }
 0x77c   : > { %4591 = vmatmul.f32.gmra.mxu2 %v4299_v43  ;;  %v4329_v43 = vld [vmem:[#allocation5 + $0x1c0] sm:$0xff] }
 0x77d   : > { %v4411_v13 = vpop.permute.xlu2 %4410  ;;  %v4415_v31 = vpop.permute.xlu0 %4414 }
 0x77e   : > { %v4407_v29 = vpop.permute.xlu1 %4406 }
 0x77f   : > { %4783 = vmatmul.f32.gmra.mxu1 %v4296_v44  ;;  %4668 = vmatmul.f32.gmra.mxu3 %v4324_v23  ;;  %v4478_v28 = vadd.f32 %v4477_v12, %v4407_v29  ;;  %v4480_v30 = vpop.f32.mrf.mxu0  ;;  %v4326_v44 = vld [vmem:[#allocation5 + $0x1a8] sm:$0xff] }
 0x780   : > { %v4481_v57 = vadd.f32 %v4480_v30, %v4411_v13  ;;  %v4341_v13 = vld [vmem:[#allocation5 + $0x220] sm:$0xff] }
 0x781   : > { %v10024_v63 = vadd.f32 %v4542_v55, %v4478_v28  ;;  %v4545_v9 = vpop.f32.mrf.mxu1 }
 0x782   : > { %v10026_v34 = vadd.f32 %v4545_v9, %v4481_v57  ;;  %v4338_v57 = vld [vmem:[#allocation5 + $0x208] sm:$0xff] }
 0x783   : > { %4721 = vmatmul.f32.gmra.mxu0 %v4301_v48  ;;  %v4354_v48 = vld [vmem:[#allocation5 + $0x288] sm:$0xff]  ;;  %5075 = vrot.lane.b32.xlu2 %v4949_v37, %s6887_s14  ;;  %v4353_v37 = vld [vmem:[#allocation5 + $0x280] sm:$0xff] }
 0x784   : > { %4594 = vmatmul.f32.gmra.mxu2 %v4305_v47 }
 0x785   : > { %v4423_v29 = vpop.permute.xlu2 %4422 }
 0x786   : > { %v4419_v47 = vpop.permute.xlu1 %4418 }
 0x787   : > { %4786 = vmatmul.f32.gmra.mxu1 %v4302_v1  ;;  %4671 = vmatmul.f32.gmra.mxu3 %v4330_v49  ;;  %v4483_v17 = vpop.f32.mrf.mxu0  ;;  %v4948_v49 = vld [vmem:[%s10034_s24 + $0x68] sm:$0xff] }
 0x788   : > { %v4484_v36 = vadd.f32 %v4483_v17, %v4415_v31  ;;  %5073 = vrot.lane.b32.xlu1 %v4948_v49, %s6887_s14  ;;  %v4943_v31 = vld [vmem:[%s10034_s24 + $0x40] sm:$0xff] }
 0x789   : > { %v4548_v15 = vpop.f32.mrf.mxu1  ;;  %v4349_v49 = vld [vmem:[#allocation5 + $0x260] sm:$0xff] }
 0x78a   : > { %v10028_v45 = vadd.f32 %v4548_v15, %v4484_v36  ;;  %v4944_v36 = vld [vmem:[%s10034_s24 + $0x48] sm:$0xff] }
 0x78b   : > { %4724 = vmatmul.f32.gmra.mxu0 %v4307_v5  ;;  %v4331_v5 = vld [vmem:[#allocation5 + $0x1d0] sm:$0xff] }
 0x78c   : > { %4597 = vmatmul.f32.gmra.mxu2 %v4311_v46  ;;  %v4335_v46 = vld [vmem:[#allocation5 + $0x1f0] sm:$0xff] }
 0x78f   : > { %4789 = vmatmul.f32.gmra.mxu1 %v4308_v54  ;;  %4674 = vmatmul.f32.gmra.mxu3 %v4336_v41  ;;  %v4486_v23 = vpop.f32.mrf.mxu0  ;;  %v4332_v54 = vld [vmem:[#allocation5 + $0x1d8] sm:$0xff] }
 0x790   : > { %v4487_v1 = vadd.f32 %v4486_v23, %v4419_v47  ;;  %v4360_v41 = vld [vmem:[#allocation5 + $0x2b8] sm:$0xff] }
 0x791   : > { %v4551_v0 = vpop.f32.mrf.mxu1 }
 0x792   : > { %v10039_v11 = vadd.f32 %v4551_v0, %v4487_v1 }
 0x793   : > { %4727 = vmatmul.f32.gmra.mxu0 %v4313_v2  ;;  %v4945_v2 = vld [vmem:[%s10034_s24 + $0x50] sm:$0xff] }
 0x794   : > { %4600 = vmatmul.f32.gmra.mxu2 %v4317_v60  ;;  %v4946_v60 = vld [vmem:[%s10034_s24 + $0x58] sm:$0xff]  ;;  %5067 = vrot.lane.b32.xlu1 %v4945_v2, %s6887_s14 }
 0x795   : > { %5069 = vrot.lane.b32.xlu2 %v4946_v60, %s6887_s14  ;;  %v4356_v60 = vld [vmem:[#allocation5 + $0x298] sm:$0xff] }
 0x797   : > { %4792 = vmatmul.f32.gmra.mxu1 %v4314_v51  ;;  %4677 = vmatmul.f32.gmra.mxu3 %v4342_v56  ;;  %v4489_v12 = vpop.f32.mrf.mxu0  ;;  %v4947_v51 = vld [vmem:[%s10034_s24 + $0x60] sm:$0xff] }
 0x798   : > { %v4490_v28 = vadd.f32 %v4489_v12, %v4423_v29  ;;  %v4337_v56 = vld [vmem:[#allocation5 + $0x200] sm:$0xff]  ;;  %5071 = vrot.lane.b32.xlu0 %v4947_v51, %s6887_s14  ;;  %v4350_v12 = vld [vmem:[#allocation5 + $0x268] sm:$0xff]  ;;  %v4359_v29 = vld [vmem:[#allocation5 + $0x2b0] sm:$0xff] }
 0x799   : > { %v4554_v55 = vpop.f32.mrf.mxu1  ;;  %v4361_v51 = vld [vmem:[#allocation5 + $0x2c0] sm:$0xff] }
 0x79a   : > { %v10047_v30 = vadd.f32 %v4554_v55, %v4490_v28  ;;  %v4938_v28 = vld [vmem:[%s10034_s24 + $0x18] sm:$0xff]  ;;  %v4937_v55 = vld [vmem:[%s10034_s24 + $0x10] sm:$0xff] }
 0x79b   : > { %4730 = vmatmul.f32.gmra.mxu0 %v4319_v8  ;;  %v4366_v8 = vld [vmem:[#allocation5 + $0x2e8] sm:$0xff] }
 0x79c   : > { %4603 = vmatmul.f32.gmra.mxu2 %v4323_v16  ;;  %v4427_v16 = vpop.permute.xlu0 %4426 }
 0x79d   : > { %5063 = vrot.lane.b32.xlu2 %v4943_v31, %s6887_s14 }
 0x79f   : > { %4795 = vmatmul.f32.gmra.mxu1 %v4320_v32  ;;  %4680 = vmatmul.f32.gmra.mxu3 %v4348_v6  ;;  %v4492_v9 = vpop.f32.mrf.mxu0  ;;  %v4942_v6 = vld [vmem:[%s10034_s24 + $0x38] sm:$0xff] }
 0x7a0   : > { %v4493_v32 = vadd.f32 %v4492_v9, %v4427_v16  ;;  %5061 = vrot.lane.b32.xlu1 %v4942_v6, %s6887_s14  ;;  %5065 = vrot.lane.b32.xlu0 %v4944_v36, %s6887_s14  ;;  %v4451_v16 = vadd.f32 %v9946_v18, %v9996_v35 }
 0x7a1   : > { %v4557_v17 = vpop.f32.mrf.mxu1 }
 0x7a2   : > { %v10055_v15 = vadd.f32 %v4557_v17, %v4493_v32  ;;  %v4368_v32 = vld [vmem:[#allocation5 + $0x2f8] sm:$0xff]  ;;  %v4516_v6 = vadd.f32 %v9949_v50, %v4451_v16 }
 0x7a3   : > { %4733 = vmatmul.f32.gmra.mxu0 %v4325_v3  ;;  %v4343_v3 = vld [vmem:[#allocation5 + $0x230] sm:$0xff] }
 0x7a4   : > { %4606 = vmatmul.f32.gmra.mxu2 %v4329_v43  ;;  %v4347_v43 = vld [vmem:[#allocation5 + $0x250] sm:$0xff] }
 0x7a7   : > { %4798 = vmatmul.f32.gmra.mxu1 %v4326_v44  ;;  %4683 = vmatmul.f32.gmra.mxu3 %v4354_v48  ;;  %v4344_v44 = vld [vmem:[#allocation5 + $0x238] sm:$0xff]  ;;  %v4495_v23 = vpop.f32.mrf.mxu0  ;;  %v4431_v48 = vpop.permute.xlu1 %4430 }
 0x7a8   : > { %v4496_v47 = vadd.f32 %v4495_v23, %v4431_v48 }
 0x7a9   : > { %v4560_v1 = vpop.f32.mrf.mxu1 }
 0x7aa   : > { %v10060_v0 = vadd.f32 %v4560_v1, %v4496_v47 }
 0x7ab   : > { %4736 = vmatmul.f32.gmra.mxu0 %v4331_v5  ;;  %v4939_v5 = vld [vmem:[%s10034_s24 + $0x20] sm:$0xff] }
 0x7ac   : > { %4609 = vmatmul.f32.gmra.mxu2 %v4335_v46  ;;  %v4941_v46 = vld [vmem:[%s10034_s24 + $0x30] sm:$0xff]  ;;  %5055 = vrot.lane.b32.xlu1 %v4939_v5, %s6887_s14 }
 0x7ad   : > { %5059 = vrot.lane.b32.xlu2 %v4941_v46, %s6887_s14 }
 0x7af   : > { %4801 = vmatmul.f32.gmra.mxu1 %v4332_v54  ;;  %4686 = vmatmul.f32.gmra.mxu3 %v4360_v41  ;;  %v4940_v54 = vld [vmem:[%s10034_s24 + $0x28] sm:$0xff]  ;;  %v4355_v41 = vld [vmem:[#allocation5 + $0x290] sm:$0xff] }
 0x7b0   : > { %5057 = vrot.lane.b32.xlu0 %v4940_v54, %s6887_s14  ;;  %v4457_v54 = vadd.f32 %v9962_v40, %v10002_v59  ;;  %v4460_v40 = vadd.f32 %v9970_v20, %v10005_v7  ;;  %v4463_v20 = vadd.f32 %v9977_v39, %v10015_v22  ;;  %v4466_v22 = vadd.f32 %v9985_v58, %v10009_v61 }
 0x7b3   : > { %4739 = vmatmul.f32.gmra.mxu0 %v4337_v56  ;;  %v4365_v56 = vld [vmem:[#allocation5 + $0x2e0] sm:$0xff] }
 0x7b4   : > { %4612 = vmatmul.f32.gmra.mxu2 %v4341_v13  ;;  %v4362_v13 = vld [vmem:[#allocation5 + $0x2c8] sm:$0xff] }
 0x7b5   : > { %5053 = vrot.lane.b32.xlu2 %v4938_v28, %s6887_s14 }
 0x7b7   : > { %4804 = vmatmul.f32.gmra.mxu1 %v4338_v57  ;;  %4689 = vmatmul.f32.gmra.mxu3 %v4366_v8  ;;  %v4841_v57 = vpop.permute.xlu2 %4840  ;;  %v4367_v8 = vld [vmem:[#allocation5 + $0x2f0] sm:$0xff] }
 0x7b8   : > { %5051 = vrot.lane.b32.xlu0 %v4937_v55, %s6887_s14 }
 0x7bb   : > { %4742 = vmatmul.f32.gmra.mxu0 %v4343_v3 }
 0x7bc   : > { %4615 = vmatmul.f32.gmra.mxu2 %v4347_v43 }
 0x7bf   : > { %4807 = vmatmul.f32.gmra.mxu1 %v4344_v44  ;;  %v10074_v17 = vpop.permute.xlu2 %4852  ;;  %v4454_v44 = vadd.f32 %v9954_v33, %v9991_v62 }
 0x7c1   : > { %v4519_v35 = vadd.f32 %v9957_v4, %v4454_v44  ;;  %v4522_v4 = vadd.f32 %v9965_v14, %v4457_v54  ;;  %v4525_v14 = vadd.f32 %v9973_v42, %v4460_v40 }
 0x7c2   : > { %v4645_v21 = vpop.f32.mrf.mxu3 }
 0x7c3   : > { %4745 = vmatmul.f32.gmra.mxu0 %v4349_v49 }
 0x7c4   : > { %4618 = vmatmul.f32.gmra.mxu2 %v4353_v37 }
 0x7c7   : > { %4810 = vmatmul.f32.gmra.mxu1 %v4350_v12  ;;  %v10079_v1 = vpop.permute.xlu2 %4860 }
 0x7ca   : > { %v4648_v2 = vpop.f32.mrf.mxu3 }
 0x7cb   : > { %4748 = vmatmul.f32.gmra.mxu0 %v4355_v41 }
 0x7cc   : > { %4621 = vmatmul.f32.gmra.mxu2 %v4359_v29  ;;  %v4845_v29 = vpop.permute.xlu0 %4844 }
 0x7cf   : > { %4813 = vmatmul.f32.gmra.mxu1 %v4356_v60 }
 0x7d2   : > { %v4651_v9 = vpop.f32.mrf.mxu3 }
 0x7d3   : > { %4751 = vmatmul.f32.gmra.mxu0 %v4361_v51 }
 0x7d4   : > { %4624 = vmatmul.f32.gmra.mxu2 %v4365_v56 }
 0x7d7   : > { %4816 = vmatmul.f32.gmra.mxu1 %v4362_v13  ;;  %v4849_v13 = vpop.permute.xlu1 %4848 }
 0x7da   : > { %v4654_v36 = vpop.f32.mrf.mxu3 }
 0x7db   : > { %4754 = vmatmul.f32.gmra.mxu0 %v4367_v8 }
 0x7df   : > { %v4580_v31 = vpop.f32.mrf.mxu2  ;;  %4819 = vmatmul.f32.gmra.mxu1 %v4368_v32 }
 0x7e0   : > { %v4581_v3 = vadd.f32 %v4580_v31, %v4516_v6  ;;  %v4710_v43 = vpop.f32.mrf.mxu0 }
 0x7e2   : > { %v4646_v23 = vadd.f32 %v4645_v21, %v4581_v3  ;;  %v4657_v46 = vpop.f32.mrf.mxu3  ;;  %v10085_v21 = vpop.permute.xlu2 %4872 }
 0x7e4   : > { %v4711_v48 = vadd.f32 %v4710_v43, %v4646_v23  ;;  %v4775_v47 = vpop.f32.mrf.mxu1  ;;  %v4857_v23 = vpop.permute.xlu1 %4856 }
 0x7e6   : > { %v4776_v18 = vadd.f32 %v4775_v47, %v4711_v48  ;;  %v4865_v48 = vpop.permute.xlu0 %4864 }
 0x7e7   : > { %v4583_v49 = vpop.f32.mrf.mxu2 }
 0x7e8   : > { %vm4823_vm0 = vcmp.ge.f32.partialorder %v4776_v18, 0.0  ;;  %v4903_v37 = vmul.f32 %v4841_v57, %v4776_v18  ;;  %v4584_v50 = vadd.f32 %v4583_v49, %v4519_v35  ;;  %v4713_v5 = vpop.f32.mrf.mxu0 }
 0x7ea   : > { %v4649_v12 = vadd.f32 %v4648_v2, %v4584_v50  ;;  %v4919_v41 = vsel %vm4823_vm0, %v4776_v18, %v4903_v37  ;;  %v4660_v57 = vpop.f32.mrf.mxu3  ;;  %v10091_v32 = vpop.permute.xlu2 %4884  ;;  %v4528_v37 = vadd.f32 %v9980_v24, %v4463_v20 }
 0x7eb   : > { %5015 = vrot.lane.b32.xlu1 %v4919_v41, %s6887_s14 }
 0x7ec   : > { %v4714_v33 = vadd.f32 %v4713_v5, %v4649_v12  ;;  %v4778_v62 = vpop.f32.mrf.mxu1  ;;  %v10104_v41 = vpop.permute.xlu1 %4868 }
 0x7ee   : > { %v4779_v28 = vadd.f32 %v4778_v62, %v4714_v33 }
 0x7ef   : > { %v4586_v55 = vpop.f32.mrf.mxu2 }
 0x7f0   : > { %vm4824_vm7 = vcmp.ge.f32.partialorder %v4779_v28, 0.0  ;;  %v4904_v60 = vmul.f32 %v4845_v29, %v4779_v28  ;;  %v4587_v51 = vadd.f32 %v4586_v55, %v4522_v4  ;;  %v4716_v56 = vpop.f32.mrf.mxu0  ;;  %v10106_v29 = vpop.permute.xlu0 %4876  ;;  %v4531_v4 = vadd.f32 %v9987_v53, %v4466_v22 }
 0x7f2   : > { %v4652_v59 = vadd.f32 %v4651_v9, %v4587_v51  ;;  %v4920_v2 = vsel %vm4824_vm7, %v4779_v28, %v4904_v60  ;;  %v10097_v35 = vpop.permute.xlu2 %4892  ;;  %v4663_v49 = vpop.f32.mrf.mxu3  ;;  %v4469_v60 = vadd.f32 %v9994_v19, %v10017_v26 }
 0x7f3   : > { %5017 = vrot.lane.b32.xlu2 %v4920_v2, %s6887_s14 }
 0x7f4   : > { %v4717_v8 = vadd.f32 %v4716_v56, %v4652_v59  ;;  %v4781_v16 = vpop.f32.mrf.mxu1  ;;  %v10113_v2 = vpop.permute.xlu1 %4880 }
 0x7f6   : > { %v4782_v6 = vadd.f32 %v4781_v16, %v4717_v8  ;;  %v4534_v16 = vadd.f32 %v9998_v25, %v4469_v60 }
 0x7f7   : > { %v4589_v31 = vpop.f32.mrf.mxu2 }
 0x7f8   : > { %vm4825_vm8 = vcmp.ge.f32.partialorder %v4782_v6, 0.0  ;;  %v4905_v3 = vmul.f32 %v4849_v13, %v4782_v6  ;;  %v4590_v43 = vadd.f32 %v4589_v31, %v4525_v14  ;;  %v4719_v44 = vpop.f32.mrf.mxu0  ;;  %v10115_v53 = vpop.permute.xlu0 %4900  ;;  %v4472_v31 = vadd.f32 %v10007_v38, %v10022_v27 }
 0x7fa   : > { %v4655_v7 = vadd.f32 %v4654_v36, %v4590_v43  ;;  %v4921_v9 = vsel %vm4825_vm8, %v4782_v6, %v4905_v3  ;;  %v5076_v24 = vpop.permute.xlu2 %5075  ;;  %v4666_v55 = vpop.f32.mrf.mxu3 }
 0x7fb   : > { %5019 = vrot.lane.b32.xlu0 %v4921_v9, %s6887_s14  ;;  %5141 = vst.msk [vmem:[#allocation2 + $0xf0] sm:$0xff] %vm2600_vm6, %v5076_v24 }
 0x7fc   : > { %v4720_v47 = vadd.f32 %v4719_v44, %v4655_v7  ;;  %v4784_v18 = vpop.f32.mrf.mxu1  ;;  %v10123_v7 = vpop.permute.xlu1 %4896 }
 0x7fe   : > { %v4785_v42 = vadd.f32 %v4784_v18, %v4720_v47 }
 0x7ff   : > { %v4592_v50 = vpop.f32.mrf.mxu2 }
 0x800   : > { %vm4826_vm9 = vcmp.ge.f32.partialorder %v4785_v42, 0.0  ;;  %v4906_v5 = vmul.f32 %v10074_v17, %v4785_v42  ;;  %v4593_v54 = vadd.f32 %v4592_v50, %v4528_v37  ;;  %v4722_v39 = vpop.f32.mrf.mxu0  ;;  %v10125_v25 = vpop.permute.xlu0 %4888 }
 0x802   : > { %v4658_v36 = vadd.f32 %v4657_v46, %v4593_v54  ;;  %v4922_v12 = vsel %vm4826_vm9, %v4785_v42, %v4906_v5  ;;  %v5070_v13 = vpop.permute.xlu2 %5069  ;;  %v4669_v14 = vpop.f32.mrf.mxu3 }
 0x803   : > { %5021 = vrot.lane.b32.xlu1 %v4922_v12, %s6887_s14  ;;  %5138 = vst.msk [vmem:[#allocation2 + $0xd8] sm:$0xff] %vm2600_vm6, %v5070_v13 }
 0x804   : > { %v4723_v33 = vadd.f32 %v4722_v39, %v4658_v36  ;;  %v4787_v62 = vpop.f32.mrf.mxu1  ;;  %v5074_v54 = vpop.permute.xlu1 %5073 }
 0x805   : > { %5140 = vst.msk [vmem:[#allocation2 + $0xe8] sm:$0xff] %vm2600_vm6, %v5074_v54 }
 0x806   : > { %v4788_v28 = vadd.f32 %v4787_v62, %v4723_v33 }
 0x807   : > { %v4595_v17 = vpop.f32.mrf.mxu2 }
 0x808   : > { %vm4827_vm10 = vcmp.ge.f32.partialorder %v4788_v28, 0.0  ;;  %v4907_v58 = vmul.f32 %v4857_v23, %v4788_v28  ;;  %v4596_v61 = vadd.f32 %v4595_v17, %v4531_v4  ;;  %v4725_v46 = vpop.f32.mrf.mxu0  ;;  %v5078_v39 = vpop.permute.xlu0 %5077 }
 0x809   : > { %5142 = vst.msk [vmem:[#allocation2 + $0xf8] sm:$0xff] %vm2600_vm6, %v5078_v39 }
 0x80a   : > { %v4661_v51 = vadd.f32 %v4660_v57, %v4596_v61  ;;  %v4923_v56 = vsel %vm4827_vm10, %v4788_v28, %v4907_v58  ;;  %v5064_v9 = vpop.permute.xlu2 %5063  ;;  %v4672_v37 = vpop.f32.mrf.mxu3 }
 0x80b   : > { %5023 = vrot.lane.b32.xlu2 %v4923_v56, %s6887_s14  ;;  %5135 = vst.msk [vmem:[#allocation2 + $0xc0] sm:$0xff] %vm2600_vm6, %v5064_v9 }
 0x80c   : > { %v4726_v40 = vadd.f32 %v4725_v46, %v4661_v51  ;;  %v4790_v59 = vpop.f32.mrf.mxu1  ;;  %v5068_v17 = vpop.permute.xlu1 %5067 }
 0x80d   : > { %5137 = vst.msk [vmem:[#allocation2 + $0xd0] sm:$0xff] %vm2600_vm6, %v5068_v17 }
 0x80e   : > { %v4791_v8 = vadd.f32 %v4790_v59, %v4726_v40 }
 0x80f   : > { %v4598_v6 = vpop.f32.mrf.mxu2 }
 0x810   : > { %vm4828_vm11 = vcmp.ge.f32.partialorder %v4791_v8, 0.0  ;;  %v4908_v19 = vmul.f32 %v10079_v1, %v4791_v8  ;;  %v4599_v26 = vadd.f32 %v4598_v6, %v4534_v16  ;;  %v4728_v57 = vpop.f32.mrf.mxu0  ;;  %v4537_v1 = vadd.f32 %v10011_v52, %v4472_v31  ;;  %v5072_v58 = vpop.permute.xlu0 %5071 }
 0x811   : > { %5139 = vst.msk [vmem:[#allocation2 + $0xe0] sm:$0xff] %vm2600_vm6, %v5072_v58 }
 0x812   : > { %v4664_v3 = vadd.f32 %v4663_v49, %v4599_v26  ;;  %v4924_v43 = vsel %vm4828_vm11, %v4791_v8, %v4908_v19  ;;  %v5060_v52 = vpop.permute.xlu2 %5059 }
 0x813   : > { %5025 = vrot.lane.b32.xlu0 %v4924_v43, %s6887_s14  ;;  %5133 = vst.msk [vmem:[#allocation2 + $0xb0] sm:$0xff] %vm2600_vm6, %v5060_v52 }
 0x814   : > { %v4729_v44 = vadd.f32 %v4728_v57, %v4664_v3  ;;  %v4793_v20 = vpop.f32.mrf.mxu1  ;;  %v5062_v8 = vpop.permute.xlu1 %5061 }
 0x815   : > { %5134 = vst.msk [vmem:[#allocation2 + $0xb8] sm:$0xff] %vm2600_vm6, %v5062_v8 }
 0x816   : > { %v4794_v23 = vadd.f32 %v4793_v20, %v4729_v44 }
 0x817   : > { %v4601_v47 = vpop.f32.mrf.mxu2 }
 0x818   : > { %vm4829_vm12 = vcmp.ge.f32.partialorder %v4794_v23, 0.0  ;;  %v4909_v18 = vmul.f32 %v4865_v48, %v4794_v23  ;;  %v4602_v38 = vadd.f32 %v4601_v47, %v4537_v1  ;;  %v4731_v27 = vpop.f32.mrf.mxu0  ;;  %v5066_v16 = vpop.permute.xlu0 %5065 }
 0x819   : > { %5136 = vst.msk [vmem:[#allocation2 + $0xc8] sm:$0xff] %vm2600_vm6, %v5066_v16 }
 0x81a   : > { %v4667_v49 = vadd.f32 %v4666_v55, %v4602_v38  ;;  %v4925_v42 = vsel %vm4829_vm12, %v4794_v23, %v4909_v18  ;;  %v4675_v55 = vpop.f32.mrf.mxu3  ;;  %v5054_v46 = vpop.permute.xlu2 %5053 }
 0x81b   : > { %5027 = vrot.lane.b32.xlu0 %v4925_v42, %s6887_s14  ;;  %5130 = vst.msk [vmem:[#allocation2 + $0x98] sm:$0xff] %vm2600_vm6, %v5054_v46 }
 0x81c   : > { %v4732_v50 = vadd.f32 %v4731_v27, %v4667_v49  ;;  %v4796_v5 = vpop.f32.mrf.mxu1 }
 0x81e   : > { %v4797_v22 = vadd.f32 %v4796_v5, %v4732_v50  ;;  %v5056_v44 = vpop.permute.xlu1 %5055 }
 0x81f   : > { %v4604_v36 = vpop.f32.mrf.mxu2  ;;  %5131 = vst.msk [vmem:[#allocation2 + $0xa0] sm:$0xff] %vm2600_vm6, %v5056_v44 }
 0x820   : > { %vm4830_vm13 = vcmp.ge.f32.partialorder %v4797_v22, 0.0  ;;  %v4910_v48 = vmul.f32 %v10104_v41, %v4797_v22  ;;  %v4605_v12 = vadd.f32 %v4604_v36, %v10019_v10  ;;  %v4734_v33 = vpop.f32.mrf.mxu0 }
 0x822   : > { %v4670_v62 = vadd.f32 %v4669_v14, %v4605_v12  ;;  %v4926_v24 = vsel %vm4830_vm13, %v4797_v22, %v4910_v48  ;;  %v4678_v26 = vpop.f32.mrf.mxu3  ;;  %v5058_v23 = vpop.permute.xlu0 %5057 }
 0x823   : > { %5029 = vrot.lane.b32.xlu1 %v4926_v24, %s6887_s14  ;;  %5132 = vst.msk [vmem:[#allocation2 + $0xa8] sm:$0xff] %vm2600_vm6, %v5058_v23  ;;  %v5171_v23 = vld [vmem:[#allocation2 + $0xe0] sm:$0xff] }
 0x824   : > { %v4735_v28 = vadd.f32 %v4734_v33, %v4670_v62  ;;  %v4799_v4 = vpop.f32.mrf.mxu1 }
 0x826   : > { %v4800_v61 = vadd.f32 %v4799_v4, %v4735_v28 }
 0x827   : > { %v4607_v60 = vpop.f32.mrf.mxu2 }
 0x828   : > { %vm4831_vm14 = vcmp.ge.f32.partialorder %v4800_v61, 0.0  ;;  %v4911_v10 = vmul.f32 %v10085_v21, %v4800_v61  ;;  %v4608_v41 = vadd.f32 %v4607_v60, %v10024_v63  ;;  %v4737_v51 = vpop.f32.mrf.mxu0 }
 0x82a   : > { %v4673_v56 = vadd.f32 %v4672_v37, %v4608_v41  ;;  %v4927_v40 = vsel %vm4831_vm14, %v4800_v61, %v4911_v10  ;;  %v5052_v50 = vpop.permute.xlu0 %5051 }
 0x82b   : > { %5031 = vrot.lane.b32.xlu2 %v4927_v40, %s6887_s14  ;;  %5129 = vst.msk [vmem:[#allocation2 + $0x90] sm:$0xff] %vm2600_vm6, %v5052_v50 }
 0x82c   : > { %v4738_v59 = vadd.f32 %v4737_v51, %v4673_v56  ;;  %v4802_v13 = vpop.f32.mrf.mxu1 }
 0x82e   : > { %v4803_v6 = vadd.f32 %v4802_v13, %v4738_v59 }
 0x82f   : > { %v4610_v19 = vpop.f32.mrf.mxu2 }
 0x830   : > { %vm4832_vm15 = vcmp.ge.f32.partialorder %v4803_v6, 0.0  ;;  %v4912_v21 = vmul.f32 %v10106_v29, %v4803_v6  ;;  %v4611_v63 = vadd.f32 %v4610_v19, %v10026_v34  ;;  %v4740_v57 = vpop.f32.mrf.mxu0  ;;  %v4681_v34 = vpop.f32.mrf.mxu3 }
 0x832   : > { %v4676_v14 = vadd.f32 %v4675_v55, %v4611_v63  ;;  %v4928_v31 = vsel %vm4832_vm15, %v4803_v6, %v4912_v21 }
 0x833   : > { %5033 = vrot.lane.b32.xlu0 %v4928_v31, %s6887_s14  ;;  %v5165_v31 = vld [vmem:[#allocation2 + $0xb0] sm:$0xff] }
 0x834   : > { %v4741_v3 = vadd.f32 %v4740_v57, %v4676_v14  ;;  %v4805_v43 = vpop.f32.mrf.mxu1  ;;  %v4935_v57 = vld [vmem:[%s10034_s24] sm:$0xff] }
 0x836   : > { %v4806_v20 = vadd.f32 %v4805_v43, %v4741_v3  ;;  %v10174_v3 = vld [vmem:[#allocation2 + $0xf8] sm:$0xff] }
 0x837   : > { %v4613_v9 = vpop.f32.mrf.mxu2  ;;  %5442 = vmatpush.msra.mxu3 %v10174_v3 }
 0x838   : > { %vm4833_vm1 = vcmp.ge.f32.partialorder %v4806_v20, 0.0  ;;  %v4913_v1 = vmul.f32 %v10113_v2, %v4806_v20  ;;  %v4614_v29 = vadd.f32 %v4613_v9, %v10028_v45  ;;  %v4743_v47 = vpop.f32.mrf.mxu0  ;;  %v4684_v22 = vpop.f32.mrf.mxu3  ;;  %v5172_v9 = vld [vmem:[#allocation2 + $0xe8] sm:$0xff] }
 0x83a   : > { %v4679_v18 = vadd.f32 %v4678_v26, %v4614_v29  ;;  %v4929_v38 = vsel %vm4833_vm1, %v4806_v20, %v4913_v1  ;;  %v10183_v20 = vld [vmem:[#allocation2 + $0xf0] sm:$0xff]  ;;  %v5170_v29 = vld [vmem:[#allocation2 + $0xd8] sm:$0xff] }
 0x83b   : > { %5035 = vrot.lane.b32.xlu1 %v4929_v38, %s6887_s14  ;;  %5443 = vmatpush.msra.mxu3 %v10183_v20 }
 0x83c   : > { %v4744_v27 = vadd.f32 %v4743_v47, %v4679_v18  ;;  %v4808_v49 = vpop.f32.mrf.mxu1  ;;  %v5169_v47 = vld [vmem:[#allocation2 + $0xd0] sm:$0xff]  ;;  %v5168_v18 = vld [vmem:[#allocation2 + $0xc8] sm:$0xff] }
 0x83d   : > { %5444 = vmatpush.msra.mxu3 %v5172_v9 }
 0x83e   : > { %v4809_v42 = vadd.f32 %v4808_v49, %v4744_v27  ;;  %v5167_v49 = vld [vmem:[#allocation2 + $0xc0] sm:$0xff] }
 0x83f   : > { %v4616_v37 = vpop.f32.mrf.mxu2  ;;  %5445 = vmatpush.msra.mxu3 %v5171_v23 }
 0x840   : > { %vm4834_vm2 = vcmp.ge.f32.partialorder %v4809_v42, 0.0  ;;  %v4914_v5 = vmul.f32 %v10091_v32, %v4809_v42  ;;  %v4617_v2 = vadd.f32 %v4616_v37, %v10039_v11  ;;  %v4746_v54 = vpop.f32.mrf.mxu0  ;;  %v4687_v55 = vpop.f32.mrf.mxu3 }
 0x841   : > { %5446 = vmatpush.msra.mxu3 %v5170_v29 }
 0x842   : > { %v4682_v45 = vadd.f32 %v4681_v34, %v4617_v2  ;;  %v4930_v39 = vsel %vm4834_vm2, %v4809_v42, %v4914_v5  ;;  %v5164_v34 = vld [vmem:[#allocation2 + $0xa8] sm:$0xff]  ;;  %v5166_v42 = vld [vmem:[#allocation2 + $0xb8] sm:$0xff]  ;;  %v5163_v5 = vld [vmem:[#allocation2 + $0xa0] sm:$0xff] }
 0x843   : > { %5037 = vrot.lane.b32.xlu2 %v4930_v39, %s6887_s14  ;;  %5447 = vmatpush.msra.mxu3 %v5169_v47  ;;  %v10198_v2 = vld [vmem:[#allocation2 + $0x98] sm:$0xff] }
 0x844   : > { %v4747_v52 = vadd.f32 %v4746_v54, %v4682_v45  ;;  %v4811_v36 = vpop.f32.mrf.mxu1  ;;  %v10201_v54 = vld [vmem:[#allocation2 + $0x90] sm:$0xff] }
 0x845   : > { %5448 = vmatpush.msra.mxu3 %v5168_v18 }
 0x846   : > { %v4812_v48 = vadd.f32 %v4811_v36, %v4747_v52 }
 0x847   : > { %v4619_v12 = vpop.f32.mrf.mxu2  ;;  %5449 = vmatpush.msra.mxu3 %v5167_v49 }
 0x848   : > { %vm4835_vm3 = vcmp.ge.f32.partialorder %v4812_v48, 0.0  ;;  %v4915_v33 = vmul.f32 %v10125_v25, %v4812_v48  ;;  %v4620_v62 = vadd.f32 %v4619_v12, %v10047_v30  ;;  %v4749_v32 = vpop.f32.mrf.mxu0  ;;  %v4690_v59 = vpop.f32.mrf.mxu3 }
 0x849   : > { %5450 = vmatpush.msra.mxu3 %v5166_v42 }
 0x84a   : > { %v4685_v24 = vadd.f32 %v4684_v22, %v4620_v62  ;;  %v4931_v11 = vsel %vm4835_vm3, %v4812_v48, %v4915_v33 }
 0x84b   : > { %5039 = vrot.lane.b32.xlu0 %v4931_v11, %s6887_s14  ;;  %5451 = vmatpush.msra.mxu3 %v5165_v31 }
 0x84c   : > { %v4750_v28 = vadd.f32 %v4749_v32, %v4685_v24  ;;  %v4814_v4 = vpop.f32.mrf.mxu1 }
 0x84d   : > { %v5018_v17 = vpop.permute.xlu2 %5017  ;;  %5452 = vmatpush.msra.mxu3 %v5164_v34 }
 0x84e   : > { %v4815_v58 = vadd.f32 %v4814_v4, %v4750_v28  ;;  %5112 = vst.msk [vmem:[#allocation2 + $0x8] sm:$0xff] %vm2600_vm6, %v5018_v17 }
 0x84f   : > { %v4622_v61 = vpop.f32.mrf.mxu2  ;;  %5453 = vmatpush.msra.mxu3 %v5163_v5 }
 0x850   : > { %vm4836_vm4 = vcmp.ge.f32.partialorder %v4815_v58, 0.0  ;;  %v4916_v46 = vmul.f32 %v10097_v35, %v4815_v58  ;;  %v4623_v25 = vadd.f32 %v4622_v61, %v10055_v15  ;;  %v4752_v60 = vpop.f32.mrf.mxu0 }
 0x851   : > { %5454 = vmatpush.msra.mxu3 %v10198_v2 }
 0x852   : > { %v4688_v30 = vadd.f32 %v4687_v55, %v4623_v25  ;;  %v4932_v10 = vsel %vm4836_vm4, %v4815_v58, %v4916_v46 }
 0x853   : > { %5041 = vrot.lane.b32.xlu1 %v4932_v10, %s6887_s14  ;;  %5455 = vmatpush.msra.mxu3 %v10201_v54 }
 0x854   : > { %v4753_v41 = vadd.f32 %v4752_v60, %v4688_v30  ;;  %v4817_v51 = vpop.f32.mrf.mxu1 }
 0x856   : > { %v4818_v56 = vadd.f32 %v4817_v51, %v4753_v41 }
 0x857   : > { %v4625_v40 = vpop.f32.mrf.mxu2 }
 0x858   : > { %vm4837_vm5 = vcmp.ge.f32.partialorder %v4818_v56, 0.0  ;;  %v4917_v13 = vmul.f32 %v10123_v7, %v4818_v56  ;;  %v4626_v8 = vadd.f32 %v4625_v40, %v10060_v0  ;;  %v4755_v16 = vpop.f32.mrf.mxu0  ;;  %v4936_v7 = vld [vmem:[%s10034_s24 + $0x8] sm:$0xff] }
 0x85a   : > { %v4691_v35 = vadd.f32 %v4690_v59, %v4626_v8  ;;  %v4933_v15 = vsel %vm4837_vm5, %v4818_v56, %v4917_v13 }
 0x85b   : > { %5043 = vrot.lane.b32.xlu2 %v4933_v15, %s6887_s14 }
 0x85c   : > { %v4756_v6 = vadd.f32 %v4755_v16, %v4691_v35  ;;  %v4820_v19 = vpop.f32.mrf.mxu1 }
 0x85d   : > { %v5016_v26 = vpop.permute.xlu1 %5015 }
 0x85e   : > { %v4821_v21 = vadd.f32 %v4820_v19, %v4756_v6  ;;  %5111 = vst.msk [vmem:[#allocation2] sm:$0xff] %vm2600_vm6, %v5016_v26 }
 0x860   : > { %vm4838_vm0 = vcmp.ge.f32.partialorder %v4821_v21, 0.0  ;;  %v4918_v63 = vmul.f32 %v10115_v53, %v4821_v21 }
 0x862   : > { %v4934_v14 = vsel %vm4838_vm0, %v4821_v21, %v4918_v63  ;;  %v5144_v63 = vld [vmem:[#allocation2 + $0x8] sm:$0xff] }
 0x863   : > { %5045 = vrot.lane.b32.xlu1 %v4934_v14, %s6887_s14  ;;  %5047 = vrot.lane.b32.xlu2 %v4935_v57, %s6887_s14 }
 0x865   : > { %v5024_v0 = vpop.permute.xlu2 %5023  ;;  %v5143_v16 = vld [vmem:[#allocation2] sm:$0xff] }
 0x866   : > { %5115 = vst.msk [vmem:[#allocation2 + $0x20] sm:$0xff] %vm2600_vm6, %v5024_v0  ;;  %v6677_v26 = vpack.i.bf16 %v5143_v16, %v10201_v54  ;;  %v6667_v0 = vpack.i.bf16 %v5144_v63, %v10198_v2 }
 0x86b   : > { %5049 = vrot.lane.b32.xlu1 %v4936_v7, %s6887_s14 }
 0x86d   : > { %v5020_v43 = vpop.permute.xlu0 %5019  ;;  %v10176_v44 = vld [vmem:[#allocation2 + $0x20] sm:$0xff] }
 0x86e   : > { %5113 = vst.msk [vmem:[#allocation2 + $0x10] sm:$0xff] %vm2600_vm6, %v5020_v43  ;;  %v10181_v53 = vpack.i.bf16 %v10176_v44, %v5165_v31 }
 0x870   : > { %6588 = vrot.lane.b32.xlu0 %v10181_v53, %s6880_s20 }
 0x875   : > { %v5022_v1 = vpop.permute.xlu1 %5021  ;;  %v5145_v59 = vld [vmem:[#allocation2 + $0x10] sm:$0xff] }
 0x876   : > { %5114 = vst.msk [vmem:[#allocation2 + $0x18] sm:$0xff] %vm2600_vm6, %v5022_v1  ;;  %v6647_v8 = vpack.i.bf16 %v5145_v59, %v5163_v5 }
 0x87d   : > { %v10189_v38 = vld [vmem:[#allocation2 + $0x18] sm:$0xff] }
 0x87e   : > { %v10192_v27 = vpack.i.bf16 %v10189_v38, %v5164_v34 }
 0x880   : > { %6583 = vrot.lane.b32.xlu2 %v10192_v27, %s6880_s20 }
 0x885   : > { %v5026_v37 = vpop.permute.xlu0 %5025  ;;  %v5032_v50 = vpop.permute.xlu2 %5031 }
 0x886   : > { %5116 = vst.msk [vmem:[#allocation2 + $0x28] sm:$0xff] %vm2600_vm6, %v5026_v37 }
 0x887   : > { %5119 = vst.msk [vmem:[#allocation2 + $0x40] sm:$0xff] %vm2600_vm6, %v5032_v50 }
 0x88d   : > { %v5028_v45 = vpop.permute.xlu0 %5027  ;;  %v10204_v39 = vld [vmem:[#allocation2 + $0x28] sm:$0xff] }
 0x88e   : > { %5117 = vst.msk [vmem:[#allocation2 + $0x30] sm:$0xff] %vm2600_vm6, %v5028_v45  ;;  %v10207_v22 = vld [vmem:[#allocation2 + $0x40] sm:$0xff]  ;;  %v10210_v52 = vpack.i.bf16 %v10204_v39, %v5166_v42 }
 0x88f   : > { %v10213_v36 = vpack.i.bf16 %v10207_v22, %v5169_v47  ;;  %v5399_v42 = vld [vmem:[%s10410_s8] sm:$0xff] }
 0x890   : > { %6593 = vrot.lane.b32.xlu1 %v10210_v52, %s6880_s20 }
 0x891   : > { %6608 = vrot.lane.b32.xlu0 %v10213_v36, %s6880_s20 }
 0x895   : > { %v5030_v48 = vpop.permute.xlu1 %5029  ;;  %v10219_v12 = vld [vmem:[#allocation2 + $0x30] sm:$0xff] }
 0x896   : > { %5118 = vst.msk [vmem:[#allocation2 + $0x38] sm:$0xff] %vm2600_vm6, %v5030_v48  ;;  %v10223_v33 = vpack.i.bf16 %v10219_v12, %v5167_v49 }
 0x898   : > { %6598 = vrot.lane.b32.xlu2 %v10223_v33, %s6880_s20 }
 0x89d   : > { %v5038_v62 = vpop.permute.xlu2 %5037  ;;  %v10227_v32 = vld [vmem:[#allocation2 + $0x38] sm:$0xff] }
 0x89e   : > { %5122 = vst.msk [vmem:[#allocation2 + $0x58] sm:$0xff] %vm2600_vm6, %v5038_v62  ;;  %v6602_v24 = vpack.i.bf16 %v10227_v32, %v5168_v18  ;;  %v5400_v18 = vld [vmem:[%s10410_s8 + $0x8] sm:$0xff] }
 0x8a0   : > { %6603 = vrot.lane.b32.xlu1 %v6602_v24, %s6880_s20 }
 0x8a5   : > { %v5034_v11 = vpop.permute.xlu0 %5033  ;;  %v5154_v28 = vld [vmem:[#allocation2 + $0x58] sm:$0xff] }
 0x8a6   : > { %5120 = vst.msk [vmem:[#allocation2 + $0x48] sm:$0xff] %vm2600_vm6, %v5034_v11  ;;  %v6622_v4 = vpack.i.bf16 %v5154_v28, %v5172_v9 }
 0x8a8   : > { %6623 = vrot.lane.b32.xlu0 %v6622_v4, %s6880_s20 }
 0x8ad   : > { %v5036_v17 = vpop.permute.xlu1 %5035  ;;  %v5152_v55 = vld [vmem:[#allocation2 + $0x48] sm:$0xff] }
 0x8ae   : > { %5121 = vst.msk [vmem:[#allocation2 + $0x50] sm:$0xff] %vm2600_vm6, %v5036_v17  ;;  %v6612_v58 = vpack.i.bf16 %v5152_v55, %v5170_v29 }
 0x8b0   : > { %6628 = vrot.lane.b32.xlu0 %v6622_v4, %s6881_s21  ;;  %6613 = vrot.lane.b32.xlu2 %v6612_v58, %s6880_s20 }
 0x8b5   : > { %v5044_v61 = vpop.permute.xlu2 %5043  ;;  %v5153_v46 = vld [vmem:[#allocation2 + $0x50] sm:$0xff] }
 0x8b6   : > { %5125 = vst.msk [vmem:[#allocation2 + $0x70] sm:$0xff] %vm2600_vm6, %v5044_v61  ;;  %v6617_v25 = vpack.i.bf16 %v5153_v46, %v5171_v23 }
 0x8b8   : > { %6618 = vrot.lane.b32.xlu1 %v6617_v25, %s6880_s20 }
 0x8bd   : > { %v5040_v60 = vpop.permute.xlu0 %5039  ;;  %v5048_v30 = vpop.permute.xlu2 %5047  ;;  %v5157_v15 = vld [vmem:[#allocation2 + $0x70] sm:$0xff] }
 0x8be   : > { %5123 = vst.msk [vmem:[#allocation2 + $0x60] sm:$0xff] %vm2600_vm6, %v5040_v60 }
 0x8bf   : > { %5127 = vst.msk [vmem:[#allocation2 + $0x80] sm:$0xff] %vm2600_vm6, %v5048_v30 }
 0x8c5   : > { %v5042_v10 = vpop.permute.xlu1 %5041  ;;  %v5155_v41 = vld [vmem:[#allocation2 + $0x60] sm:$0xff] }
 0x8c6   : > { %5124 = vst.msk [vmem:[#allocation2 + $0x68] sm:$0xff] %vm2600_vm6, %v5042_v10  ;;  %v6632_v51 = vpack.i.bf16 %v5155_v41, %v10183_v20  ;;  %v5159_v21 = vld [vmem:[#allocation2 + $0x80] sm:$0xff] }
 0x8c8   : > { %6633 = vrot.lane.b32.xlu2 %v6632_v51, %s6880_s20  ;;  %6638 = vrot.lane.b32.xlu1 %v6632_v51, %s6881_s21 }
 0x8cd   : > { %v5156_v56 = vld [vmem:[#allocation2 + $0x68] sm:$0xff] }
 0x8ce   : > { %v6642_v40 = vpack.i.bf16 %v5156_v56, %v10174_v3 }
 0x8d0   : > { %6653 = vrot.lane.b32.xlu2 %v6617_v25, %s6881_s21  ;;  %6643 = vrot.lane.b32.xlu1 %v6642_v40, %s6880_s20 }
 0x8d5   : > { %v5046_v13 = vpop.permute.xlu1 %5045 }
 0x8d6   : > { %5126 = vst.msk [vmem:[#allocation2 + $0x78] sm:$0xff] %vm2600_vm6, %v5046_v13  ;;  %v5402_v13 = vld [vmem:[%s10410_s8 + $0x18] sm:$0xff] }
 0x8d8   : > { %6658 = vrot.lane.b32.xlu2 %v6642_v40, %s6881_s21  ;;  %6648 = vrot.lane.b32.xlu1 %v6647_v8, %s6880_s20 }
 0x8da   : > { %v10283_v31 = vpop.permute.xlu2 %6583 }
 0x8db   : > { %v6585_v11 = vunpack.i.l.bf16 %v10283_v31 }
 0x8dd   : > { %v5050_v35 = vpop.permute.xlu1 %5049  ;;  %v5158_v6 = vld [vmem:[#allocation2 + $0x78] sm:$0xff] }
 0x8de   : > { %5128 = vst.msk [vmem:[#allocation2 + $0x88] sm:$0xff] %vm2600_vm6, %v5050_v35  ;;  %v6662_v19 = vpack.i.bf16 %v5157_v15, %v5158_v6  ;;  %5419 = vmatpush.msra.mxu2 %v5158_v6  ;;  %vm5559_vm6 = vcmask 64512  }
 0x8e0   : > { %6678 = vrot.lane.b32.xlu2 %v6677_v26, %s6880_s20  ;;  %6673 = vrot.lane.b32.xlu1 %v6612_v58, %s6881_s21 }
 0x8e1   : > { %6663 = vrot.lane.b32.xlu0 %v6662_v19, %s6880_s20  ;;  %5420 = vmatpush.msra.mxu2 %v5157_v15 }
 0x8e3   : > { %5421 = vmatpush.msra.mxu2 %v5156_v56 }
 0x8e5   : > { %5422 = vmatpush.msra.mxu2 %v5155_v41  ;;  %v5160_v57 = vld [vmem:[#allocation2 + $0x88] sm:$0xff] }
 0x8e6   : > { %v6692_v14 = vpack.i.bf16 %v5159_v21, %v5160_v57  ;;  %5456 = vmatpush.msra.mxu3 %v5160_v57 }
 0x8e7   : > { %5423 = vmatpush.msra.mxu2 %v5154_v28 }
 0x8e8   : > { %6698 = vrot.lane.b32.xlu2 %v6602_v24, %s6881_s21  ;;  %6693 = vrot.lane.b32.xlu1 %v6692_v14, %s6880_s20 }
 0x8e9   : > { %6668 = vrot.lane.b32.xlu0 %v6667_v0, %s6880_s20  ;;  %5424 = vmatpush.msra.mxu2 %v5153_v46 }
 0x8ea   : > { %5457 = vmatpush.msra.mxu3 %v5159_v21 }
 0x8eb   : > { %5425 = vmatpush.msra.mxu2 %v5152_v55  ;;  %5458 = vmatmul.f32.vlgmr.msra.gmra.mxu3 %v5400_v18  ;;  %v5401_v18 = vld [vmem:[%s10410_s8 + $0x10] sm:$0xff] }
 0x8ed   : > { %5426 = vmatpush.msra.mxu2 %v10207_v22 }
 0x8ef   : > { %5427 = vmatpush.msra.mxu2 %v10227_v32 }
 0x8f0   : > { %6713 = vrot.lane.b32.xlu2 %v10181_v53, %s6881_s21  ;;  %6708 = vrot.lane.b32.xlu1 %v10210_v52, %s6881_s21 }
 0x8f1   : > { %6683 = vrot.lane.b32.xlu0 %v6662_v19, %s6881_s21  ;;  %5428 = vmatpush.msra.mxu2 %v10219_v12 }
 0x8f2   : > { %v10287_v43 = vpop.permute.xlu2 %6598 }
 0x8f3   : > { %5429 = vmatpush.msra.mxu2 %v10204_v39  ;;  %v5405_v39 = vld [vmem:[%s10410_s8 + $0x30] sm:$0xff]  ;;  %v6600_v22 = vunpack.i.l.bf16 %v10287_v43  ;;  %v6601_v35 = vunpack.i.h.bf16 %v10287_v43  ;;  %v6794_v43 = vld [vmem:[%s10411_s9 + $0x8] sm:$0xff] }
 0x8f5   : > { %5430 = vmatpush.msra.mxu2 %v10176_v44  ;;  %v10289_v44 = vpop.permute.xlu0 %6588 }
 0x8f6   : > { %v6590_v32 = vunpack.i.l.bf16 %v10289_v44  ;;  %v6591_v21 = vunpack.i.h.bf16 %v10289_v44 }
 0x8f7   : > { %5431 = vmatpush.msra.mxu2 %v10189_v38 }
 0x8f8   : > { %6728 = vrot.lane.b32.xlu2 %v6667_v0, %s6881_s21  ;;  %6723 = vrot.lane.b32.xlu1 %v6647_v8, %s6881_s21  ;;  %v6586_v0 = vunpack.i.h.bf16 %v10283_v31 }
 0x8f9   : > { %6688 = vrot.lane.b32.xlu0 %v10213_v36, %s6881_s21  ;;  %5432 = vmatpush.msra.mxu2 %v5145_v59  ;;  %v5406_v36 = vld [vmem:[%s10410_s8 + $0x38] sm:$0xff] }
 0x8fa   : > { %5461 = vmatmul.f32.gmra.mxu3 %v5406_v36 }
 0x8fb   : > { %5433 = vmatpush.msra.mxu2 %v5144_v63 }
 0x8fd   : > { %5434 = vmatpush.msra.mxu2 %v5143_v16 }
 0x8fe   : > { %5435 = vmatmul.f32.vlgmr.msra.gmra.mxu2 %v5399_v42 }
 0x900   : > { %6738 = vrot.lane.b32.xlu1 %v6692_v14, %s6881_s21  ;;  %v5408_v14 = vld [vmem:[%s10410_s8 + $0x48] sm:$0xff] }
 0x901   : > { %6703 = vrot.lane.b32.xlu0 %v10223_v33, %s6881_s21 }
 0x902   : > { %v10281_v7 = vpop.permute.xlu1 %6593 }
 0x903   : > { %v10295_v9 = vpop.permute.xlu0 %6608  ;;  %v6595_v48 = vunpack.i.l.bf16 %v10281_v7  ;;  %v6596_v6 = vunpack.i.h.bf16 %v10281_v7 }
 0x904   : > { %v6610_v54 = vunpack.i.l.bf16 %v10295_v9  ;;  %v6611_v56 = vunpack.i.h.bf16 %v10295_v9  ;;  %v6795_v9 = vld [vmem:[%s10411_s9] sm:$0xff] }
 0x906   : > { %5438 = vmatmul.f32.gmra.mxu2 %v5405_v39 }
 0x909   : > { %6718 = vrot.lane.b32.xlu0 %v10192_v27, %s6881_s21 }
 0x90a   : > { %v10293_v20 = vpop.permute.xlu2 %6613 }
 0x90b   : > { %v6615_v5 = vunpack.i.l.bf16 %v10293_v20  ;;  %v6616_v41 = vunpack.i.h.bf16 %v10293_v20 }
 0x911   : > { %6733 = vrot.lane.b32.xlu0 %v6677_v26, %s6881_s21 }
 0x912   : > { %v10285_v3 = vpop.permute.xlu1 %6603 }
 0x913   : > { %v6605_v45 = vunpack.i.l.bf16 %v10285_v3  ;;  %v6606_v8 = vunpack.i.h.bf16 %v10285_v3  ;;  %v6892_v3 = vmov 6  }
 0x914   : > { %6743 = vset.pattern.permute.xlu0 %v6892_v3  ;;  %6742 = vset.pattern.permute.xlu2 %v6892_v3 }
 0x915   : > { %5412 = vperm.xlu2 %6742, %v6795_v9  }
 0x919   : > { %5416 = vperm.xlu0 %6743, %v6794_v43  }
 0x91a   : > { %v6624_v29 = vpop.permute.xlu0 %6623 }
 0x91b   : > { %v6625_v27 = vunpack.i.l.bf16 %v6624_v29  ;;  %v6626_v61 = vunpack.i.h.bf16 %v6624_v29 }
 0x922   : > { %v6634_v1 = vpop.permute.xlu2 %6633  ;;  %v10311_v2 = vpop.permute.xlu0 %6628 }
 0x923   : > { %v6635_v38 = vunpack.i.l.bf16 %v6634_v1  ;;  %v6636_v17 = vunpack.i.h.bf16 %v6634_v1  ;;  %v6630_v15 = vunpack.i.l.bf16 %v10311_v2 }
 0x92a   : > { %v10291_v53 = vpop.permute.xlu1 %6618  ;;  %v10302_v49 = vpop.permute.xlu2 %6653 }
 0x92b   : > { %v6620_v37 = vunpack.i.l.bf16 %v10291_v53  ;;  %v6621_v60 = vunpack.i.h.bf16 %v10291_v53  ;;  %v6655_v19 = vunpack.i.l.bf16 %v10302_v49 }
 0x932   : > { %v10319_v52 = vpop.permute.xlu2 %6658 }
 0x933   : > { %v6660_v40 = vunpack.i.l.bf16 %v10319_v52 }
 0x93a   : > { %v10297_v23 = vpop.permute.xlu1 %6638  ;;  %v10330_v55 = vpop.permute.xlu2 %6678 }
 0x93b   : > { %v6680_v30 = vunpack.i.l.bf16 %v10330_v55  ;;  %v6640_v16 = vunpack.i.l.bf16 %v10297_v23  ;;  %v6681_v1 = vunpack.i.h.bf16 %v10330_v55  ;;  %v5404_v55 = vld [vmem:[%s10410_s8 + $0x28] sm:$0xff] }
 0x942   : > { %v6644_v47 = vpop.permute.xlu1 %6643  ;;  %v10349_v26 = vpop.permute.xlu2 %6698 }
 0x943   : > { %v6645_v34 = vunpack.i.l.bf16 %v6644_v47  ;;  %v6646_v28 = vunpack.i.h.bf16 %v6644_v47  ;;  %v6700_v53 = vunpack.i.l.bf16 %v10349_v26 }
 0x945   : > { %5488 = vmatpush.msrb.mxu3 %v6645_v34 }
 0x947   : > { %5489 = vmatpush.msrb.mxu3 %v6635_v38 }
 0x949   : > { %5490 = vmatpush.msrb.mxu3 %v6625_v27 }
 0x94a   : > { %v10308_v50 = vpop.permute.xlu1 %6648  ;;  %v6714_v29 = vpop.permute.xlu2 %6713 }
 0x94b   : > { %5491 = vmatpush.msrb.mxu3 %v6620_v37  ;;  %v6650_v4 = vunpack.i.l.bf16 %v10308_v50  ;;  %v6651_v44 = vunpack.i.h.bf16 %v10308_v50  ;;  %v6661_v37 = vunpack.i.h.bf16 %v10319_v52  ;;  %v6715_v50 = vunpack.i.l.bf16 %v6714_v29 }
 0x94d   : > { %5492 = vmatpush.msrb.mxu3 %v6615_v5  ;;  %v6641_v5 = vunpack.i.h.bf16 %v10297_v23 }
 0x94f   : > { %5493 = vmatpush.msrb.mxu3 %v6610_v54 }
 0x951   : > { %5494 = vmatpush.msrb.mxu3 %v6605_v45  ;;  %v6631_v45 = vunpack.i.h.bf16 %v10311_v2 }
 0x952   : > { %v10325_v33 = vpop.permute.xlu1 %6673  ;;  %v6729_v52 = vpop.permute.xlu2 %6728 }
 0x953   : > { %v6664_v12 = vpop.permute.xlu0 %6663  ;;  %5495 = vmatpush.msrb.mxu3 %v6600_v22  ;;  %v6675_v63 = vunpack.i.l.bf16 %v10325_v33  ;;  %v5407_v22 = vld [vmem:[%s10410_s8 + $0x40] sm:$0xff]  ;;  %v6676_v23 = vunpack.i.h.bf16 %v10325_v33 }
 0x954   : > { %v6665_v62 = vunpack.i.l.bf16 %v6664_v12  ;;  %v6666_v24 = vunpack.i.h.bf16 %v6664_v12 }
 0x955   : > { %5496 = vmatpush.msrb.mxu3 %v6595_v48  ;;  %v6656_v48 = vunpack.i.h.bf16 %v10302_v49 }
 0x956   : > { %5465 = vmatpush.msrb.mxu2 %v6665_v62  ;;  %v6730_v62 = vunpack.i.l.bf16 %v6729_v52 }
 0x957   : > { %5497 = vmatpush.msrb.mxu3 %v6590_v32  ;;  %v6701_v32 = vunpack.i.h.bf16 %v10349_v26 }
 0x958   : > { %5466 = vmatpush.msrb.mxu2 %v6666_v24 }
 0x959   : > { %5498 = vmatpush.msrb.mxu3 %v6585_v11 }
 0x95a   : > { %5467 = vmatpush.msrb.mxu2 %v6646_v28  ;;  %v6694_v25 = vpop.permute.xlu1 %6693 }
 0x95b   : > { %v10332_v58 = vpop.permute.xlu0 %6668  ;;  %5499 = vmatpush.msrb.mxu3 %v6650_v4  ;;  %v6695_v10 = vunpack.i.l.bf16 %v6694_v25  ;;  %v6696_v51 = vunpack.i.h.bf16 %v6694_v25  ;;  %v6731_v25 = vunpack.i.h.bf16 %v6729_v52 }
 0x95c   : > { %v6670_v46 = vunpack.i.l.bf16 %v10332_v58  ;;  %5468 = vmatpush.msrb.mxu2 %v6636_v17  ;;  %v6671_v31 = vunpack.i.h.bf16 %v10332_v58  ;;  %v6716_v58 = vunpack.i.h.bf16 %v6714_v29 }
 0x95e   : > { %5469 = vmatpush.msrb.mxu2 %v6626_v61  ;;  %5500 = vmatpush.msrb.mxu3 %v6670_v46 }
 0x960   : > { %5470 = vmatpush.msrb.mxu2 %v6621_v60  ;;  %5501 = vmatpush.msrb.mxu3 %v6680_v30  ;;  %v5410_v60 = vld [vmem:[%s10410_s8 + $0x58] sm:$0xff] }
 0x962   : > { %5471 = vmatpush.msrb.mxu2 %v6616_v41  ;;  %5502 = vmatpush.msrb.mxu3 %v6695_v10  ;;  %v6709_v20 = vpop.permute.xlu1 %6708  ;;  %v5403_v10 = vld [vmem:[%s10410_s8 + $0x20] sm:$0xff]  ;;  %v5409_v41 = vld [vmem:[%s10410_s8 + $0x50] sm:$0xff] }
 0x963   : > { %v6684_v59 = vpop.permute.xlu0 %6683  ;;  %v6710_v42 = vunpack.i.l.bf16 %v6709_v20  ;;  %v6711_v17 = vunpack.i.h.bf16 %v6709_v20 }
 0x964   : > { %5472 = vmatpush.msrb.mxu2 %v6611_v56  ;;  %5503 = vmatpush.msrb.mxu3 %v6696_v51  ;;  %v6685_v47 = vunpack.i.l.bf16 %v6684_v59  ;;  %v6686_v27 = vunpack.i.h.bf16 %v6684_v59 }
 0x965   : > { %5504 = vmatmul.f32.vlgmr.msrb.gmra.mxu3 %v5402_v13 }
 0x966   : > { %5534 = vmatpush.msra.mxu3 %v6660_v40  ;;  %5473 = vmatpush.msrb.mxu2 %v6606_v8 }
 0x968   : > { %5535 = vmatpush.msra.mxu3 %v6640_v16  ;;  %5474 = vmatpush.msrb.mxu2 %v6601_v35 }
 0x96a   : > { %5536 = vmatpush.msra.mxu3 %v6630_v15  ;;  %5475 = vmatpush.msrb.mxu2 %v6596_v6  ;;  %v6724_v54 = vpop.permute.xlu1 %6723 }
 0x96b   : > { %v10353_v57 = vpop.permute.xlu0 %6688  ;;  %v6725_v12 = vunpack.i.l.bf16 %v6724_v54  ;;  %v6726_v46 = vunpack.i.h.bf16 %v6724_v54 }
 0x96c   : > { %5537 = vmatpush.msra.mxu3 %v6655_v19  ;;  %v6690_v7 = vunpack.i.l.bf16 %v10353_v57  ;;  %5476 = vmatpush.msrb.mxu2 %v6591_v21  ;;  %v6691_v2 = vunpack.i.h.bf16 %v10353_v57 }
 0x96d   : > { %5507 = vmatmul.f32.gmra.mxu3 %v5408_v14 }
 0x96e   : > { %5538 = vmatpush.msra.mxu3 %v6675_v63  ;;  %5477 = vmatpush.msrb.mxu2 %v6586_v0  ;;  %v5459_v51 = vpop.f32.mrf.mxu3 }
 0x96f   : > { %v5413_v16 = vpop.permute.xlu2 %5412 }
 0x970   : > { %5539 = vmatpush.msra.mxu3 %v6690_v7  ;;  %5478 = vmatpush.msrb.mxu2 %v6651_v44 }
 0x972   : > { %5540 = vmatpush.msra.mxu3 %v6700_v53  ;;  %5479 = vmatpush.msrb.mxu2 %v6671_v31  ;;  %v6739_v11 = vpop.permute.xlu1 %6738 }
 0x973   : > { %v6704_v34 = vpop.permute.xlu0 %6703  ;;  %v6740_v4 = vunpack.i.l.bf16 %v6739_v11  ;;  %v6741_v33 = vunpack.i.h.bf16 %v6739_v11 }
 0x974   : > { %v6705_v38 = vunpack.i.l.bf16 %v6704_v34  ;;  %5480 = vmatpush.msrb.mxu2 %v6681_v1  ;;  %v6706_v28 = vunpack.i.h.bf16 %v6704_v34 }
 0x975   : > { %5481 = vmatmul.f32.vlgmr.msrb.gmra.mxu2 %v5401_v18 }
 0x976   : > { %5511 = vmatpush.msra.mxu2 %v6685_v47  ;;  %5541 = vmatpush.msra.mxu3 %v6705_v38 }
 0x978   : > { %5512 = vmatpush.msra.mxu2 %v6686_v27  ;;  %5542 = vmatpush.msra.mxu3 %v6710_v42 }
 0x97a   : > { %5513 = vmatpush.msra.mxu2 %v6661_v37  ;;  %5543 = vmatpush.msra.mxu3 %v6715_v50 }
 0x97b   : > { %v6719_v39 = vpop.permute.xlu0 %6718 }
 0x97c   : > { %5514 = vmatpush.msra.mxu2 %v6641_v5  ;;  %v6720_v36 = vunpack.i.l.bf16 %v6719_v39  ;;  %v6721_v61 = vunpack.i.h.bf16 %v6719_v39 }
 0x97d   : > { %5484 = vmatmul.f32.gmra.mxu2 %v5407_v22  ;;  %v5462_v40 = vpop.f32.mrf.mxu3 }
 0x97e   : > { %5515 = vmatpush.msra.mxu2 %v6631_v45  ;;  %5544 = vmatpush.msra.mxu3 %v6720_v36 }
 0x980   : > { %5516 = vmatpush.msra.mxu2 %v6656_v48  ;;  %5545 = vmatpush.msra.mxu3 %v6725_v12 }
 0x981   : > { %v5436_v56 = vpop.f32.mrf.mxu2 }
 0x982   : > { %5517 = vmatpush.msra.mxu2 %v6676_v23  ;;  %5546 = vmatpush.msra.mxu3 %v6730_v62  ;;  %v5437_v35 = vadd.f32 %v5436_v56, %v5413_v16 }
 0x983   : > { %v6734_v24 = vpop.permute.xlu0 %6733 }
 0x984   : > { %5518 = vmatpush.msra.mxu2 %v6691_v2  ;;  %v6735_v49 = vunpack.i.l.bf16 %v6734_v24  ;;  %v6736_v30 = vunpack.i.h.bf16 %v6734_v24  ;;  %v5460_v6 = vadd.f32 %v5459_v51, %v5437_v35 }
 0x986   : > { %5519 = vmatpush.msra.mxu2 %v6701_v32  ;;  %5547 = vmatpush.msra.mxu3 %v6735_v49 }
 0x988   : > { %5520 = vmatpush.msra.mxu2 %v6706_v28  ;;  %5548 = vmatpush.msra.mxu3 %v6740_v4 }
 0x989   : > { %v5439_v59 = vpop.f32.mrf.mxu2 }
 0x98a   : > { %5521 = vmatpush.msra.mxu2 %v6711_v17  ;;  %5549 = vmatpush.msra.mxu3 %v6741_v33 }
 0x98b   : > { %5550 = vmatmul.f32.vlgmr.msra.gmra.mxu3 %v5404_v55  ;;  %v5417_v26 = vpop.permute.xlu0 %5416 }
 0x98c   : > { %5522 = vmatpush.msra.mxu2 %v6716_v58  ;;  %v5440_v21 = vadd.f32 %v5439_v59, %v5417_v26 }
 0x98e   : > { %5523 = vmatpush.msra.mxu2 %v6721_v61  ;;  %v5463_v14 = vadd.f32 %v5462_v40, %v5440_v21 }
 0x990   : > { %5524 = vmatpush.msra.mxu2 %v6726_v46 }
 0x992   : > { %5525 = vmatpush.msra.mxu2 %v6731_v25 }
 0x993   : > { %5553 = vmatmul.f32.gmra.mxu3 %v5410_v60 }
 0x994   : > { %5526 = vmatpush.msra.mxu2 %v6736_v30 }
 0x995   : > { %5527 = vmatmul.f32.vlgmr.msra.gmra.mxu2 %v5403_v10 }
 0x99d   : > { %5530 = vmatmul.f32.gmra.mxu2 %v5409_v41 }
 0x9e8   : > { %v5505_v13 = vpop.f32.mrf.mxu3 }
 0x9f0   : > { %v5508_v15 = vpop.f32.mrf.mxu3 }
 0x9f8   : > { %v5482_v8 = vpop.f32.mrf.mxu2 }
 0x9f9   : > { %v5483_v63 = vadd.f32 %v5482_v8, %v5460_v6 }
 0x9fb   : > { %v5506_v0 = vadd.f32 %v5505_v13, %v5483_v63 }
 0xa00   : > { %v5485_v19 = vpop.f32.mrf.mxu2 }
 0xa01   : > { %v5486_v44 = vadd.f32 %v5485_v19, %v5463_v14 }
 0xa03   : > { %v5509_v53 = vadd.f32 %v5508_v15, %v5486_v44 }
 0xa0e   : > { %v5551_v57 = vpop.f32.mrf.mxu3 }
 0xa16   : > { %v5554_v31 = vpop.f32.mrf.mxu3 }
 0xa18   : > { %v5528_v7 = vpop.f32.mrf.mxu2 }
 0xa19   : > { %v5529_v3 = vadd.f32 %v5528_v7, %v5506_v0 }
 0xa1b   : > { %v5552_v43 = vadd.f32 %v5551_v57, %v5529_v3 }
 0xa1d   : > { %6744 = vtanh.f32 %v5552_v43 }
 0xa20   : > { %v5531_v20 = vpop.f32.mrf.mxu2 }
 0xa21   : > { %v5532_v9 = vadd.f32 %v5531_v20, %v5509_v53 }
 0xa23   : > { %v6745_v1 = vpop.eup %6744  ;;  %v5555_v29 = vadd.f32 %v5554_v31, %v5532_v9 }
 0xa24   : > { %5560 = vst.msk [vmem:[%s473_s16] sm:$0xff] %vm5559_vm6, %v6745_v1 }
 0xa25   : > { %6746 = vtanh.f32 %v5555_v29 }
 0xa2b   : > { %v6747_v47 = vpop.eup %6746 }
 0xa2c   : > { %5561 = vst.msk [vmem:[%s473_s16 + $0x8] sm:$0xff] %vm5559_vm6, %v6747_v47 }
 0xa2d PF: > { %s22_s13 = sadd.s32 1, %s6870_s13  }
 0xa2e   : > { %p19_p7 = scmp.ge.s32.totalorder %s22_s13, 4  }
 0xa30   :  { %21 = sbr.rel (!%p19_p7) target bundleno = 2 (0x2), region = 111 }
 0xa35   :  { %5583 = vsyncpa [#allocation4], 1 }
 0xa36   :  { %5585 = vsyncpa [#allocation4 + $0x1], 1 }
 0xa37   :  { %5586 = vsyncpa [#allocation6], 1 }

</bundles_post_ra>
